<compile_context>
chip_gen: v7x
topology: tpu7x:2x2x1
jax: 0.10.0
libtpu: 0.0.40
codegen_flags: <defaults>
</compile_context>

<pallas_src>
import functools

import jax
import jax.numpy as jnp
from jax.experimental import pallas as pl
from jax.experimental.pallas import tpu as pltpu

EPS = 1e-5
NPAD = 128                       # FC output padded to one full lane tile
COUTS = (64, 128, 256)           # true per-block output channels
CPAD = (128, 128, 256)           # lane-tile aligned in-kernel channel counts
CIN_PAD = 8                      # block-1 Cin 1 -> 8 (zero channels)
BATCH_TILE = 8                   # samples per grid step (rows = h*8 + b)


# ----------------------------------------------------------------------------
# In-kernel helpers (operate on values; weights are read from refs per tap)
# ----------------------------------------------------------------------------
def _tap_matmul(taps, w_ref, b_ref):
    """sum_k taps[k] @ w_ref[k] + bias.  taps[k]: (Wo, M, C) bf16, w: (3, C, N) bf16."""
    wo, m, c = taps[0].shape
    n = w_ref.shape[-1]
    acc = jnp.zeros((wo * m, n), jnp.float32)
    for k in range(3):
        acc = acc + jnp.dot(taps[k].reshape(wo * m, c), w_ref[k],
                            preferred_element_type=jnp.float32)
    acc = acc + b_ref[...]                      # folded conv-bias + BN shift (f32)
    return acc.reshape(wo, m, n)


def _conv3_s2(x, w_ref, b_ref):
    """(1,3) conv, stride 2, pad 1 along W.  x: (W, M, C) f32 -> (W//2, M, N) f32."""
    w, m, c = x.shape
    wo = w // 2
    xb = x.astype(jnp.bfloat16)                 # one cast per conv input
    xr = xb.reshape(wo, 2, m, c)                # leading-dim split only
    xe = xr[:, 0]                               # x[2w]      -> tap k=1
    xo = xr[:, 1]                               # x[2w + 1]  -> tap k=2
    zero = jnp.zeros((1, m, c), jnp.bfloat16)
    xo_prev = jnp.concatenate([zero, xo[:wo - 1]], axis=0)   # x[2w - 1] -> tap k=0
    return _tap_matmul((xo_prev, xe, xo), w_ref, b_ref)


def _conv3_s1(x, w_ref, b_ref):
    """(1,3) conv, stride 1, pad 1 along W.  x: (W, M, C) f32 -> (W, M, N) f32."""
    w, m, c = x.shape
    xb = x.astype(jnp.bfloat16)
    zero = jnp.zeros((1, m, c), jnp.bfloat16)
    xp = jnp.concatenate([zero, xb, zero], axis=0)           # single zero-halo copy
    return _tap_matmul((xp[:w], xp[1:w + 1], xp[2:w + 2]), w_ref, b_ref)


def _block(x, w1s_ref, b1s_ref, w2_ref, b2_ref, coutp):
    """Conv2d_shortcut: fused (layer1|shortcut), layer2, residual add + ReLU."""
    y = _conv3_s2(x, w1s_ref, b1s_ref)          # (Wo, M, 2*coutp), no act yet
    l1 = jnp.maximum(y[..., :coutp], 0.0)       # layer1: conv+BN+ReLU
    sc = y[..., coutp:]                         # shortcut: conv+BN (no ReLU)
    l2 = jnp.maximum(_conv3_s1(l1, w2_ref, b2_ref), 0.0)     # layer2: conv+BN+ReLU
    return jnp.maximum(l2 + sc, 0.0)            # residual add + ReLU


def _rescnn_kernel(x_ref,
                   w1s1, b1s1, w21, b21,
                   w1s2, b1s2, w22, b22,
                   w1s3, b1s3, w23, b23,
                   fcw_ref, fcb_ref,
                   logits_ref, feat_ref, *, height, batch_tile):
    x = x_ref[...]                                            # (W0, TM, CIN_PAD) f32
    x = _block(x, w1s1, b1s1, w21, b21, CPAD[0])
    x = _block(x, w1s2, b1s2, w22, b22, CPAD[1])
    x = _block(x, w1s3, b1s3, w23, b23, CPAD[2])
    feat_ref[...] = x                                         # (W3, TM, C3) f32

    # Fused FC as a single K = W3*H*C3 matmul: gather the tile-aligned
    # (batch_tile, C3) row-groups (row = h*batch_tile + b) into one lane-dense
    # (batch_tile, K) operand; the FC weight was pre-permuted to the matching
    # (w, h, c) contraction order at init, so no MXU output is discarded.
    w3 = x.shape[0]
    pieces = [x[w, h * batch_tile:(h + 1) * batch_tile, :]
              for w in range(w3) for h in range(height)]
    xflat = jnp.concatenate(pieces, axis=-1).astype(jnp.bfloat16)
    logits_ref[...] = (jnp.dot(xflat, fcw_ref[...],
                               preferred_element_type=jnp.float32) + fcb_ref[...])


# ----------------------------------------------------------------------------
# Parameter init (synthetic, deterministic) and one-time kernel-param prep
# ----------------------------------------------------------------------------
def init_conv_bn(key, cin, cout):
    k1, k2, k3, k4, k5, k6 = jax.random.split(key, 6)
    return dict(
        w=jax.random.normal(k1, (cout, cin, 1, 3), jnp.float32) * 0.1,  # OIHW
        b=jax.random.normal(k2, (cout,), jnp.float32) * 0.01,
        gamma=1.0 + 0.1 * jax.random.normal(k3, (cout,), jnp.float32),
        beta=0.1 * jax.random.normal(k4, (cout,), jnp.float32),
        mean=0.1 * jax.random.normal(k5, (cout,), jnp.float32),
        var=jnp.abs(jax.random.normal(k6, (cout,), jnp.float32)) * 0.1 + 1.0,
    )


def init_rescnn_params(key, num_classes, input_shape):
    H, W = input_shape
    keys = jax.random.split(key, 10)
    chans = [(1, COUTS[0]), (COUTS[0], COUTS[1]), (COUTS[1], COUTS[2])]
    blocks = []
    for i, (cin, cout) in enumerate(chans):
        blocks.append(dict(layer1=init_conv_bn(keys[3 * i + 0], cin, cout),
                           layer2=init_conv_bn(keys[3 * i + 1], cout, cout),
                           shortcut=init_conv_bn(keys[3 * i + 2], cin, cout)))
    w3 = W // 8                                  # three stride-2 (1,3) convs
    flatten = COUTS[2] * H * w3
    fc_w = jax.random.normal(keys[9], (flatten, num_classes), jnp.float32) * 0.02
    fc_b = jnp.linspace(-0.1, 0.1, num_classes).astype(jnp.float32)
    return dict(blocks=blocks, fc_w=fc_w, fc_b=fc_b)


def _fold_conv_bn(p, cin_pad, cout_pad):
    """Fold inference-mode BN into per-tap matmul weights + one bias row; zero-pad."""
    scale = p["gamma"] / jnp.sqrt(p["var"] + EPS)
    # w_taps[k, ci, co] = torch_w[co, ci, 0, k] * scale[co]
    w = jnp.transpose(p["w"][:, :, 0, :], (2, 1, 0)) * scale[None, None, :]
    b = (p["b"] * scale + p["beta"] - p["mean"] * scale).reshape(1, -1)
    cin, cout = w.shape[1], w.shape[2]
    w = jnp.pad(w, ((0, 0), (0, cin_pad - cin), (0, cout_pad - cout)))
    b = jnp.pad(b, ((0, 0), (0, cout_pad - cout)))
    return w, b


def prepare_kernel_params(params, height, width, num_classes):
    cins_pad = (CIN_PAD, CPAD[0], CPAD[1])
    kp = []
    for i, blk in enumerate(params["blocks"]):
        cip, cop = cins_pad[i], CPAD[i]
        w1, b1 = _fold_conv_bn(blk["layer1"], cip, cop)
        ws, bs = _fold_conv_bn(blk["shortcut"], cip, cop)
        w1s = jnp.concatenate([w1, ws], axis=2).astype(jnp.bfloat16)   # (3, Cin, 2*Cout)
        b1s = jnp.concatenate([b1, bs], axis=1).astype(jnp.float32)    # (1, 2*Cout)
        w2, b2 = _fold_conv_bn(blk["layer2"], cop, cop)
        kp += [w1s, b1s, w2.astype(jnp.bfloat16), b2.astype(jnp.float32)]

    c3, w3 = COUTS[2], width // 8
    # torch NCHW flatten index = c*(H*W3) + h*W3 + w
    # kernel contraction order   = w*(H*C3) + h*C3 + c   (matches in-kernel xflat)
    fcw = jnp.pad(params["fc_w"], ((0, 0), (0, NPAD - num_classes)))   # (flatten, NPAD)
    fc_flat = (fcw.reshape(c3, height, w3, NPAD)
               .transpose(2, 1, 0, 3).reshape(w3 * height * c3, NPAD))
    fcb = jnp.zeros((1, NPAD), jnp.float32).at[0, :num_classes].set(params["fc_b"])
    return kp + [fc_flat.astype(jnp.bfloat16), fcb]


# ----------------------------------------------------------------------------
# Forward pass: one fused pallas_call, batch-tiled grid
# ----------------------------------------------------------------------------
def rescnn_forward(x_nchw, kernel_params, num_classes):
    B, _, H, W = x_nchw.shape
    assert W % 8 == 0, "W must be divisible by 8 (three stride-2 convs)"
    W3, C3 = W // 8, COUTS[2]
    TB = BATCH_TILE
    T = -(-B // TB)
    Bp = T * TB
    TM = H * TB                       # rows per grid step (h-major, b-minor)
    M = T * TM

    # (B,1,H,W) -> rows t*TM + h*TB + b ; zero-pad batch -> Bp and Cin 1 -> CIN_PAD.
    xpad = jnp.pad(x_nchw[:, 0].astype(jnp.float32), ((0, Bp - B), (0, 0), (0, 0)))
    x_rows = xpad.reshape(T, TB, H, W).transpose(3, 0, 2, 1).reshape(W, M, 1)
    x_rows = jnp.pad(x_rows, ((0, 0), (0, 0), (0, CIN_PAD - 1)))

    def resident(arr):                 # whole array, VMEM-resident across steps
        return pl.BlockSpec(arr.shape, lambda t, _nd=arr.ndim: (0,) * _nd)

    in_specs = ([pl.BlockSpec((W, TM, CIN_PAD), lambda t: (0, t, 0))]
                + [resident(p) for p in kernel_params])
    out_specs = (pl.BlockSpec((TB, NPAD), lambda t: (t, 0)),
                 pl.BlockSpec((W3, TM, C3), lambda t: (0, t, 0)))
    out_shape = (jax.ShapeDtypeStruct((Bp, NPAD), jnp.float32),
                 jax.ShapeDtypeStruct((W3, M, C3), jnp.float32))

    # rough advisory cost estimate for the XLA scheduler
    rows = Bp * H
    conv_dims = [(W // 2, CIN_PAD, 2 * CPAD[0]), (W // 2, CPAD[0], CPAD[0]),
                 (W // 4, CPAD[0], 2 * CPAD[1]), (W // 4, CPAD[1], CPAD[1]),
                 (W3, CPAD[1], 2 * CPAD[2]), (W3, CPAD[2], CPAD[2])]
    flops = rows * sum(2 * 3 * wo * k * n for wo, k, n in conv_dims) \
        + 2 * Bp * (W3 * H * C3) * NPAD
    bytes_accessed = (x_rows.size * 4
                      + sum(int(p.size) * p.dtype.itemsize for p in kernel_params)
                      + Bp * NPAD * 4 + W3 * M * C3 * 4)
    cost = pl.CostEstimate(flops=int(flops), transcendentals=0,
                           bytes_accessed=int(bytes_accessed))

    kern = functools.partial(_rescnn_kernel, height=H, batch_tile=TB)
    logits_pad, feat = pl.pallas_call(
        kern,
        grid=(T,),
        in_specs=in_specs,
        out_specs=out_specs,
        out_shape=out_shape,
        compiler_params=pltpu.CompilerParams(
            dimension_semantics=("parallel",),
            vmem_limit_bytes=32 * 1024 * 1024),
        cost_estimate=cost,
    )(x_rows, *kernel_params)

    # TODO(synk): the torch-order (NCHW) feature flatten below is done by XLA
    # outside the kernel; at large batch it could be emitted from the kernel.
    features = (feat.reshape(W3, T, H, TB, C3)
                .transpose(1, 3, 4, 2, 0).reshape(Bp, -1))[:B]
    return logits_pad[:B, :num_classes], features


# ----------------------------------------------------------------------------
# Pure-JAX reference (independent: lax.conv), for correctness checking only
# ----------------------------------------------------------------------------
def ref_forward(x_nchw, params):
    def conv_bn(x, p, stride, relu):
        y = jax.lax.conv_general_dilated(
            x, p["w"], window_strides=(1, stride), padding=((0, 0), (1, 1)),
            dimension_numbers=("NCHW", "OIHW", "NCHW"),
            precision=jax.lax.Precision.HIGHEST)
        scale = p["gamma"] / jnp.sqrt(p["var"] + EPS)
        shift = p["beta"] - p["mean"] * scale
        y = (y + p["b"][None, :, None, None]) * scale[None, :, None, None] \
            + shift[None, :, None, None]
        return jnp.maximum(y, 0.0) if relu else y

    x = x_nchw.astype(jnp.float32)
    for blk in params["blocks"]:
        identity = conv_bn(x, blk["shortcut"], 2, False)
        y = conv_bn(x, blk["layer1"], 2, True)
        y = conv_bn(y, blk["layer2"], 1, True)
        x = jnp.maximum(y + identity, 0.0)
    feats = x.reshape(x.shape[0], -1)
    logits = jnp.dot(feats, params["fc_w"],
                     precision=jax.lax.Precision.HIGHEST) + params["fc_b"]
    return logits, feats


# ----------------------------------------------------------------------------
# Main
# ----------------------------------------------------------------------------
if __name__ == "__main__":
    # ResCNN(dataset='PAMAP2', num_classes=6, input_shape=(4, 32), largeKernal=False)
    num_classes = 6
    B, H, W = 16, 4, 32            # 2 grid steps of 8 samples each

    key = jax.random.PRNGKey(0)
    k_params, k_x = jax.random.split(key)
    params = init_rescnn_params(k_params, num_classes, (H, W))
    kparams = prepare_kernel_params(params, H, W, num_classes)
    x = jax.random.normal(k_x, (B, 1, H, W), jnp.float32)     # NCHW like PyTorch

    fwd = jax.jit(functools.partial(rescnn_forward, num_classes=num_classes))
    logits, features = fwd(x, kparams)
    jax.block_until_ready((logits, features))

    flatten_size = COUTS[2] * H * (W // 8)
    assert logits.shape == (B, num_classes)
    assert features.shape == (B, flatten_size)
    assert bool(jnp.all(jnp.isfinite(logits)))
    assert bool(jnp.all(jnp.isfinite(features)))

    # correctness check against an independent plain-JAX reference
    ref_logits, ref_features = ref_forward(x, params)

    def _max_rel(a, b):
        return float(jnp.max(jnp.abs(a - b)) / (jnp.max(jnp.abs(b)) + 1e-6))

    assert _max_rel(features, ref_features) < 2e-2, _max_rel(features, ref_features)
    assert _max_rel(logits, ref_logits) < 2e-2, _max_rel(logits, ref_logits)

    print("KERNEL_OK")
</pallas_src>

<mosaic_0001>
module attributes {stable_mosaic.version = 11 : i64} {
  func.func @_rescnn_kernel(%arg0: i32, %arg1: memref<32x32x8xf32, #tpu.memory_space<vmem>>, %arg2: memref<3x8x256xbf16, #tpu.memory_space<vmem>>, %arg3: memref<1x256xf32, #tpu.memory_space<vmem>>, %arg4: memref<3x128x128xbf16, #tpu.memory_space<vmem>>, %arg5: memref<1x128xf32, #tpu.memory_space<vmem>>, %arg6: memref<3x128x256xbf16, #tpu.memory_space<vmem>>, %arg7: memref<1x256xf32, #tpu.memory_space<vmem>>, %arg8: memref<3x128x128xbf16, #tpu.memory_space<vmem>>, %arg9: memref<1x128xf32, #tpu.memory_space<vmem>>, %arg10: memref<3x128x512xbf16, #tpu.memory_space<vmem>>, %arg11: memref<1x512xf32, #tpu.memory_space<vmem>>, %arg12: memref<3x256x256xbf16, #tpu.memory_space<vmem>>, %arg13: memref<1x256xf32, #tpu.memory_space<vmem>>, %arg14: memref<4096x128xbf16, #tpu.memory_space<vmem>>, %arg15: memref<1x128xf32, #tpu.memory_space<vmem>>, %arg16: memref<8x128xf32, #tpu.memory_space<vmem>>, %arg17: memref<4x32x256xf32, #tpu.memory_space<vmem>>) attributes {dimension_semantics = [#tpu.dimension_semantics<parallel>], iteration_bounds = array<i64: 2>, scalar_prefetch = 0 : i64, scratch_operands = 0 : i64, tpu.core_type = #tpu.core_type<tc>, window_params = [{transform_indices = @transform_0, window_bounds = array<i64: 32, 32, 8>}, {pipeline_mode = #tpu.pipeline_mode<synchronous>, transform_indices = @transform_1, window_bounds = array<i64: 3, 8, 256>}, {pipeline_mode = #tpu.pipeline_mode<synchronous>, transform_indices = @transform_2, window_bounds = array<i64: 1, 256>}, {pipeline_mode = #tpu.pipeline_mode<synchronous>, transform_indices = @transform_3, window_bounds = array<i64: 3, 128, 128>}, {pipeline_mode = #tpu.pipeline_mode<synchronous>, transform_indices = @transform_4, window_bounds = array<i64: 1, 128>}, {pipeline_mode = #tpu.pipeline_mode<synchronous>, transform_indices = @transform_5, window_bounds = array<i64: 3, 128, 256>}, {pipeline_mode = #tpu.pipeline_mode<synchronous>, transform_indices = @transform_6, window_bounds = array<i64: 1, 256>}, {pipeline_mode = #tpu.pipeline_mode<synchronous>, transform_indices = @transform_7, window_bounds = array<i64: 3, 128, 128>}, {pipeline_mode = #tpu.pipeline_mode<synchronous>, transform_indices = @transform_8, window_bounds = array<i64: 1, 128>}, {pipeline_mode = #tpu.pipeline_mode<synchronous>, transform_indices = @transform_9, window_bounds = array<i64: 3, 128, 512>}, {pipeline_mode = #tpu.pipeline_mode<synchronous>, transform_indices = @transform_10, window_bounds = array<i64: 1, 512>}, {pipeline_mode = #tpu.pipeline_mode<synchronous>, transform_indices = @transform_11, window_bounds = array<i64: 3, 256, 256>}, {pipeline_mode = #tpu.pipeline_mode<synchronous>, transform_indices = @transform_12, window_bounds = array<i64: 1, 256>}, {pipeline_mode = #tpu.pipeline_mode<synchronous>, transform_indices = @transform_13, window_bounds = array<i64: 4096, 128>}, {pipeline_mode = #tpu.pipeline_mode<synchronous>, transform_indices = @transform_14, window_bounds = array<i64: 1, 128>}, {transform_indices = @transform_15, window_bounds = array<i64: 8, 128>}, {transform_indices = @transform_16, window_bounds = array<i64: 4, 32, 256>}]} {
    %c0 = arith.constant 0 : index
    %c0_0 = arith.constant 0 : index
    %c0_1 = arith.constant 0 : index
    %0 = vector.load %arg1[%c0, %c0_0, %c0_1] : memref<32x32x8xf32, #tpu.memory_space<vmem>>, vector<32x32x8xf32>
    %1 = arith.truncf %0 : vector<32x32x8xf32> to vector<32x32x8xbf16>
    %2 = vector.shape_cast %1 : vector<32x32x8xbf16> to vector<16x2x32x8xbf16>
    %3 = vector.extract_strided_slice %2 {offsets = [0, 0, 0, 0], sizes = [16, 1, 32, 8], strides = [1, 1, 1, 1]} : vector<16x2x32x8xbf16> to vector<16x1x32x8xbf16>
    %4 = vector.shape_cast %3 : vector<16x1x32x8xbf16> to vector<16x32x8xbf16>
    %5 = vector.extract_strided_slice %2 {offsets = [0, 1, 0, 0], sizes = [16, 1, 32, 8], strides = [1, 1, 1, 1]} : vector<16x2x32x8xbf16> to vector<16x1x32x8xbf16>
    %6 = vector.shape_cast %5 : vector<16x1x32x8xbf16> to vector<16x32x8xbf16>
    %cst = arith.constant 0.000000e+00 : bf16
    %7 = vector.broadcast %cst : bf16 to vector<1x32x8xbf16>
    %8 = vector.extract_strided_slice %6 {offsets = [0, 0, 0], sizes = [15, 32, 8], strides = [1, 1, 1]} : vector<16x32x8xbf16> to vector<15x32x8xbf16>
    %9 = tpu.concatenate %7, %8 in 0 : vector<1x32x8xbf16>, vector<15x32x8xbf16> -> vector<16x32x8xbf16>
    %cst_2 = arith.constant 0.000000e+00 : f32
    %10 = vector.broadcast %cst_2 : f32 to vector<512x256xf32>
    %11 = vector.shape_cast %9 : vector<16x32x8xbf16> to vector<512x8xbf16>
    %c0_3 = arith.constant 0 : index
    %c0_4 = arith.constant 0 : index
    %c0_5 = arith.constant 0 : index
    %12 = vector.load %arg2[%c0_3, %c0_4, %c0_5] : memref<3x8x256xbf16, #tpu.memory_space<vmem>>, vector<1x8x256xbf16>
    %13 = vector.shape_cast %12 : vector<1x8x256xbf16> to vector<8x256xbf16>
    %cst_6 = arith.constant dense<0.000000e+00> : vector<512x256xf32>
    %14 = tpu.matmul %11, %13, %cst_6 {dimension_numbers = #tpu.dot_dimension_numbers<[1], [0], [0], [1], [0, 0, 1, 1], [], []>} : vector<512x8xbf16>, vector<8x256xbf16>, vector<512x256xf32> -> vector<512x256xf32>
    %15 = arith.addf %10, %14 : vector<512x256xf32>
    %16 = vector.shape_cast %4 : vector<16x32x8xbf16> to vector<512x8xbf16>
    %c1 = arith.constant 1 : index
    %c0_7 = arith.constant 0 : index
    %c0_8 = arith.constant 0 : index
    %17 = vector.load %arg2[%c1, %c0_7, %c0_8] : memref<3x8x256xbf16, #tpu.memory_space<vmem>>, vector<1x8x256xbf16>
    %18 = vector.shape_cast %17 : vector<1x8x256xbf16> to vector<8x256xbf16>
    %cst_9 = arith.constant dense<0.000000e+00> : vector<512x256xf32>
    %19 = tpu.matmul %16, %18, %cst_9 {dimension_numbers = #tpu.dot_dimension_numbers<[1], [0], [0], [1], [0, 0, 1, 1], [], []>} : vector<512x8xbf16>, vector<8x256xbf16>, vector<512x256xf32> -> vector<512x256xf32>
    %20 = arith.addf %15, %19 : vector<512x256xf32>
    %21 = vector.shape_cast %6 : vector<16x32x8xbf16> to vector<512x8xbf16>
    %c2 = arith.constant 2 : index
    %c0_10 = arith.constant 0 : index
    %c0_11 = arith.constant 0 : index
    %22 = vector.load %arg2[%c2, %c0_10, %c0_11] : memref<3x8x256xbf16, #tpu.memory_space<vmem>>, vector<1x8x256xbf16>
    %23 = vector.shape_cast %22 : vector<1x8x256xbf16> to vector<8x256xbf16>
    %cst_12 = arith.constant dense<0.000000e+00> : vector<512x256xf32>
    %24 = tpu.matmul %21, %23, %cst_12 {dimension_numbers = #tpu.dot_dimension_numbers<[1], [0], [0], [1], [0, 0, 1, 1], [], []>} : vector<512x8xbf16>, vector<8x256xbf16>, vector<512x256xf32> -> vector<512x256xf32>
    %25 = arith.addf %20, %24 : vector<512x256xf32>
    %c0_13 = arith.constant 0 : index
    %c0_14 = arith.constant 0 : index
    %26 = vector.load %arg3[%c0_13, %c0_14] : memref<1x256xf32, #tpu.memory_space<vmem>>, vector<1x256xf32>
    %27 = vector.broadcast %26 : vector<1x256xf32> to vector<512x256xf32>
    %28 = arith.addf %25, %27 : vector<512x256xf32>
    %29 = vector.shape_cast %28 : vector<512x256xf32> to vector<16x32x256xf32>
    %30 = vector.extract_strided_slice %29 {offsets = [0, 0, 0], sizes = [16, 32, 128], strides = [1, 1, 1]} : vector<16x32x256xf32> to vector<16x32x128xf32>
    %cst_15 = arith.constant 0.000000e+00 : f32
    %31 = vector.broadcast %cst_15 : f32 to vector<16x32x128xf32>
    %32 = arith.maximumf %30, %31 : vector<16x32x128xf32>
    %33 = vector.extract_strided_slice %29 {offsets = [0, 0, 128], sizes = [16, 32, 128], strides = [1, 1, 1]} : vector<16x32x256xf32> to vector<16x32x128xf32>
    %34 = arith.truncf %32 : vector<16x32x128xf32> to vector<16x32x128xbf16>
    %cst_16 = arith.constant 0.000000e+00 : bf16
    %35 = vector.broadcast %cst_16 : bf16 to vector<1x32x128xbf16>
    %36 = tpu.concatenate %35, %34, %35 in 0 : vector<1x32x128xbf16>, vector<16x32x128xbf16>, vector<1x32x128xbf16> -> vector<18x32x128xbf16>
    %37 = vector.extract_strided_slice %36 {offsets = [0, 0, 0], sizes = [16, 32, 128], strides = [1, 1, 1]} : vector<18x32x128xbf16> to vector<16x32x128xbf16>
    %38 = vector.extract_strided_slice %36 {offsets = [1, 0, 0], sizes = [16, 32, 128], strides = [1, 1, 1]} : vector<18x32x128xbf16> to vector<16x32x128xbf16>
    %39 = vector.extract_strided_slice %36 {offsets = [2, 0, 0], sizes = [16, 32, 128], strides = [1, 1, 1]} : vector<18x32x128xbf16> to vector<16x32x128xbf16>
    %cst_17 = arith.constant 0.000000e+00 : f32
    %40 = vector.broadcast %cst_17 : f32 to vector<512x128xf32>
    %41 = vector.shape_cast %37 : vector<16x32x128xbf16> to vector<512x128xbf16>
    %c0_18 = arith.constant 0 : index
    %c0_19 = arith.constant 0 : index
    %c0_20 = arith.constant 0 : index
    %42 = vector.load %arg4[%c0_18, %c0_19, %c0_20] : memref<3x128x128xbf16, #tpu.memory_space<vmem>>, vector<1x128x128xbf16>
    %43 = vector.shape_cast %42 : vector<1x128x128xbf16> to vector<128x128xbf16>
    %cst_21 = arith.constant dense<0.000000e+00> : vector<512x128xf32>
    %44 = tpu.matmul %41, %43, %cst_21 {dimension_numbers = #tpu.dot_dimension_numbers<[1], [0], [0], [1], [0, 0, 1, 1], [], []>} : vector<512x128xbf16>, vector<128x128xbf16>, vector<512x128xf32> -> vector<512x128xf32>
    %45 = arith.addf %40, %44 : vector<512x128xf32>
    %46 = vector.shape_cast %38 : vector<16x32x128xbf16> to vector<512x128xbf16>
    %c1_22 = arith.constant 1 : index
    %c0_23 = arith.constant 0 : index
    %c0_24 = arith.constant 0 : index
    %47 = vector.load %arg4[%c1_22, %c0_23, %c0_24] : memref<3x128x128xbf16, #tpu.memory_space<vmem>>, vector<1x128x128xbf16>
    %48 = vector.shape_cast %47 : vector<1x128x128xbf16> to vector<128x128xbf16>
    %cst_25 = arith.constant dense<0.000000e+00> : vector<512x128xf32>
    %49 = tpu.matmul %46, %48, %cst_25 {dimension_numbers = #tpu.dot_dimension_numbers<[1], [0], [0], [1], [0, 0, 1, 1], [], []>} : vector<512x128xbf16>, vector<128x128xbf16>, vector<512x128xf32> -> vector<512x128xf32>
    %50 = arith.addf %45, %49 : vector<512x128xf32>
    %51 = vector.shape_cast %39 : vector<16x32x128xbf16> to vector<512x128xbf16>
    %c2_26 = arith.constant 2 : index
    %c0_27 = arith.constant 0 : index
    %c0_28 = arith.constant 0 : index
    %52 = vector.load %arg4[%c2_26, %c0_27, %c0_28] : memref<3x128x128xbf16, #tpu.memory_space<vmem>>, vector<1x128x128xbf16>
    %53 = vector.shape_cast %52 : vector<1x128x128xbf16> to vector<128x128xbf16>
    %cst_29 = arith.constant dense<0.000000e+00> : vector<512x128xf32>
    %54 = tpu.matmul %51, %53, %cst_29 {dimension_numbers = #tpu.dot_dimension_numbers<[1], [0], [0], [1], [0, 0, 1, 1], [], []>} : vector<512x128xbf16>, vector<128x128xbf16>, vector<512x128xf32> -> vector<512x128xf32>
    %55 = arith.addf %50, %54 : vector<512x128xf32>
    %c0_30 = arith.constant 0 : index
    %c0_31 = arith.constant 0 : index
    %56 = vector.load %arg5[%c0_30, %c0_31] : memref<1x128xf32, #tpu.memory_space<vmem>>, vector<1x128xf32>
    %57 = vector.broadcast %56 : vector<1x128xf32> to vector<512x128xf32>
    %58 = arith.addf %55, %57 : vector<512x128xf32>
    %59 = vector.shape_cast %58 : vector<512x128xf32> to vector<16x32x128xf32>
    %cst_32 = arith.constant 0.000000e+00 : f32
    %60 = vector.broadcast %cst_32 : f32 to vector<16x32x128xf32>
    %61 = arith.maximumf %59, %60 : vector<16x32x128xf32>
    %62 = arith.addf %61, %33 : vector<16x32x128xf32>
    %cst_33 = arith.constant 0.000000e+00 : f32
    %63 = vector.broadcast %cst_33 : f32 to vector<16x32x128xf32>
    %64 = arith.maximumf %62, %63 : vector<16x32x128xf32>
    %65 = arith.truncf %64 : vector<16x32x128xf32> to vector<16x32x128xbf16>
    %66 = vector.shape_cast %65 : vector<16x32x128xbf16> to vector<8x2x32x128xbf16>
    %67 = vector.extract_strided_slice %66 {offsets = [0, 0, 0, 0], sizes = [8, 1, 32, 128], strides = [1, 1, 1, 1]} : vector<8x2x32x128xbf16> to vector<8x1x32x128xbf16>
    %68 = vector.shape_cast %67 : vector<8x1x32x128xbf16> to vector<8x32x128xbf16>
    %69 = vector.extract_strided_slice %66 {offsets = [0, 1, 0, 0], sizes = [8, 1, 32, 128], strides = [1, 1, 1, 1]} : vector<8x2x32x128xbf16> to vector<8x1x32x128xbf16>
    %70 = vector.shape_cast %69 : vector<8x1x32x128xbf16> to vector<8x32x128xbf16>
    %cst_34 = arith.constant 0.000000e+00 : bf16
    %71 = vector.broadcast %cst_34 : bf16 to vector<1x32x128xbf16>
    %72 = vector.extract_strided_slice %70 {offsets = [0, 0, 0], sizes = [7, 32, 128], strides = [1, 1, 1]} : vector<8x32x128xbf16> to vector<7x32x128xbf16>
    %73 = tpu.concatenate %71, %72 in 0 : vector<1x32x128xbf16>, vector<7x32x128xbf16> -> vector<8x32x128xbf16>
    %cst_35 = arith.constant 0.000000e+00 : f32
    %74 = vector.broadcast %cst_35 : f32 to vector<256x256xf32>
    %75 = vector.shape_cast %73 : vector<8x32x128xbf16> to vector<256x128xbf16>
    %c0_36 = arith.constant 0 : index
    %c0_37 = arith.constant 0 : index
    %c0_38 = arith.constant 0 : index
    %76 = vector.load %arg6[%c0_36, %c0_37, %c0_38] : memref<3x128x256xbf16, #tpu.memory_space<vmem>>, vector<1x128x256xbf16>
    %77 = vector.shape_cast %76 : vector<1x128x256xbf16> to vector<128x256xbf16>
    %cst_39 = arith.constant dense<0.000000e+00> : vector<256x256xf32>
    %78 = tpu.matmul %75, %77, %cst_39 {dimension_numbers = #tpu.dot_dimension_numbers<[1], [0], [0], [1], [0, 0, 1, 1], [], []>} : vector<256x128xbf16>, vector<128x256xbf16>, vector<256x256xf32> -> vector<256x256xf32>
    %79 = arith.addf %74, %78 : vector<256x256xf32>
    %80 = vector.shape_cast %68 : vector<8x32x128xbf16> to vector<256x128xbf16>
    %c1_40 = arith.constant 1 : index
    %c0_41 = arith.constant 0 : index
    %c0_42 = arith.constant 0 : index
    %81 = vector.load %arg6[%c1_40, %c0_41, %c0_42] : memref<3x128x256xbf16, #tpu.memory_space<vmem>>, vector<1x128x256xbf16>
    %82 = vector.shape_cast %81 : vector<1x128x256xbf16> to vector<128x256xbf16>
    %cst_43 = arith.constant dense<0.000000e+00> : vector<256x256xf32>
    %83 = tpu.matmul %80, %82, %cst_43 {dimension_numbers = #tpu.dot_dimension_numbers<[1], [0], [0], [1], [0, 0, 1, 1], [], []>} : vector<256x128xbf16>, vector<128x256xbf16>, vector<256x256xf32> -> vector<256x256xf32>
    %84 = arith.addf %79, %83 : vector<256x256xf32>
    %85 = vector.shape_cast %70 : vector<8x32x128xbf16> to vector<256x128xbf16>
    %c2_44 = arith.constant 2 : index
    %c0_45 = arith.constant 0 : index
    %c0_46 = arith.constant 0 : index
    %86 = vector.load %arg6[%c2_44, %c0_45, %c0_46] : memref<3x128x256xbf16, #tpu.memory_space<vmem>>, vector<1x128x256xbf16>
    %87 = vector.shape_cast %86 : vector<1x128x256xbf16> to vector<128x256xbf16>
    %cst_47 = arith.constant dense<0.000000e+00> : vector<256x256xf32>
    %88 = tpu.matmul %85, %87, %cst_47 {dimension_numbers = #tpu.dot_dimension_numbers<[1], [0], [0], [1], [0, 0, 1, 1], [], []>} : vector<256x128xbf16>, vector<128x256xbf16>, vector<256x256xf32> -> vector<256x256xf32>
    %89 = arith.addf %84, %88 : vector<256x256xf32>
    %c0_48 = arith.constant 0 : index
    %c0_49 = arith.constant 0 : index
    %90 = vector.load %arg7[%c0_48, %c0_49] : memref<1x256xf32, #tpu.memory_space<vmem>>, vector<1x256xf32>
    %91 = vector.broadcast %90 : vector<1x256xf32> to vector<256x256xf32>
    %92 = arith.addf %89, %91 : vector<256x256xf32>
    %93 = vector.shape_cast %92 : vector<256x256xf32> to vector<8x32x256xf32>
    %94 = vector.extract_strided_slice %93 {offsets = [0, 0, 0], sizes = [8, 32, 128], strides = [1, 1, 1]} : vector<8x32x256xf32> to vector<8x32x128xf32>
    %cst_50 = arith.constant 0.000000e+00 : f32
    %95 = vector.broadcast %cst_50 : f32 to vector<8x32x128xf32>
    %96 = arith.maximumf %94, %95 : vector<8x32x128xf32>
    %97 = vector.extract_strided_slice %93 {offsets = [0, 0, 128], sizes = [8, 32, 128], strides = [1, 1, 1]} : vector<8x32x256xf32> to vector<8x32x128xf32>
    %98 = arith.truncf %96 : vector<8x32x128xf32> to vector<8x32x128xbf16>
    %cst_51 = arith.constant 0.000000e+00 : bf16
    %99 = vector.broadcast %cst_51 : bf16 to vector<1x32x128xbf16>
    %100 = tpu.concatenate %99, %98, %99 in 0 : vector<1x32x128xbf16>, vector<8x32x128xbf16>, vector<1x32x128xbf16> -> vector<10x32x128xbf16>
    %101 = vector.extract_strided_slice %100 {offsets = [0, 0, 0], sizes = [8, 32, 128], strides = [1, 1, 1]} : vector<10x32x128xbf16> to vector<8x32x128xbf16>
    %102 = vector.extract_strided_slice %100 {offsets = [1, 0, 0], sizes = [8, 32, 128], strides = [1, 1, 1]} : vector<10x32x128xbf16> to vector<8x32x128xbf16>
    %103 = vector.extract_strided_slice %100 {offsets = [2, 0, 0], sizes = [8, 32, 128], strides = [1, 1, 1]} : vector<10x32x128xbf16> to vector<8x32x128xbf16>
    %cst_52 = arith.constant 0.000000e+00 : f32
    %104 = vector.broadcast %cst_52 : f32 to vector<256x128xf32>
    %105 = vector.shape_cast %101 : vector<8x32x128xbf16> to vector<256x128xbf16>
    %c0_53 = arith.constant 0 : index
    %c0_54 = arith.constant 0 : index
    %c0_55 = arith.constant 0 : index
    %106 = vector.load %arg8[%c0_53, %c0_54, %c0_55] : memref<3x128x128xbf16, #tpu.memory_space<vmem>>, vector<1x128x128xbf16>
    %107 = vector.shape_cast %106 : vector<1x128x128xbf16> to vector<128x128xbf16>
    %cst_56 = arith.constant dense<0.000000e+00> : vector<256x128xf32>
    %108 = tpu.matmul %105, %107, %cst_56 {dimension_numbers = #tpu.dot_dimension_numbers<[1], [0], [0], [1], [0, 0, 1, 1], [], []>} : vector<256x128xbf16>, vector<128x128xbf16>, vector<256x128xf32> -> vector<256x128xf32>
    %109 = arith.addf %104, %108 : vector<256x128xf32>
    %110 = vector.shape_cast %102 : vector<8x32x128xbf16> to vector<256x128xbf16>
    %c1_57 = arith.constant 1 : index
    %c0_58 = arith.constant 0 : index
    %c0_59 = arith.constant 0 : index
    %111 = vector.load %arg8[%c1_57, %c0_58, %c0_59] : memref<3x128x128xbf16, #tpu.memory_space<vmem>>, vector<1x128x128xbf16>
    %112 = vector.shape_cast %111 : vector<1x128x128xbf16> to vector<128x128xbf16>
    %cst_60 = arith.constant dense<0.000000e+00> : vector<256x128xf32>
    %113 = tpu.matmul %110, %112, %cst_60 {dimension_numbers = #tpu.dot_dimension_numbers<[1], [0], [0], [1], [0, 0, 1, 1], [], []>} : vector<256x128xbf16>, vector<128x128xbf16>, vector<256x128xf32> -> vector<256x128xf32>
    %114 = arith.addf %109, %113 : vector<256x128xf32>
    %115 = vector.shape_cast %103 : vector<8x32x128xbf16> to vector<256x128xbf16>
    %c2_61 = arith.constant 2 : index
    %c0_62 = arith.constant 0 : index
    %c0_63 = arith.constant 0 : index
    %116 = vector.load %arg8[%c2_61, %c0_62, %c0_63] : memref<3x128x128xbf16, #tpu.memory_space<vmem>>, vector<1x128x128xbf16>
    %117 = vector.shape_cast %116 : vector<1x128x128xbf16> to vector<128x128xbf16>
    %cst_64 = arith.constant dense<0.000000e+00> : vector<256x128xf32>
    %118 = tpu.matmul %115, %117, %cst_64 {dimension_numbers = #tpu.dot_dimension_numbers<[1], [0], [0], [1], [0, 0, 1, 1], [], []>} : vector<256x128xbf16>, vector<128x128xbf16>, vector<256x128xf32> -> vector<256x128xf32>
    %119 = arith.addf %114, %118 : vector<256x128xf32>
    %c0_65 = arith.constant 0 : index
    %c0_66 = arith.constant 0 : index
    %120 = vector.load %arg9[%c0_65, %c0_66] : memref<1x128xf32, #tpu.memory_space<vmem>>, vector<1x128xf32>
    %121 = vector.broadcast %120 : vector<1x128xf32> to vector<256x128xf32>
    %122 = arith.addf %119, %121 : vector<256x128xf32>
    %123 = vector.shape_cast %122 : vector<256x128xf32> to vector<8x32x128xf32>
    %cst_67 = arith.constant 0.000000e+00 : f32
    %124 = vector.broadcast %cst_67 : f32 to vector<8x32x128xf32>
    %125 = arith.maximumf %123, %124 : vector<8x32x128xf32>
    %126 = arith.addf %125, %97 : vector<8x32x128xf32>
    %cst_68 = arith.constant 0.000000e+00 : f32
    %127 = vector.broadcast %cst_68 : f32 to vector<8x32x128xf32>
    %128 = arith.maximumf %126, %127 : vector<8x32x128xf32>
    %129 = arith.truncf %128 : vector<8x32x128xf32> to vector<8x32x128xbf16>
    %130 = vector.shape_cast %129 : vector<8x32x128xbf16> to vector<4x2x32x128xbf16>
    %131 = vector.extract_strided_slice %130 {offsets = [0, 0, 0, 0], sizes = [4, 1, 32, 128], strides = [1, 1, 1, 1]} : vector<4x2x32x128xbf16> to vector<4x1x32x128xbf16>
    %132 = vector.shape_cast %131 : vector<4x1x32x128xbf16> to vector<4x32x128xbf16>
    %133 = vector.extract_strided_slice %130 {offsets = [0, 1, 0, 0], sizes = [4, 1, 32, 128], strides = [1, 1, 1, 1]} : vector<4x2x32x128xbf16> to vector<4x1x32x128xbf16>
    %134 = vector.shape_cast %133 : vector<4x1x32x128xbf16> to vector<4x32x128xbf16>
    %cst_69 = arith.constant 0.000000e+00 : bf16
    %135 = vector.broadcast %cst_69 : bf16 to vector<1x32x128xbf16>
    %136 = vector.extract_strided_slice %134 {offsets = [0, 0, 0], sizes = [3, 32, 128], strides = [1, 1, 1]} : vector<4x32x128xbf16> to vector<3x32x128xbf16>
    %137 = tpu.concatenate %135, %136 in 0 : vector<1x32x128xbf16>, vector<3x32x128xbf16> -> vector<4x32x128xbf16>
    %cst_70 = arith.constant 0.000000e+00 : f32
    %138 = vector.broadcast %cst_70 : f32 to vector<128x512xf32>
    %139 = vector.shape_cast %137 : vector<4x32x128xbf16> to vector<128x128xbf16>
    %c0_71 = arith.constant 0 : index
    %c0_72 = arith.constant 0 : index
    %c0_73 = arith.constant 0 : index
    %140 = vector.load %arg10[%c0_71, %c0_72, %c0_73] : memref<3x128x512xbf16, #tpu.memory_space<vmem>>, vector<1x128x512xbf16>
    %141 = vector.shape_cast %140 : vector<1x128x512xbf16> to vector<128x512xbf16>
    %cst_74 = arith.constant dense<0.000000e+00> : vector<128x512xf32>
    %142 = tpu.matmul %139, %141, %cst_74 {dimension_numbers = #tpu.dot_dimension_numbers<[1], [0], [0], [1], [0, 0, 1, 1], [], []>} : vector<128x128xbf16>, vector<128x512xbf16>, vector<128x512xf32> -> vector<128x512xf32>
    %143 = arith.addf %138, %142 : vector<128x512xf32>
    %144 = vector.shape_cast %132 : vector<4x32x128xbf16> to vector<128x128xbf16>
    %c1_75 = arith.constant 1 : index
    %c0_76 = arith.constant 0 : index
    %c0_77 = arith.constant 0 : index
    %145 = vector.load %arg10[%c1_75, %c0_76, %c0_77] : memref<3x128x512xbf16, #tpu.memory_space<vmem>>, vector<1x128x512xbf16>
    %146 = vector.shape_cast %145 : vector<1x128x512xbf16> to vector<128x512xbf16>
    %cst_78 = arith.constant dense<0.000000e+00> : vector<128x512xf32>
    %147 = tpu.matmul %144, %146, %cst_78 {dimension_numbers = #tpu.dot_dimension_numbers<[1], [0], [0], [1], [0, 0, 1, 1], [], []>} : vector<128x128xbf16>, vector<128x512xbf16>, vector<128x512xf32> -> vector<128x512xf32>
    %148 = arith.addf %143, %147 : vector<128x512xf32>
    %149 = vector.shape_cast %134 : vector<4x32x128xbf16> to vector<128x128xbf16>
    %c2_79 = arith.constant 2 : index
    %c0_80 = arith.constant 0 : index
    %c0_81 = arith.constant 0 : index
    %150 = vector.load %arg10[%c2_79, %c0_80, %c0_81] : memref<3x128x512xbf16, #tpu.memory_space<vmem>>, vector<1x128x512xbf16>
    %151 = vector.shape_cast %150 : vector<1x128x512xbf16> to vector<128x512xbf16>
    %cst_82 = arith.constant dense<0.000000e+00> : vector<128x512xf32>
    %152 = tpu.matmul %149, %151, %cst_82 {dimension_numbers = #tpu.dot_dimension_numbers<[1], [0], [0], [1], [0, 0, 1, 1], [], []>} : vector<128x128xbf16>, vector<128x512xbf16>, vector<128x512xf32> -> vector<128x512xf32>
    %153 = arith.addf %148, %152 : vector<128x512xf32>
    %c0_83 = arith.constant 0 : index
    %c0_84 = arith.constant 0 : index
    %154 = vector.load %arg11[%c0_83, %c0_84] : memref<1x512xf32, #tpu.memory_space<vmem>>, vector<1x512xf32>
    %155 = vector.broadcast %154 : vector<1x512xf32> to vector<128x512xf32>
    %156 = arith.addf %153, %155 : vector<128x512xf32>
    %157 = vector.shape_cast %156 : vector<128x512xf32> to vector<4x32x512xf32>
    %158 = vector.extract_strided_slice %157 {offsets = [0, 0, 0], sizes = [4, 32, 256], strides = [1, 1, 1]} : vector<4x32x512xf32> to vector<4x32x256xf32>
    %cst_85 = arith.constant 0.000000e+00 : f32
    %159 = vector.broadcast %cst_85 : f32 to vector<4x32x256xf32>
    %160 = arith.maximumf %158, %159 : vector<4x32x256xf32>
    %161 = vector.extract_strided_slice %157 {offsets = [0, 0, 256], sizes = [4, 32, 256], strides = [1, 1, 1]} : vector<4x32x512xf32> to vector<4x32x256xf32>
    %162 = arith.truncf %160 : vector<4x32x256xf32> to vector<4x32x256xbf16>
    %cst_86 = arith.constant 0.000000e+00 : bf16
    %163 = vector.broadcast %cst_86 : bf16 to vector<1x32x256xbf16>
    %164 = tpu.concatenate %163, %162, %163 in 0 : vector<1x32x256xbf16>, vector<4x32x256xbf16>, vector<1x32x256xbf16> -> vector<6x32x256xbf16>
    %165 = vector.extract_strided_slice %164 {offsets = [0, 0, 0], sizes = [4, 32, 256], strides = [1, 1, 1]} : vector<6x32x256xbf16> to vector<4x32x256xbf16>
    %166 = vector.extract_strided_slice %164 {offsets = [1, 0, 0], sizes = [4, 32, 256], strides = [1, 1, 1]} : vector<6x32x256xbf16> to vector<4x32x256xbf16>
    %167 = vector.extract_strided_slice %164 {offsets = [2, 0, 0], sizes = [4, 32, 256], strides = [1, 1, 1]} : vector<6x32x256xbf16> to vector<4x32x256xbf16>
    %cst_87 = arith.constant 0.000000e+00 : f32
    %168 = vector.broadcast %cst_87 : f32 to vector<128x256xf32>
    %169 = vector.shape_cast %165 : vector<4x32x256xbf16> to vector<128x256xbf16>
    %c0_88 = arith.constant 0 : index
    %c0_89 = arith.constant 0 : index
    %c0_90 = arith.constant 0 : index
    %170 = vector.load %arg12[%c0_88, %c0_89, %c0_90] : memref<3x256x256xbf16, #tpu.memory_space<vmem>>, vector<1x256x256xbf16>
    %171 = vector.shape_cast %170 : vector<1x256x256xbf16> to vector<256x256xbf16>
    %cst_91 = arith.constant dense<0.000000e+00> : vector<128x256xf32>
    %172 = tpu.matmul %169, %171, %cst_91 {dimension_numbers = #tpu.dot_dimension_numbers<[1], [0], [0], [1], [0, 0, 1, 1], [], []>} : vector<128x256xbf16>, vector<256x256xbf16>, vector<128x256xf32> -> vector<128x256xf32>
    %173 = arith.addf %168, %172 : vector<128x256xf32>
    %174 = vector.shape_cast %166 : vector<4x32x256xbf16> to vector<128x256xbf16>
    %c1_92 = arith.constant 1 : index
    %c0_93 = arith.constant 0 : index
    %c0_94 = arith.constant 0 : index
    %175 = vector.load %arg12[%c1_92, %c0_93, %c0_94] : memref<3x256x256xbf16, #tpu.memory_space<vmem>>, vector<1x256x256xbf16>
    %176 = vector.shape_cast %175 : vector<1x256x256xbf16> to vector<256x256xbf16>
    %cst_95 = arith.constant dense<0.000000e+00> : vector<128x256xf32>
    %177 = tpu.matmul %174, %176, %cst_95 {dimension_numbers = #tpu.dot_dimension_numbers<[1], [0], [0], [1], [0, 0, 1, 1], [], []>} : vector<128x256xbf16>, vector<256x256xbf16>, vector<128x256xf32> -> vector<128x256xf32>
    %178 = arith.addf %173, %177 : vector<128x256xf32>
    %179 = vector.shape_cast %167 : vector<4x32x256xbf16> to vector<128x256xbf16>
    %c2_96 = arith.constant 2 : index
    %c0_97 = arith.constant 0 : index
    %c0_98 = arith.constant 0 : index
    %180 = vector.load %arg12[%c2_96, %c0_97, %c0_98] : memref<3x256x256xbf16, #tpu.memory_space<vmem>>, vector<1x256x256xbf16>
    %181 = vector.shape_cast %180 : vector<1x256x256xbf16> to vector<256x256xbf16>
    %cst_99 = arith.constant dense<0.000000e+00> : vector<128x256xf32>
    %182 = tpu.matmul %179, %181, %cst_99 {dimension_numbers = #tpu.dot_dimension_numbers<[1], [0], [0], [1], [0, 0, 1, 1], [], []>} : vector<128x256xbf16>, vector<256x256xbf16>, vector<128x256xf32> -> vector<128x256xf32>
    %183 = arith.addf %178, %182 : vector<128x256xf32>
    %c0_100 = arith.constant 0 : index
    %c0_101 = arith.constant 0 : index
    %184 = vector.load %arg13[%c0_100, %c0_101] : memref<1x256xf32, #tpu.memory_space<vmem>>, vector<1x256xf32>
    %185 = vector.broadcast %184 : vector<1x256xf32> to vector<128x256xf32>
    %186 = arith.addf %183, %185 : vector<128x256xf32>
    %187 = vector.shape_cast %186 : vector<128x256xf32> to vector<4x32x256xf32>
    %cst_102 = arith.constant 0.000000e+00 : f32
    %188 = vector.broadcast %cst_102 : f32 to vector<4x32x256xf32>
    %189 = arith.maximumf %187, %188 : vector<4x32x256xf32>
    %190 = arith.addf %189, %161 : vector<4x32x256xf32>
    %cst_103 = arith.constant 0.000000e+00 : f32
    %191 = vector.broadcast %cst_103 : f32 to vector<4x32x256xf32>
    %192 = arith.maximumf %190, %191 : vector<4x32x256xf32>
    %c0_104 = arith.constant 0 : index
    %c0_105 = arith.constant 0 : index
    %c0_106 = arith.constant 0 : index
    %193 = vector.load %arg17[%c0_104, %c0_105, %c0_106] : memref<4x32x256xf32, #tpu.memory_space<vmem>>, vector<4x32x256xf32>
    tpu.vector_store %arg17[%c0_104, %c0_105, %c0_106], %192 {strides = array<i32>} : memref<4x32x256xf32, #tpu.memory_space<vmem>>, vector<4x32x256xf32>,
    %194 = vector.extract_strided_slice %192 {offsets = [0, 0, 0], sizes = [1, 8, 256], strides = [1, 1, 1]} : vector<4x32x256xf32> to vector<1x8x256xf32>
    %195 = vector.shape_cast %194 : vector<1x8x256xf32> to vector<8x256xf32>
    %196 = vector.extract_strided_slice %192 {offsets = [0, 8, 0], sizes = [1, 8, 256], strides = [1, 1, 1]} : vector<4x32x256xf32> to vector<1x8x256xf32>
    %197 = vector.shape_cast %196 : vector<1x8x256xf32> to vector<8x256xf32>
    %198 = vector.extract_strided_slice %192 {offsets = [0, 16, 0], sizes = [1, 8, 256], strides = [1, 1, 1]} : vector<4x32x256xf32> to vector<1x8x256xf32>
    %199 = vector.shape_cast %198 : vector<1x8x256xf32> to vector<8x256xf32>
    %200 = vector.extract_strided_slice %192 {offsets = [0, 24, 0], sizes = [1, 8, 256], strides = [1, 1, 1]} : vector<4x32x256xf32> to vector<1x8x256xf32>
    %201 = vector.shape_cast %200 : vector<1x8x256xf32> to vector<8x256xf32>
    %202 = vector.extract_strided_slice %192 {offsets = [1, 0, 0], sizes = [1, 8, 256], strides = [1, 1, 1]} : vector<4x32x256xf32> to vector<1x8x256xf32>
    %203 = vector.shape_cast %202 : vector<1x8x256xf32> to vector<8x256xf32>
    %204 = vector.extract_strided_slice %192 {offsets = [1, 8, 0], sizes = [1, 8, 256], strides = [1, 1, 1]} : vector<4x32x256xf32> to vector<1x8x256xf32>
    %205 = vector.shape_cast %204 : vector<1x8x256xf32> to vector<8x256xf32>
    %206 = vector.extract_strided_slice %192 {offsets = [1, 16, 0], sizes = [1, 8, 256], strides = [1, 1, 1]} : vector<4x32x256xf32> to vector<1x8x256xf32>
    %207 = vector.shape_cast %206 : vector<1x8x256xf32> to vector<8x256xf32>
    %208 = vector.extract_strided_slice %192 {offsets = [1, 24, 0], sizes = [1, 8, 256], strides = [1, 1, 1]} : vector<4x32x256xf32> to vector<1x8x256xf32>
    %209 = vector.shape_cast %208 : vector<1x8x256xf32> to vector<8x256xf32>
    %210 = vector.extract_strided_slice %192 {offsets = [2, 0, 0], sizes = [1, 8, 256], strides = [1, 1, 1]} : vector<4x32x256xf32> to vector<1x8x256xf32>
    %211 = vector.shape_cast %210 : vector<1x8x256xf32> to vector<8x256xf32>
    %212 = vector.extract_strided_slice %192 {offsets = [2, 8, 0], sizes = [1, 8, 256], strides = [1, 1, 1]} : vector<4x32x256xf32> to vector<1x8x256xf32>
    %213 = vector.shape_cast %212 : vector<1x8x256xf32> to vector<8x256xf32>
    %214 = vector.extract_strided_slice %192 {offsets = [2, 16, 0], sizes = [1, 8, 256], strides = [1, 1, 1]} : vector<4x32x256xf32> to vector<1x8x256xf32>
    %215 = vector.shape_cast %214 : vector<1x8x256xf32> to vector<8x256xf32>
    %216 = vector.extract_strided_slice %192 {offsets = [2, 24, 0], sizes = [1, 8, 256], strides = [1, 1, 1]} : vector<4x32x256xf32> to vector<1x8x256xf32>
    %217 = vector.shape_cast %216 : vector<1x8x256xf32> to vector<8x256xf32>
    %218 = vector.extract_strided_slice %192 {offsets = [3, 0, 0], sizes = [1, 8, 256], strides = [1, 1, 1]} : vector<4x32x256xf32> to vector<1x8x256xf32>
    %219 = vector.shape_cast %218 : vector<1x8x256xf32> to vector<8x256xf32>
    %220 = vector.extract_strided_slice %192 {offsets = [3, 8, 0], sizes = [1, 8, 256], strides = [1, 1, 1]} : vector<4x32x256xf32> to vector<1x8x256xf32>
    %221 = vector.shape_cast %220 : vector<1x8x256xf32> to vector<8x256xf32>
    %222 = vector.extract_strided_slice %192 {offsets = [3, 16, 0], sizes = [1, 8, 256], strides = [1, 1, 1]} : vector<4x32x256xf32> to vector<1x8x256xf32>
    %223 = vector.shape_cast %222 : vector<1x8x256xf32> to vector<8x256xf32>
    %224 = vector.extract_strided_slice %192 {offsets = [3, 24, 0], sizes = [1, 8, 256], strides = [1, 1, 1]} : vector<4x32x256xf32> to vector<1x8x256xf32>
    %225 = vector.shape_cast %224 : vector<1x8x256xf32> to vector<8x256xf32>
    %226 = tpu.concatenate %195, %197, %199, %201, %203, %205, %207, %209, %211, %213, %215, %217, %219, %221, %223, %225 in 1 : vector<8x256xf32>, vector<8x256xf32>, vector<8x256xf32>, vector<8x256xf32>, vector<8x256xf32>, vector<8x256xf32>, vector<8x256xf32>, vector<8x256xf32>, vector<8x256xf32>, vector<8x256xf32>, vector<8x256xf32>, vector<8x256xf32>, vector<8x256xf32>, vector<8x256xf32>, vector<8x256xf32>, vector<8x256xf32> -> vector<8x4096xf32>
    %227 = arith.truncf %226 : vector<8x4096xf32> to vector<8x4096xbf16>
    %c0_107 = arith.constant 0 : index
    %c0_108 = arith.constant 0 : index
    %228 = vector.load %arg14[%c0_107, %c0_108] : memref<4096x128xbf16, #tpu.memory_space<vmem>>, vector<4096x128xbf16>
    %cst_109 = arith.constant dense<0.000000e+00> : vector<8x128xf32>
    %229 = tpu.matmul %227, %228, %cst_109 {dimension_numbers = #tpu.dot_dimension_numbers<[1], [0], [0], [1], [0, 0, 1, 1], [], []>} : vector<8x4096xbf16>, vector<4096x128xbf16>, vector<8x128xf32> -> vector<8x128xf32>
    %c0_110 = arith.constant 0 : index
    %c0_111 = arith.constant 0 : index
    %230 = vector.load %arg15[%c0_110, %c0_111] : memref<1x128xf32, #tpu.memory_space<vmem>>, vector<1x128xf32>
    %231 = vector.broadcast %230 : vector<1x128xf32> to vector<8x128xf32>
    %232 = arith.addf %229, %231 : vector<8x128xf32>
    %c0_112 = arith.constant 0 : index
    %c0_113 = arith.constant 0 : index
    %233 = vector.load %arg16[%c0_112, %c0_113] : memref<8x128xf32, #tpu.memory_space<vmem>>, vector<8x128xf32>
    tpu.vector_store %arg16[%c0_112, %c0_113], %232 {strides = array<i32>} : memref<8x128xf32, #tpu.memory_space<vmem>>, vector<8x128xf32>,
    return
  }
  func.func @transform_0(%arg0: i32) -> (i32, i32, i32) {
    %c0_i32 = arith.constant 0 : i32
    %c0_i32_0 = arith.constant 0 : i32
    %c0_i32_1 = arith.constant 0 : i32
    return %c0_i32, %arg0, %c0_i32_0 : i32, i32, i32
  }
  func.func @transform_1(%arg0: i32) -> (i32, i32, i32) {
    %c0_i32 = arith.constant 0 : i32
    %c0_i32_0 = arith.constant 0 : i32
    %c0_i32_1 = arith.constant 0 : i32
    %c0_i32_2 = arith.constant 0 : i32
    return %c0_i32, %c0_i32_0, %c0_i32_1 : i32, i32, i32
  }
  func.func @transform_2(%arg0: i32) -> (i32, i32) {
    %c0_i32 = arith.constant 0 : i32
    %c0_i32_0 = arith.constant 0 : i32
    %c0_i32_1 = arith.constant 0 : i32
    return %c0_i32, %c0_i32_0 : i32, i32
  }
  func.func @transform_3(%arg0: i32) -> (i32, i32, i32) {
    %c0_i32 = arith.constant 0 : i32
    %c0_i32_0 = arith.constant 0 : i32
    %c0_i32_1 = arith.constant 0 : i32
    %c0_i32_2 = arith.constant 0 : i32
    return %c0_i32, %c0_i32_0, %c0_i32_1 : i32, i32, i32
  }
  func.func @transform_4(%arg0: i32) -> (i32, i32) {
    %c0_i32 = arith.constant 0 : i32
    %c0_i32_0 = arith.constant 0 : i32
    %c0_i32_1 = arith.constant 0 : i32
    return %c0_i32, %c0_i32_0 : i32, i32
  }
  func.func @transform_5(%arg0: i32) -> (i32, i32, i32) {
    %c0_i32 = arith.constant 0 : i32
    %c0_i32_0 = arith.constant 0 : i32
    %c0_i32_1 = arith.constant 0 : i32
    %c0_i32_2 = arith.constant 0 : i32
    return %c0_i32, %c0_i32_0, %c0_i32_1 : i32, i32, i32
  }
  func.func @transform_6(%arg0: i32) -> (i32, i32) {
    %c0_i32 = arith.constant 0 : i32
    %c0_i32_0 = arith.constant 0 : i32
    %c0_i32_1 = arith.constant 0 : i32
    return %c0_i32, %c0_i32_0 : i32, i32
  }
  func.func @transform_7(%arg0: i32) -> (i32, i32, i32) {
    %c0_i32 = arith.constant 0 : i32
    %c0_i32_0 = arith.constant 0 : i32
    %c0_i32_1 = arith.constant 0 : i32
    %c0_i32_2 = arith.constant 0 : i32
    return %c0_i32, %c0_i32_0, %c0_i32_1 : i32, i32, i32
  }
  func.func @transform_8(%arg0: i32) -> (i32, i32) {
    %c0_i32 = arith.constant 0 : i32
    %c0_i32_0 = arith.constant 0 : i32
    %c0_i32_1 = arith.constant 0 : i32
    return %c0_i32, %c0_i32_0 : i32, i32
  }
  func.func @transform_9(%arg0: i32) -> (i32, i32, i32) {
    %c0_i32 = arith.constant 0 : i32
    %c0_i32_0 = arith.constant 0 : i32
    %c0_i32_1 = arith.constant 0 : i32
    %c0_i32_2 = arith.constant 0 : i32
    return %c0_i32, %c0_i32_0, %c0_i32_1 : i32, i32, i32
  }
  func.func @transform_10(%arg0: i32) -> (i32, i32) {
    %c0_i32 = arith.constant 0 : i32
    %c0_i32_0 = arith.constant 0 : i32
    %c0_i32_1 = arith.constant 0 : i32
    return %c0_i32, %c0_i32_0 : i32, i32
  }
  func.func @transform_11(%arg0: i32) -> (i32, i32, i32) {
    %c0_i32 = arith.constant 0 : i32
    %c0_i32_0 = arith.constant 0 : i32
    %c0_i32_1 = arith.constant 0 : i32
    %c0_i32_2 = arith.constant 0 : i32
    return %c0_i32, %c0_i32_0, %c0_i32_1 : i32, i32, i32
  }
  func.func @transform_12(%arg0: i32) -> (i32, i32) {
    %c0_i32 = arith.constant 0 : i32
    %c0_i32_0 = arith.constant 0 : i32
    %c0_i32_1 = arith.constant 0 : i32
    return %c0_i32, %c0_i32_0 : i32, i32
  }
  func.func @transform_13(%arg0: i32) -> (i32, i32) {
    %c0_i32 = arith.constant 0 : i32
    %c0_i32_0 = arith.constant 0 : i32
    %c0_i32_1 = arith.constant 0 : i32
    return %c0_i32, %c0_i32_0 : i32, i32
  }
  func.func @transform_14(%arg0: i32) -> (i32, i32) {
    %c0_i32 = arith.constant 0 : i32
    %c0_i32_0 = arith.constant 0 : i32
    %c0_i32_1 = arith.constant 0 : i32
    return %c0_i32, %c0_i32_0 : i32, i32
  }
  func.func @transform_15(%arg0: i32) -> (i32, i32) {
    %c0_i32 = arith.constant 0 : i32
    %c0_i32_0 = arith.constant 0 : i32
    return %arg0, %c0_i32 : i32, i32
  }
  func.func @transform_16(%arg0: i32) -> (i32, i32, i32) {
    %c0_i32 = arith.constant 0 : i32
    %c0_i32_0 = arith.constant 0 : i32
    %c0_i32_1 = arith.constant 0 : i32
    return %c0_i32, %arg0, %c0_i32_0 : i32, i32, i32
  }
}

</mosaic_0001>

<bundles_post_ra>
// kernel: rescnn_forward.1
= control target key start
LH: loop header
LB: loop body
LE: loop exit
PB: predicated region body
PF: predicated region fallthrough
CT: control target
= control target key end

     0   :  { %s18608_s0 = inlined_call_operand.vmem [shape: f32[32,64,8], index: 0, kind: input, shape index: {}]   ;;  %s18609_s1 = inlined_call_operand.hbm [shape: bf16[3,8,256], index: 1, kind: input, shape index: {}]   ;;  %s18610_s2 = inlined_call_operand.hbm [shape: f32[1,256], index: 2, kind: input, shape index: {}]   ;;  %s18611_s3 = inlined_call_operand.hbm [shape: bf16[3,128,128], index: 3, kind: input, shape index: {}]   ;;  %s18612_s4 = inlined_call_operand.hbm [shape: f32[1,128], index: 4, kind: input, shape index: {}]   ;;  %s18613_s5 = inlined_call_operand.hbm [shape: bf16[3,128,256], index: 5, kind: input, shape index: {}]   ;;  %s18614_s6 = inlined_call_operand.hbm [shape: f32[1,256], index: 6, kind: input, shape index: {}]   ;;  %s18615_s7 = inlined_call_operand.hbm [shape: bf16[3,128,128], index: 7, kind: input, shape index: {}]   ;;  %s18616_s8 = inlined_call_operand.hbm [shape: f32[1,128], index: 8, kind: input, shape index: {}]   ;;  %s18617_s9 = inlined_call_operand.hbm [shape: bf16[3,128,512], index: 9, kind: input, shape index: {}]   ;;  %s18618_s10 = inlined_call_operand.hbm [shape: f32[1,512], index: 10, kind: input, shape index: {}]   ;;  %s18619_s11 = inlined_call_operand.hbm [shape: bf16[3,256,256], index: 11, kind: input, shape index: {}]   ;;  %s18620_s12 = inlined_call_operand.hbm [shape: f32[1,256], index: 12, kind: input, shape index: {}]   ;;  %s18621_s13 = inlined_call_operand.hbm [shape: bf16[4096,128], index: 13, kind: input, shape index: {}]   ;;  %s18622_s14 = inlined_call_operand.hbm [shape: f32[1,128], index: 14, kind: input, shape index: {}]   ;;  %s18623_s15 = inlined_call_operand.vmem [shape: f32[16,128], index: 15, kind: output, shape index: {0}]   ;;  %s18624_s16 = inlined_call_operand.vmem [shape: f32[4,64,256], index: 16, kind: output, shape index: {1}]  }
   0x1   :  { %18648 = sst [smem:[#allocation88_spill]] %s18608_s0 }
   0x2   :  { %18649 = sst [smem:[#allocation89_spill]] %s18609_s1 }
   0x3   :  { %18650 = sst [smem:[#allocation90_spill]] %s18610_s2 }
   0x4   :  { %18651 = sst [smem:[#allocation91_spill]] %s18611_s3 }
   0x5   :  { %18652 = sst [smem:[#allocation92_spill]] %s18612_s4 }
   0x6   :  { %18653 = sst [smem:[#allocation93_spill]] %s18613_s5 }
   0x7   :  { %18654 = sst [smem:[#allocation94_spill]] %s18614_s6 }
   0x8   :  { %18655 = sst [smem:[#allocation95_spill]] %s18615_s7 }
   0x9   :  { %18656 = sst [smem:[#allocation96_spill]] %s18623_s15 }
   0xa   :  { %18657 = sst [smem:[#allocation97_spill]] %s18624_s16 }
   0xb   :  { %22 = vsyncpa [#allocation4], 0 }
   0xc   :  { %23 = vsyncpa [#allocation6], 0 }
   0xd   :  { %24 = vsyncpa [#allocation9], 0 }
   0xe   :  { %25 = vsyncpa [#allocation12], 0 }
   0xf   :  { %26 = vsyncpa [#allocation15], 0 }
  0x10   :  { %27 = vsyncpa [#allocation18], 0 }
  0x11   :  { %28 = vsyncpa [#allocation21], 0 }
  0x12   :  { %29 = vsyncpa [#allocation24], 0  ;;  %s15856_s21 = smov 0   ;;  %s15858_s22 = smov 0  }
  0x13   :  { %s15860_s23 = smov 0  }
  0x14 LB: > { %18658 = sst [smem:[#allocation34_spill]] %s15740_s21  ;;  %s15872_s24 = sadd.s32 4294967295, %s15748_s23   ;;  %s15748_s23 = sphi %s15860_s23, %s18805_s23   ;;  %s15744_s22 = sphi %s15858_s22, %s18808_s22   ;;  %s15740_s21 = sphi %s15856_s21, %s18807_s21  }
  0x15   : > { %18659 = sst [smem:[#allocation35_spill]] %s15872_s24  ;;  %s15875_s25 = sadd.s32 1, %s15748_s23  }
  0x16   : > { %18660 = sst [smem:[#allocation36_spill]] %s15875_s25  ;;  %s39_s26 = ssub.s32 %s15748_s23, %s15875_s25 }
  0x17   : > { %s42_s27 = sadd.s32 1, %s15744_s22  ;;  %p40_p0 = scmp.eq.s32.totalorder %s39_s26, 0 }
  0x18   : > { %p49_p1 = scmp.ne.s32.totalorder %s15744_s22, %s15740_s21  ;;  %p50_p2 = scmp.eq.s32.totalorder %s15748_s23, 0 }
  0x19   : > { %p399_p3 = scmp.eq.s32.totalorder %s15872_s24, 1  ;;  %p12068_p6 = scmp.ge.s32.totalorder %s15748_s23, 1 }
  0x1a   : > { %s15885_s28 = scalar_select %p40_p0, %s15744_s22, %s42_s27  }
  0x1b   : > { %p15887_p4 = por %p50_p2, %p49_p1  ;;  %p15891_p5 = por %p399_p3, %p49_p1 }
  0x1c   : > { %18661 = sst [smem:[#allocation37_spill]] %s15885_s28  ;;  %p412_p7 = scmp.lt.s32.totalorder %s15748_s23, 3 }
  0x1d   : > { %s18662_s29 = scalar_select %p15887_p4, 1, 0 }
  0x1e   : > { %s18663_s30 = scalar_select %p15891_p5, 1, 0 }
  0x1f   : > { %p18630_p8 = scmp.eq.s32.totalorder %s15872_s24, 0  ;;  %p15898_p9 = pnand %p12068_p6, %p412_p7 }
  0x20   : > { %18664 = sst [smem:[#allocation38_spill]] %s18663_s30  ;;  %s15750_s17 = smov [#allocation5]  }
  0x21   : > { %s18665_s0 = scalar_select %p15898_p9, 1, 0 }
  0x22   : > { %s438_s18 = sshll.u32 %s15750_s17, 4  ;;  %p14516_p10 = pneg %p15898_p9  ;;  %s439_s18 = int_to_ptr.vmem [resolvable:$true] %s438_s18 }
  0x23   : > { %18666 = sst [smem:[#allocation39_spill]] %s18665_s0  ;;  %s15751_s19 = smov [#allocation8]  }
  0x24   : > { %s462_s20 = sshll.u32 %s15751_s19, 4  ;;  %p15906_p11 = pnand %p18630_p8, %p14516_p10  ;;  %s15910_s20 = int_to_ptr.vmem [resolvable:$true] %s462_s20 }
  0x25   : > { %s15752_s27 = smov [#allocation11]   ;;  %s18668_s2 = sld [smem:[#allocation90_spill]] }
  0x26   : > { %s486_s28 = sshll.u32 %s15752_s27, 4  ;;  %p15922_p13 = pneg %p15906_p11  ;;  %s15912_s28 = int_to_ptr.vmem [resolvable:$true] %s486_s28 }
  0x2b   : > { %s15302_s17 = scalar_lea.hbm %s18668_s2, 32 }
  0x2c   : > { %p15303_p12 = scmp.ne.s32.totalorder %s18668_s2, %s15302_s17  ;;  %p15309_p2 = scmp.lt.u32.totalorder %s15302_s17, %s18668_s2 }
  0x2e   : > { %p15305_p0 = pnand %p15922_p13, %p15303_p12 }
  0x30   : > { %p15306_p1 = pneg %p15305_p0 }
  0x32   : > { %p15311_p3 = pnand %p15309_p2, %p15306_p1 }
  0x34   : > { %15314 = shalt.err (!%p15311_p3)
}
  0x35   : > { %s15315_s16 = scalar_lea.vmem %s439_s18, 32  ;;  %p15323_p8 = scmp.lt.s32.totalorder %s439_s18, %s439_s18 }
  0x36   : > { %p15316_p6 = scmp.ne.s32.totalorder %s439_s18, %s15315_s16  ;;  %p15324_p5 = scmp.lt.s32.totalorder %s15315_s16, %s15315_s16 }
  0x38   : > { %p15318_p7 = pnand %p15316_p6, %p15922_p13  ;;  %p15325_p9 = por %p15324_p5, %p15323_p8 }
  0x3a   : > { %p15319_p10 = pneg %p15318_p7 }
  0x3c   : > { %p15326_p4 = pnand %p15325_p9, %p15319_p10 }
  0x3e   : > { %15329 = shalt.err (!%p15326_p4)
}
  0x3f   : > { %14522 = dma.hbm_to_vmem [thread:$0]  (!%p15906_p11), %s18668_s2, 32, %s439_s18, [#allocation6]  }
  0x40   : > { %s18670_s4 = sld [smem:[#allocation92_spill]] }
  0x46   : > { %s15330_s17 = scalar_lea.hbm %s18670_s4, 16 }
  0x47   : > { %p15331_p12 = scmp.ne.s32.totalorder %s18670_s4, %s15330_s17  ;;  %p15337_p4 = scmp.lt.u32.totalorder %s15330_s17, %s18670_s4 }
  0x49   : > { %p15333_p0 = pnand %p15331_p12, %p15922_p13 }
  0x4b   : > { %p15334_p5 = pneg %p15333_p0 }
  0x4d   : > { %p15339_p8 = pnand %p15337_p4, %p15334_p5 }
  0x4f   : > { %15342 = shalt.err (!%p15339_p8)
}
  0x50   : > { %s15343_s18 = scalar_lea.vmem %s15910_s20, 16  ;;  %s15350_s21 = scalar_lea.vmem %s15910_s20, 32 }
  0x51   : > { %p15344_p9 = scmp.ne.s32.totalorder %s15910_s20, %s15343_s18  ;;  %p15351_p3 = scmp.lt.s32.totalorder %s15910_s20, %s15910_s20 }
  0x52   : > { %p15352_p6 = scmp.lt.s32.totalorder %s15350_s21, %s15343_s18 }
  0x53   : > { %p15346_p1 = pnand %p15344_p9, %p15922_p13 }
  0x54   : > { %p15353_p7 = por %p15352_p6, %p15351_p3 }
  0x55   : > { %p15347_p2 = pneg %p15346_p1 }
  0x57   : > { %p15354_p10 = pnand %p15353_p7, %p15347_p2 }
  0x59   : > { %15357 = shalt.err (!%p15354_p10)
}
  0x5a   : > { %14528 = dma.hbm_to_vmem [thread:$0]  (!%p15906_p11), %s18670_s4, 16, %s15910_s20, [#allocation9]  }
  0x5b   : > { %s18671_s6 = sld [smem:[#allocation94_spill]] }
  0x61   : > { %s15358_s30 = scalar_lea.hbm %s18671_s6, 32 }
  0x62   : > { %p15359_p12 = scmp.ne.s32.totalorder %s18671_s6, %s15358_s30  ;;  %p15365_p4 = scmp.lt.u32.totalorder %s15358_s30, %s18671_s6 }
  0x64   : > { %p15361_p0 = pnand %p15359_p12, %p15922_p13 }
  0x66   : > { %p15362_p5 = pneg %p15361_p0 }
  0x68   : > { %p15367_p8 = pnand %p15365_p4, %p15362_p5 }
  0x6a   : > { %15370 = shalt.err (!%p15367_p8)
}
  0x6b   : > { %s15371_s20 = scalar_lea.vmem %s15912_s28, 32  ;;  %p15379_p3 = scmp.lt.s32.totalorder %s15912_s28, %s15912_s28 }
  0x6c   : > { %p15372_p9 = scmp.ne.s32.totalorder %s15912_s28, %s15371_s20  ;;  %p15380_p6 = scmp.lt.s32.totalorder %s15371_s20, %s15371_s20 }
  0x6e   : > { %p15374_p1 = pnand %p15372_p9, %p15922_p13  ;;  %p15381_p7 = por %p15380_p6, %p15379_p3 }
  0x70   : > { %p15375_p2 = pneg %p15374_p1 }
  0x72   : > { %p15382_p10 = pnand %p15381_p7, %p15375_p2 }
  0x74   : > { %15385 = shalt.err (!%p15382_p10)
}
  0x75   : > { %14534 = dma.hbm_to_vmem [thread:$0]  (!%p15906_p11), %s18671_s6, 32, %s15912_s28, [#allocation12]  }
  0x76   : > { %s15753_s15 = smov [#allocation14]   ;;  %s15754_s24 = smov [#allocation17]  }
  0x77   : > { %s510_s25 = sshll.u32 %s15753_s15, 4  ;;  %s534_s30 = sshll.u32 %s15754_s24, 4  ;;  %s511_s25 = int_to_ptr.vmem [resolvable:$true] %s510_s25  ;;  %s535_s30 = int_to_ptr.vmem [resolvable:$true] %s534_s30 }
  0x78   : > { %s15386_s16 = scalar_lea.hbm %s18616_s8, 16 }
  0x79   : > { %p15387_p12 = scmp.ne.s32.totalorder %s18616_s8, %s15386_s16  ;;  %p15393_p4 = scmp.lt.u32.totalorder %s15386_s16, %s18616_s8 }
  0x7b   : > { %p15389_p0 = pnand %p15387_p12, %p15922_p13 }
  0x7d   : > { %p15390_p5 = pneg %p15389_p0 }
  0x7f   : > { %p15395_p8 = pnand %p15393_p4, %p15390_p5 }
  0x81   : > { %15398 = shalt.err (!%p15395_p8)
}
  0x82   : > { %s15399_s28 = scalar_lea.vmem %s511_s25, 16  ;;  %s15406_s0 = scalar_lea.vmem %s511_s25, 32 }
  0x83   : > { %p15400_p9 = scmp.ne.s32.totalorder %s511_s25, %s15399_s28  ;;  %p15407_p3 = scmp.lt.s32.totalorder %s511_s25, %s511_s25 }
  0x84   : > { %p15408_p6 = scmp.lt.s32.totalorder %s15406_s0, %s15399_s28 }
  0x85   : > { %p15402_p1 = pnand %p15400_p9, %p15922_p13 }
  0x86   : > { %p15409_p7 = por %p15408_p6, %p15407_p3 }
  0x87   : > { %p15403_p2 = pneg %p15402_p1 }
  0x89   : > { %p15410_p10 = pnand %p15409_p7, %p15403_p2 }
  0x8b   : > { %15413 = shalt.err (!%p15410_p10)
}
  0x8c   : > { %14540 = dma.hbm_to_vmem [thread:$0]  (!%p15906_p11), %s18616_s8, 16, %s511_s25, [#allocation15]  }
  0x8d   : > { %s15414_s27 = scalar_lea.hbm %s18618_s10, 64 }
  0x8e   : > { %p15415_p12 = scmp.ne.s32.totalorder %s18618_s10, %s15414_s27  ;;  %p15421_p4 = scmp.lt.u32.totalorder %s15414_s27, %s18618_s10 }
  0x90   : > { %p15417_p0 = pnand %p15415_p12, %p15922_p13 }
  0x92   : > { %p15418_p5 = pneg %p15417_p0 }
  0x94   : > { %p15423_p8 = pnand %p15421_p4, %p15418_p5 }
  0x96   : > { %15426 = shalt.err (!%p15423_p8)
}
  0x97   : > { %s15427_s28 = scalar_lea.vmem %s535_s30, 64  ;;  %p15435_p3 = scmp.lt.s32.totalorder %s535_s30, %s535_s30 }
  0x98   : > { %p15428_p9 = scmp.ne.s32.totalorder %s535_s30, %s15427_s28  ;;  %p15436_p6 = scmp.lt.s32.totalorder %s15427_s28, %s15427_s28 }
  0x9a   : > { %p15430_p1 = pnand %p15428_p9, %p15922_p13  ;;  %p15437_p7 = por %p15436_p6, %p15435_p3 }
  0x9c   : > { %p15431_p2 = pneg %p15430_p1 }
  0x9e   : > { %p15438_p10 = pnand %p15437_p7, %p15431_p2 }
  0xa0   : > { %15441 = shalt.err (!%p15438_p10)
}
  0xa1   : > { %14546 = dma.hbm_to_vmem [thread:$0]  (!%p15906_p11), %s18618_s10, 64, %s535_s30, [#allocation18]  }
  0xa2   : > { %s15755_s15 = smov [#allocation20]   ;;  %s15756_s2 = smov [#allocation3]  }
  0xa3   : > { %s558_s24 = sshll.u32 %s15755_s15, 4  ;;  %s424_s17 = sshll.u32 %s15756_s2, 4  ;;  %s559_s24 = int_to_ptr.vmem [resolvable:$true] %s558_s24  ;;  %s425_s17 = int_to_ptr.vmem [resolvable:$true] %s424_s17 }
  0xa4   : > { %s15442_s18 = scalar_lea.hbm %s18620_s12, 32 }
  0xa5   : > { %p15443_p12 = scmp.ne.s32.totalorder %s18620_s12, %s15442_s18  ;;  %p15449_p4 = scmp.lt.u32.totalorder %s15442_s18, %s18620_s12 }
  0xa7   : > { %p15445_p0 = pnand %p15443_p12, %p15922_p13 }
  0xa9   : > { %p15446_p5 = pneg %p15445_p0 }
  0xab   : > { %p15451_p8 = pnand %p15449_p4, %p15446_p5 }
  0xad   : > { %15454 = shalt.err (!%p15451_p8)
}
  0xae   : > { %s15455_s30 = scalar_lea.vmem %s559_s24, 32  ;;  %p15463_p3 = scmp.lt.s32.totalorder %s559_s24, %s559_s24 }
  0xaf   : > { %p15456_p9 = scmp.ne.s32.totalorder %s559_s24, %s15455_s30  ;;  %p15464_p6 = scmp.lt.s32.totalorder %s15455_s30, %s15455_s30 }
  0xb1   : > { %p15458_p1 = pnand %p15456_p9, %p15922_p13  ;;  %p15465_p7 = por %p15464_p6, %p15463_p3 }
  0xb3   : > { %p15459_p2 = pneg %p15458_p1 }
  0xb5   : > { %p15466_p10 = pnand %p15465_p7, %p15459_p2 }
  0xb7   : > { %15469 = shalt.err (!%p15466_p10)
}
  0xb8   : > { %14552 = dma.hbm_to_vmem [thread:$0]  (!%p15906_p11), %s18620_s12, 32, %s559_s24, [#allocation21]  }
  0xb9   : > { %s18672_s1 = sld [smem:[#allocation89_spill]] }
  0xbf   : > { %s15470_s16 = scalar_lea.hbm %s18672_s1, 384 }
  0xc0   : > { %p15471_p12 = scmp.ne.s32.totalorder %s18672_s1, %s15470_s16  ;;  %p15477_p4 = scmp.lt.u32.totalorder %s15470_s16, %s18672_s1 }
  0xc2   : > { %p15473_p0 = pnand %p15471_p12, %p15922_p13 }
  0xc4   : > { %p15474_p5 = pneg %p15473_p0 }
  0xc6   : > { %p15479_p8 = pnand %p15477_p4, %p15474_p5 }
  0xc8   : > { %15482 = shalt.err (!%p15479_p8)
}
  0xc9   : > { %s15483_s25 = scalar_lea.vmem %s425_s17, 384  ;;  %p15491_p3 = scmp.lt.s32.totalorder %s425_s17, %s425_s17 }
  0xca   : > { %p15484_p9 = scmp.ne.s32.totalorder %s425_s17, %s15483_s25  ;;  %p15492_p6 = scmp.lt.s32.totalorder %s15483_s25, %s15483_s25 }
  0xcc   : > { %p15486_p1 = pnand %p15484_p9, %p15922_p13  ;;  %p15493_p7 = por %p15492_p6, %p15491_p3 }
  0xce   : > { %p15487_p2 = pneg %p15486_p1 }
  0xd0   : > { %p15494_p10 = pnand %p15493_p7, %p15487_p2 }
  0xd2   : > { %15497 = shalt.err (!%p15494_p10)
}
  0xd3   : > { %s18635_s24 = smov 128   ;;  %s18637_s30 = smov 8  }
  0xd4   : > { %14519 = dma.hbm_to_vmem [thread:$0]  (!%p15906_p11), %s18672_s1, 384, %s425_s17, [#allocation4], %s18635_s24, %s18635_s24, %s18637_s30  }
  0xd5   : > { %s15759_s2 = smov [#allocation7]   ;;  %s18673_s3 = sld [smem:[#allocation91_spill]] }
  0xd6   : > { %s448_s27 = sshll.u32 %s15759_s2, 4  ;;  %s449_s27 = int_to_ptr.vmem [resolvable:$true] %s448_s27 }
  0xdb   : > { %s15498_s20 = scalar_lea.hbm %s18673_s3, 3072 }
  0xdc   : > { %p15499_p12 = scmp.ne.s32.totalorder %s18673_s3, %s15498_s20  ;;  %p15505_p4 = scmp.lt.u32.totalorder %s15498_s20, %s18673_s3 }
  0xde   : > { %p15501_p0 = pnand %p15499_p12, %p15922_p13 }
  0xe0   : > { %p15502_p5 = pneg %p15501_p0 }
  0xe2   : > { %p15507_p8 = pnand %p15505_p4, %p15502_p5 }
  0xe4   : > { %15510 = shalt.err (!%p15507_p8)
}
  0xe5   : > { %s15511_s17 = scalar_lea.vmem %s449_s27, 3072  ;;  %p15519_p3 = scmp.lt.s32.totalorder %s449_s27, %s449_s27 }
  0xe6   : > { %p15512_p9 = scmp.ne.s32.totalorder %s449_s27, %s15511_s17  ;;  %p15520_p6 = scmp.lt.s32.totalorder %s15511_s17, %s15511_s17 }
  0xe8   : > { %p15514_p1 = pnand %p15512_p9, %p15922_p13  ;;  %p15521_p7 = por %p15520_p6, %p15519_p3 }
  0xea   : > { %p15515_p2 = pneg %p15514_p1 }
  0xec   : > { %p15522_p10 = pnand %p15521_p7, %p15515_p2 }
  0xee   : > { %15525 = shalt.err (!%p15522_p10)
}
  0xef   : > { %s18639_s0 = smov 64   ;;  %s18641_s15 = smov 4  }
  0xf0   : > { %14525 = dma.hbm_to_vmem [thread:$0]  (!%p15906_p11), %s18673_s3, 3072, %s449_s27, [#allocation6], %s18639_s0, %s18639_s0, %s18641_s15  }
  0xf1   : > { %s15762_s16 = smov [#allocation10]   ;;  %s15763_s20 = smov [#allocation13]  }
  0xf2   : > { %s472_s18 = sshll.u32 %s15762_s16, 4  ;;  %s496_s21 = sshll.u32 %s15763_s20, 4  ;;  %s473_s18 = int_to_ptr.vmem [resolvable:$true] %s472_s18  ;;  %s16081_s21 = int_to_ptr.vmem [resolvable:$true] %s496_s21 }
  0xf3   : > { %s18674_s5 = sld [smem:[#allocation93_spill]] }
  0xf9   : > { %s15526_s17 = scalar_lea.hbm %s18674_s5, 6144 }
  0xfa   : > { %p15527_p12 = scmp.ne.s32.totalorder %s18674_s5, %s15526_s17  ;;  %p15533_p4 = scmp.lt.u32.totalorder %s15526_s17, %s18674_s5 }
  0xfc   : > { %p15529_p0 = pnand %p15527_p12, %p15922_p13 }
  0xfe   : > { %p15530_p5 = pneg %p15529_p0 }
 0x100   : > { %p15535_p8 = pnand %p15533_p4, %p15530_p5 }
 0x102   : > { %15538 = shalt.err (!%p15535_p8)
}
 0x103   : > { %s15539_s2 = scalar_lea.vmem %s473_s18, 6144  ;;  %p15547_p3 = scmp.lt.s32.totalorder %s473_s18, %s473_s18 }
 0x104   : > { %p15540_p9 = scmp.ne.s32.totalorder %s473_s18, %s15539_s2  ;;  %p15548_p6 = scmp.lt.s32.totalorder %s15539_s2, %s15539_s2 }
 0x106   : > { %p15542_p1 = pnand %p15540_p9, %p15922_p13  ;;  %p15549_p7 = por %p15548_p6, %p15547_p3 }
 0x108   : > { %p15543_p2 = pneg %p15542_p1 }
 0x10a   : > { %p15550_p10 = pnand %p15549_p7, %p15543_p2 }
 0x10c   : > { %15553 = shalt.err (!%p15550_p10)
}
 0x10d   : > { %s18675_s24 = smov 8   ;;  %s18676_s30 = smov 128  }
 0x10e   : > { %14531 = dma.hbm_to_vmem [thread:$0]  (!%p15906_p11), %s18674_s5, 6144, %s473_s18, [#allocation9], %s18676_s30, %s18676_s30, %s18675_s24  }
 0x10f   : > { %s18677_s7 = sld [smem:[#allocation95_spill]] }
 0x115   : > { %s15554_s17 = scalar_lea.hbm %s18677_s7, 3072 }
 0x116   : > { %p15555_p12 = scmp.ne.s32.totalorder %s18677_s7, %s15554_s17  ;;  %p15561_p4 = scmp.lt.u32.totalorder %s15554_s17, %s18677_s7 }
 0x118   : > { %p15557_p0 = pnand %p15555_p12, %p15922_p13 }
 0x11a   : > { %p15558_p5 = pneg %p15557_p0 }
 0x11c   : > { %p15563_p8 = pnand %p15561_p4, %p15558_p5 }
 0x11e   : > { %15566 = shalt.err (!%p15563_p8)
}
 0x11f   : > { %s15567_s18 = scalar_lea.vmem %s16081_s21, 3072  ;;  %p15575_p3 = scmp.lt.s32.totalorder %s16081_s21, %s16081_s21 }
 0x120   : > { %p15568_p9 = scmp.ne.s32.totalorder %s16081_s21, %s15567_s18  ;;  %p15576_p6 = scmp.lt.s32.totalorder %s15567_s18, %s15567_s18 }
 0x122   : > { %p15570_p1 = pnand %p15568_p9, %p15922_p13  ;;  %p15577_p7 = por %p15576_p6, %p15575_p3 }
 0x124   : > { %p15571_p2 = pneg %p15570_p1 }
 0x126   : > { %p15578_p10 = pnand %p15577_p7, %p15571_p2 }
 0x128   : > { %15581 = shalt.err (!%p15578_p10)
}
 0x129   : > { %s18678_s0 = smov 64   ;;  %s15764_s28 = smov [#allocation16]  }
 0x12a   : > { %14537 = dma.hbm_to_vmem [thread:$0]  (!%p15906_p11), %s18677_s7, 3072, %s16081_s21, [#allocation12], %s18678_s0, %s18678_s0, %s18641_s15  }
 0x12b   : > { %s520_s25 = sshll.u32 %s15764_s28, 4  ;;  %s15582_s27 = scalar_lea.hbm %s18617_s9, 12288  ;;  %s521_s25 = int_to_ptr.vmem [resolvable:$true] %s520_s25 }
 0x12c   : > { %p15583_p12 = scmp.ne.s32.totalorder %s18617_s9, %s15582_s27  ;;  %p15589_p4 = scmp.lt.u32.totalorder %s15582_s27, %s18617_s9 }
 0x12e   : > { %p15585_p0 = pnand %p15583_p12, %p15922_p13 }
 0x130   : > { %p15586_p5 = pneg %p15585_p0 }
 0x132   : > { %p15591_p8 = pnand %p15589_p4, %p15586_p5 }
 0x134   : > { %15594 = shalt.err (!%p15591_p8)
}
 0x135   : > { %s15595_s21 = scalar_lea.vmem %s521_s25, 12288  ;;  %p15603_p3 = scmp.lt.s32.totalorder %s521_s25, %s521_s25 }
 0x136   : > { %p15596_p9 = scmp.ne.s32.totalorder %s521_s25, %s15595_s21  ;;  %p15604_p6 = scmp.lt.s32.totalorder %s15595_s21, %s15595_s21 }
 0x138   : > { %p15598_p1 = pnand %p15596_p9, %p15922_p13  ;;  %p15605_p7 = por %p15604_p6, %p15603_p3 }
 0x13a   : > { %p15599_p2 = pneg %p15598_p1 }
 0x13c   : > { %p15606_p10 = pnand %p15605_p7, %p15599_p2 }
 0x13e   : > { %15609 = shalt.err (!%p15606_p10)
}
 0x13f   : > { %s15765_s16 = smov 256   ;;  %s15766_s20 = smov 16  }
 0x140   : > { %14543 = dma.hbm_to_vmem [thread:$0]  (!%p15906_p11), %s18617_s9, 12288, %s521_s25, [#allocation15], %s15765_s16, %s15765_s16, %s15766_s20  }
 0x141   : > { %s15767_s28 = smov [#allocation19]   ;;  %s15768_s4 = smov [#allocation22]  }
 0x142   : > { %s544_s17 = sshll.u32 %s15767_s28, 4  ;;  %s568_s27 = sshll.u32 %s15768_s4, 4  ;;  %s545_s17 = int_to_ptr.vmem [resolvable:$true] %s544_s17  ;;  %s569_s27 = int_to_ptr.vmem [resolvable:$true] %s568_s27 }
 0x143   : > { %s15610_s21 = scalar_lea.hbm %s18619_s11, 12288 }
 0x144   : > { %p15611_p12 = scmp.ne.s32.totalorder %s18619_s11, %s15610_s21  ;;  %p15617_p4 = scmp.lt.u32.totalorder %s15610_s21, %s18619_s11 }
 0x146   : > { %p15613_p0 = pnand %p15611_p12, %p15922_p13 }
 0x148   : > { %p15614_p5 = pneg %p15613_p0 }
 0x14a   : > { %p15619_p8 = pnand %p15617_p4, %p15614_p5 }
 0x14c   : > { %15622 = shalt.err (!%p15619_p8)
}
 0x14d   : > { %s15623_s25 = scalar_lea.vmem %s545_s17, 12288  ;;  %p15631_p3 = scmp.lt.s32.totalorder %s545_s17, %s545_s17 }
 0x14e   : > { %p15624_p9 = scmp.ne.s32.totalorder %s545_s17, %s15623_s25  ;;  %p15632_p6 = scmp.lt.s32.totalorder %s15623_s25, %s15623_s25 }
 0x150   : > { %p15626_p1 = pnand %p15624_p9, %p15922_p13  ;;  %p15633_p7 = por %p15632_p6, %p15631_p3 }
 0x152   : > { %p15627_p2 = pneg %p15626_p1 }
 0x154   : > { %p15634_p10 = pnand %p15633_p7, %p15627_p2 }
 0x156   : > { %15637 = shalt.err (!%p15634_p10)
}
 0x157   : > { %14549 = dma.hbm_to_vmem [thread:$0]  (!%p15906_p11), %s18619_s11, 12288, %s545_s17, [#allocation18], %s18676_s30, %s18676_s30, %s18675_s24  }
 0x158   : > { %s15638_s16 = scalar_lea.hbm %s18621_s13, 32768 }
 0x159   : > { %p15639_p12 = scmp.ne.s32.totalorder %s18621_s13, %s15638_s16  ;;  %p15645_p4 = scmp.lt.u32.totalorder %s15638_s16, %s18621_s13 }
 0x15b   : > { %p15641_p0 = pnand %p15639_p12, %p15922_p13 }
 0x15d   : > { %p15642_p5 = pneg %p15641_p0 }
 0x15f   : > { %p15647_p8 = pnand %p15645_p4, %p15642_p5 }
 0x161   : > { %15650 = shalt.err (!%p15647_p8)
}
 0x162   : > { %s15651_s4 = scalar_lea.vmem %s569_s27, 32768  ;;  %p15659_p3 = scmp.lt.s32.totalorder %s569_s27, %s569_s27 }
 0x163   : > { %p15652_p9 = scmp.ne.s32.totalorder %s569_s27, %s15651_s4  ;;  %p15660_p6 = scmp.lt.s32.totalorder %s15651_s4, %s15651_s4 }
 0x165   : > { %p15654_p1 = pnand %p15652_p9, %p15922_p13  ;;  %p15661_p7 = por %p15660_p6, %p15659_p3 }
 0x167   : > { %p15655_p2 = pneg %p15654_p1 }
 0x169   : > { %p15662_p10 = pnand %p15661_p7, %p15655_p2 }
 0x16b   : > { %15665 = shalt.err (!%p15662_p10)
}
 0x16c   : > { %s18679_s24 = smov 4   ;;  %s15769_s2 = smov [#allocation23]  }
 0x16d   : > { %14555 = dma.hbm_to_vmem [thread:$0]  (!%p15906_p11), %s18621_s13, 32768, %s569_s27, [#allocation21], %s18678_s0, %s18678_s0, %s18679_s24  }
 0x16e   : > { %s582_s18 = sshll.u32 %s15769_s2, 4  ;;  %s15666_s5 = scalar_lea.hbm %s18622_s14, 16  ;;  %s583_s18 = int_to_ptr.vmem [resolvable:$true] %s582_s18 }
 0x16f   : > { %p15667_p12 = scmp.ne.s32.totalorder %s18622_s14, %s15666_s5  ;;  %p15673_p4 = scmp.lt.u32.totalorder %s15666_s5, %s18622_s14 }
 0x171   : > { %p15669_p0 = pnand %p15667_p12, %p15922_p13 }
 0x173   : > { %p15670_p5 = pneg %p15669_p0 }
 0x175   : > { %p15675_p8 = pnand %p15673_p4, %p15670_p5 }
 0x177   : > { %15678 = shalt.err (!%p15675_p8)
}
 0x178   : > { %s15679_s0 = scalar_lea.vmem %s583_s18, 16  ;;  %s15686_s27 = scalar_lea.vmem %s583_s18, 32 }
 0x179   : > { %p15680_p9 = scmp.ne.s32.totalorder %s583_s18, %s15679_s0  ;;  %p15687_p3 = scmp.lt.s32.totalorder %s583_s18, %s583_s18 }
 0x17a   : > { %p15688_p6 = scmp.lt.s32.totalorder %s15686_s27, %s15679_s0 }
 0x17b   : > { %p15682_p1 = pnand %p15680_p9, %p15922_p13 }
 0x17c   : > { %p15689_p7 = por %p15688_p6, %p15687_p3 }
 0x17d   : > { %p15683_p2 = pneg %p15682_p1 }
 0x17f   : > { %p15690_p10 = pnand %p15689_p7, %p15683_p2 }
 0x181   : > { %15693 = shalt.err (!%p15690_p10)
}
 0x182   : > { %14558 = dma.hbm_to_vmem [thread:$0]  (!%p15906_p11), %s18622_s14, 16, %s583_s18, [#allocation24]  }
 0x183   : > { %p12083_p12 = scmp.ge.s32.totalorder %s15748_s23, 2 }
 0x184   : > { %p18680_p0 = scmp.ne.s32.totalorder (!%p12083_p12), %s18662_s29, 0 }
 0x185   : > { %589 = sbr.rel (%p12083_p12) target bundleno = 470 (0x1d6), region = 72 }
 0x18c   : > { %592 = sbr.rel (!%p18680_p0) target bundleno = 470 (0x1d6), region = 76  ;;  %s594_s19 = sand.u32 (%p18680_p0), 1, %s15744_s22  }
 0x18d   : > { %s12761_s3 = sshll.u32 (%p18680_p0), %s15748_s23, 5  ;;  %s12084_s28 = sshll.u32 (%p18680_p0), %s594_s19, 10 }
 0x18e   : > { %s18681_s30 = sld [smem:[#allocation88_spill]] (%p18680_p0)  ;;  %s16221_s29 = scalar_lea.vmem (%p18680_p0), [#allocation2], %s12084_s28 }
 0x194   : > { %s16216_s17 = scalar_lea.vmem %s18681_s30, %s12761_s3 }
 0x195   : > { %v881_v0 = vld [vmem:[%s16216_s17] sm:$0xff]  ;;  %v883_v1 = vld [vmem:[%s16216_s17 + $0x8] sm:$0xff]  ;;  %v885_v2 = vld [vmem:[%s16216_s17 + $0x10] sm:$0xff] }
 0x196   : > { %882 = vst [vmem:[%s16221_s29] sm:$0xff] %v881_v0  ;;  %884 = vst [vmem:[%s16221_s29 + $0x8] sm:$0xff] %v883_v1  ;;  %v887_v3 = vld [vmem:[%s16216_s17 + $0x18] sm:$0xff]  ;;  %v889_v4 = vld [vmem:[%s16216_s17 + $0x40] sm:$0xff] }
 0x197   : > { %886 = vst [vmem:[%s16221_s29 + $0x10] sm:$0xff] %v885_v2  ;;  %v891_v5 = vld [vmem:[%s16216_s17 + $0x48] sm:$0xff]  ;;  %888 = vst [vmem:[%s16221_s29 + $0x18] sm:$0xff] %v887_v3  ;;  %v893_v6 = vld [vmem:[%s16216_s17 + $0x50] sm:$0xff] }
 0x198   : > { %890 = vst [vmem:[%s16221_s29 + $0x20] sm:$0xff] %v889_v4  ;;  %892 = vst [vmem:[%s16221_s29 + $0x28] sm:$0xff] %v891_v5  ;;  %v895_v7 = vld [vmem:[%s16216_s17 + $0x58] sm:$0xff]  ;;  %v897_v8 = vld [vmem:[%s16216_s17 + $0x80] sm:$0xff] }
 0x199   : > { %894 = vst [vmem:[%s16221_s29 + $0x30] sm:$0xff] %v893_v6  ;;  %896 = vst [vmem:[%s16221_s29 + $0x38] sm:$0xff] %v895_v7  ;;  %v899_v9 = vld [vmem:[%s16216_s17 + $0x88] sm:$0xff]  ;;  %v901_v10 = vld [vmem:[%s16216_s17 + $0x90] sm:$0xff] }
 0x19a   : > { %898 = vst [vmem:[%s16221_s29 + $0x40] sm:$0xff] %v897_v8  ;;  %v903_v11 = vld [vmem:[%s16216_s17 + $0x98] sm:$0xff]  ;;  %900 = vst [vmem:[%s16221_s29 + $0x48] sm:$0xff] %v899_v9  ;;  %v905_v12 = vld [vmem:[%s16216_s17 + $0xc0] sm:$0xff] }
 0x19b   : > { %902 = vst [vmem:[%s16221_s29 + $0x50] sm:$0xff] %v901_v10  ;;  %904 = vst [vmem:[%s16221_s29 + $0x58] sm:$0xff] %v903_v11  ;;  %v907_v13 = vld [vmem:[%s16216_s17 + $0xc8] sm:$0xff]  ;;  %v909_v14 = vld [vmem:[%s16216_s17 + $0xd0] sm:$0xff] }
 0x19c   : > { %906 = vst [vmem:[%s16221_s29 + $0x60] sm:$0xff] %v905_v12  ;;  %908 = vst [vmem:[%s16221_s29 + $0x68] sm:$0xff] %v907_v13  ;;  %v911_v15 = vld [vmem:[%s16216_s17 + $0xd8] sm:$0xff]  ;;  %v913_v16 = vld [vmem:[%s16216_s17 + $0x100] sm:$0xff] }
 0x19d   : > { %910 = vst [vmem:[%s16221_s29 + $0x70] sm:$0xff] %v909_v14  ;;  %v915_v17 = vld [vmem:[%s16216_s17 + $0x108] sm:$0xff]  ;;  %912 = vst [vmem:[%s16221_s29 + $0x78] sm:$0xff] %v911_v15  ;;  %v917_v18 = vld [vmem:[%s16216_s17 + $0x110] sm:$0xff] }
 0x19e   : > { %914 = vst [vmem:[%s16221_s29 + $0x80] sm:$0xff] %v913_v16  ;;  %916 = vst [vmem:[%s16221_s29 + $0x88] sm:$0xff] %v915_v17  ;;  %v919_v19 = vld [vmem:[%s16216_s17 + $0x118] sm:$0xff]  ;;  %v921_v20 = vld [vmem:[%s16216_s17 + $0x140] sm:$0xff] }
 0x19f   : > { %918 = vst [vmem:[%s16221_s29 + $0x90] sm:$0xff] %v917_v18  ;;  %920 = vst [vmem:[%s16221_s29 + $0x98] sm:$0xff] %v919_v19  ;;  %v923_v21 = vld [vmem:[%s16216_s17 + $0x148] sm:$0xff]  ;;  %v925_v22 = vld [vmem:[%s16216_s17 + $0x150] sm:$0xff] }
 0x1a0   : > { %922 = vst [vmem:[%s16221_s29 + $0xa0] sm:$0xff] %v921_v20  ;;  %v927_v23 = vld [vmem:[%s16216_s17 + $0x158] sm:$0xff]  ;;  %924 = vst [vmem:[%s16221_s29 + $0xa8] sm:$0xff] %v923_v21  ;;  %v929_v24 = vld [vmem:[%s16216_s17 + $0x180] sm:$0xff] }
 0x1a1   : > { %926 = vst [vmem:[%s16221_s29 + $0xb0] sm:$0xff] %v925_v22  ;;  %928 = vst [vmem:[%s16221_s29 + $0xb8] sm:$0xff] %v927_v23  ;;  %v931_v25 = vld [vmem:[%s16216_s17 + $0x188] sm:$0xff]  ;;  %v933_v26 = vld [vmem:[%s16216_s17 + $0x190] sm:$0xff] }
 0x1a2   : > { %930 = vst [vmem:[%s16221_s29 + $0xc0] sm:$0xff] %v929_v24  ;;  %932 = vst [vmem:[%s16221_s29 + $0xc8] sm:$0xff] %v931_v25  ;;  %v935_v27 = vld [vmem:[%s16216_s17 + $0x198] sm:$0xff]  ;;  %v937_v28 = vld [vmem:[%s16216_s17 + $0x1c0] sm:$0xff] }
 0x1a3   : > { %934 = vst [vmem:[%s16221_s29 + $0xd0] sm:$0xff] %v933_v26  ;;  %v939_v29 = vld [vmem:[%s16216_s17 + $0x1c8] sm:$0xff]  ;;  %936 = vst [vmem:[%s16221_s29 + $0xd8] sm:$0xff] %v935_v27  ;;  %v941_v30 = vld [vmem:[%s16216_s17 + $0x1d0] sm:$0xff] }
 0x1a4   : > { %938 = vst [vmem:[%s16221_s29 + $0xe0] sm:$0xff] %v937_v28  ;;  %940 = vst [vmem:[%s16221_s29 + $0xe8] sm:$0xff] %v939_v29  ;;  %v943_v31 = vld [vmem:[%s16216_s17 + $0x1d8] sm:$0xff]  ;;  %v945_v32 = vld [vmem:[%s16216_s17 + $0x200] sm:$0xff] }
 0x1a5   : > { %942 = vst [vmem:[%s16221_s29 + $0xf0] sm:$0xff] %v941_v30  ;;  %944 = vst [vmem:[%s16221_s29 + $0xf8] sm:$0xff] %v943_v31  ;;  %v947_v33 = vld [vmem:[%s16216_s17 + $0x208] sm:$0xff]  ;;  %v949_v34 = vld [vmem:[%s16216_s17 + $0x210] sm:$0xff] }
 0x1a6   : > { %946 = vst [vmem:[%s16221_s29 + $0x100] sm:$0xff] %v945_v32  ;;  %v951_v35 = vld [vmem:[%s16216_s17 + $0x218] sm:$0xff]  ;;  %948 = vst [vmem:[%s16221_s29 + $0x108] sm:$0xff] %v947_v33  ;;  %v953_v36 = vld [vmem:[%s16216_s17 + $0x240] sm:$0xff] }
 0x1a7   : > { %950 = vst [vmem:[%s16221_s29 + $0x110] sm:$0xff] %v949_v34  ;;  %952 = vst [vmem:[%s16221_s29 + $0x118] sm:$0xff] %v951_v35  ;;  %v955_v37 = vld [vmem:[%s16216_s17 + $0x248] sm:$0xff]  ;;  %v957_v38 = vld [vmem:[%s16216_s17 + $0x250] sm:$0xff] }
 0x1a8   : > { %954 = vst [vmem:[%s16221_s29 + $0x120] sm:$0xff] %v953_v36  ;;  %956 = vst [vmem:[%s16221_s29 + $0x128] sm:$0xff] %v955_v37  ;;  %v959_v39 = vld [vmem:[%s16216_s17 + $0x258] sm:$0xff]  ;;  %v961_v40 = vld [vmem:[%s16216_s17 + $0x280] sm:$0xff] }
 0x1a9   : > { %958 = vst [vmem:[%s16221_s29 + $0x130] sm:$0xff] %v957_v38  ;;  %v963_v41 = vld [vmem:[%s16216_s17 + $0x288] sm:$0xff]  ;;  %960 = vst [vmem:[%s16221_s29 + $0x138] sm:$0xff] %v959_v39  ;;  %v965_v42 = vld [vmem:[%s16216_s17 + $0x290] sm:$0xff] }
 0x1aa   : > { %962 = vst [vmem:[%s16221_s29 + $0x140] sm:$0xff] %v961_v40  ;;  %964 = vst [vmem:[%s16221_s29 + $0x148] sm:$0xff] %v963_v41  ;;  %v967_v43 = vld [vmem:[%s16216_s17 + $0x298] sm:$0xff]  ;;  %v969_v44 = vld [vmem:[%s16216_s17 + $0x2c0] sm:$0xff] }
 0x1ab   : > { %966 = vst [vmem:[%s16221_s29 + $0x150] sm:$0xff] %v965_v42  ;;  %968 = vst [vmem:[%s16221_s29 + $0x158] sm:$0xff] %v967_v43  ;;  %v971_v45 = vld [vmem:[%s16216_s17 + $0x2c8] sm:$0xff]  ;;  %v973_v46 = vld [vmem:[%s16216_s17 + $0x2d0] sm:$0xff] }
 0x1ac   : > { %970 = vst [vmem:[%s16221_s29 + $0x160] sm:$0xff] %v969_v44  ;;  %v975_v47 = vld [vmem:[%s16216_s17 + $0x2d8] sm:$0xff]  ;;  %972 = vst [vmem:[%s16221_s29 + $0x168] sm:$0xff] %v971_v45  ;;  %v977_v48 = vld [vmem:[%s16216_s17 + $0x300] sm:$0xff] }
 0x1ad   : > { %974 = vst [vmem:[%s16221_s29 + $0x170] sm:$0xff] %v973_v46  ;;  %976 = vst [vmem:[%s16221_s29 + $0x178] sm:$0xff] %v975_v47  ;;  %v979_v49 = vld [vmem:[%s16216_s17 + $0x308] sm:$0xff]  ;;  %v981_v50 = vld [vmem:[%s16216_s17 + $0x310] sm:$0xff] }
 0x1ae   : > { %978 = vst [vmem:[%s16221_s29 + $0x180] sm:$0xff] %v977_v48  ;;  %980 = vst [vmem:[%s16221_s29 + $0x188] sm:$0xff] %v979_v49  ;;  %v983_v51 = vld [vmem:[%s16216_s17 + $0x318] sm:$0xff]  ;;  %v985_v52 = vld [vmem:[%s16216_s17 + $0x340] sm:$0xff] }
 0x1af   : > { %982 = vst [vmem:[%s16221_s29 + $0x190] sm:$0xff] %v981_v50  ;;  %v987_v53 = vld [vmem:[%s16216_s17 + $0x348] sm:$0xff]  ;;  %984 = vst [vmem:[%s16221_s29 + $0x198] sm:$0xff] %v983_v51  ;;  %v989_v54 = vld [vmem:[%s16216_s17 + $0x350] sm:$0xff] }
 0x1b0   : > { %986 = vst [vmem:[%s16221_s29 + $0x1a0] sm:$0xff] %v985_v52  ;;  %988 = vst [vmem:[%s16221_s29 + $0x1a8] sm:$0xff] %v987_v53  ;;  %v991_v55 = vld [vmem:[%s16216_s17 + $0x358] sm:$0xff]  ;;  %v993_v56 = vld [vmem:[%s16216_s17 + $0x380] sm:$0xff] }
 0x1b1   : > { %990 = vst [vmem:[%s16221_s29 + $0x1b0] sm:$0xff] %v989_v54  ;;  %992 = vst [vmem:[%s16221_s29 + $0x1b8] sm:$0xff] %v991_v55  ;;  %v995_v57 = vld [vmem:[%s16216_s17 + $0x388] sm:$0xff]  ;;  %v997_v58 = vld [vmem:[%s16216_s17 + $0x390] sm:$0xff] }
 0x1b2   : > { %994 = vst [vmem:[%s16221_s29 + $0x1c0] sm:$0xff] %v993_v56  ;;  %v999_v59 = vld [vmem:[%s16216_s17 + $0x398] sm:$0xff]  ;;  %996 = vst [vmem:[%s16221_s29 + $0x1c8] sm:$0xff] %v995_v57  ;;  %v1001_v60 = vld [vmem:[%s16216_s17 + $0x3c0] sm:$0xff] }
 0x1b3   : > { %998 = vst [vmem:[%s16221_s29 + $0x1d0] sm:$0xff] %v997_v58  ;;  %1000 = vst [vmem:[%s16221_s29 + $0x1d8] sm:$0xff] %v999_v59  ;;  %v1003_v61 = vld [vmem:[%s16216_s17 + $0x3c8] sm:$0xff]  ;;  %v1005_v62 = vld [vmem:[%s16216_s17 + $0x3d0] sm:$0xff] }
 0x1b4   : > { %1002 = vst [vmem:[%s16221_s29 + $0x1e0] sm:$0xff] %v1001_v60  ;;  %1004 = vst [vmem:[%s16221_s29 + $0x1e8] sm:$0xff] %v1003_v61  ;;  %v1007_v63 = vld [vmem:[%s16216_s17 + $0x3d8] sm:$0xff]  ;;  %v1009_v0 = vld [vmem:[%s16216_s17 + $0x400] sm:$0xff] }
 0x1b5   : > { %1006 = vst [vmem:[%s16221_s29 + $0x1f0] sm:$0xff] %v1005_v62  ;;  %v1011_v1 = vld [vmem:[%s16216_s17 + $0x408] sm:$0xff]  ;;  %1008 = vst [vmem:[%s16221_s29 + $0x1f8] sm:$0xff] %v1007_v63  ;;  %v1013_v2 = vld [vmem:[%s16216_s17 + $0x410] sm:$0xff] }
 0x1b6   : > { %1010 = vst [vmem:[%s16221_s29 + $0x200] sm:$0xff] %v1009_v0  ;;  %1012 = vst [vmem:[%s16221_s29 + $0x208] sm:$0xff] %v1011_v1  ;;  %v1015_v3 = vld [vmem:[%s16216_s17 + $0x418] sm:$0xff]  ;;  %v1017_v4 = vld [vmem:[%s16216_s17 + $0x440] sm:$0xff] }
 0x1b7   : > { %1014 = vst [vmem:[%s16221_s29 + $0x210] sm:$0xff] %v1013_v2  ;;  %1016 = vst [vmem:[%s16221_s29 + $0x218] sm:$0xff] %v1015_v3  ;;  %v1019_v5 = vld [vmem:[%s16216_s17 + $0x448] sm:$0xff]  ;;  %v1021_v6 = vld [vmem:[%s16216_s17 + $0x450] sm:$0xff] }
 0x1b8   : > { %1018 = vst [vmem:[%s16221_s29 + $0x220] sm:$0xff] %v1017_v4  ;;  %v1023_v7 = vld [vmem:[%s16216_s17 + $0x458] sm:$0xff]  ;;  %1020 = vst [vmem:[%s16221_s29 + $0x228] sm:$0xff] %v1019_v5  ;;  %v1025_v8 = vld [vmem:[%s16216_s17 + $0x480] sm:$0xff] }
 0x1b9   : > { %1022 = vst [vmem:[%s16221_s29 + $0x230] sm:$0xff] %v1021_v6  ;;  %1024 = vst [vmem:[%s16221_s29 + $0x238] sm:$0xff] %v1023_v7  ;;  %v1027_v9 = vld [vmem:[%s16216_s17 + $0x488] sm:$0xff]  ;;  %v1029_v10 = vld [vmem:[%s16216_s17 + $0x490] sm:$0xff] }
 0x1ba   : > { %1026 = vst [vmem:[%s16221_s29 + $0x240] sm:$0xff] %v1025_v8  ;;  %1028 = vst [vmem:[%s16221_s29 + $0x248] sm:$0xff] %v1027_v9  ;;  %v1031_v11 = vld [vmem:[%s16216_s17 + $0x498] sm:$0xff]  ;;  %v1033_v12 = vld [vmem:[%s16216_s17 + $0x4c0] sm:$0xff] }
 0x1bb   : > { %1030 = vst [vmem:[%s16221_s29 + $0x250] sm:$0xff] %v1029_v10  ;;  %v1035_v13 = vld [vmem:[%s16216_s17 + $0x4c8] sm:$0xff]  ;;  %1032 = vst [vmem:[%s16221_s29 + $0x258] sm:$0xff] %v1031_v11  ;;  %v1037_v14 = vld [vmem:[%s16216_s17 + $0x4d0] sm:$0xff] }
 0x1bc   : > { %1034 = vst [vmem:[%s16221_s29 + $0x260] sm:$0xff] %v1033_v12  ;;  %1036 = vst [vmem:[%s16221_s29 + $0x268] sm:$0xff] %v1035_v13  ;;  %v1039_v15 = vld [vmem:[%s16216_s17 + $0x4d8] sm:$0xff]  ;;  %v1041_v16 = vld [vmem:[%s16216_s17 + $0x500] sm:$0xff] }
 0x1bd   : > { %1038 = vst [vmem:[%s16221_s29 + $0x270] sm:$0xff] %v1037_v14  ;;  %1040 = vst [vmem:[%s16221_s29 + $0x278] sm:$0xff] %v1039_v15  ;;  %v1043_v17 = vld [vmem:[%s16216_s17 + $0x508] sm:$0xff]  ;;  %v1045_v18 = vld [vmem:[%s16216_s17 + $0x510] sm:$0xff] }
 0x1be   : > { %1042 = vst [vmem:[%s16221_s29 + $0x280] sm:$0xff] %v1041_v16  ;;  %v1047_v19 = vld [vmem:[%s16216_s17 + $0x518] sm:$0xff]  ;;  %1044 = vst [vmem:[%s16221_s29 + $0x288] sm:$0xff] %v1043_v17  ;;  %v1049_v20 = vld [vmem:[%s16216_s17 + $0x540] sm:$0xff] }
 0x1bf   : > { %1046 = vst [vmem:[%s16221_s29 + $0x290] sm:$0xff] %v1045_v18  ;;  %1048 = vst [vmem:[%s16221_s29 + $0x298] sm:$0xff] %v1047_v19  ;;  %v1051_v21 = vld [vmem:[%s16216_s17 + $0x548] sm:$0xff]  ;;  %v1053_v22 = vld [vmem:[%s16216_s17 + $0x550] sm:$0xff] }
 0x1c0   : > { %1050 = vst [vmem:[%s16221_s29 + $0x2a0] sm:$0xff] %v1049_v20  ;;  %1052 = vst [vmem:[%s16221_s29 + $0x2a8] sm:$0xff] %v1051_v21  ;;  %v1055_v23 = vld [vmem:[%s16216_s17 + $0x558] sm:$0xff]  ;;  %v1057_v24 = vld [vmem:[%s16216_s17 + $0x580] sm:$0xff] }
 0x1c1   : > { %1054 = vst [vmem:[%s16221_s29 + $0x2b0] sm:$0xff] %v1053_v22  ;;  %v1059_v25 = vld [vmem:[%s16216_s17 + $0x588] sm:$0xff]  ;;  %1056 = vst [vmem:[%s16221_s29 + $0x2b8] sm:$0xff] %v1055_v23  ;;  %v1061_v26 = vld [vmem:[%s16216_s17 + $0x590] sm:$0xff] }
 0x1c2   : > { %1058 = vst [vmem:[%s16221_s29 + $0x2c0] sm:$0xff] %v1057_v24  ;;  %1060 = vst [vmem:[%s16221_s29 + $0x2c8] sm:$0xff] %v1059_v25  ;;  %v1063_v27 = vld [vmem:[%s16216_s17 + $0x598] sm:$0xff]  ;;  %v1065_v28 = vld [vmem:[%s16216_s17 + $0x5c0] sm:$0xff] }
 0x1c3   : > { %1062 = vst [vmem:[%s16221_s29 + $0x2d0] sm:$0xff] %v1061_v26  ;;  %1064 = vst [vmem:[%s16221_s29 + $0x2d8] sm:$0xff] %v1063_v27  ;;  %v1067_v29 = vld [vmem:[%s16216_s17 + $0x5c8] sm:$0xff]  ;;  %v1069_v30 = vld [vmem:[%s16216_s17 + $0x5d0] sm:$0xff] }
 0x1c4   : > { %1066 = vst [vmem:[%s16221_s29 + $0x2e0] sm:$0xff] %v1065_v28  ;;  %v1071_v31 = vld [vmem:[%s16216_s17 + $0x5d8] sm:$0xff]  ;;  %1068 = vst [vmem:[%s16221_s29 + $0x2e8] sm:$0xff] %v1067_v29  ;;  %v1073_v32 = vld [vmem:[%s16216_s17 + $0x600] sm:$0xff] }
 0x1c5   : > { %1070 = vst [vmem:[%s16221_s29 + $0x2f0] sm:$0xff] %v1069_v30  ;;  %1072 = vst [vmem:[%s16221_s29 + $0x2f8] sm:$0xff] %v1071_v31  ;;  %v1075_v33 = vld [vmem:[%s16216_s17 + $0x608] sm:$0xff]  ;;  %v1077_v34 = vld [vmem:[%s16216_s17 + $0x610] sm:$0xff] }
 0x1c6   : > { %1074 = vst [vmem:[%s16221_s29 + $0x300] sm:$0xff] %v1073_v32  ;;  %1076 = vst [vmem:[%s16221_s29 + $0x308] sm:$0xff] %v1075_v33  ;;  %v1079_v35 = vld [vmem:[%s16216_s17 + $0x618] sm:$0xff]  ;;  %v1081_v36 = vld [vmem:[%s16216_s17 + $0x640] sm:$0xff] }
 0x1c7   : > { %1078 = vst [vmem:[%s16221_s29 + $0x310] sm:$0xff] %v1077_v34  ;;  %v1083_v37 = vld [vmem:[%s16216_s17 + $0x648] sm:$0xff]  ;;  %1080 = vst [vmem:[%s16221_s29 + $0x318] sm:$0xff] %v1079_v35  ;;  %v1085_v38 = vld [vmem:[%s16216_s17 + $0x650] sm:$0xff] }
 0x1c8   : > { %1082 = vst [vmem:[%s16221_s29 + $0x320] sm:$0xff] %v1081_v36  ;;  %1084 = vst [vmem:[%s16221_s29 + $0x328] sm:$0xff] %v1083_v37  ;;  %v1087_v39 = vld [vmem:[%s16216_s17 + $0x658] sm:$0xff]  ;;  %v1089_v40 = vld [vmem:[%s16216_s17 + $0x680] sm:$0xff] }
 0x1c9   : > { %1086 = vst [vmem:[%s16221_s29 + $0x330] sm:$0xff] %v1085_v38  ;;  %1088 = vst [vmem:[%s16221_s29 + $0x338] sm:$0xff] %v1087_v39  ;;  %v1091_v41 = vld [vmem:[%s16216_s17 + $0x688] sm:$0xff]  ;;  %v1093_v42 = vld [vmem:[%s16216_s17 + $0x690] sm:$0xff] }
 0x1ca   : > { %1090 = vst [vmem:[%s16221_s29 + $0x340] sm:$0xff] %v1089_v40  ;;  %v1095_v43 = vld [vmem:[%s16216_s17 + $0x698] sm:$0xff]  ;;  %1092 = vst [vmem:[%s16221_s29 + $0x348] sm:$0xff] %v1091_v41  ;;  %v1097_v44 = vld [vmem:[%s16216_s17 + $0x6c0] sm:$0xff] }
 0x1cb   : > { %1094 = vst [vmem:[%s16221_s29 + $0x350] sm:$0xff] %v1093_v42  ;;  %1096 = vst [vmem:[%s16221_s29 + $0x358] sm:$0xff] %v1095_v43  ;;  %v1099_v45 = vld [vmem:[%s16216_s17 + $0x6c8] sm:$0xff]  ;;  %v1101_v46 = vld [vmem:[%s16216_s17 + $0x6d0] sm:$0xff] }
 0x1cc   : > { %1098 = vst [vmem:[%s16221_s29 + $0x360] sm:$0xff] %v1097_v44  ;;  %1100 = vst [vmem:[%s16221_s29 + $0x368] sm:$0xff] %v1099_v45  ;;  %v1103_v47 = vld [vmem:[%s16216_s17 + $0x6d8] sm:$0xff]  ;;  %v1105_v48 = vld [vmem:[%s16216_s17 + $0x700] sm:$0xff] }
 0x1cd   : > { %1102 = vst [vmem:[%s16221_s29 + $0x370] sm:$0xff] %v1101_v46  ;;  %v1107_v49 = vld [vmem:[%s16216_s17 + $0x708] sm:$0xff]  ;;  %1104 = vst [vmem:[%s16221_s29 + $0x378] sm:$0xff] %v1103_v47  ;;  %v1109_v50 = vld [vmem:[%s16216_s17 + $0x710] sm:$0xff] }
 0x1ce   : > { %1106 = vst [vmem:[%s16221_s29 + $0x380] sm:$0xff] %v1105_v48  ;;  %1108 = vst [vmem:[%s16221_s29 + $0x388] sm:$0xff] %v1107_v49  ;;  %v1111_v51 = vld [vmem:[%s16216_s17 + $0x718] sm:$0xff]  ;;  %v1113_v52 = vld [vmem:[%s16216_s17 + $0x740] sm:$0xff] }
 0x1cf   : > { %1110 = vst [vmem:[%s16221_s29 + $0x390] sm:$0xff] %v1109_v50  ;;  %1112 = vst [vmem:[%s16221_s29 + $0x398] sm:$0xff] %v1111_v51  ;;  %v1115_v53 = vld [vmem:[%s16216_s17 + $0x748] sm:$0xff]  ;;  %v1117_v54 = vld [vmem:[%s16216_s17 + $0x750] sm:$0xff] }
 0x1d0   : > { %1114 = vst [vmem:[%s16221_s29 + $0x3a0] sm:$0xff] %v1113_v52  ;;  %v1119_v55 = vld [vmem:[%s16216_s17 + $0x758] sm:$0xff]  ;;  %1116 = vst [vmem:[%s16221_s29 + $0x3a8] sm:$0xff] %v1115_v53  ;;  %v1121_v56 = vld [vmem:[%s16216_s17 + $0x780] sm:$0xff] }
 0x1d1   : > { %1118 = vst [vmem:[%s16221_s29 + $0x3b0] sm:$0xff] %v1117_v54  ;;  %1120 = vst [vmem:[%s16221_s29 + $0x3b8] sm:$0xff] %v1119_v55  ;;  %v1123_v57 = vld [vmem:[%s16216_s17 + $0x788] sm:$0xff]  ;;  %v1125_v58 = vld [vmem:[%s16216_s17 + $0x790] sm:$0xff] }
 0x1d2   : > { %1122 = vst [vmem:[%s16221_s29 + $0x3c0] sm:$0xff] %v1121_v56  ;;  %1124 = vst [vmem:[%s16221_s29 + $0x3c8] sm:$0xff] %v1123_v57  ;;  %v1127_v59 = vld [vmem:[%s16216_s17 + $0x798] sm:$0xff]  ;;  %v1129_v60 = vld [vmem:[%s16216_s17 + $0x7c0] sm:$0xff] }
 0x1d3   : > { %1126 = vst [vmem:[%s16221_s29 + $0x3d0] sm:$0xff] %v1125_v58  ;;  %v1131_v61 = vld [vmem:[%s16216_s17 + $0x7c8] sm:$0xff]  ;;  %1128 = vst [vmem:[%s16221_s29 + $0x3d8] sm:$0xff] %v1127_v59  ;;  %v1133_v62 = vld [vmem:[%s16216_s17 + $0x7d0] sm:$0xff] }
 0x1d4   : > { %1130 = vst [vmem:[%s16221_s29 + $0x3e0] sm:$0xff] %v1129_v60  ;;  %1132 = vst [vmem:[%s16221_s29 + $0x3e8] sm:$0xff] %v1131_v61  ;;  %v1135_v63 = vld [vmem:[%s16216_s17 + $0x7d8] sm:$0xff] }
 0x1d5   : > { %1134 = vst [vmem:[%s16221_s29 + $0x3f0] sm:$0xff] %v1133_v62  ;;  %1136 = vst [vmem:[%s16221_s29 + $0x3f8] sm:$0xff] %v1135_v63 }
 0x1d6 PF: > { %s18682_s23 = sld [smem:[#allocation39_spill]] }
 0x1dc   : > { %p18683_p11 = scmp.ne.s32.totalorder %s18682_s23, 0 }
 0x1de   : > { %1145 = sbr.rel (%p18683_p11) target bundleno = 4033 (0xfc1), region = 114 }
 0x1e5   : > { %s18684_s26 = sld [smem:[#allocation34_spill]]  ;;  %s18685_s2 = sld [smem:[#allocation35_spill]] }
 0x1eb   : > { %s1148_s18 = sand.u32 1, %s18684_s26   ;;  %p18686_p13 = scmp.eq.s32.totalorder %s18685_s2, 0 }
 0x1ec   : > { %s12088_s21 = sshll.u32 %s1148_s18, 10 }
 0x1ed   : > { %s16481_s25 = scalar_lea.vmem [#allocation2], %s12088_s21 }
 0x1ee   : > { %15707 = dma.done.wait (%p18686_p13), [#allocation4], 384   ;;  %p18687_p5 = pmov %p18686_p13 }
 0x1f0   : > { %15709 = vsyncadd (%p18687_p5), [#allocation4], 4294966912  ;;  %p18688_p4 = pmov %p18687_p5 }
 0x1f2   : > { %15711 = dma.done.wait (%p18688_p4), [#allocation6], 3104   ;;  %p18689_p8 = pmov %p18688_p4 }
 0x1f3   : > { %p18690_p9 = pmov %p18688_p4 }
 0x1f4   : > { %15713 = vsyncadd (%p18689_p8), [#allocation6], 4294964192 }
 0x1f5   : > { %15715 = dma.done.wait (%p18690_p9), [#allocation9], 6160   ;;  %p18691_p1 = pmov %p18688_p4 }
 0x1f7   : > { %15717 = vsyncadd (%p18691_p1), [#allocation9], 4294961136  ;;  %p18692_p2 = pmov %p18691_p1 }
 0x1f8   : > { %p18693_p3 = pmov %p18691_p1 }
 0x1f9   : > { %15719 = dma.done.wait (%p18692_p2), [#allocation12], 3104  }
 0x1fa   : > { %15721 = vsyncadd (%p18693_p3), [#allocation12], 4294964192  ;;  %p18694_p6 = pmov %p18691_p1 }
 0x1fb   : > { %p18695_p7 = pmov %p18691_p1 }
 0x1fc   : > { %15723 = dma.done.wait (%p18694_p6), [#allocation15], 12304  }
 0x1fd   : > { %15725 = vsyncadd (%p18695_p7), [#allocation15], 4294954992  ;;  %p18696_p10 = pmov %p18691_p1 }
 0x1fe   : > { %p18697_p12 = pmov %p18691_p1 }
 0x1ff   : > { %15727 = dma.done.wait (%p18696_p10), [#allocation18], 12352  }
 0x200   : > { %15729 = vsyncadd (%p18697_p12), [#allocation18], 4294954944  ;;  %p18698_p0 = pmov %p18691_p1 }
 0x202   : > { %15731 = dma.done.wait (%p18698_p0), [#allocation21], 32800   ;;  %p18699_p11 = pmov %p18698_p0 }
 0x203   : > { %p18700_p13 = pmov %p18698_p0 }
 0x204   : > { %15733 = vsyncadd (%p18699_p11), [#allocation21], 4294934496 }
 0x205   : > { %15735 = dma.done.wait (%p18700_p13), [#allocation24], 16   ;;  %p18701_p5 = pmov %p18698_p0 }
 0x206   : > { %v18642_v0 = vmov 0   ;;  %v1457_v1 = vld [vmem:[#allocation3 + $0x8] sm:$0xff]  ;;  %vm1560_vm0 = vcmask 1043456   ;;  %v1263_v2 = vld [vmem:[%s16481_s25] sm:$0xff]  ;;  %vm1463_vm1 = vcmask 64512   ;;  %v1265_v12 = vld [vmem:[%s16481_s25 + $0x10] sm:$0xff] }
 0x207   : > { %15737 = vsyncadd (%p18701_p5), [#allocation24], 4294967280  ;;  %1599 = vmatprep.mubr.bf16.mxu0 %v18642_v0  ;;  %v1264_v3 = vld [vmem:[%s16481_s25 + $0x8] sm:$0xff]  ;;  %v12106_v4 = vcombine.high %v1457_v1, %v1457_v1  ;;  %v12105_v5 = vcombine.low %v1457_v1, %v1457_v1  ;;  %v1455_v6 = vld [vmem:[#allocation3] sm:$0xff]  ;;  %s12103_s5 = sshll.u32 %s1148_s18, 8  ;;  %p1257_p4 = scmp.lt.s32.totalorder %s18685_s2, 1 }
 0x208   : > { %v12141_v7 = vcombine.high %v1455_v6, %v1455_v6  ;;  %v12140_v8 = vcombine.low %v1455_v6, %v1455_v6  ;;  %v1391_v10 = vpack.c.bf16 %v1264_v3, %v1263_v2  ;;  %v1266_v13 = vld [vmem:[%s16481_s25 + $0x18] sm:$0xff]  ;;  %v1271_v15 = vld [vmem:[%s16481_s25 + $0x40] sm:$0xff]  ;;  %v1272_v16 = vld [vmem:[%s16481_s25 + $0x48] sm:$0xff]  ;;  %s18273_s6 = scalar_lea.vmem [#allocation25], %s12103_s5  ;;  %s18800_s0 = sld [smem:[#allocation96_spill]] }
 0x209   : > { %12107 = vmatprep.subr.msk.bf16.mxu0 %vm1560_vm0, %v12106_v4  ;;  %v1562_v9 = vsel %vm1560_vm0, %v12105_v5, 0  ;;  %v1392_v14 = vpack.c.bf16 %v1266_v13, %v1265_v12  ;;  %v1395_v17 = vpack.c.bf16 %v1272_v16, %v1271_v15  ;;  %v1273_v18 = vld [vmem:[%s16481_s25 + $0x50] sm:$0xff]  ;;  %v1274_v19 = vld [vmem:[%s16481_s25 + $0x58] sm:$0xff]  ;;  %v1279_v21 = vld [vmem:[%s16481_s25 + $0x80] sm:$0xff]  ;;  %s18810_s2 = smov (!%p1257_p4, %s18685_s2), 1  ;;  %s18801_s20 = sld [smem:[#allocation38_spill]] }
 0x20a   : > { %1568 = vmatpush1.bf16.msra.mxu0 %v1562_v9  ;;  %v2019_v11 = vsel %vm1560_vm0, %v12140_v8, 0  ;;  %v1396_v20 = vpack.c.bf16 %v1274_v19, %v1273_v18  ;;  %v1280_v22 = vld [vmem:[%s16481_s25 + $0x88] sm:$0xff]  ;;  %v1281_v24 = vld [vmem:[%s16481_s25 + $0x90] sm:$0xff]  ;;  %v1282_v25 = vld [vmem:[%s16481_s25 + $0x98] sm:$0xff]  ;;  %s12104_s7 = sshll.u32 %s18810_s2, 3 }
 0x20b   : > { %12142 = vmatprep.subr.msk.bf16.mxu0 %vm1560_vm0, %v12141_v7  ;;  %v1399_v23 = vpack.c.bf16 %v1280_v22, %v1279_v21  ;;  %v1400_v26 = vpack.c.bf16 %v1282_v25, %v1281_v24  ;;  %v1287_v27 = vld [vmem:[%s16481_s25 + $0xc0] sm:$0xff]  ;;  %v1288_v28 = vld [vmem:[%s16481_s25 + $0xc8] sm:$0xff]  ;;  %v1289_v30 = vld [vmem:[%s16481_s25 + $0xd0] sm:$0xff] }
 0x20c   : > { %v1403_v29 = vpack.c.bf16 %v1288_v28, %v1287_v27  ;;  %v1290_v31 = vld [vmem:[%s16481_s25 + $0xd8] sm:$0xff]  ;;  %v1295_v33 = vld [vmem:[%s16481_s25 + $0x100] sm:$0xff]  ;;  %v1296_v34 = vld [vmem:[%s16481_s25 + $0x108] sm:$0xff] }
 0x20d   : > { %12108 = vmatmul.mubr.msk.bf16.vlgmr.msra.gmra.mrb[0].mxu0 %vm1463_vm1, %v1391_v10  ;;  %v1404_v32 = vpack.c.bf16 %v1290_v31, %v1289_v30  ;;  %v1407_v35 = vpack.c.bf16 %v1296_v34, %v1295_v33  ;;  %v1297_v36 = vld [vmem:[%s16481_s25 + $0x110] sm:$0xff]  ;;  %v1298_v37 = vld [vmem:[%s16481_s25 + $0x118] sm:$0xff]  ;;  %v1303_v39 = vld [vmem:[%s16481_s25 + $0x140] sm:$0xff] }
 0x20e   : > { %2025 = vmatpush1.bf16.msra.mxu0 %v2019_v11  ;;  %1609 = vmatprep.mubr.bf16.mxu0 %v18642_v0  ;;  %v1408_v38 = vpack.c.bf16 %v1298_v37, %v1297_v36  ;;  %v1304_v40 = vld [vmem:[%s16481_s25 + $0x148] sm:$0xff]  ;;  %v1305_v42 = vld [vmem:[%s16481_s25 + $0x150] sm:$0xff]  ;;  %v1306_v43 = vld [vmem:[%s16481_s25 + $0x158] sm:$0xff]  ;;  %s1260_s27 = scalar_lea.vmem %s18800_s0, %s12104_s7 }
 0x20f   : > { %v1411_v41 = vpack.c.bf16 %v1304_v40, %v1303_v39  ;;  %v1412_v44 = vpack.c.bf16 %v1306_v43, %v1305_v42  ;;  %v1311_v45 = vld [vmem:[%s16481_s25 + $0x180] sm:$0xff]  ;;  %v1312_v46 = vld [vmem:[%s16481_s25 + $0x188] sm:$0xff]  ;;  %v1313_v48 = vld [vmem:[%s16481_s25 + $0x190] sm:$0xff]  ;;  %p18802_p8 = scmp.ne.s32.totalorder %s18801_s20, 0 }
 0x210   : > { %v1415_v47 = vpack.c.bf16 %v1312_v46, %v1311_v45  ;;  %v1314_v49 = vld [vmem:[%s16481_s25 + $0x198] sm:$0xff]  ;;  %v1319_v51 = vld [vmem:[%s16481_s25 + $0x1c0] sm:$0xff]  ;;  %v1320_v52 = vld [vmem:[%s16481_s25 + $0x1c8] sm:$0xff]  ;;  %s18803_s1 = sld [smem:[#allocation35_spill]] (%p18802_p8)  ;;  %s18804_s4 = sld [smem:[#allocation97_spill]] (%p18802_p8) }
 0x211   : > { %v1416_v50 = vpack.c.bf16 %v1314_v49, %v1313_v48  ;;  %v1419_v53 = vpack.c.bf16 %v1320_v52, %v1319_v51  ;;  %v1321_v54 = vld [vmem:[%s16481_s25 + $0x1d0] sm:$0xff]  ;;  %v1322_v55 = vld [vmem:[%s16481_s25 + $0x1d8] sm:$0xff]  ;;  %v1327_v57 = vld [vmem:[%s16481_s25 + $0x200] sm:$0xff] }
 0x212   : > { %v1420_v56 = vpack.c.bf16 %v1322_v55, %v1321_v54  ;;  %v1328_v58 = vld [vmem:[%s16481_s25 + $0x208] sm:$0xff]  ;;  %v1329_v60 = vld [vmem:[%s16481_s25 + $0x210] sm:$0xff]  ;;  %v1330_v61 = vld [vmem:[%s16481_s25 + $0x218] sm:$0xff] }
 0x213   : > { %v1423_v59 = vpack.c.bf16 %v1328_v58, %v1327_v57  ;;  %v16589_v62 = vld [vmem:[#allocation3 + $0x10] sm:$0xff]  ;;  %v1424_v1 = vpack.c.bf16 %v1330_v61, %v1329_v60  ;;  %v1335_v2 = vld [vmem:[%s16481_s25 + $0x240] sm:$0xff]  ;;  %v1336_v3 = vld [vmem:[%s16481_s25 + $0x248] sm:$0xff] }
 0x214   : > { %v12174_v63 = vcombine.high %v16589_v62, %v16589_v62  ;;  %v1427_v4 = vpack.c.bf16 %v1336_v3, %v1335_v2  ;;  %v1337_v5 = vld [vmem:[%s16481_s25 + $0x250] sm:$0xff]  ;;  %v1338_v6 = vld [vmem:[%s16481_s25 + $0x258] sm:$0xff]  ;;  %v1343_v8 = vld [vmem:[%s16481_s25 + $0x280] sm:$0xff] }
 0x215   : > { %12109 = vmatmul.mubr.msk.bf16.gmra.mrb[4].mxu0 %vm1463_vm1, %v1392_v14  ;;  %v1428_v7 = vpack.c.bf16 %v1338_v6, %v1337_v5  ;;  %v1344_v9 = vld [vmem:[%s16481_s25 + $0x288] sm:$0xff]  ;;  %v1345_v11 = vld [vmem:[%s16481_s25 + $0x290] sm:$0xff]  ;;  %v1346_v12 = vld [vmem:[%s16481_s25 + $0x298] sm:$0xff] }
 0x216   : > { %1619 = vmatprep.mubr.bf16.mxu0 %v18642_v0  ;;  %12175 = vmatprep.subr.msk.bf16.mxu0 %vm1560_vm0, %v12174_v63  ;;  %v1431_v10 = vpack.c.bf16 %v1344_v9, %v1343_v8  ;;  %v1432_v13 = vpack.c.bf16 %v1346_v12, %v1345_v11  ;;  %v1351_v14 = vld [vmem:[%s16481_s25 + $0x2c0] sm:$0xff]  ;;  %v1352_v15 = vld [vmem:[%s16481_s25 + $0x2c8] sm:$0xff]  ;;  %v1354_v18 = vld [vmem:[%s16481_s25 + $0x2d8] sm:$0xff]  ;;  %s12763_s19 = sshll.u32 (%p18802_p8), %s18803_s1, 6 }
 0x217   : > { %v1435_v16 = vpack.c.bf16 %v1352_v15, %v1351_v14  ;;  %v1360_v21 = vld [vmem:[%s16481_s25 + $0x308] sm:$0xff]  ;;  %v1362_v24 = vld [vmem:[%s16481_s25 + $0x318] sm:$0xff]  ;;  %v1267_v46 = vld [vmem:[%s16481_s25 + $0x20] sm:$0xff]  ;;  %s18535_s24 = scalar_lea.vmem (%p18802_p8), %s18804_s4, %s12763_s19 }
 0x218   : > { %v1368_v27 = vld [vmem:[%s16481_s25 + $0x348] sm:$0xff]  ;;  %v1370_v30 = vld [vmem:[%s16481_s25 + $0x358] sm:$0xff]  ;;  %v1269_v49 = vld [vmem:[%s16481_s25 + $0x30] sm:$0xff] }
 0x219   : > { %v1376_v33 = vld [vmem:[%s16481_s25 + $0x388] sm:$0xff]  ;;  %v1378_v36 = vld [vmem:[%s16481_s25 + $0x398] sm:$0xff]  ;;  %v1275_v52 = vld [vmem:[%s16481_s25 + $0x60] sm:$0xff] }
 0x21a   : > { %v1384_v39 = vld [vmem:[%s16481_s25 + $0x3c8] sm:$0xff]  ;;  %v1386_v42 = vld [vmem:[%s16481_s25 + $0x3d8] sm:$0xff]  ;;  %v1277_v55 = vld [vmem:[%s16481_s25 + $0x70] sm:$0xff] }
 0x21b   : > { %v1283_v58 = vld [vmem:[%s16481_s25 + $0xa0] sm:$0xff]  ;;  %v1285_v61 = vld [vmem:[%s16481_s25 + $0xb0] sm:$0xff]  ;;  %v1292_v2 = vld [vmem:[%s16481_s25 + $0xe8] sm:$0xff] }
 0x21c   : > { %v1294_v5 = vld [vmem:[%s16481_s25 + $0xf8] sm:$0xff]  ;;  %v1300_v8 = vld [vmem:[%s16481_s25 + $0x128] sm:$0xff] }
 0x21d   : > { %12110 = vmatmul.mubr.msk.bf16.gmra.mrb[8].mxu0 %vm1463_vm1, %v1395_v17  ;;  %v1353_v17 = vld [vmem:[%s16481_s25 + $0x2d0] sm:$0xff]  ;;  %v1302_v11 = vld [vmem:[%s16481_s25 + $0x138] sm:$0xff]  ;;  %v1308_v14 = vld [vmem:[%s16481_s25 + $0x168] sm:$0xff] }
 0x21e   : > { %1629 = vmatprep.mubr.bf16.mxu0 %v18642_v0  ;;  %v1436_v19 = vpack.c.bf16 %v1354_v18, %v1353_v17  ;;  %v1310_v17 = vld [vmem:[%s16481_s25 + $0x178] sm:$0xff] }
 0x225   : > { %12111 = vmatmul.mubr.msk.bf16.gmra.mrb[12].mxu0 %vm1463_vm1, %v1396_v20  ;;  %v1359_v20 = vld [vmem:[%s16481_s25 + $0x300] sm:$0xff] }
 0x226   : > { %1639 = vmatprep.mubr.bf16.mxu0 %v18642_v0  ;;  %v1439_v22 = vpack.c.bf16 %v1360_v21, %v1359_v20  ;;  %v1316_v20 = vld [vmem:[%s16481_s25 + $0x1a8] sm:$0xff] }
 0x22d   : > { %12112 = vmatmul.mubr.msk.bf16.gmra.mrb[16].mxu0 %vm1463_vm1, %v1399_v23  ;;  %v1361_v23 = vld [vmem:[%s16481_s25 + $0x310] sm:$0xff] }
 0x22e   : > { %1649 = vmatprep.mubr.bf16.mxu0 %v18642_v0  ;;  %v1440_v25 = vpack.c.bf16 %v1362_v24, %v1361_v23  ;;  %v1318_v23 = vld [vmem:[%s16481_s25 + $0x1b8] sm:$0xff] }
 0x235   : > { %12113 = vmatmul.mubr.msk.bf16.gmra.mrb[20].mxu0 %vm1463_vm1, %v1400_v26  ;;  %v1367_v26 = vld [vmem:[%s16481_s25 + $0x340] sm:$0xff] }
 0x236   : > { %1659 = vmatprep.mubr.bf16.mxu0 %v18642_v0  ;;  %v1443_v28 = vpack.c.bf16 %v1368_v27, %v1367_v26  ;;  %v1324_v26 = vld [vmem:[%s16481_s25 + $0x1e8] sm:$0xff] }
 0x23d   : > { %12114 = vmatmul.mubr.msk.bf16.gmra.mrb[24].mxu0 %vm1463_vm1, %v1403_v29  ;;  %v1369_v29 = vld [vmem:[%s16481_s25 + $0x350] sm:$0xff] }
 0x23e   : > { %1669 = vmatprep.mubr.bf16.mxu0 %v18642_v0  ;;  %v1444_v31 = vpack.c.bf16 %v1370_v30, %v1369_v29  ;;  %v1326_v29 = vld [vmem:[%s16481_s25 + $0x1f8] sm:$0xff] }
 0x245   : > { %12115 = vmatmul.mubr.msk.bf16.gmra.mrb[28].mxu0 %vm1463_vm1, %v1404_v32  ;;  %v1375_v32 = vld [vmem:[%s16481_s25 + $0x380] sm:$0xff] }
 0x246   : > { %1679 = vmatprep.mubr.bf16.mxu0 %v18642_v0  ;;  %v1447_v34 = vpack.c.bf16 %v1376_v33, %v1375_v32  ;;  %v1332_v32 = vld [vmem:[%s16481_s25 + $0x228] sm:$0xff] }
 0x24d   : > { %12116 = vmatmul.mubr.msk.bf16.gmra.mrb[32].mxu0 %vm1463_vm1, %v1407_v35  ;;  %v1377_v35 = vld [vmem:[%s16481_s25 + $0x390] sm:$0xff] }
 0x24e   : > { %1689 = vmatprep.mubr.bf16.mxu0 %v18642_v0  ;;  %v1448_v37 = vpack.c.bf16 %v1378_v36, %v1377_v35  ;;  %v1334_v35 = vld [vmem:[%s16481_s25 + $0x238] sm:$0xff] }
 0x255   : > { %12117 = vmatmul.mubr.msk.bf16.gmra.mrb[36].mxu0 %vm1463_vm1, %v1408_v38  ;;  %v1383_v38 = vld [vmem:[%s16481_s25 + $0x3c0] sm:$0xff] }
 0x256   : > { %1699 = vmatprep.mubr.bf16.mxu0 %v18642_v0  ;;  %v1451_v40 = vpack.c.bf16 %v1384_v39, %v1383_v38  ;;  %v1340_v38 = vld [vmem:[%s16481_s25 + $0x268] sm:$0xff] }
 0x25d   : > { %12118 = vmatmul.mubr.msk.bf16.gmra.mrb[40].mxu0 %vm1463_vm1, %v1411_v41  ;;  %v1385_v41 = vld [vmem:[%s16481_s25 + $0x3d0] sm:$0xff] }
 0x25e   : > { %1709 = vmatprep.mubr.bf16.mxu0 %v18642_v0  ;;  %v1452_v43 = vpack.c.bf16 %v1386_v42, %v1385_v41  ;;  %v1342_v41 = vld [vmem:[%s16481_s25 + $0x278] sm:$0xff] }
 0x265   : > { %12119 = vmatmul.mubr.msk.bf16.gmra.mrb[44].mxu0 %vm1463_vm1, %v1412_v44  ;;  %v12173_v44 = vcombine.low %v16589_v62, %v16589_v62  ;;  %v1286_v62 = vld [vmem:[%s16481_s25 + $0xb8] sm:$0xff] }
 0x266   : > { %1719 = vmatprep.mubr.bf16.mxu0 %v18642_v0  ;;  %v16697_v63 = vpack.c.bf16 %v1286_v62, %v1285_v61  ;;  %v1364_v61 = vld [vmem:[%s16481_s25 + $0x328] sm:$0xff] }
 0x267   : > { %v2391_v45 = vsel %vm1560_vm0, %v12173_v44, 0  ;;  %v1348_v44 = vld [vmem:[%s16481_s25 + $0x2a8] sm:$0xff] }
 0x26d   : > { %12120 = vmatmul.mubr.msk.bf16.gmra.mrb[48].mxu0 %vm1463_vm1, %v1415_v47  ;;  %v1268_v47 = vld [vmem:[%s16481_s25 + $0x28] sm:$0xff] }
 0x26e   : > { %1729 = vmatprep.mubr.bf16.mxu0 %v18642_v0  ;;  %v16662_v48 = vpack.c.bf16 %v1268_v47, %v1267_v46  ;;  %v1349_v46 = vld [vmem:[%s16481_s25 + $0x2b0] sm:$0xff]  ;;  %v1350_v47 = vld [vmem:[%s16481_s25 + $0x2b8] sm:$0xff] }
 0x275   : > { %12121 = vmatmul.mubr.msk.bf16.gmra.mrb[52].mxu0 %vm1463_vm1, %v1416_v50  ;;  %v1270_v50 = vld [vmem:[%s16481_s25 + $0x38] sm:$0xff] }
 0x276   : > { %1739 = vmatprep.mubr.bf16.mxu0 %v18642_v0  ;;  %v16669_v51 = vpack.c.bf16 %v1270_v50, %v1269_v49  ;;  %v16809_v49 = vpack.c.bf16 %v1350_v47, %v1349_v46  ;;  %v1355_v50 = vld [vmem:[%s16481_s25 + $0x2e0] sm:$0xff] }
 0x27d   : > { %12122 = vmatmul.mubr.msk.bf16.gmra.mrb[56].mxu0 %vm1463_vm1, %v1419_v53  ;;  %v1276_v53 = vld [vmem:[%s16481_s25 + $0x68] sm:$0xff] }
 0x27e   : > { %1749 = vmatprep.mubr.bf16.mxu0 %v18642_v0  ;;  %v16676_v54 = vpack.c.bf16 %v1276_v53, %v1275_v52  ;;  %v1356_v52 = vld [vmem:[%s16481_s25 + $0x2e8] sm:$0xff] }
 0x27f   : > { %v16816_v53 = vpack.c.bf16 %v1356_v52, %v1355_v50  ;;  %v1387_v52 = vld [vmem:[%s16481_s25 + $0x3e0] sm:$0xff] }
 0x285   : > { %12123 = vmatmul.mubr.msk.bf16.gmra.mrb[60].mxu0 %vm1463_vm1, %v1420_v56  ;;  %v1278_v56 = vld [vmem:[%s16481_s25 + $0x78] sm:$0xff] }
 0x286   : > { %1759 = vmatprep.mubr.bf16.mxu0 %v18642_v0  ;;  %v16683_v57 = vpack.c.bf16 %v1278_v56, %v1277_v55  ;;  %v1357_v55 = vld [vmem:[%s16481_s25 + $0x2f0] sm:$0xff]  ;;  %v1358_v56 = vld [vmem:[%s16481_s25 + $0x2f8] sm:$0xff] }
 0x28d   : > { %12124 = vmatmul.mubr.msk.bf16.gmra.mrb[64].mxu0 %vm1463_vm1, %v1423_v59  ;;  %v1284_v59 = vld [vmem:[%s16481_s25 + $0xa8] sm:$0xff] }
 0x28e   : > { %1769 = vmatprep.mubr.bf16.mxu0 %v18642_v0  ;;  %v16690_v60 = vpack.c.bf16 %v1284_v59, %v1283_v58  ;;  %v16823_v58 = vpack.c.bf16 %v1358_v56, %v1357_v55  ;;  %v1363_v59 = vld [vmem:[%s16481_s25 + $0x320] sm:$0xff] }
 0x28f   : > { %v16830_v62 = vpack.c.bf16 %v1364_v61, %v1363_v59 }
 0x295   : > { %12125 = vmatmul.mubr.msk.bf16.gmra.mrb[68].mxu0 %vm1463_vm1, %v1424_v1  ;;  %v1291_v1 = vld [vmem:[%s16481_s25 + $0xe0] sm:$0xff] }
 0x296   : > { %1779 = vmatprep.mubr.bf16.mxu0 %v18642_v0  ;;  %v16704_v3 = vpack.c.bf16 %v1292_v2, %v1291_v1  ;;  %v1365_v1 = vld [vmem:[%s16481_s25 + $0x330] sm:$0xff]  ;;  %v1366_v2 = vld [vmem:[%s16481_s25 + $0x338] sm:$0xff] }
 0x29d   : > { %12126 = vmatmul.mubr.msk.bf16.gmra.mrb[72].mxu0 %vm1463_vm1, %v1427_v4  ;;  %v1293_v4 = vld [vmem:[%s16481_s25 + $0xf0] sm:$0xff] }
 0x29e   : > { %1789 = vmatprep.mubr.bf16.mxu0 %v18642_v0  ;;  %v16711_v6 = vpack.c.bf16 %v1294_v5, %v1293_v4  ;;  %v16837_v4 = vpack.c.bf16 %v1366_v2, %v1365_v1  ;;  %v1371_v5 = vld [vmem:[%s16481_s25 + $0x360] sm:$0xff] }
 0x2a5   : > { %12127 = vmatmul.mubr.msk.bf16.gmra.mrb[76].mxu0 %vm1463_vm1, %v1428_v7  ;;  %v1299_v7 = vld [vmem:[%s16481_s25 + $0x120] sm:$0xff] }
 0x2a6   : > { %1799 = vmatprep.mubr.bf16.mxu0 %v18642_v0  ;;  %v16718_v9 = vpack.c.bf16 %v1300_v8, %v1299_v7  ;;  %v1372_v7 = vld [vmem:[%s16481_s25 + $0x368] sm:$0xff] }
 0x2a7   : > { %v16844_v8 = vpack.c.bf16 %v1372_v7, %v1371_v5 }
 0x2ad   : > { %12128 = vmatmul.mubr.msk.bf16.gmra.mrb[80].mxu0 %vm1463_vm1, %v1431_v10  ;;  %v1301_v10 = vld [vmem:[%s16481_s25 + $0x130] sm:$0xff] }
 0x2ae   : > { %1809 = vmatprep.mubr.bf16.mxu0 %v18642_v0  ;;  %v16725_v12 = vpack.c.bf16 %v1302_v11, %v1301_v10  ;;  %v1373_v10 = vld [vmem:[%s16481_s25 + $0x370] sm:$0xff]  ;;  %v1374_v11 = vld [vmem:[%s16481_s25 + $0x378] sm:$0xff] }
 0x2b5   : > { %12129 = vmatmul.mubr.msk.bf16.gmra.mrb[84].mxu0 %vm1463_vm1, %v1432_v13  ;;  %v1307_v13 = vld [vmem:[%s16481_s25 + $0x160] sm:$0xff] }
 0x2b6   : > { %1819 = vmatprep.mubr.bf16.mxu0 %v18642_v0  ;;  %v16732_v15 = vpack.c.bf16 %v1308_v14, %v1307_v13  ;;  %v16851_v13 = vpack.c.bf16 %v1374_v11, %v1373_v10  ;;  %v1379_v14 = vld [vmem:[%s16481_s25 + $0x3a0] sm:$0xff]  ;;  %v1390_v10 = vld [vmem:[%s16481_s25 + $0x3f8] sm:$0xff] }
 0x2bd   : > { %12130 = vmatmul.mubr.msk.bf16.gmra.mrb[88].mxu0 %vm1463_vm1, %v1435_v16  ;;  %v1309_v16 = vld [vmem:[%s16481_s25 + $0x170] sm:$0xff] }
 0x2be   : > { %1829 = vmatprep.mubr.bf16.mxu0 %v18642_v0  ;;  %v16739_v18 = vpack.c.bf16 %v1310_v17, %v1309_v16  ;;  %v1380_v16 = vld [vmem:[%s16481_s25 + $0x3a8] sm:$0xff] }
 0x2bf   : > { %v16858_v17 = vpack.c.bf16 %v1380_v16, %v1379_v14 }
 0x2c5   : > { %12131 = vmatmul.mubr.msk.bf16.gmra.mrb[92].mxu0 %vm1463_vm1, %v1436_v19  ;;  %v1315_v19 = vld [vmem:[%s16481_s25 + $0x1a0] sm:$0xff] }
 0x2c6   : > { %1839 = vmatprep.mubr.bf16.mxu0 %v18642_v0  ;;  %v16746_v21 = vpack.c.bf16 %v1316_v20, %v1315_v19  ;;  %v1381_v19 = vld [vmem:[%s16481_s25 + $0x3b0] sm:$0xff]  ;;  %v1382_v20 = vld [vmem:[%s16481_s25 + $0x3b8] sm:$0xff] }
 0x2cd   : > { %12132 = vmatmul.mubr.msk.bf16.gmra.mrb[96].mxu0 %vm1463_vm1, %v1439_v22  ;;  %v1317_v22 = vld [vmem:[%s16481_s25 + $0x1b0] sm:$0xff] }
 0x2ce   : > { %1849 = vmatprep.mubr.bf16.mxu0 %v18642_v0  ;;  %v16753_v24 = vpack.c.bf16 %v1318_v23, %v1317_v22  ;;  %v16865_v22 = vpack.c.bf16 %v1382_v20, %v1381_v19 }
 0x2d5   : > { %12133 = vmatmul.mubr.msk.bf16.gmra.mrb[100].mxu0 %vm1463_vm1, %v1440_v25  ;;  %v1323_v25 = vld [vmem:[%s16481_s25 + $0x1e0] sm:$0xff] }
 0x2d6   : > { %1859 = vmatprep.mubr.bf16.mxu0 %v18642_v0  ;;  %v16760_v27 = vpack.c.bf16 %v1324_v26, %v1323_v25 }
 0x2dd   : > { %12134 = vmatmul.mubr.msk.bf16.gmra.mrb[104].mxu0 %vm1463_vm1, %v1443_v28  ;;  %v1325_v28 = vld [vmem:[%s16481_s25 + $0x1f0] sm:$0xff] }
 0x2de   : > { %1869 = vmatprep.mubr.bf16.mxu0 %v18642_v0  ;;  %v16767_v30 = vpack.c.bf16 %v1326_v29, %v1325_v28 }
 0x2e5   : > { %12135 = vmatmul.mubr.msk.bf16.gmra.mrb[108].mxu0 %vm1463_vm1, %v1444_v31  ;;  %v1331_v31 = vld [vmem:[%s16481_s25 + $0x220] sm:$0xff] }
 0x2e6   : > { %1879 = vmatprep.mubr.bf16.mxu0 %v18642_v0  ;;  %v16774_v33 = vpack.c.bf16 %v1332_v32, %v1331_v31 }
 0x2ed   : > { %12136 = vmatmul.mubr.msk.bf16.gmra.mrb[112].mxu0 %vm1463_vm1, %v1447_v34  ;;  %v1333_v34 = vld [vmem:[%s16481_s25 + $0x230] sm:$0xff] }
 0x2ee   : > { %1889 = vmatprep.mubr.bf16.mxu0 %v18642_v0  ;;  %v16781_v36 = vpack.c.bf16 %v1334_v35, %v1333_v34 }
 0x2f5   : > { %12137 = vmatmul.mubr.msk.bf16.gmra.mrb[116].mxu0 %vm1463_vm1, %v1448_v37  ;;  %v1339_v37 = vld [vmem:[%s16481_s25 + $0x260] sm:$0xff] }
 0x2f6   : > { %1899 = vmatprep.mubr.bf16.mxu0 %v18642_v0  ;;  %v16788_v39 = vpack.c.bf16 %v1340_v38, %v1339_v37  ;;  %v14646_v38 = vld [vmem:[#allocation7] sm:$0xff]  }
 0x2fd   : > { %12138 = vmatmul.mubr.msk.bf16.gmra.mrb[120].mxu0 %vm1463_vm1, %v1451_v40  ;;  %v1341_v40 = vld [vmem:[%s16481_s25 + $0x270] sm:$0xff] }
 0x2fe   : > { %1909 = vmatprep.mubr.bf16.mxu0 %v18642_v0  ;;  %v16795_v42 = vpack.c.bf16 %v1342_v41, %v1341_v40 }
 0x305   : > { %12139 = vmatmul.mubr.msk.bf16.gmra.mrb[124].mxu0 %vm1463_vm1, %v1452_v43  ;;  %v1347_v43 = vld [vmem:[%s16481_s25 + $0x2a0] sm:$0xff] }
 0x306   : > { %2056 = vmatprep.mubr.bf16.mxu0 %v18642_v0 }
 0x30d   : > { %2057 = vmatmul.mubr.bf16.vlgmr.msra.gmra.mrb[0].mxu0 %v18642_v0 }
 0x30e   : > { %2397 = vmatpush1.bf16.msra.mxu0 %v2391_v45  ;;  %2066 = vmatprep.mubr.bf16.mxu0 %v18642_v0  ;;  %v16802_v45 = vpack.c.bf16 %v1348_v44, %v1347_v43 }
 0x315   : > { %2067 = vmatmul.mubr.bf16.gmra.mrb[4].mxu0 %v18642_v0 }
 0x316   : > { %2076 = vmatprep.mubr.bf16.mxu0 %v18642_v0 }
 0x31d   : > { %12143 = vmatmul.mubr.msk.bf16.gmra.mrb[8].mxu0 %vm1463_vm1, %v16662_v48 }
 0x31e   : > { %2086 = vmatprep.mubr.bf16.mxu0 %v18642_v0 }
 0x325   : > { %12144 = vmatmul.mubr.msk.bf16.gmra.mrb[12].mxu0 %vm1463_vm1, %v16669_v51 }
 0x326   : > { %2096 = vmatprep.mubr.bf16.mxu0 %v18642_v0 }
 0x32d   : > { %12145 = vmatmul.mubr.msk.bf16.gmra.mrb[16].mxu0 %vm1463_vm1, %v16676_v54 }
 0x32e   : > { %2106 = vmatprep.mubr.bf16.mxu0 %v18642_v0 }
 0x335   : > { %12146 = vmatmul.mubr.msk.bf16.gmra.mrb[20].mxu0 %vm1463_vm1, %v16683_v57 }
 0x336   : > { %2116 = vmatprep.mubr.bf16.mxu0 %v18642_v0 }
 0x33d   : > { %12147 = vmatmul.mubr.msk.bf16.gmra.mrb[24].mxu0 %vm1463_vm1, %v16690_v60 }
 0x33e   : > { %2126 = vmatprep.mubr.bf16.mxu0 %v18642_v0 }
 0x345   : > { %12148 = vmatmul.mubr.msk.bf16.gmra.mrb[28].mxu0 %vm1463_vm1, %v16697_v63 }
 0x346   : > { %2136 = vmatprep.mubr.bf16.mxu0 %v18642_v0 }
 0x34d   : > { %12149 = vmatmul.mubr.msk.bf16.gmra.mrb[32].mxu0 %vm1463_vm1, %v16704_v3 }
 0x34e   : > { %2146 = vmatprep.mubr.bf16.mxu0 %v18642_v0 }
 0x355   : > { %12150 = vmatmul.mubr.msk.bf16.gmra.mrb[36].mxu0 %vm1463_vm1, %v16711_v6 }
 0x356   : > { %2156 = vmatprep.mubr.bf16.mxu0 %v18642_v0 }
 0x35d   : > { %12151 = vmatmul.mubr.msk.bf16.gmra.mrb[40].mxu0 %vm1463_vm1, %v16718_v9 }
 0x35e   : > { %2166 = vmatprep.mubr.bf16.mxu0 %v18642_v0 }
 0x365   : > { %12152 = vmatmul.mubr.msk.bf16.gmra.mrb[44].mxu0 %vm1463_vm1, %v16725_v12 }
 0x366   : > { %2176 = vmatprep.mubr.bf16.mxu0 %v18642_v0 }
 0x36d   : > { %12153 = vmatmul.mubr.msk.bf16.gmra.mrb[48].mxu0 %vm1463_vm1, %v16732_v15 }
 0x36e   : > { %2186 = vmatprep.mubr.bf16.mxu0 %v18642_v0 }
 0x375   : > { %12154 = vmatmul.mubr.msk.bf16.gmra.mrb[52].mxu0 %vm1463_vm1, %v16739_v18 }
 0x376   : > { %2196 = vmatprep.mubr.bf16.mxu0 %v18642_v0 }
 0x37d   : > { %12155 = vmatmul.mubr.msk.bf16.gmra.mrb[56].mxu0 %vm1463_vm1, %v16746_v21 }
 0x37e   : > { %2206 = vmatprep.mubr.bf16.mxu0 %v18642_v0 }
 0x385   : > { %12156 = vmatmul.mubr.msk.bf16.gmra.mrb[60].mxu0 %vm1463_vm1, %v16753_v24 }
 0x386   : > { %2216 = vmatprep.mubr.bf16.mxu0 %v18642_v0 }
 0x38d   : > { %12157 = vmatmul.mubr.msk.bf16.gmra.mrb[64].mxu0 %vm1463_vm1, %v16760_v27 }
 0x38e   : > { %2226 = vmatprep.mubr.bf16.mxu0 %v18642_v0 }
 0x395   : > { %12158 = vmatmul.mubr.msk.bf16.gmra.mrb[68].mxu0 %vm1463_vm1, %v16767_v30 }
 0x396   : > { %2236 = vmatprep.mubr.bf16.mxu0 %v18642_v0 }
 0x39d   : > { %12159 = vmatmul.mubr.msk.bf16.gmra.mrb[72].mxu0 %vm1463_vm1, %v16774_v33 }
 0x39e   : > { %2246 = vmatprep.mubr.bf16.mxu0 %v18642_v0 }
 0x3a5   : > { %12160 = vmatmul.mubr.msk.bf16.gmra.mrb[76].mxu0 %vm1463_vm1, %v16781_v36 }
 0x3a6   : > { %2256 = vmatprep.mubr.bf16.mxu0 %v18642_v0 }
 0x3ad   : > { %12161 = vmatmul.mubr.msk.bf16.gmra.mrb[80].mxu0 %vm1463_vm1, %v16788_v39 }
 0x3ae   : > { %2266 = vmatprep.mubr.bf16.mxu0 %v18642_v0 }
 0x3b5   : > { %12162 = vmatmul.mubr.msk.bf16.gmra.mrb[84].mxu0 %vm1463_vm1, %v16795_v42 }
 0x3b6   : > { %2276 = vmatprep.mubr.bf16.mxu0 %v18642_v0 }
 0x3bd   : > { %12163 = vmatmul.mubr.msk.bf16.gmra.mrb[88].mxu0 %vm1463_vm1, %v16802_v45 }
 0x3be   : > { %2286 = vmatprep.mubr.bf16.mxu0 %v18642_v0 }
 0x3c5   : > { %12164 = vmatmul.mubr.msk.bf16.gmra.mrb[92].mxu0 %vm1463_vm1, %v16809_v49 }
 0x3c6   : > { %2296 = vmatprep.mubr.bf16.mxu0 %v18642_v0 }
 0x3cd   : > { %12165 = vmatmul.mubr.msk.bf16.gmra.mrb[96].mxu0 %vm1463_vm1, %v16816_v53 }
 0x3ce   : > { %2306 = vmatprep.mubr.bf16.mxu0 %v18642_v0 }
 0x3d5   : > { %12166 = vmatmul.mubr.msk.bf16.gmra.mrb[100].mxu0 %vm1463_vm1, %v16823_v58 }
 0x3d6   : > { %2316 = vmatprep.mubr.bf16.mxu0 %v18642_v0 }
 0x3dd   : > { %12167 = vmatmul.mubr.msk.bf16.gmra.mrb[104].mxu0 %vm1463_vm1, %v16830_v62 }
 0x3de   : > { %2326 = vmatprep.mubr.bf16.mxu0 %v18642_v0 }
 0x3e5   : > { %12168 = vmatmul.mubr.msk.bf16.gmra.mrb[108].mxu0 %vm1463_vm1, %v16837_v4 }
 0x3e6   : > { %2336 = vmatprep.mubr.bf16.mxu0 %v18642_v0 }
 0x3ed   : > { %12169 = vmatmul.mubr.msk.bf16.gmra.mrb[112].mxu0 %vm1463_vm1, %v16844_v8 }
 0x3ee   : > { %2346 = vmatprep.mubr.bf16.mxu0 %v18642_v0 }
 0x3f5   : > { %12170 = vmatmul.mubr.msk.bf16.gmra.mrb[116].mxu0 %vm1463_vm1, %v16851_v13 }
 0x3f6   : > { %2356 = vmatprep.mubr.bf16.mxu0 %v18642_v0 }
 0x3fd   : > { %12171 = vmatmul.mubr.msk.bf16.gmra.mrb[120].mxu0 %vm1463_vm1, %v16858_v17 }
 0x3fe   : > { %2366 = vmatprep.mubr.bf16.mxu0 %v18642_v0 }
 0x405   : > { %12172 = vmatmul.mubr.msk.bf16.gmra.mrb[124].mxu0 %vm1463_vm1, %v16865_v22 }
 0x406   : > { %2428 = vmatprep.mubr.bf16.mxu0 %v18642_v0 }
 0x40d   : > { %12176 = vmatmul.mubr.msk.bf16.vlgmr.msra.gmra.mrb[0].mxu0 %vm1463_vm1, %v16662_v48  ;;  %v14638_v48 = vld [vmem:[#allocation7 + $0x40] sm:$0xff]  }
 0x40e   : > { %2438 = vmatprep.mubr.bf16.mxu0 %v18642_v0  ;;  %13308 = vmatprep.subr.bf16.mxu1 %v14638_v48 }
 0x40f   : > { %13309 = vmatpush3.bf16.msra.mxu1 %v14638_v48 }
 0x415   : > { %12177 = vmatmul.mubr.msk.bf16.gmra.mrb[4].mxu0 %vm1463_vm1, %v16669_v51  ;;  %v14639_v51 = vld [vmem:[#allocation7 + $0x48] sm:$0xff]  }
 0x416   : > { %2448 = vmatprep.mubr.bf16.mxu0 %v18642_v0  ;;  %13310 = vmatprep.subr.bf16.mxu1 %v14639_v51 }
 0x417   : > { %13311 = vmatpush3.bf16.msra.mxu1 %v14639_v51 }
 0x41d   : > { %12178 = vmatmul.mubr.msk.bf16.gmra.mrb[8].mxu0 %vm1463_vm1, %v16676_v54  ;;  %v14640_v54 = vld [vmem:[#allocation7 + $0x50] sm:$0xff]  }
 0x41e   : > { %2458 = vmatprep.mubr.bf16.mxu0 %v18642_v0  ;;  %13312 = vmatprep.subr.bf16.mxu1 %v14640_v54 }
 0x41f   : > { %13313 = vmatpush3.bf16.msra.mxu1 %v14640_v54 }
 0x425   : > { %12179 = vmatmul.mubr.msk.bf16.gmra.mrb[12].mxu0 %vm1463_vm1, %v16683_v57  ;;  %v14641_v57 = vld [vmem:[#allocation7 + $0x58] sm:$0xff]  }
 0x426   : > { %2468 = vmatprep.mubr.bf16.mxu0 %v18642_v0  ;;  %13314 = vmatprep.subr.bf16.mxu1 %v14641_v57 }
 0x427   : > { %13315 = vmatpush3.bf16.msra.mxu1 %v14641_v57 }
 0x42d   : > { %12180 = vmatmul.mubr.msk.bf16.gmra.mrb[16].mxu0 %vm1463_vm1, %v16690_v60  ;;  %v14642_v60 = vld [vmem:[#allocation7 + $0x60] sm:$0xff]  }
 0x42e   : > { %2478 = vmatprep.mubr.bf16.mxu0 %v18642_v0  ;;  %13316 = vmatprep.subr.bf16.mxu1 %v14642_v60 }
 0x42f   : > { %13317 = vmatpush3.bf16.msra.mxu1 %v14642_v60 }
 0x435   : > { %12181 = vmatmul.mubr.msk.bf16.gmra.mrb[20].mxu0 %vm1463_vm1, %v16697_v63  ;;  %v14643_v63 = vld [vmem:[#allocation7 + $0x68] sm:$0xff]  }
 0x436   : > { %2488 = vmatprep.mubr.bf16.mxu0 %v18642_v0  ;;  %13318 = vmatprep.subr.bf16.mxu1 %v14643_v63 }
 0x437   : > { %13319 = vmatpush3.bf16.msra.mxu1 %v14643_v63 }
 0x43d   : > { %12182 = vmatmul.mubr.msk.bf16.gmra.mrb[24].mxu0 %vm1463_vm1, %v16704_v3  ;;  %v14644_v3 = vld [vmem:[#allocation7 + $0x70] sm:$0xff]  }
 0x43e   : > { %2498 = vmatprep.mubr.bf16.mxu0 %v18642_v0  ;;  %13320 = vmatprep.subr.bf16.mxu1 %v14644_v3 }
 0x43f   : > { %13321 = vmatpush3.bf16.msra.mxu1 %v14644_v3 }
 0x445   : > { %12183 = vmatmul.mubr.msk.bf16.gmra.mrb[28].mxu0 %vm1463_vm1, %v16711_v6  ;;  %v14645_v6 = vld [vmem:[#allocation7 + $0x78] sm:$0xff]  }
 0x446   : > { %2508 = vmatprep.mubr.bf16.mxu0 %v18642_v0  ;;  %13322 = vmatprep.subr.bf16.mxu1 %v14645_v6 }
 0x447   : > { %13323 = vmatpush3.bf16.msra.mxu1 %v14645_v6 }
 0x448   : > { %13388 = vmatprep.subr.bf16.mxu1 %v14646_v38 }
 0x44d   : > { %12184 = vmatmul.mubr.msk.bf16.gmra.mrb[32].mxu0 %vm1463_vm1, %v16718_v9  ;;  %v2879_v9 = vlaneseq }
 0x44e   : > { %2518 = vmatprep.mubr.bf16.mxu0 %v18642_v0 }
 0x455   : > { %12185 = vmatmul.mubr.msk.bf16.gmra.mrb[36].mxu0 %vm1463_vm1, %v16725_v12  ;;  %v16947_v12 = vshrl.u32 %v2879_v9, 7 }
 0x456   : > { %2528 = vmatprep.mubr.bf16.mxu0 %v18642_v0 }
 0x457   : > { %18702 = vst [vmem:[#allocation40_spill] sm:$0xff] %v16947_v12 }
 0x45d   : > { %12186 = vmatmul.mubr.msk.bf16.gmra.mrb[40].mxu0 %vm1463_vm1, %v16732_v15  ;;  %v16951_v15 = vsub.s32 0, %v16947_v12 }
 0x45e   : > { %2538 = vmatprep.mubr.bf16.mxu0 %v18642_v0 }
 0x45f   : > { %18703 = vst [vmem:[#allocation41_spill] sm:$0xff] %v16951_v15 }
 0x465   : > { %12187 = vmatmul.mubr.msk.bf16.gmra.mrb[44].mxu0 %vm1463_vm1, %v16739_v18  ;;  %v16953_v18 = vld [vmem:[#allocation5] sm:$0x3] }
 0x466   : > { %2548 = vmatprep.mubr.bf16.mxu0 %v18642_v0 }
 0x46d   : > { %12188 = vmatmul.mubr.msk.bf16.gmra.mrb[48].mxu0 %vm1463_vm1, %v16746_v21  ;;  %v16959_v21 = vrot.slane %v16953_v18, %v16951_v15 }
 0x46e   : > { %2558 = vmatprep.mubr.bf16.mxu0 %v18642_v0 }
 0x475   : > { %12189 = vmatmul.mubr.msk.bf16.gmra.mrb[52].mxu0 %vm1463_vm1, %v16753_v24 }
 0x476   : > { %2568 = vmatprep.mubr.bf16.mxu0 %v18642_v0 }
 0x47d   : > { %12190 = vmatmul.mubr.msk.bf16.gmra.mrb[56].mxu0 %vm1463_vm1, %v16760_v27 }
 0x47e   : > { %2578 = vmatprep.mubr.bf16.mxu0 %v18642_v0 }
 0x485   : > { %12191 = vmatmul.mubr.msk.bf16.gmra.mrb[60].mxu0 %vm1463_vm1, %v16767_v30 }
 0x486   : > { %2588 = vmatprep.mubr.bf16.mxu0 %v18642_v0 }
 0x48d   : > { %12192 = vmatmul.mubr.msk.bf16.gmra.mrb[64].mxu0 %vm1463_vm1, %v16774_v33 }
 0x48e   : > { %2598 = vmatprep.mubr.bf16.mxu0 %v18642_v0 }
 0x495   : > { %12193 = vmatmul.mubr.msk.bf16.gmra.mrb[68].mxu0 %vm1463_vm1, %v16781_v36 }
 0x496   : > { %2608 = vmatprep.mubr.bf16.mxu0 %v18642_v0 }
 0x49d   : > { %12194 = vmatmul.mubr.msk.bf16.gmra.mrb[72].mxu0 %vm1463_vm1, %v16788_v39 }
 0x49e   : > { %2618 = vmatprep.mubr.bf16.mxu0 %v18642_v0 }
 0x4a5   : > { %12195 = vmatmul.mubr.msk.bf16.gmra.mrb[76].mxu0 %vm1463_vm1, %v16795_v42 }
 0x4a6   : > { %2628 = vmatprep.mubr.bf16.mxu0 %v18642_v0 }
 0x4ad   : > { %12196 = vmatmul.mubr.msk.bf16.gmra.mrb[80].mxu0 %vm1463_vm1, %v16802_v45 }
 0x4ae   : > { %2638 = vmatprep.mubr.bf16.mxu0 %v18642_v0 }
 0x4b5   : > { %12197 = vmatmul.mubr.msk.bf16.gmra.mrb[84].mxu0 %vm1463_vm1, %v16809_v49 }
 0x4b6   : > { %2648 = vmatprep.mubr.bf16.mxu0 %v18642_v0 }
 0x4bd   : > { %12198 = vmatmul.mubr.msk.bf16.gmra.mrb[88].mxu0 %vm1463_vm1, %v16816_v53  ;;  %v1388_v53 = vld [vmem:[%s16481_s25 + $0x3e8] sm:$0xff] }
 0x4be   : > { %2658 = vmatprep.mubr.bf16.mxu0 %v18642_v0  ;;  %v1453_v61 = vpack.c.bf16 %v1388_v53, %v1387_v52  ;;  %v14649_v52 = vld [vmem:[#allocation7 + $0x18] sm:$0xff]  }
 0x4c5   : > { %12199 = vmatmul.mubr.msk.bf16.gmra.mrb[92].mxu0 %vm1463_vm1, %v16823_v58 }
 0x4c6   : > { %2668 = vmatprep.mubr.bf16.mxu0 %v18642_v0 }
 0x4cd   : > { %12200 = vmatmul.mubr.msk.bf16.gmra.mrb[96].mxu0 %vm1463_vm1, %v16830_v62 }
 0x4ce   : > { %2678 = vmatprep.mubr.bf16.mxu0 %v18642_v0 }
 0x4d5   : > { %12201 = vmatmul.mubr.msk.bf16.gmra.mrb[100].mxu0 %vm1463_vm1, %v16837_v4  ;;  %v14647_v4 = vld [vmem:[#allocation7 + $0x8] sm:$0xff]  }
 0x4d6   : > { %2688 = vmatprep.mubr.bf16.mxu0 %v18642_v0 }
 0x4dd   : > { %12202 = vmatmul.mubr.msk.bf16.gmra.mrb[104].mxu0 %vm1463_vm1, %v16844_v8  ;;  %v1389_v8 = vld [vmem:[%s16481_s25 + $0x3f0] sm:$0xff] }
 0x4de   : > { %2698 = vmatprep.mubr.bf16.mxu0 %v18642_v0 }
 0x4e0   : > { %v2430_v23 = vpop.f32.mrb[0].mxu0 }
 0x4e1   : > { %v2889_v24 = vadd.f32 %v16959_v21, %v2430_v23  ;;  %v16963_v25 = vpop.f32.mrb[1].mxu0  ;;  %v14648_v23 = vld [vmem:[#allocation7 + $0x10] sm:$0xff]  }
 0x4e2   : > { %v2434_v26 = vpop.f32.mrb[2].mxu0 }
 0x4e3   : > { %v2891_v27 = vadd.f32 %v16959_v21, %v2434_v26  ;;  %v16966_v28 = vpop.f32.mrb[3].mxu0  ;;  %v3017_v29 = vmax.f32 %v2889_v24, 0.0 }
 0x4e5   : > { %v3018_v30 = vmax.f32 %v2891_v27, 0.0  ;;  %12203 = vmatmul.mubr.msk.bf16.gmra.mrb[108].mxu0 %vm1463_vm1, %v16851_v13 }
 0x4e6   : > { %2708 = vmatprep.mubr.bf16.mxu0 %v18642_v0 }
 0x4e7   : > { %v16971_v31 = vpack.c.bf16 %v3018_v30, %v3017_v29 }
 0x4e8   : > { %v2440_v32 = vpop.f32.mrb[4].mxu0 }
 0x4e9   : > { %v2893_v33 = vadd.f32 %v16959_v21, %v2440_v32  ;;  %v16974_v34 = vpop.f32.mrb[5].mxu0  ;;  %13324 = vmatprep.mubr.bf16.mxu1 %v16971_v31 }
 0x4ea   : > { %v2444_v35 = vpop.f32.mrb[6].mxu0 }
 0x4eb   : > { %v2895_v36 = vadd.f32 %v16959_v21, %v2444_v35  ;;  %v16978_v37 = vpop.f32.mrb[7].mxu0  ;;  %v3019_v39 = vmax.f32 %v2893_v33, 0.0 }
 0x4ed   : > { %v3020_v40 = vmax.f32 %v2895_v36, 0.0  ;;  %12204 = vmatmul.mubr.msk.bf16.gmra.mrb[112].mxu0 %vm1463_vm1, %v16858_v17  ;;  %v1454_v17 = vpack.c.bf16 %v1390_v10, %v1389_v8 }
 0x4ee   : > { %2718 = vmatprep.mubr.bf16.mxu0 %v18642_v0 }
 0x4ef   : > { %v16983_v41 = vpack.c.bf16 %v3020_v40, %v3019_v39 }
 0x4f0   : > { %v2450_v42 = vpop.f32.mrb[8].mxu0 }
 0x4f1   : > { %v2897_v43 = vadd.f32 %v16959_v21, %v2450_v42  ;;  %v16986_v44 = vpop.f32.mrb[9].mxu0  ;;  %13325 = vmatmul.mubr.bf16.vlgmr.msra.gmra.mrb[0].mxu1 %v16983_v41 }
 0x4f2   : > { %v2454_v45 = vpop.f32.mrb[10].mxu0  ;;  %13389 = vmatpush3.bf16.msra.mxu1 %v14646_v38 }
 0x4f3   : > { %v2899_v46 = vadd.f32 %v16959_v21, %v2454_v45  ;;  %v16990_v47 = vpop.f32.mrb[11].mxu0  ;;  %v3021_v49 = vmax.f32 %v2897_v43, 0.0  ;;  %13390 = vmatprep.subr.bf16.mxu1 %v14647_v4 }
 0x4f5   : > { %v3022_v50 = vmax.f32 %v2899_v46, 0.0  ;;  %12205 = vmatmul.mubr.msk.bf16.gmra.mrb[116].mxu0 %vm1463_vm1, %v16865_v22 }
 0x4f6   : > { %2728 = vmatprep.mubr.bf16.mxu0 %v18642_v0  ;;  %13391 = vmatpush3.bf16.msra.mxu1 %v14647_v4 }
 0x4f7   : > { %v16997_v55 = vpack.c.bf16 %v3022_v50, %v3021_v49  ;;  %13392 = vmatprep.subr.bf16.mxu1 %v14648_v23 }
 0x4f8   : > { %v2460_v56 = vpop.f32.mrb[12].mxu0 }
 0x4f9   : > { %v2901_v58 = vadd.f32 %v16959_v21, %v2460_v56  ;;  %v17000_v59 = vpop.f32.mrb[13].mxu0  ;;  %13328 = vmatprep.mubr.bf16.mxu1 %v16997_v55 }
 0x4fa   : > { %v2464_v62 = vpop.f32.mrb[14].mxu0  ;;  %13393 = vmatpush3.bf16.msra.mxu1 %v14648_v23 }
 0x4fb   : > { %v2903_v1 = vadd.f32 %v16959_v21, %v2464_v62  ;;  %v17004_v2 = vpop.f32.mrb[15].mxu0  ;;  %v3023_v5 = vmax.f32 %v2901_v58, 0.0  ;;  %13394 = vmatprep.subr.bf16.mxu1 %v14649_v52 }
 0x4fd   : > { %v3024_v7 = vmax.f32 %v2903_v1, 0.0  ;;  %12206 = vmatmul.mubr.msk.bf16.gmra.mrb[120].mxu0 %vm1463_vm1, %v1453_v61 }
 0x4fe   : > { %2738 = vmatprep.mubr.bf16.mxu0 %v18642_v0  ;;  %13395 = vmatpush3.bf16.msra.mxu1 %v14649_v52 }
 0x4ff   : > { %v17010_v11 = vpack.c.bf16 %v3024_v7, %v3023_v5 }
 0x500   : > { %v2470_v13 = vpop.f32.mrb[16].mxu0 }
 0x501   : > { %v2905_v14 = vadd.f32 %v16959_v21, %v2470_v13  ;;  %v17013_v16 = vpop.f32.mrb[17].mxu0  ;;  %13329 = vmatmul.mubr.bf16.gmra.mrb[4].mxu1 %v17010_v11 }
 0x502   : > { %v2474_v19 = vpop.f32.mrb[18].mxu0 }
 0x503   : > { %v2907_v20 = vadd.f32 %v16959_v21, %v2474_v19  ;;  %v17017_v22 = vpop.f32.mrb[19].mxu0  ;;  %v3025_v48 = vmax.f32 %v2905_v14, 0.0 }
 0x505   : > { %v3026_v51 = vmax.f32 %v2907_v20, 0.0  ;;  %12207 = vmatmul.mubr.msk.bf16.gmra.mrb[124].mxu0 %vm1463_vm1, %v1454_v17 }
 0x507   : > { %v17020_v54 = vpack.c.bf16 %v3026_v51, %v3025_v48 }
 0x508   : > { %v2480_v57 = vpop.f32.mrb[20].mxu0 }
 0x509   : > { %v2909_v60 = vadd.f32 %v16959_v21, %v2480_v57  ;;  %v17023_v63 = vpop.f32.mrb[21].mxu0  ;;  %13332 = vmatprep.mubr.bf16.mxu1 %v17020_v54  ;;  %v14650_v57 = vld [vmem:[#allocation7 + $0x20] sm:$0xff]  }
 0x50a   : > { %v2484_v3 = vpop.f32.mrb[22].mxu0  ;;  %13396 = vmatprep.subr.bf16.mxu1 %v14650_v57 }
 0x50b   : > { %v2911_v6 = vadd.f32 %v16959_v21, %v2484_v3  ;;  %v17027_v9 = vpop.f32.mrb[23].mxu0  ;;  %v3027_v24 = vmax.f32 %v2909_v60, 0.0  ;;  %13397 = vmatpush3.bf16.msra.mxu1 %v14650_v57 }
 0x50d   : > { %v3028_v26 = vmax.f32 %v2911_v6, 0.0 }
 0x50f   : > { %v17029_v27 = vpack.c.bf16 %v3028_v26, %v3027_v24 }
 0x510   : > { %v2490_v29 = vpop.f32.mrb[24].mxu0 }
 0x511   : > { %v2913_v30 = vadd.f32 %v16959_v21, %v2490_v29  ;;  %v17032_v32 = vpop.f32.mrb[25].mxu0  ;;  %13333 = vmatmul.mubr.bf16.gmra.mrb[8].mxu1 %v17029_v27 }
 0x512   : > { %v2494_v33 = vpop.f32.mrb[26].mxu0 }
 0x513   : > { %v2915_v35 = vadd.f32 %v16959_v21, %v2494_v33  ;;  %v17036_v36 = vpop.f32.mrb[27].mxu0  ;;  %v3029_v38 = vmax.f32 %v2913_v30, 0.0 }
 0x514   : > { %18704 = vst [vmem:[#allocation42_spill] sm:$0xff] %v17036_v36 }
 0x515   : > { %v3030_v39 = vmax.f32 %v2915_v35, 0.0 }
 0x517   : > { %v17038_v40 = vpack.c.bf16 %v3030_v39, %v3029_v38 }
 0x518   : > { %v2500_v42 = vpop.f32.mrb[28].mxu0 }
 0x519   : > { %v2917_v43 = vadd.f32 %v16959_v21, %v2500_v42  ;;  %v17041_v45 = vpop.f32.mrb[29].mxu0  ;;  %13336 = vmatprep.mubr.bf16.mxu1 %v17038_v40 }
 0x51a   : > { %v2504_v46 = vpop.f32.mrb[30].mxu0 }
 0x51b   : > { %v2919_v49 = vadd.f32 %v16959_v21, %v2504_v46  ;;  %v17045_v50 = vpop.f32.mrb[31].mxu0  ;;  %v3031_v53 = vmax.f32 %v2917_v43, 0.0 }
 0x51d   : > { %v3032_v56 = vmax.f32 %v2919_v49, 0.0 }
 0x51f   : > { %v17047_v58 = vpack.c.bf16 %v3032_v56, %v3031_v53  ;;  %v14651_v56 = vld [vmem:[#allocation7 + $0x28] sm:$0xff]  }
 0x520   : > { %v2510_v61 = vpop.f32.mrb[32].mxu0  ;;  %13398 = vmatprep.subr.bf16.mxu1 %v14651_v56 }
 0x521   : > { %v2921_v62 = vadd.f32 %v16959_v21, %v2510_v61  ;;  %v17050_v1 = vpop.f32.mrb[33].mxu0  ;;  %13337 = vmatmul.mubr.bf16.gmra.mrb[12].mxu1 %v17047_v58 }
 0x522   : > { %18705 = vst [vmem:[#allocation43_spill] sm:$0xff] %v17050_v1  ;;  %v2514_v4 = vpop.f32.mrb[34].mxu0  ;;  %13399 = vmatpush3.bf16.msra.mxu1 %v14651_v56 }
 0x523   : > { %v2923_v5 = vadd.f32 %v16959_v21, %v2514_v4  ;;  %v17054_v7 = vpop.f32.mrb[35].mxu0  ;;  %v3033_v8 = vmax.f32 %v2921_v62, 0.0 }
 0x524   : > { %18706 = vst [vmem:[#allocation44_spill] sm:$0xff] %v17054_v7 }
 0x525   : > { %v3034_v10 = vmax.f32 %v2923_v5, 0.0 }
 0x527   : > { %v17056_v13 = vpack.c.bf16 %v3034_v10, %v3033_v8 }
 0x528   : > { %v2520_v14 = vpop.f32.mrb[36].mxu0 }
 0x529   : > { %v2925_v17 = vadd.f32 %v16959_v21, %v2520_v14  ;;  %v17059_v19 = vpop.f32.mrb[37].mxu0  ;;  %13340 = vmatprep.mubr.bf16.mxu1 %v17056_v13 }
 0x52a   : > { %18707 = vst [vmem:[#allocation45_spill] sm:$0xff] %v17059_v19  ;;  %v2524_v20 = vpop.f32.mrb[38].mxu0 }
 0x52b   : > { %v2927_v48 = vadd.f32 %v16959_v21, %v2524_v20  ;;  %v17063_v51 = vpop.f32.mrb[39].mxu0  ;;  %v3035_v60 = vmax.f32 %v2925_v17, 0.0 }
 0x52c   : > { %18708 = vst [vmem:[#allocation46_spill] sm:$0xff] %v17063_v51 }
 0x52d   : > { %v3036_v3 = vmax.f32 %v2927_v48, 0.0 }
 0x52f   : > { %v17065_v6 = vpack.c.bf16 %v3036_v3, %v3035_v60 }
 0x530   : > { %v2530_v23 = vpop.f32.mrb[40].mxu0 }
 0x531   : > { %v2929_v24 = vadd.f32 %v16959_v21, %v2530_v23  ;;  %v17068_v26 = vpop.f32.mrb[41].mxu0  ;;  %13341 = vmatmul.mubr.bf16.gmra.mrb[16].mxu1 %v17065_v6 }
 0x532   : > { %18709 = vst [vmem:[#allocation47_spill] sm:$0xff] %v17068_v26  ;;  %v2534_v29 = vpop.f32.mrb[42].mxu0 }
 0x533   : > { %v2931_v30 = vadd.f32 %v16959_v21, %v2534_v29  ;;  %v17072_v33 = vpop.f32.mrb[43].mxu0  ;;  %v3037_v35 = vmax.f32 %v2929_v24, 0.0 }
 0x534   : > { %18710 = vst [vmem:[#allocation48_spill] sm:$0xff] %v17072_v33 }
 0x535   : > { %v3038_v38 = vmax.f32 %v2931_v30, 0.0 }
 0x537   : > { %v17074_v39 = vpack.c.bf16 %v3038_v38, %v3037_v35  ;;  %v14652_v38 = vld [vmem:[#allocation7 + $0x30] sm:$0xff]  }
 0x538   : > { %v2540_v42 = vpop.f32.mrb[44].mxu0  ;;  %13400 = vmatprep.subr.bf16.mxu1 %v14652_v38 }
 0x539   : > { %v2933_v43 = vadd.f32 %v16959_v21, %v2540_v42  ;;  %v17077_v46 = vpop.f32.mrb[45].mxu0  ;;  %13344 = vmatprep.mubr.bf16.mxu1 %v17074_v39  ;;  %13401 = vmatpush3.bf16.msra.mxu1 %v14652_v38 }
 0x53a   : > { %18711 = vst [vmem:[#allocation49_spill] sm:$0xff] %v17077_v46  ;;  %v2544_v49 = vpop.f32.mrb[46].mxu0 }
 0x53b   : > { %v2935_v52 = vadd.f32 %v16959_v21, %v2544_v49  ;;  %v17081_v53 = vpop.f32.mrb[47].mxu0  ;;  %v3039_v61 = vmax.f32 %v2933_v43, 0.0 }
 0x53c   : > { %18712 = vst [vmem:[#allocation50_spill] sm:$0xff] %v17081_v53 }
 0x53d   : > { %v3040_v62 = vmax.f32 %v2935_v52, 0.0 }
 0x53f   : > { %v17083_v4 = vpack.c.bf16 %v3040_v62, %v3039_v61 }
 0x540   : > { %v2550_v5 = vpop.f32.mrb[48].mxu0 }
 0x541   : > { %v2937_v8 = vadd.f32 %v16959_v21, %v2550_v5  ;;  %v17086_v10 = vpop.f32.mrb[49].mxu0  ;;  %13345 = vmatmul.mubr.bf16.gmra.mrb[20].mxu1 %v17083_v4 }
 0x542   : > { %18713 = vst [vmem:[#allocation51_spill] sm:$0xff] %v17086_v10  ;;  %v2554_v14 = vpop.f32.mrb[50].mxu0 }
 0x543   : > { %v2939_v17 = vadd.f32 %v16959_v21, %v2554_v14  ;;  %v17090_v20 = vpop.f32.mrb[51].mxu0  ;;  %v3041_v48 = vmax.f32 %v2937_v8, 0.0 }
 0x544   : > { %18714 = vst [vmem:[#allocation52_spill] sm:$0xff] %v17090_v20 }
 0x545   : > { %v3042_v57 = vmax.f32 %v2939_v17, 0.0 }
 0x547   : > { %v17092_v60 = vpack.c.bf16 %v3042_v57, %v3041_v48 }
 0x548   : > { %v2560_v3 = vpop.f32.mrb[52].mxu0 }
 0x549   : > { %v2941_v23 = vadd.f32 %v16959_v21, %v2560_v3  ;;  %v17095_v24 = vpop.f32.mrb[53].mxu0  ;;  %13348 = vmatprep.mubr.bf16.mxu1 %v17092_v60 }
 0x54a   : > { %18715 = vst [vmem:[#allocation53_spill] sm:$0xff] %v17095_v24  ;;  %v2564_v29 = vpop.f32.mrb[54].mxu0 }
 0x54b   : > { %v2943_v30 = vadd.f32 %v16959_v21, %v2564_v29  ;;  %v17099_v35 = vpop.f32.mrb[55].mxu0  ;;  %v3043_v42 = vmax.f32 %v2941_v23, 0.0 }
 0x54c   : > { %18716 = vst [vmem:[#allocation54_spill] sm:$0xff] %v17099_v35 }
 0x54d   : > { %v3044_v43 = vmax.f32 %v2943_v30, 0.0 }
 0x54f   : > { %v17101_v49 = vpack.c.bf16 %v3044_v43, %v3043_v42  ;;  %v14653_v42 = vld [vmem:[#allocation7 + $0x38] sm:$0xff]  }
 0x550   : > { %v2570_v52 = vpop.f32.mrb[56].mxu0  ;;  %13402 = vmatprep.subr.bf16.mxu1 %v14653_v42 }
 0x551   : > { %v2945_v56 = vadd.f32 %v16959_v21, %v2570_v52  ;;  %v17104_v61 = vpop.f32.mrb[57].mxu0  ;;  %13349 = vmatmul.mubr.bf16.gmra.mrb[24].mxu1 %v17101_v49 }
 0x552   : > { %18717 = vst [vmem:[#allocation55_spill] sm:$0xff] %v17104_v61  ;;  %v2574_v62 = vpop.f32.mrb[58].mxu0  ;;  %13403 = vmatpush3.bf16.msra.mxu1 %v14653_v42 }
 0x553   : > { %v2947_v5 = vadd.f32 %v16959_v21, %v2574_v62  ;;  %v17108_v8 = vpop.f32.mrb[59].mxu0  ;;  %v3045_v14 = vmax.f32 %v2945_v56, 0.0 }
 0x554   : > { %18718 = vst [vmem:[#allocation56_spill] sm:$0xff] %v17108_v8 }
 0x555   : > { %v3046_v17 = vmax.f32 %v2947_v5, 0.0 }
 0x557   : > { %v17110_v48 = vpack.c.bf16 %v3046_v17, %v3045_v14 }
 0x558   : > { %v2580_v57 = vpop.f32.mrb[60].mxu0 }
 0x559   : > { %v2949_v3 = vadd.f32 %v16959_v21, %v2580_v57  ;;  %v17113_v23 = vpop.f32.mrb[61].mxu0  ;;  %13352 = vmatprep.mubr.bf16.mxu1 %v17110_v48 }
 0x55a   : > { %18719 = vst [vmem:[#allocation57_spill] sm:$0xff] %v17113_v23  ;;  %v2584_v29 = vpop.f32.mrb[62].mxu0 }
 0x55b   : > { %v2951_v30 = vadd.f32 %v16959_v21, %v2584_v29  ;;  %v17117_v38 = vpop.f32.mrb[63].mxu0  ;;  %v3047_v43 = vmax.f32 %v2949_v3, 0.0 }
 0x55c   : > { %18720 = vst [vmem:[#allocation58_spill] sm:$0xff] %v17117_v38 }
 0x55d   : > { %v3048_v52 = vmax.f32 %v2951_v30, 0.0 }
 0x55f   : > { %v17119_v56 = vpack.c.bf16 %v3048_v52, %v3047_v43  ;;  %v17134_v52 = vld [vmem:[#allocation7 + $0x80] sm:$0xff]  }
 0x560   : > { %v2590_v62 = vpop.f32.mrb[64].mxu0  ;;  %13468 = vmatprep.subr.bf16.mxu1 %v17134_v52 }
 0x561   : > { %v2953_v5 = vadd.f32 %v16959_v21, %v2590_v62  ;;  %v17122_v14 = vpop.f32.mrb[65].mxu0  ;;  %13353 = vmatmul.mubr.bf16.gmra.mrb[28].mxu1 %v17119_v56 }
 0x562   : > { %18721 = vst [vmem:[#allocation59_spill] sm:$0xff] %v17122_v14  ;;  %v2594_v17 = vpop.f32.mrb[66].mxu0 }
 0x563   : > { %v2955_v57 = vadd.f32 %v16959_v21, %v2594_v17  ;;  %v17126_v29 = vpop.f32.mrb[67].mxu0  ;;  %v3049_v0 = vmax.f32 %v2953_v5, 0.0 }
 0x564   : > { %18722 = vst [vmem:[#allocation60_spill] sm:$0xff] %v17126_v29 }
 0x565   : > { %v3050_v15 = vmax.f32 %v2955_v57, 0.0 }
 0x567   : > { %v17128_v3 = vpack.c.bf16 %v3050_v15, %v3049_v0 }
 0x568   : > { %v2600_v30 = vpop.f32.mrb[68].mxu0 }
 0x569   : > { %v2957_v42 = vadd.f32 %v16959_v21, %v2600_v30  ;;  %v17131_v43 = vpop.f32.mrb[69].mxu0  ;;  %13356 = vmatprep.mubr.bf16.mxu1 %v17128_v3 }
 0x56a   : > { %18723 = vst [vmem:[#allocation61_spill] sm:$0xff] %v17131_v43  ;;  %v2604_v62 = vpop.f32.mrb[70].mxu0 }
 0x56b   : > { %v2959_v14 = vadd.f32 %v16959_v21, %v2604_v62  ;;  %v17137_v8 = vpop.f32.mrb[71].mxu0  ;;  %v3051_v5 = vmax.f32 %v2957_v42, 0.0 }
 0x56c   : > { %18724 = vst [vmem:[#allocation62_spill] sm:$0xff] %v17137_v8 }
 0x56d   : > { %v3052_v17 = vmax.f32 %v2959_v14, 0.0 }
 0x56f   : > { %v17140_v0 = vpack.c.bf16 %v3052_v17, %v3051_v5 }
 0x570   : > { %v2610_v15 = vpop.f32.mrb[72].mxu0 }
 0x571   : > { %v2961_v57 = vadd.f32 %v16959_v21, %v2610_v15  ;;  %v17143_v30 = vpop.f32.mrb[73].mxu0  ;;  %13357 = vmatmul.mubr.bf16.gmra.mrb[32].mxu1 %v17140_v0 }
 0x572   : > { %18725 = vst [vmem:[#allocation63_spill] sm:$0xff] %v17143_v30  ;;  %v2614_v29 = vpop.f32.mrb[74].mxu0 }
 0x573   : > { %v2963_v43 = vadd.f32 %v16959_v21, %v2614_v29  ;;  %v17147_v38 = vpop.f32.mrb[75].mxu0  ;;  %v3053_v62 = vmax.f32 %v2961_v57, 0.0 }
 0x574   : > { %18726 = vst [vmem:[#allocation64_spill] sm:$0xff] %v17147_v38 }
 0x575   : > { %v3054_v8 = vmax.f32 %v2963_v43, 0.0 }
 0x577   : > { %v17149_v61 = vpack.c.bf16 %v3054_v8, %v3053_v62 }
 0x578   : > { %v2620_v42 = vpop.f32.mrb[76].mxu0 }
 0x579   : > { %v2965_v14 = vadd.f32 %v16959_v21, %v2620_v42  ;;  %v17152_v5 = vpop.f32.mrb[77].mxu0  ;;  %13360 = vmatprep.mubr.bf16.mxu1 %v17149_v61 }
 0x57a   : > { %18727 = vst [vmem:[#allocation65_spill] sm:$0xff] %v17152_v5  ;;  %v2624_v17 = vpop.f32.mrb[78].mxu0 }
 0x57b   : > { %v2967_v15 = vadd.f32 %v16959_v21, %v2624_v17  ;;  %v17156_v30 = vpop.f32.mrb[79].mxu0  ;;  %v3055_v23 = vmax.f32 %v2965_v14, 0.0 }
 0x57c   : > { %18728 = vst [vmem:[#allocation66_spill] sm:$0xff] %v17156_v30 }
 0x57d   : > { %v3056_v29 = vmax.f32 %v2967_v15, 0.0 }
 0x57f   : > { %v17158_v20 = vpack.c.bf16 %v3056_v29, %v3055_v23 }
 0x580   : > { %v2630_v57 = vpop.f32.mrb[80].mxu0 }
 0x581   : > { %v2969_v8 = vadd.f32 %v16959_v21, %v2630_v57  ;;  %v17161_v43 = vpop.f32.mrb[81].mxu0  ;;  %13361 = vmatmul.mubr.bf16.gmra.mrb[36].mxu1 %v17158_v20 }
 0x582   : > { %18729 = vst [vmem:[#allocation67_spill] sm:$0xff] %v17161_v43  ;;  %v2634_v62 = vpop.f32.mrb[82].mxu0 }
 0x583   : > { %v2971_v42 = vadd.f32 %v16959_v21, %v2634_v62  ;;  %v17165_v38 = vpop.f32.mrb[83].mxu0  ;;  %v3057_v5 = vmax.f32 %v2969_v8, 0.0 }
 0x584   : > { %18730 = vst [vmem:[#allocation68_spill] sm:$0xff] %v17165_v38 }
 0x585   : > { %v3058_v17 = vmax.f32 %v2971_v42, 0.0 }
 0x587   : > { %v17167_v35 = vpack.c.bf16 %v3058_v17, %v3057_v5 }
 0x588   : > { %v2640_v14 = vpop.f32.mrb[84].mxu0 }
 0x589   : > { %v2973_v23 = vadd.f32 %v16959_v21, %v2640_v14  ;;  %v17170_v15 = vpop.f32.mrb[85].mxu0  ;;  %13364 = vmatprep.mubr.bf16.mxu1 %v17167_v35 }
 0x58a   : > { %18731 = vst [vmem:[#allocation69_spill] sm:$0xff] %v17170_v15  ;;  %v2644_v29 = vpop.f32.mrb[86].mxu0 }
 0x58b   : > { %v2975_v57 = vadd.f32 %v16959_v21, %v2644_v29  ;;  %v17174_v43 = vpop.f32.mrb[87].mxu0  ;;  %v3059_v30 = vmax.f32 %v2973_v23, 0.0 }
 0x58c   : > { %18732 = vst [vmem:[#allocation70_spill] sm:$0xff] %v17174_v43 }
 0x58d   : > { %v3060_v62 = vmax.f32 %v2975_v57, 0.0 }
 0x58f   : > { %v17176_v10 = vpack.c.bf16 %v3060_v62, %v3059_v30 }
 0x590   : > { %v2650_v8 = vpop.f32.mrb[88].mxu0 }
 0x591   : > { %v2977_v5 = vadd.f32 %v16959_v21, %v2650_v8  ;;  %v17179_v42 = vpop.f32.mrb[89].mxu0  ;;  %13365 = vmatmul.mubr.bf16.gmra.mrb[40].mxu1 %v17176_v10 }
 0x592   : > { %18733 = vst [vmem:[#allocation71_spill] sm:$0xff] %v17179_v42  ;;  %v2654_v17 = vpop.f32.mrb[90].mxu0 }
 0x593   : > { %v2979_v14 = vadd.f32 %v16959_v21, %v2654_v17  ;;  %v17183_v38 = vpop.f32.mrb[91].mxu0  ;;  %v3061_v15 = vmax.f32 %v2977_v5, 0.0 }
 0x594   : > { %18734 = vst [vmem:[#allocation72_spill] sm:$0xff] %v17183_v38 }
 0x595   : > { %v3062_v29 = vmax.f32 %v2979_v14, 0.0 }
 0x597   : > { %v17185_v24 = vpack.c.bf16 %v3062_v29, %v3061_v15 }
 0x598   : > { %v2660_v23 = vpop.f32.mrb[92].mxu0 }
 0x599   : > { %v2981_v30 = vadd.f32 %v16959_v21, %v2660_v23  ;;  %v17188_v57 = vpop.f32.mrb[93].mxu0  ;;  %13368 = vmatprep.mubr.bf16.mxu1 %v17185_v24 }
 0x59a   : > { %18735 = vst [vmem:[#allocation73_spill] sm:$0xff] %v17188_v57  ;;  %v2664_v62 = vpop.f32.mrb[94].mxu0 }
 0x59b   : > { %v2983_v8 = vadd.f32 %v16959_v21, %v2664_v62  ;;  %v17192_v42 = vpop.f32.mrb[95].mxu0  ;;  %v3063_v43 = vmax.f32 %v2981_v30, 0.0 }
 0x59c   : > { %18736 = vst [vmem:[#allocation74_spill] sm:$0xff] %v17192_v42 }
 0x59d   : > { %v3064_v17 = vmax.f32 %v2983_v8, 0.0 }
 0x59f   : > { %v17194_v33 = vpack.c.bf16 %v3064_v17, %v3063_v43 }
 0x5a0   : > { %v2670_v5 = vpop.f32.mrb[96].mxu0 }
 0x5a1   : > { %v2985_v15 = vadd.f32 %v16959_v21, %v2670_v5  ;;  %v17197_v14 = vpop.f32.mrb[97].mxu0  ;;  %13369 = vmatmul.mubr.bf16.gmra.mrb[44].mxu1 %v17194_v33 }
 0x5a2   : > { %18737 = vst [vmem:[#allocation75_spill] sm:$0xff] %v17197_v14  ;;  %v2674_v29 = vpop.f32.mrb[98].mxu0 }
 0x5a3   : > { %v2987_v23 = vadd.f32 %v16959_v21, %v2674_v29  ;;  %v17201_v38 = vpop.f32.mrb[99].mxu0  ;;  %v3065_v57 = vmax.f32 %v2985_v15, 0.0 }
 0x5a4   : > { %18738 = vst [vmem:[#allocation76_spill] sm:$0xff] %v17201_v38 }
 0x5a5   : > { %v3066_v62 = vmax.f32 %v2987_v23, 0.0 }
 0x5a7   : > { %v17203_v53 = vpack.c.bf16 %v3066_v62, %v3065_v57 }
 0x5a8   : > { %v2680_v30 = vpop.f32.mrb[100].mxu0 }
 0x5a9   : > { %v2989_v43 = vadd.f32 %v16959_v21, %v2680_v30  ;;  %v17206_v8 = vpop.f32.mrb[101].mxu0  ;;  %13372 = vmatprep.mubr.bf16.mxu1 %v17203_v53 }
 0x5aa   : > { %18739 = vst [vmem:[#allocation77_spill] sm:$0xff] %v17206_v8  ;;  %v2684_v17 = vpop.f32.mrb[102].mxu0 }
 0x5ab   : > { %v2991_v5 = vadd.f32 %v16959_v21, %v2684_v17  ;;  %v17210_v14 = vpop.f32.mrb[103].mxu0  ;;  %v3067_v42 = vmax.f32 %v2989_v43, 0.0 }
 0x5ac   : > { %18740 = vst [vmem:[#allocation78_spill] sm:$0xff] %v17210_v14 }
 0x5ad   : > { %v3068_v29 = vmax.f32 %v2991_v5, 0.0 }
 0x5af   : > { %v17212_v26 = vpack.c.bf16 %v3068_v29, %v3067_v42 }
 0x5b0   : > { %v2690_v15 = vpop.f32.mrb[104].mxu0 }
 0x5b1   : > { %v2993_v57 = vadd.f32 %v16959_v21, %v2690_v15  ;;  %v17215_v23 = vpop.f32.mrb[105].mxu0  ;;  %13373 = vmatmul.mubr.bf16.gmra.mrb[48].mxu1 %v17212_v26 }
 0x5b2   : > { %18741 = vst [vmem:[#allocation79_spill] sm:$0xff] %v17215_v23  ;;  %v2694_v62 = vpop.f32.mrb[106].mxu0 }
 0x5b3   : > { %v2995_v30 = vadd.f32 %v16959_v21, %v2694_v62  ;;  %v17219_v38 = vpop.f32.mrb[107].mxu0  ;;  %v3069_v8 = vmax.f32 %v2993_v57, 0.0 }
 0x5b4   : > { %18742 = vst [vmem:[#allocation80_spill] sm:$0xff] %v17219_v38 }
 0x5b5   : > { %v3070_v17 = vmax.f32 %v2995_v30, 0.0 }
 0x5b7   : > { %v17221_v46 = vpack.c.bf16 %v3070_v17, %v3069_v8 }
 0x5b8   : > { %v2700_v43 = vpop.f32.mrb[108].mxu0 }
 0x5b9   : > { %v2997_v42 = vadd.f32 %v16959_v21, %v2700_v43  ;;  %v17224_v5 = vpop.f32.mrb[109].mxu0  ;;  %13376 = vmatprep.mubr.bf16.mxu1 %v17221_v46 }
 0x5ba   : > { %18743 = vst [vmem:[#allocation81_spill] sm:$0xff] %v17224_v5  ;;  %v2704_v29 = vpop.f32.mrb[110].mxu0 }
 0x5bb   : > { %v2999_v15 = vadd.f32 %v16959_v21, %v2704_v29  ;;  %v17228_v23 = vpop.f32.mrb[111].mxu0  ;;  %v3071_v14 = vmax.f32 %v2997_v42, 0.0 }
 0x5bc   : > { %18744 = vst [vmem:[#allocation82_spill] sm:$0xff] %v17228_v23 }
 0x5bd   : > { %v3072_v62 = vmax.f32 %v2999_v15, 0.0 }
 0x5bf   : > { %v17230_v7 = vpack.c.bf16 %v3072_v62, %v3071_v14 }
 0x5c0   : > { %v2710_v57 = vpop.f32.mrb[112].mxu0 }
 0x5c1   : > { %v3001_v8 = vadd.f32 %v16959_v21, %v2710_v57  ;;  %v17233_v30 = vpop.f32.mrb[113].mxu0  ;;  %13377 = vmatmul.mubr.bf16.gmra.mrb[52].mxu1 %v17230_v7 }
 0x5c2   : > { %18745 = vst [vmem:[#allocation83_spill] sm:$0xff] %v17233_v30  ;;  %v2714_v17 = vpop.f32.mrb[114].mxu0 }
 0x5c3   : > { %v3003_v43 = vadd.f32 %v16959_v21, %v2714_v17  ;;  %v17237_v38 = vpop.f32.mrb[115].mxu0  ;;  %v3073_v5 = vmax.f32 %v3001_v8, 0.0 }
 0x5c4   : > { %18746 = vst [vmem:[#allocation84_spill] sm:$0xff] %v17237_v38 }
 0x5c5   : > { %v3074_v29 = vmax.f32 %v3003_v43, 0.0 }
 0x5c7   : > { %v17239_v51 = vpack.c.bf16 %v3074_v29, %v3073_v5 }
 0x5c8   : > { %v2720_v42 = vpop.f32.mrb[116].mxu0 }
 0x5c9   : > { %v3005_v14 = vadd.f32 %v16959_v21, %v2720_v42  ;;  %v17242_v15 = vpop.f32.mrb[117].mxu0  ;;  %13380 = vmatprep.mubr.bf16.mxu1 %v17239_v51 }
 0x5ca   : > { %18747 = vst [vmem:[#allocation85_spill] sm:$0xff] %v17242_v15  ;;  %v2724_v62 = vpop.f32.mrb[118].mxu0 }
 0x5cb   : > { %v3007_v57 = vadd.f32 %v16959_v21, %v2724_v62  ;;  %v17246_v30 = vpop.f32.mrb[119].mxu0  ;;  %v3075_v23 = vmax.f32 %v3005_v14, 0.0 }
 0x5cc   : > { %18748 = vst [vmem:[#allocation86_spill] sm:$0xff] %v17246_v30 }
 0x5cd   : > { %v3076_v17 = vmax.f32 %v3007_v57, 0.0 }
 0x5cf   : > { %v17248_v1 = vpack.c.bf16 %v3076_v17, %v3075_v23 }
 0x5d0   : > { %v2730_v8 = vpop.f32.mrb[120].mxu0 }
 0x5d1   : > { %v3009_v5 = vadd.f32 %v16959_v21, %v2730_v8  ;;  %v17251_v43 = vpop.f32.mrb[121].mxu0  ;;  %13381 = vmatmul.mubr.bf16.gmra.mrb[56].mxu1 %v17248_v1 }
 0x5d2   : > { %18749 = vst [vmem:[#allocation87_spill] sm:$0xff] %v17251_v43  ;;  %v2734_v29 = vpop.f32.mrb[122].mxu0 }
 0x5d3   : > { %v3011_v42 = vadd.f32 %v16959_v21, %v2734_v29  ;;  %v17255_v38 = vpop.f32.mrb[123].mxu0  ;;  %v3077_v15 = vmax.f32 %v3009_v5, 0.0  ;;  %v14655_v5 = vld [vmem:[#allocation7 + $0x88] sm:$0xff]  }
 0x5d5   : > { %v3078_v62 = vmax.f32 %v3011_v42, 0.0  ;;  %v14656_v42 = vld [vmem:[#allocation7 + $0x90] sm:$0xff]  }
 0x5d7   : > { %v17257_v19 = vpack.c.bf16 %v3078_v62, %v3077_v15  ;;  %v18750_v15 = vmov 0   ;;  %v14659_v62 = vld [vmem:[#allocation7 + $0xa8] sm:$0xff]  }
 0x5d8   : > { %v2740_v14 = vpop.f32.mrb[124].mxu0 }
 0x5d9   : > { %v3013_v23 = vadd.f32 %v16959_v21, %v2740_v14  ;;  %v17260_v57 = vpop.f32.mrb[125].mxu0  ;;  %13384 = vmatprep.mubr.bf16.mxu1 %v17257_v19  ;;  %v14662_v14 = vld [vmem:[#allocation10 + $0x80] ss:$8 sps:$4 sm:$0xff]  }
 0x5da   : > { %v2744_v17 = vpop.f32.mrb[126].mxu0 }
 0x5db   : > { %v3015_v8 = vadd.f32 %v16959_v21, %v2744_v17  ;;  %v17264_v43 = vpop.f32.mrb[127].mxu0  ;;  %v3079_v30 = vmax.f32 %v3013_v23, 0.0  ;;  %v14657_v21 = vld [vmem:[#allocation7 + $0x98] sm:$0xff]  }
 0x5dc   : > { %v14667_v23 = vld [vmem:[#allocation10 + $0x94] ss:$8 sps:$4 sm:$0xff]   ;;  %v14665_v17 = vld [vmem:[#allocation10 + $0x90] ss:$8 sps:$4 sm:$0xff]  }
 0x5dd   : > { %v3080_v29 = vmax.f32 %v3015_v8, 0.0  ;;  %v14670_v8 = vld [vmem:[#allocation10 + $0xa4] ss:$8 sps:$4 sm:$0xff]  }
 0x5df   : > { %v17266_v36 = vpack.c.bf16 %v3080_v29, %v3079_v30  ;;  %v14658_v30 = vld [vmem:[#allocation7 + $0xa0] sm:$0xff]  }
 0x5e0   : > { %v14668_v29 = vld [vmem:[#allocation10 + $0xa0] ss:$8 sps:$4 sm:$0xff]  }
 0x5e1   : > { %13385 = vmatmul.mubr.bf16.gmra.mrb[60].mxu1 %v17266_v36 }
 0x5e2   : > { %13404 = vmatprep.mubr.bf16.mxu1 %v18750_v15 }
 0x5e9   : > { %13405 = vmatmul.mubr.bf16.vlgmr.msra.gmra.mrb[0].mxu1 %v18750_v15 }
 0x5ea   : > { %13408 = vmatprep.mubr.bf16.mxu1 %v16971_v31  ;;  %13469 = vmatpush3.bf16.msra.mxu1 %v17134_v52  ;;  %v14660_v31 = vld [vmem:[#allocation7 + $0xb0] sm:$0xff]   ;;  %v14661_v52 = vld [vmem:[#allocation7 + $0xb8] sm:$0xff]  }
 0x5eb   : > { %13470 = vmatprep.subr.bf16.mxu1 %v14655_v5 }
 0x5ee   : > { %13471 = vmatpush3.bf16.msra.mxu1 %v14655_v5  ;;  %v14673_v5 = vld [vmem:[#allocation10 + $0xb4] ss:$8 sps:$4 sm:$0xff]  }
 0x5ef   : > { %13472 = vmatprep.subr.bf16.mxu1 %v14656_v42 }
 0x5f1   : > { %13409 = vmatmul.mubr.bf16.gmra.mrb[4].mxu1 %v16983_v41  ;;  %v14664_v41 = vld [vmem:[#allocation10 + $0x84] ss:$8 sps:$4 sm:$0xff]  }
 0x5f2   : > { %13412 = vmatprep.mubr.bf16.mxu1 %v16997_v55  ;;  %13473 = vmatpush3.bf16.msra.mxu1 %v14656_v42  ;;  %v14676_v42 = vld [vmem:[#allocation10 + $0xc4] ss:$8 sps:$4 sm:$0xff]  }
 0x5f3   : > { %13474 = vmatprep.subr.bf16.mxu1 %v14657_v21 }
 0x5f6   : > { %13475 = vmatpush3.bf16.msra.mxu1 %v14657_v21  ;;  %v14677_v21 = vld [vmem:[#allocation10 + $0xd0] ss:$8 sps:$4 sm:$0xff]  }
 0x5f7   : > { %13476 = vmatprep.subr.bf16.mxu1 %v14658_v30 }
 0x5f9   : > { %13413 = vmatmul.mubr.bf16.gmra.mrb[8].mxu1 %v17010_v11 }
 0x5fa   : > { %13416 = vmatprep.mubr.bf16.mxu1 %v17020_v54  ;;  %13477 = vmatpush3.bf16.msra.mxu1 %v14658_v30  ;;  %v14682_v30 = vld [vmem:[#allocation10 + $0xe4] ss:$8 sps:$4 sm:$0xff]  }
 0x5fb   : > { %13478 = vmatprep.subr.bf16.mxu1 %v14659_v62 }
 0x5fe   : > { %13479 = vmatpush3.bf16.msra.mxu1 %v14659_v62  ;;  %v14683_v62 = vld [vmem:[#allocation10 + $0xf0] ss:$8 sps:$4 sm:$0xff]  }
 0x5ff   : > { %13480 = vmatprep.subr.bf16.mxu1 %v14660_v31 }
 0x601   : > { %13417 = vmatmul.mubr.bf16.gmra.mrb[12].mxu1 %v17029_v27 }
 0x602   : > { %13420 = vmatprep.mubr.bf16.mxu1 %v17038_v40  ;;  %13481 = vmatpush3.bf16.msra.mxu1 %v14660_v31 }
 0x603   : > { %13482 = vmatprep.subr.bf16.mxu1 %v14661_v52 }
 0x606   : > { %13483 = vmatpush3.bf16.msra.mxu1 %v14661_v52 }
 0x607   : > { %4646 = vmatprep.subr.bf16.mxu1 %v14664_v41 }
 0x609   : > { %13421 = vmatmul.mubr.bf16.gmra.mrb[16].mxu1 %v17047_v58 }
 0x60a   : > { %13424 = vmatprep.mubr.bf16.mxu1 %v17056_v13 }
 0x611   : > { %13425 = vmatmul.mubr.bf16.gmra.mrb[20].mxu1 %v17065_v6 }
 0x612   : > { %13428 = vmatprep.mubr.bf16.mxu1 %v17074_v39 }
 0x619   : > { %13429 = vmatmul.mubr.bf16.gmra.mrb[24].mxu1 %v17083_v4 }
 0x61a   : > { %13432 = vmatprep.mubr.bf16.mxu1 %v17092_v60 }
 0x621   : > { %13433 = vmatmul.mubr.bf16.gmra.mrb[28].mxu1 %v17101_v49 }
 0x622   : > { %13436 = vmatprep.mubr.bf16.mxu1 %v17110_v48 }
 0x629   : > { %13437 = vmatmul.mubr.bf16.gmra.mrb[32].mxu1 %v17119_v56 }
 0x62a   : > { %13440 = vmatprep.mubr.bf16.mxu1 %v17128_v3 }
 0x631   : > { %13441 = vmatmul.mubr.bf16.gmra.mrb[36].mxu1 %v17140_v0 }
 0x632   : > { %13444 = vmatprep.mubr.bf16.mxu1 %v17149_v61 }
 0x639   : > { %13445 = vmatmul.mubr.bf16.gmra.mrb[40].mxu1 %v17158_v20 }
 0x63a   : > { %13448 = vmatprep.mubr.bf16.mxu1 %v17167_v35 }
 0x641   : > { %13449 = vmatmul.mubr.bf16.gmra.mrb[44].mxu1 %v17176_v10 }
 0x642   : > { %13452 = vmatprep.mubr.bf16.mxu1 %v17185_v24 }
 0x649   : > { %13453 = vmatmul.mubr.bf16.gmra.mrb[48].mxu1 %v17194_v33 }
 0x64a   : > { %13456 = vmatprep.mubr.bf16.mxu1 %v17203_v53 }
 0x651   : > { %13457 = vmatmul.mubr.bf16.gmra.mrb[52].mxu1 %v17212_v26 }
 0x652   : > { %13460 = vmatprep.mubr.bf16.mxu1 %v17221_v46 }
 0x659   : > { %13461 = vmatmul.mubr.bf16.gmra.mrb[56].mxu1 %v17230_v7 }
 0x65a   : > { %13464 = vmatprep.mubr.bf16.mxu1 %v17239_v51 }
 0x661   : > { %13465 = vmatmul.mubr.bf16.gmra.mrb[60].mxu1 %v17248_v1 }
 0x662   : > { %13484 = vmatprep.mubr.bf16.mxu1 %v16997_v55  ;;  %v14671_v55 = vld [vmem:[#allocation10 + $0xb0] ss:$8 sps:$4 sm:$0xff]  }
 0x669   : > { %13485 = vmatmul.mubr.bf16.vlgmr.msra.gmra.mrb[0].mxu1 %v17010_v11  ;;  %v14674_v11 = vld [vmem:[#allocation10 + $0xc0] ss:$8 sps:$4 sm:$0xff]  }
 0x66a   : > { %13488 = vmatprep.mubr.bf16.mxu1 %v17020_v54  ;;  %4647 = vmatpush1.bf16.msra.mxu1 %v14662_v14  ;;  %v14679_v54 = vld [vmem:[#allocation10 + $0xd4] ss:$8 sps:$4 sm:$0xff]  }
 0x66b   : > { %4648 = vmatprep.subr.bf16.mxu1 %v14667_v23 }
 0x66e   : > { %4649 = vmatpush1.bf16.msra.mxu1 %v14665_v17 }
 0x66f   : > { %4650 = vmatprep.subr.bf16.mxu1 %v14670_v8 }
 0x671   : > { %13489 = vmatmul.mubr.bf16.gmra.mrb[4].mxu1 %v17029_v27  ;;  %v14680_v27 = vld [vmem:[#allocation10 + $0xe0] ss:$8 sps:$4 sm:$0xff]  }
 0x672   : > { %13492 = vmatprep.mubr.bf16.mxu1 %v17038_v40  ;;  %4651 = vmatpush1.bf16.msra.mxu1 %v14668_v29  ;;  %v14685_v40 = vld [vmem:[#allocation10 + $0xf4] ss:$8 sps:$4 sm:$0xff]   ;;  %v14686_v29 = vld [vmem:[#allocation10] ss:$8 sps:$4 sm:$0xff]  }
 0x673   : > { %4652 = vmatprep.subr.bf16.mxu1 %v14673_v5 }
 0x676   : > { %4653 = vmatpush1.bf16.msra.mxu1 %v14671_v55 }
 0x677   : > { %4654 = vmatprep.subr.bf16.mxu1 %v14676_v42 }
 0x679   : > { %13493 = vmatmul.mubr.bf16.gmra.mrb[8].mxu1 %v17047_v58  ;;  %v14688_v58 = vld [vmem:[#allocation10 + $0x4] ss:$8 sps:$4 sm:$0xff]  }
 0x67a   : > { %13496 = vmatprep.mubr.bf16.mxu1 %v17056_v13  ;;  %4655 = vmatpush1.bf16.msra.mxu1 %v14674_v11  ;;  %v17336_v13 = vsub.s32 1, %v16947_v12 }
 0x67b   : > { %4656 = vmatprep.subr.bf16.mxu1 %v14679_v54 }
 0x67e   : > { %4657 = vmatpush1.bf16.msra.mxu1 %v14677_v21  ;;  %v14691_v21 = vld [vmem:[#allocation10 + $0x14] ss:$8 sps:$4 sm:$0xff]  }
 0x67f   : > { %4658 = vmatprep.subr.bf16.mxu1 %v14682_v30 }
 0x681   : > { %13497 = vmatmul.mubr.bf16.gmra.mrb[12].mxu1 %v17065_v6 }
 0x682   : > { %13500 = vmatprep.mubr.bf16.mxu1 %v17074_v39  ;;  %4659 = vmatpush1.bf16.msra.mxu1 %v14680_v27 }
 0x683   : > { %4660 = vmatprep.subr.bf16.mxu1 %v14685_v40 }
 0x686   : > { %4661 = vmatpush1.bf16.msra.mxu1 %v14683_v62 }
 0x687   : > { %4919 = vmatprep.subr.bf16.mxu1 %v14688_v58 }
 0x689   : > { %13501 = vmatmul.mubr.bf16.gmra.mrb[16].mxu1 %v17083_v4 }
 0x68a   : > { %13504 = vmatprep.mubr.bf16.mxu1 %v17092_v60 }
 0x691   : > { %13505 = vmatmul.mubr.bf16.gmra.mrb[20].mxu1 %v17101_v49 }
 0x692   : > { %13508 = vmatprep.mubr.bf16.mxu1 %v17110_v48 }
 0x699   : > { %13509 = vmatmul.mubr.bf16.gmra.mrb[24].mxu1 %v17119_v56 }
 0x69a   : > { %13512 = vmatprep.mubr.bf16.mxu1 %v17128_v3 }
 0x6a1   : > { %13513 = vmatmul.mubr.bf16.gmra.mrb[28].mxu1 %v17140_v0 }
 0x6a2   : > { %13516 = vmatprep.mubr.bf16.mxu1 %v17149_v61 }
 0x6a9   : > { %13517 = vmatmul.mubr.bf16.gmra.mrb[32].mxu1 %v17158_v20 }
 0x6aa   : > { %13520 = vmatprep.mubr.bf16.mxu1 %v17167_v35 }
 0x6b1   : > { %13521 = vmatmul.mubr.bf16.gmra.mrb[36].mxu1 %v17176_v10 }
 0x6b2   : > { %13524 = vmatprep.mubr.bf16.mxu1 %v17185_v24 }
 0x6b9   : > { %13525 = vmatmul.mubr.bf16.gmra.mrb[40].mxu1 %v17194_v33 }
 0x6ba   : > { %13528 = vmatprep.mubr.bf16.mxu1 %v17203_v53 }
 0x6c1   : > { %13529 = vmatmul.mubr.bf16.gmra.mrb[44].mxu1 %v17212_v26 }
 0x6c2   : > { %13532 = vmatprep.mubr.bf16.mxu1 %v17221_v46 }
 0x6c9   : > { %13533 = vmatmul.mubr.bf16.gmra.mrb[48].mxu1 %v17230_v7  ;;  %v17338_v7 = vld [vmem:[#allocation8] ss:$0 sm:$0xff] }
 0x6ca   : > { %13536 = vmatprep.mubr.bf16.mxu1 %v17239_v51  ;;  %v17342_v51 = vrot.slane %v16953_v18, %v17336_v13 }
 0x6cc   : > { %v2894_v33 = vadd.f32 %v17342_v51, %v16974_v34  ;;  %v2890_v4 = vadd.f32 %v17342_v51, %v16963_v25  ;;  %v2896_v20 = vadd.f32 %v17342_v51, %v16978_v37  ;;  %v2892_v35 = vadd.f32 %v17342_v51, %v16966_v28 }
 0x6cd   : > { %v2902_v23 = vadd.f32 %v17342_v51, %v17000_v59  ;;  %v2898_v55 = vadd.f32 %v17342_v51, %v16986_v44  ;;  %v2904_v30 = vadd.f32 %v17342_v51, %v17004_v2  ;;  %v2900_v59 = vadd.f32 %v17342_v51, %v16990_v47  ;;  %v14689_v44 = vld [vmem:[#allocation10 + $0x10] ss:$8 sps:$4 sm:$0xff]  }
 0x6d1   : > { %13537 = vmatmul.mubr.bf16.gmra.mrb[52].mxu1 %v17248_v1 }
 0x6d2   : > { %13540 = vmatprep.mubr.bf16.mxu1 %v17257_v19 }
 0x6d9   : > { %13541 = vmatmul.mubr.bf16.gmra.mrb[56].mxu1 %v17266_v36 }
 0x6da   : > { %13544 = vmatprep.mubr.bf16.mxu1 %v18750_v15 }
 0x6e1   : > { %13545 = vmatmul.mubr.bf16.gmra.mrb[60].mxu1 %v18750_v15 }
 0x6e2   : > { %4678 = vmatprep.mubr.bf16.mxu1 %v18750_v15 }
 0x73c   : > { %v13486_v1 = vpop.f32.mrb[0].mxu1 }
 0x73d   : > { %v4247_v19 = vadd.f32 %v13486_v1, %v17338_v7  ;;  %v3919_v6 = vpop.f32.mrb[1].mxu1 }
 0x73e   : > { %v4245_v36 = vadd.f32 %v17338_v7, %v3919_v6  ;;  %v13487_v26 = vpop.f32.mrb[2].mxu1 }
 0x73f   : > { %v4311_v39 = vmax.f32 %v4247_v19, 0.0  ;;  %v4248_v46 = vadd.f32 %v13487_v26, %v17338_v7  ;;  %v3922_v53 = vpop.f32.mrb[3].mxu1 }
 0x740   : > { %v4309_v10 = vmax.f32 %v4245_v36, 0.0  ;;  %v4246_v18 = vadd.f32 %v17338_v7, %v3922_v53  ;;  %v14694_v36 = vld [vmem:[#allocation10 + $0x24] ss:$8 sps:$4 sm:$0xff]  }
 0x741   : > { %v4375_v60 = vadd.f32 %v4311_v39, %v2894_v33  ;;  %v4312_v24 = vmax.f32 %v4248_v46, 0.0 }
 0x742   : > { %v4373_v49 = vadd.f32 %v4309_v10, %v2890_v4  ;;  %v4310_v34 = vmax.f32 %v4246_v18, 0.0  ;;  %v2910_v10 = vadd.f32 %v17342_v51, %v17023_v63  ;;  %v2912_v63 = vadd.f32 %v17342_v51, %v17027_v9 }
 0x743   : > { %v4376_v61 = vadd.f32 %v4312_v24, %v2896_v20  ;;  %v4439_v3 = vmax.f32 %v4375_v60, 0.0  ;;  %v14692_v24 = vld [vmem:[#allocation10 + $0x20] ss:$8 sps:$4 sm:$0xff]  }
 0x744   : > { %v4374_v48 = vadd.f32 %v4310_v34, %v2892_v35  ;;  %v13490_v56 = vpop.f32.mrb[4].mxu1  ;;  %v4437_v52 = vmax.f32 %v4373_v49, 0.0  ;;  %v2906_v49 = vadd.f32 %v17342_v51, %v17013_v16  ;;  %v14695_v16 = vld [vmem:[#allocation10 + $0x30] ss:$8 sps:$4 sm:$0xff]  }
 0x745   : > { %v4440_v0 = vmax.f32 %v4376_v61, 0.0  ;;  %v4251_v25 = vadd.f32 %v13490_v56, %v17338_v7  ;;  %v3935_v31 = vpop.f32.mrb[5].mxu1 }
 0x746   : > { %v4438_v41 = vmax.f32 %v4374_v48, 0.0  ;;  %v4249_v14 = vadd.f32 %v17338_v7, %v3935_v31  ;;  %v13491_v37 = vpop.f32.mrb[6].mxu1  ;;  %v14697_v48 = vld [vmem:[#allocation10 + $0x34] ss:$8 sps:$4 sm:$0xff]  }
 0x747   : > { %v4315_v17 = vmax.f32 %v4251_v25, 0.0  ;;  %v4252_v28 = vadd.f32 %v13491_v37, %v17338_v7  ;;  %v3938_v8 = vpop.f32.mrb[7].mxu1  ;;  %v4502_v5 = vpack.c.bf16 %v4440_v0, %v4439_v3  ;;  %v2908_v25 = vadd.f32 %v17342_v51, %v17017_v22 }
 0x748   : > { %v4501_v42 = vpack.c.bf16 %v4438_v41, %v4437_v52  ;;  %v4313_v11 = vmax.f32 %v4249_v14, 0.0  ;;  %v4250_v54 = vadd.f32 %v17338_v7, %v3938_v8 }
 0x749   : > { %v4379_v27 = vadd.f32 %v4315_v17, %v2902_v23  ;;  %v4316_v40 = vmax.f32 %v4252_v28, 0.0  ;;  %v14700_v23 = vld [vmem:[#allocation10 + $0x44] ss:$8 sps:$4 sm:$0xff]  }
 0x74a   : > { %v4377_v62 = vadd.f32 %v4313_v11, %v2898_v55  ;;  %v4314_v58 = vmax.f32 %v4250_v54, 0.0  ;;  %4679 = vmatmul.mubr.bf16.vlgmr.msra.gmra.mrb[64].mxu1 %v4501_v42 }
 0x74b   : > { %v4380_v1 = vadd.f32 %v4316_v40, %v2904_v30  ;;  %4920 = vmatpush1.bf16.msra.mxu1 %v14686_v29  ;;  %4688 = vmatprep.mubr.bf16.mxu1 %v18750_v15  ;;  %v4443_v26 = vmax.f32 %v4379_v27, 0.0  ;;  %v14698_v27 = vld [vmem:[#allocation10 + $0x40] ss:$8 sps:$4 sm:$0xff]   ;;  %v2914_v40 = vadd.f32 %v17342_v51, %v17032_v32  ;;  %v14701_v32 = vld [vmem:[#allocation10 + $0x50] ss:$8 sps:$4 sm:$0xff]  }
 0x74c   : > { %v4378_v19 = vadd.f32 %v4314_v58, %v2900_v59  ;;  %v13494_v6 = vpop.f32.mrb[8].mxu1  ;;  %4921 = vmatprep.subr.bf16.mxu1 %v14691_v21  ;;  %v4441_v46 = vmax.f32 %v4377_v62, 0.0 }
 0x74d   : > { %v4444_v33 = vmax.f32 %v4380_v1, 0.0  ;;  %v4255_v2 = vadd.f32 %v13494_v6, %v17338_v7  ;;  %v3951_v39 = vpop.f32.mrb[9].mxu1  ;;  %v14703_v1 = vld [vmem:[#allocation10 + $0x54] ss:$8 sps:$4 sm:$0xff]  }
 0x74e   : > { %v4442_v53 = vmax.f32 %v4378_v19, 0.0  ;;  %v4253_v47 = vadd.f32 %v17338_v7, %v3951_v39  ;;  %v13495_v4 = vpop.f32.mrb[10].mxu1  ;;  %v18751_v6 = vld [vmem:[#allocation42_spill] sm:$0xff] }
 0x74f   : > { %v4319_v18 = vmax.f32 %v4255_v2, 0.0  ;;  %v4256_v20 = vadd.f32 %v13495_v4, %v17338_v7  ;;  %v3954_v60 = vpop.f32.mrb[11].mxu1  ;;  %4922 = vmatpush1.bf16.msra.mxu1 %v14689_v44  ;;  %v17374_v35 = vpack.c.bf16 %v4444_v33, %v4443_v26  ;;  %v2920_v44 = vadd.f32 %v17342_v51, %v17045_v50 }
 0x750   : > { %v4317_v34 = vmax.f32 %v4253_v47, 0.0  ;;  %v4254_v61 = vadd.f32 %v17338_v7, %v3954_v60  ;;  %4923 = vmatprep.subr.bf16.mxu1 %v14694_v36  ;;  %v17379_v56 = vpack.c.bf16 %v4442_v53, %v4441_v46  ;;  %v2916_v36 = vadd.f32 %v17342_v51, %v18751_v6  ;;  %v14706_v53 = vld [vmem:[#allocation10 + $0x64] ss:$8 sps:$4 sm:$0xff]  }
 0x751   : > { %v4383_v3 = vadd.f32 %v4319_v18, %v2910_v10  ;;  %v4320_v0 = vmax.f32 %v4256_v20, 0.0 }
 0x752   : > { %v4381_v31 = vadd.f32 %v4317_v34, %v2906_v49  ;;  %v4318_v52 = vmax.f32 %v4254_v61, 0.0  ;;  %4689 = vmatmul.mubr.bf16.gmra.mrb[68].mxu1 %v4502_v5  ;;  %v2918_v5 = vadd.f32 %v17342_v51, %v17041_v45  ;;  %v18752_v49 = vld [vmem:[#allocation45_spill] sm:$0xff] }
 0x753   : > { %v4384_v41 = vadd.f32 %v4320_v0, %v2912_v63  ;;  %4698 = vmatprep.mubr.bf16.mxu1 %v18750_v15  ;;  %4924 = vmatpush1.bf16.msra.mxu1 %v14692_v24  ;;  %v4447_v17 = vmax.f32 %v4383_v3, 0.0  ;;  %v2926_v34 = vadd.f32 %v17342_v51, %v18752_v49  ;;  %v14704_v3 = vld [vmem:[#allocation10 + $0x60] ss:$8 sps:$4 sm:$0xff]  }
 0x754   : > { %v4382_v14 = vadd.f32 %v4318_v52, %v2908_v25  ;;  %v13498_v37 = vpop.f32.mrb[12].mxu1  ;;  %4925 = vmatprep.subr.bf16.mxu1 %v14697_v48  ;;  %v4445_v29 = vmax.f32 %v4381_v31, 0.0  ;;  %v18753_v25 = vld [vmem:[#allocation43_spill] sm:$0xff] }
 0x755   : > { %v4448_v28 = vmax.f32 %v4384_v41, 0.0  ;;  %v4259_v9 = vadd.f32 %v13498_v37, %v17338_v7  ;;  %v3967_v8 = vpop.f32.mrb[13].mxu1  ;;  %v2922_v31 = vadd.f32 %v17342_v51, %v18753_v25  ;;  %v18754_v37 = vld [vmem:[#allocation46_spill] sm:$0xff] }
 0x756   : > { %v4446_v55 = vmax.f32 %v4382_v14, 0.0  ;;  %v4257_v22 = vadd.f32 %v17338_v7, %v3967_v8  ;;  %v13499_v42 = vpop.f32.mrb[14].mxu1 }
 0x757   : > { %v4323_v11 = vmax.f32 %v4259_v9, 0.0  ;;  %v4260_v54 = vadd.f32 %v13499_v42, %v17338_v7  ;;  %v3970_v21 = vpop.f32.mrb[15].mxu1  ;;  %v4506_v30 = vpack.c.bf16 %v4448_v28, %v4447_v17  ;;  %4926 = vmatpush1.bf16.msra.mxu1 %v14695_v16  ;;  %v14709_v16 = vld [vmem:[#allocation10 + $0x74] ss:$8 sps:$4 sm:$0xff]   ;;  %v18755_v9 = vld [vmem:[#allocation44_spill] sm:$0xff] }
 0x758   : > { %v4321_v59 = vmax.f32 %v4257_v22, 0.0  ;;  %v4258_v62 = vadd.f32 %v17338_v7, %v3970_v21  ;;  %v4505_v58 = vpack.c.bf16 %v4446_v55, %v4445_v29  ;;  %4927 = vmatprep.subr.bf16.mxu1 %v14700_v23  ;;  %v2928_v23 = vadd.f32 %v17342_v51, %v18754_v37  ;;  %v14707_v42 = vld [vmem:[#allocation10 + $0x70] ss:$8 sps:$4 sm:$0xff]  }
 0x759   : > { %v4387_v45 = vadd.f32 %v4323_v11, %v2918_v5  ;;  %v4324_v19 = vmax.f32 %v4260_v54, 0.0  ;;  %v2924_v8 = vadd.f32 %v17342_v51, %v18755_v9  ;;  %v14712_v54 = vld [vmem:[#allocation10 + $0x104] ss:$8 sps:$4 sm:$0xff]  }
 0x75a   : > { %v4385_v26 = vadd.f32 %v4321_v59, %v2914_v40  ;;  %v4322_v33 = vmax.f32 %v4258_v62, 0.0  ;;  %4699 = vmatmul.mubr.bf16.gmra.mrb[72].mxu1 %v4505_v58 }
 0x75b   : > { %v4388_v2 = vadd.f32 %v4324_v19, %v2920_v44  ;;  %4708 = vmatprep.mubr.bf16.mxu1 %v18750_v15  ;;  %4928 = vmatpush1.bf16.msra.mxu1 %v14698_v27  ;;  %v4451_v47 = vmax.f32 %v4387_v45, 0.0 }
 0x75c   : > { %v4386_v39 = vadd.f32 %v4322_v33, %v2916_v36  ;;  %v13502_v46 = vpop.f32.mrb[16].mxu1  ;;  %4929 = vmatprep.subr.bf16.mxu1 %v14703_v1  ;;  %v4449_v18 = vmax.f32 %v4385_v26, 0.0  ;;  %v18757_v33 = vld [vmem:[#allocation47_spill] sm:$0xff] }
 0x75d   : > { %v4452_v4 = vmax.f32 %v4388_v2, 0.0  ;;  %v4263_v50 = vadd.f32 %v13502_v46, %v17338_v7  ;;  %v3983_v10 = vpop.f32.mrb[17].mxu1  ;;  %v2930_v2 = vadd.f32 %v17342_v51, %v18757_v33 }
 0x75e   : > { %v4450_v20 = vmax.f32 %v4386_v39, 0.0  ;;  %v4261_v60 = vadd.f32 %v17338_v7, %v3983_v10  ;;  %v13503_v24 = vpop.f32.mrb[18].mxu1  ;;  %v18759_v10 = vld [vmem:[#allocation48_spill] sm:$0xff] }
 0x75f   : > { %v4327_v61 = vmax.f32 %v4263_v50, 0.0  ;;  %v4264_v48 = vadd.f32 %v13503_v24, %v17338_v7  ;;  %v3986_v63 = vpop.f32.mrb[19].mxu1  ;;  %4930 = vmatpush1.bf16.msra.mxu1 %v14701_v32  ;;  %v17404_v0 = vpack.c.bf16 %v4452_v4, %v4451_v47 }
 0x760   : > { %v4325_v52 = vmax.f32 %v4261_v60, 0.0  ;;  %v4262_v41 = vadd.f32 %v17338_v7, %v3986_v63  ;;  %4931 = vmatprep.subr.bf16.mxu1 %v14706_v53  ;;  %v17409_v14 = vpack.c.bf16 %v4450_v20, %v4449_v18  ;;  %v18758_v53 = vld [vmem:[#allocation50_spill] sm:$0xff]  ;;  %v2932_v18 = vadd.f32 %v17342_v51, %v18759_v10 }
 0x761   : > { %v4391_v17 = vadd.f32 %v4327_v61, %v2926_v34  ;;  %v4328_v28 = vmax.f32 %v4264_v48, 0.0  ;;  %v2936_v47 = vadd.f32 %v17342_v51, %v18758_v53 }
 0x762   : > { %v4389_v29 = vadd.f32 %v4325_v52, %v2922_v31  ;;  %v4326_v55 = vmax.f32 %v4262_v41, 0.0  ;;  %4709 = vmatmul.mubr.bf16.gmra.mrb[76].mxu1 %v4506_v30  ;;  %v18756_v30 = vld [vmem:[#allocation49_spill] sm:$0xff] }
 0x763   : > { %v4392_v22 = vadd.f32 %v4328_v28, %v2928_v23  ;;  %4718 = vmatprep.mubr.bf16.mxu1 %v18750_v15  ;;  %4932 = vmatpush1.bf16.msra.mxu1 %v14704_v3  ;;  %v4455_v21 = vmax.f32 %v4391_v17, 0.0  ;;  %v2934_v45 = vadd.f32 %v17342_v51, %v18756_v30 }
 0x764   : > { %v4390_v5 = vadd.f32 %v4326_v55, %v2924_v8  ;;  %v13506_v11 = vpop.f32.mrb[20].mxu1  ;;  %4933 = vmatprep.subr.bf16.mxu1 %v14709_v16  ;;  %v4453_v62 = vmax.f32 %v4389_v29, 0.0  ;;  %v18760_v16 = vld [vmem:[#allocation53_spill] sm:$0xff]  ;;  %v18761_v8 = vld [vmem:[#allocation51_spill] sm:$0xff] }
 0x765   : > { %v4456_v27 = vmax.f32 %v4392_v22, 0.0  ;;  %v4267_v40 = vadd.f32 %v13506_v11, %v17338_v7  ;;  %v3999_v59 = vpop.f32.mrb[21].mxu1  ;;  %v2942_v37 = vadd.f32 %v17342_v51, %v18760_v16  ;;  %v2938_v29 = vadd.f32 %v17342_v51, %v18761_v8 }
 0x766   : > { %v4454_v58 = vmax.f32 %v4390_v5, 0.0  ;;  %v4265_v1 = vadd.f32 %v17338_v7, %v3999_v59  ;;  %v13507_v44 = vpop.f32.mrb[22].mxu1  ;;  %v18762_v5 = vld [vmem:[#allocation54_spill] sm:$0xff] }
 0x767   : > { %v4331_v19 = vmax.f32 %v4267_v40, 0.0  ;;  %v4268_v6 = vadd.f32 %v13507_v44, %v17338_v7  ;;  %v4002_v36 = vpop.f32.mrb[23].mxu1  ;;  %v4510_v26 = vpack.c.bf16 %v4456_v27, %v4455_v21  ;;  %4934 = vmatpush1.bf16.msra.mxu1 %v14707_v42  ;;  %v2944_v11 = vadd.f32 %v17342_v51, %v18762_v5  ;;  %v18763_v27 = vld [vmem:[#allocation52_spill] sm:$0xff] }
 0x768   : > { %v4329_v32 = vmax.f32 %v4265_v1, 0.0  ;;  %v4266_v39 = vadd.f32 %v17338_v7, %v4002_v36  ;;  %v4509_v46 = vpack.c.bf16 %v4454_v58, %v4453_v62  ;;  %5209 = vmatprep.subr.bf16.mxu1 %v14712_v54  ;;  %v2940_v40 = vadd.f32 %v17342_v51, %v18763_v27 }
 0x769   : > { %v4395_v4 = vadd.f32 %v4331_v19, %v2934_v45  ;;  %v4332_v50 = vmax.f32 %v4268_v6, 0.0 }
 0x76a   : > { %v4393_v20 = vadd.f32 %v4329_v32, %v2930_v2  ;;  %v4330_v60 = vmax.f32 %v4266_v39, 0.0  ;;  %4719 = vmatmul.mubr.bf16.gmra.mrb[80].mxu1 %v4509_v46  ;;  %v18764_v39 = vld [vmem:[#allocation57_spill] sm:$0xff] }
 0x76b   : > { %v4396_v24 = vadd.f32 %v4332_v50, %v2936_v47  ;;  %4728 = vmatprep.mubr.bf16.mxu1 %v18750_v15  ;;  %v4459_v61 = vmax.f32 %v4395_v4, 0.0  ;;  %v2950_v46 = vadd.f32 %v17342_v51, %v18764_v39  ;;  %v18765_v50 = vld [vmem:[#allocation55_spill] sm:$0xff] }
 0x76c   : > { %v4394_v49 = vadd.f32 %v4330_v60, %v2932_v18  ;;  %v13510_v34 = vpop.f32.mrb[24].mxu1  ;;  %v4457_v25 = vmax.f32 %v4393_v20, 0.0  ;;  %v2946_v10 = vadd.f32 %v17342_v51, %v18765_v50 }
 0x76d   : > { %v4460_v48 = vmax.f32 %v4396_v24, 0.0  ;;  %v4271_v63 = vadd.f32 %v13510_v34, %v17338_v7  ;;  %v4015_v3 = vpop.f32.mrb[25].mxu1  ;;  %v18766_v24 = vld [vmem:[#allocation58_spill] sm:$0xff] }
 0x76e   : > { %v4458_v31 = vmax.f32 %v4394_v49, 0.0  ;;  %v4269_v52 = vadd.f32 %v17338_v7, %v4015_v3  ;;  %v13511_v41 = vpop.f32.mrb[26].mxu1  ;;  %v2952_v49 = vadd.f32 %v17342_v51, %v18766_v24  ;;  %v18772_v24 = vld [vmem:[#allocation65_spill] sm:$0xff] }
 0x76f   : > { %v4335_v23 = vmax.f32 %v4271_v63, 0.0  ;;  %v4272_v17 = vadd.f32 %v13511_v41, %v17338_v7  ;;  %v4018_v28 = vpop.f32.mrb[27].mxu1  ;;  %v17434_v9 = vpack.c.bf16 %v4460_v48, %v4459_v61  ;;  %v18767_v48 = vld [vmem:[#allocation56_spill] sm:$0xff] }
 0x770   : > { %v4333_v55 = vmax.f32 %v4269_v52, 0.0  ;;  %v4270_v22 = vadd.f32 %v17338_v7, %v4018_v28  ;;  %v17439_v42 = vpack.c.bf16 %v4458_v31, %v4457_v25  ;;  %v2948_v63 = vadd.f32 %v17342_v51, %v18767_v48 }
 0x771   : > { %v4399_v54 = vadd.f32 %v4335_v23, %v2942_v37  ;;  %v4336_v21 = vmax.f32 %v4272_v17, 0.0 }
 0x772   : > { %v4397_v59 = vadd.f32 %v4333_v55, %v2938_v29  ;;  %v4334_v62 = vmax.f32 %v4270_v22, 0.0  ;;  %4729 = vmatmul.mubr.bf16.gmra.mrb[84].mxu1 %v4510_v26  ;;  %v18768_v22 = vld [vmem:[#allocation61_spill] sm:$0xff] }
 0x773   : > { %v4400_v58 = vadd.f32 %v4336_v21, %v2944_v11  ;;  %4738 = vmatprep.mubr.bf16.mxu1 %v18750_v15  ;;  %v4463_v30 = vmax.f32 %v4399_v54, 0.0  ;;  %v2958_v5 = vadd.f32 %v17342_v51, %v18768_v22 }
 0x774   : > { %v4398_v1 = vadd.f32 %v4334_v62, %v2940_v40  ;;  %v13514_v44 = vpop.f32.mrb[28].mxu1  ;;  %v4461_v36 = vmax.f32 %v4397_v59, 0.0  ;;  %v18769_v40 = vld [vmem:[#allocation59_spill] sm:$0xff] }
 0x775   : > { %v4464_v45 = vmax.f32 %v4400_v58, 0.0  ;;  %v4275_v19 = vadd.f32 %v13514_v44, %v17338_v7  ;;  %v4031_v6 = vpop.f32.mrb[29].mxu1  ;;  %v2954_v59 = vadd.f32 %v17342_v51, %v18769_v40  ;;  %v18770_v44 = vld [vmem:[#allocation62_spill] sm:$0xff] }
 0x776   : > { %v4462_v33 = vmax.f32 %v4398_v1, 0.0  ;;  %v4273_v2 = vadd.f32 %v17338_v7, %v4031_v6  ;;  %v13515_v32 = vpop.f32.mrb[30].mxu1  ;;  %v18771_v6 = vld [vmem:[#allocation60_spill] sm:$0xff] }
 0x777   : > { %v4339_v53 = vmax.f32 %v4275_v19, 0.0  ;;  %v4276_v26 = vadd.f32 %v13515_v32, %v17338_v7  ;;  %v4034_v47 = vpop.f32.mrb[31].mxu1  ;;  %v4514_v4 = vpack.c.bf16 %v4464_v45, %v4463_v30  ;;  %v2960_v30 = vadd.f32 %v17342_v51, %v18770_v44 }
 0x778   : > { %v4337_v18 = vmax.f32 %v4273_v2, 0.0  ;;  %v4274_v20 = vadd.f32 %v17338_v7, %v4034_v47  ;;  %v4513_v60 = vpack.c.bf16 %v4462_v33, %v4461_v36  ;;  %v2956_v36 = vadd.f32 %v17342_v51, %v18771_v6 }
 0x779   : > { %v4403_v34 = vadd.f32 %v4339_v53, %v2950_v46  ;;  %v4340_v61 = vmax.f32 %v4276_v26, 0.0 }
 0x77a   : > { %v4401_v3 = vadd.f32 %v4337_v18, %v2946_v10  ;;  %v4338_v25 = vmax.f32 %v4274_v20, 0.0  ;;  %4739 = vmatmul.mubr.bf16.gmra.mrb[88].mxu1 %v4513_v60 }
 0x77b   : > { %v4404_v31 = vadd.f32 %v4340_v61, %v2952_v49  ;;  %4748 = vmatprep.mubr.bf16.mxu1 %v18750_v15  ;;  %v4467_v16 = vmax.f32 %v4403_v34, 0.0  ;;  %v2966_v49 = vadd.f32 %v17342_v51, %v18772_v24 }
 0x77c   : > { %v4402_v52 = vadd.f32 %v4338_v25, %v2948_v63  ;;  %v13518_v41 = vpop.f32.mrb[32].mxu1  ;;  %v4465_v28 = vmax.f32 %v4401_v3, 0.0  ;;  %v18773_v63 = vld [vmem:[#allocation63_spill] sm:$0xff] }
 0x77d   : > { %v4468_v37 = vmax.f32 %v4404_v31, 0.0  ;;  %v4279_v23 = vadd.f32 %v13518_v41, %v17338_v7  ;;  %v4047_v17 = vpop.f32.mrb[33].mxu1  ;;  %v2962_v3 = vadd.f32 %v17342_v51, %v18773_v63  ;;  %v18774_v41 = vld [vmem:[#allocation66_spill] sm:$0xff] }
 0x77e   : > { %v4466_v8 = vmax.f32 %v4402_v52, 0.0  ;;  %v4277_v29 = vadd.f32 %v17338_v7, %v4047_v17  ;;  %v13519_v55 = vpop.f32.mrb[34].mxu1  ;;  %v18775_v17 = vld [vmem:[#allocation64_spill] sm:$0xff] }
 0x77f   : > { %v4343_v11 = vmax.f32 %v4279_v23, 0.0  ;;  %v4280_v54 = vadd.f32 %v13519_v55, %v17338_v7  ;;  %v4050_v21 = vpop.f32.mrb[35].mxu1  ;;  %v17464_v27 = vpack.c.bf16 %v4468_v37, %v4467_v16  ;;  %v2968_v16 = vadd.f32 %v17342_v51, %v18774_v41 }
 0x780   : > { %v4341_v62 = vmax.f32 %v4277_v29, 0.0  ;;  %v4278_v58 = vadd.f32 %v17338_v7, %v4050_v21  ;;  %v17469_v1 = vpack.c.bf16 %v4466_v8, %v4465_v28  ;;  %v2964_v28 = vadd.f32 %v17342_v51, %v18775_v17 }
 0x781   : > { %v4407_v45 = vadd.f32 %v4343_v11, %v2958_v5  ;;  %v4344_v19 = vmax.f32 %v4280_v54, 0.0 }
 0x782   : > { %v4405_v33 = vadd.f32 %v4341_v62, %v2954_v59  ;;  %v4342_v2 = vmax.f32 %v4278_v58, 0.0  ;;  %4749 = vmatmul.mubr.bf16.gmra.mrb[92].mxu1 %v4514_v4 }
 0x783   : > { %v4408_v32 = vadd.f32 %v4344_v19, %v2960_v30  ;;  %4758 = vmatprep.mubr.bf16.mxu1 %v18750_v15  ;;  %v4471_v53 = vmax.f32 %v4407_v45, 0.0  ;;  %v18776_v30 = vld [vmem:[#allocation69_spill] sm:$0xff] }
 0x784   : > { %v4406_v39 = vadd.f32 %v4342_v2, %v2956_v36  ;;  %v13522_v46 = vpop.f32.mrb[36].mxu1  ;;  %v4469_v10 = vmax.f32 %v4405_v33, 0.0  ;;  %v2974_v45 = vadd.f32 %v17342_v51, %v18776_v30  ;;  %v18777_v2 = vld [vmem:[#allocation67_spill] sm:$0xff] }
 0x785   : > { %v4472_v26 = vmax.f32 %v4408_v32, 0.0  ;;  %v4283_v47 = vadd.f32 %v13522_v46, %v17338_v7  ;;  %v4063_v50 = vpop.f32.mrb[37].mxu1  ;;  %v2970_v32 = vadd.f32 %v17342_v51, %v18777_v2 }
 0x786   : > { %v4470_v18 = vmax.f32 %v4406_v39, 0.0  ;;  %v4281_v20 = vadd.f32 %v17338_v7, %v4063_v50  ;;  %v13523_v60 = vpop.f32.mrb[38].mxu1 }
 0x787   : > { %v4347_v34 = vmax.f32 %v4283_v47, 0.0  ;;  %v4284_v4 = vadd.f32 %v13523_v60, %v17338_v7  ;;  %v4066_v61 = vpop.f32.mrb[39].mxu1  ;;  %v4518_v48 = vpack.c.bf16 %v4472_v26, %v4471_v53  ;;  %v18778_v26 = vld [vmem:[#allocation70_spill] sm:$0xff] }
 0x788   : > { %v4345_v25 = vmax.f32 %v4281_v20, 0.0  ;;  %v4282_v31 = vadd.f32 %v17338_v7, %v4066_v61  ;;  %v4517_v52 = vpack.c.bf16 %v4470_v18, %v4469_v10  ;;  %v2976_v47 = vadd.f32 %v17342_v51, %v18778_v26  ;;  %v18779_v18 = vld [vmem:[#allocation68_spill] sm:$0xff] }
 0x789   : > { %v4411_v37 = vadd.f32 %v4347_v34, %v2966_v49  ;;  %v4348_v23 = vmax.f32 %v4284_v4, 0.0  ;;  %v2972_v20 = vadd.f32 %v17342_v51, %v18779_v18 }
 0x78a   : > { %v4409_v8 = vadd.f32 %v4345_v25, %v2962_v3  ;;  %v4346_v29 = vmax.f32 %v4282_v31, 0.0  ;;  %4759 = vmatmul.mubr.bf16.gmra.mrb[96].mxu1 %v4517_v52 }
 0x78b   : > { %v4412_v55 = vadd.f32 %v4348_v23, %v2968_v16  ;;  %4768 = vmatprep.mubr.bf16.mxu1 %v18750_v15  ;;  %v4475_v11 = vmax.f32 %v4411_v37, 0.0  ;;  %v18780_v37 = vld [vmem:[#allocation73_spill] sm:$0xff] }
 0x78c   : > { %v4410_v22 = vadd.f32 %v4346_v29, %v2964_v28  ;;  %v13526_v5 = vpop.f32.mrb[40].mxu1  ;;  %v4473_v59 = vmax.f32 %v4409_v8, 0.0  ;;  %v2982_v23 = vadd.f32 %v17342_v51, %v18780_v37  ;;  %v18781_v29 = vld [vmem:[#allocation71_spill] sm:$0xff] }
 0x78d   : > { %v4476_v54 = vmax.f32 %v4412_v55, 0.0  ;;  %v4287_v21 = vadd.f32 %v13526_v5, %v17338_v7  ;;  %v4079_v40 = vpop.f32.mrb[41].mxu1  ;;  %v2978_v55 = vadd.f32 %v17342_v51, %v18781_v29 }
 0x78e   : > { %v4474_v62 = vmax.f32 %v4410_v22, 0.0  ;;  %v4285_v58 = vadd.f32 %v17338_v7, %v4079_v40  ;;  %v13527_v44 = vpop.f32.mrb[42].mxu1 }
 0x78f   : > { %v4351_v19 = vmax.f32 %v4287_v21, 0.0  ;;  %v4288_v6 = vadd.f32 %v13527_v44, %v17338_v7  ;;  %v4082_v36 = vpop.f32.mrb[43].mxu1  ;;  %v17494_v33 = vpack.c.bf16 %v4476_v54, %v4475_v11  ;;  %v18782_v54 = vld [vmem:[#allocation74_spill] sm:$0xff] }
 0x790   : > { %v4349_v39 = vmax.f32 %v4285_v58, 0.0  ;;  %v4286_v46 = vadd.f32 %v17338_v7, %v4082_v36  ;;  %v17499_v53 = vpack.c.bf16 %v4474_v62, %v4473_v59  ;;  %v2984_v21 = vadd.f32 %v17342_v51, %v18782_v54  ;;  %v18783_v62 = vld [vmem:[#allocation72_spill] sm:$0xff] }
 0x791   : > { %v4415_v50 = vadd.f32 %v4351_v19, %v2974_v45  ;;  %v4352_v10 = vmax.f32 %v4288_v6, 0.0  ;;  %v2980_v58 = vadd.f32 %v17342_v51, %v18783_v62  ;;  %v18788_v62 = vld [vmem:[#allocation81_spill] sm:$0xff] }
 0x792   : > { %v4413_v60 = vadd.f32 %v4349_v39, %v2970_v32  ;;  %v4350_v24 = vmax.f32 %v4286_v46, 0.0  ;;  %4769 = vmatmul.mubr.bf16.gmra.mrb[100].mxu1 %v4518_v48 }
 0x793   : > { %v4416_v49 = vadd.f32 %v4352_v10, %v2976_v47  ;;  %4778 = vmatprep.mubr.bf16.mxu1 %v18750_v15  ;;  %v4479_v61 = vmax.f32 %v4415_v50, 0.0  ;;  %v18784_v10 = vld [vmem:[#allocation77_spill] sm:$0xff] }
 0x794   : > { %v4414_v34 = vadd.f32 %v4350_v24, %v2972_v20  ;;  %v13530_v4 = vpop.f32.mrb[44].mxu1  ;;  %v4477_v31 = vmax.f32 %v4413_v60, 0.0  ;;  %v2990_v18 = vadd.f32 %v17342_v51, %v18784_v10 }
 0x795   : > { %v4480_v63 = vmax.f32 %v4416_v49, 0.0  ;;  %v4291_v3 = vadd.f32 %v13530_v4, %v17338_v7  ;;  %v4095_v25 = vpop.f32.mrb[45].mxu1 }
 0x796   : > { %v4478_v52 = vmax.f32 %v4414_v34, 0.0  ;;  %v4289_v41 = vadd.f32 %v17338_v7, %v4095_v25  ;;  %v13531_v16 = vpop.f32.mrb[46].mxu1  ;;  %v18785_v34 = vld [vmem:[#allocation75_spill] sm:$0xff]  ;;  %v18786_v25 = vld [vmem:[#allocation78_spill] sm:$0xff] }
 0x797   : > { %v4355_v17 = vmax.f32 %v4291_v3, 0.0  ;;  %v4292_v48 = vadd.f32 %v13531_v16, %v17338_v7  ;;  %v4098_v28 = vpop.f32.mrb[47].mxu1  ;;  %v4522_v8 = vpack.c.bf16 %v4480_v63, %v4479_v61  ;;  %v2986_v4 = vadd.f32 %v17342_v51, %v18785_v34  ;;  %v18787_v16 = vld [vmem:[#allocation76_spill] sm:$0xff] }
 0x798   : > { %v4353_v22 = vmax.f32 %v4289_v41, 0.0  ;;  %v4290_v5 = vadd.f32 %v17338_v7, %v4098_v28  ;;  %v4521_v11 = vpack.c.bf16 %v4478_v52, %v4477_v31  ;;  %v2992_v31 = vadd.f32 %v17342_v51, %v18786_v25 }
 0x799   : > { %v4419_v40 = vadd.f32 %v4355_v17, %v2982_v23  ;;  %v4356_v59 = vmax.f32 %v4292_v48, 0.0  ;;  %v2988_v37 = vadd.f32 %v17342_v51, %v18787_v16 }
 0x79a   : > { %v4417_v44 = vadd.f32 %v4353_v22, %v2978_v55  ;;  %v4354_v30 = vmax.f32 %v4290_v5, 0.0  ;;  %4779 = vmatmul.mubr.bf16.gmra.mrb[104].mxu1 %v4521_v11 }
 0x79b   : > { %v4420_v45 = vadd.f32 %v4356_v59, %v2984_v21  ;;  %4788 = vmatprep.mubr.bf16.mxu1 %v18750_v15  ;;  %v4483_v36 = vmax.f32 %v4419_v40, 0.0 }
 0x79c   : > { %v4418_v19 = vadd.f32 %v4354_v30, %v2980_v58  ;;  %v13534_v6 = vpop.f32.mrb[48].mxu1  ;;  %v4481_v46 = vmax.f32 %v4417_v44, 0.0  ;;  %v2998_v58 = vadd.f32 %v17342_v51, %v18788_v62 }
 0x79d   : > { %v4484_v2 = vmax.f32 %v4420_v45, 0.0  ;;  %v4295_v32 = vadd.f32 %v13534_v6, %v17338_v7  ;;  %v4111_v39 = vpop.f32.mrb[49].mxu1 }
 0x79e   : > { %v4482_v26 = vmax.f32 %v4418_v19, 0.0  ;;  %v4293_v47 = vadd.f32 %v17338_v7, %v4111_v39  ;;  %v13535_v50 = vpop.f32.mrb[50].mxu1  ;;  %v18789_v19 = vld [vmem:[#allocation79_spill] sm:$0xff]  ;;  %v18790_v39 = vld [vmem:[#allocation82_spill] sm:$0xff] }
 0x79f   : > { %v4359_v20 = vmax.f32 %v4295_v32, 0.0  ;;  %v4296_v60 = vadd.f32 %v13535_v50, %v17338_v7  ;;  %v4114_v24 = vpop.f32.mrb[51].mxu1  ;;  %v17524_v49 = vpack.c.bf16 %v4484_v2, %v4483_v36  ;;  %v2994_v6 = vadd.f32 %v17342_v51, %v18789_v19  ;;  %v18791_v50 = vld [vmem:[#allocation80_spill] sm:$0xff] }
 0x7a0   : > { %v4357_v61 = vmax.f32 %v4293_v47, 0.0  ;;  %v4294_v63 = vadd.f32 %v17338_v7, %v4114_v24  ;;  %v17529_v3 = vpack.c.bf16 %v4482_v26, %v4481_v46  ;;  %v3000_v46 = vadd.f32 %v17342_v51, %v18790_v39 }
 0x7a1   : > { %v4423_v52 = vadd.f32 %v4359_v20, %v2990_v18  ;;  %v4360_v41 = vmax.f32 %v4296_v60, 0.0  ;;  %v2996_v10 = vadd.f32 %v17342_v51, %v18791_v50 }
 0x7a2   : > { %v4421_v23 = vadd.f32 %v4357_v61, %v2986_v4  ;;  %v4358_v17 = vmax.f32 %v4294_v63, 0.0  ;;  %4789 = vmatmul.mubr.bf16.gmra.mrb[108].mxu1 %v4522_v8 }
 0x7a3   : > { %v4424_v48 = vadd.f32 %v4360_v41, %v2992_v31  ;;  %4798 = vmatprep.mubr.bf16.mxu1 %v18750_v15  ;;  %v4487_v55 = vmax.f32 %v4423_v52, 0.0 }
 0x7a4   : > { %v4422_v28 = vadd.f32 %v4358_v17, %v2988_v37  ;;  %v13538_v29 = vpop.f32.mrb[52].mxu1  ;;  %v4485_v54 = vmax.f32 %v4421_v23, 0.0  ;;  %v18792_v37 = vld [vmem:[#allocation85_spill] sm:$0xff] }
 0x7a5   : > { %v4488_v22 = vmax.f32 %v4424_v48, 0.0  ;;  %v4299_v5 = vadd.f32 %v13538_v29, %v17338_v7  ;;  %v4127_v11 = vpop.f32.mrb[53].mxu1  ;;  %v3006_v23 = vadd.f32 %v17342_v51, %v18792_v37 }
 0x7a6   : > { %v4486_v21 = vmax.f32 %v4422_v28, 0.0  ;;  %v4297_v40 = vadd.f32 %v17338_v7, %v4127_v11  ;;  %v13539_v59 = vpop.f32.mrb[54].mxu1 }
 0x7a7   : > { %v4363_v44 = vmax.f32 %v4299_v5, 0.0  ;;  %v4300_v8 = vadd.f32 %v13539_v59, %v17338_v7  ;;  %v4130_v30 = vpop.f32.mrb[55].mxu1  ;;  %v4526_v45 = vpack.c.bf16 %v4488_v22, %v4487_v55  ;;  %v18793_v55 = vld [vmem:[#allocation83_spill] sm:$0xff] }
 0x7a8   : > { %v4361_v36 = vmax.f32 %v4297_v40, 0.0  ;;  %v4298_v2 = vadd.f32 %v17338_v7, %v4130_v30  ;;  %v4525_v32 = vpack.c.bf16 %v4486_v21, %v4485_v54  ;;  %v3002_v22 = vadd.f32 %v17342_v51, %v18793_v55  ;;  %v18794_v21 = vld [vmem:[#allocation86_spill] sm:$0xff] }
 0x7a9   : > { %v4427_v26 = vadd.f32 %v4363_v44, %v2998_v58  ;;  %v4364_v47 = vmax.f32 %v4300_v8, 0.0  ;;  %v3008_v40 = vadd.f32 %v17342_v51, %v18794_v21  ;;  %v18795_v58 = vld [vmem:[#allocation84_spill] sm:$0xff]  ;;  %v14716_v21 = vld [vmem:[#allocation10 + $0x120] ss:$8 sps:$4 sm:$0xff]  }
 0x7aa   : > { %v4425_v18 = vadd.f32 %v4361_v36, %v2994_v6  ;;  %v4362_v20 = vmax.f32 %v4298_v2, 0.0  ;;  %4799 = vmatmul.mubr.bf16.gmra.mrb[112].mxu1 %v4525_v32  ;;  %v3004_v44 = vadd.f32 %v17342_v51, %v18795_v58  ;;  %v14722_v58 = vld [vmem:[#allocation10 + $0x140] ss:$8 sps:$4 sm:$0xff]  }
 0x7ab   : > { %v4428_v60 = vadd.f32 %v4364_v47, %v3000_v46  ;;  %4808 = vmatprep.mubr.bf16.mxu1 %v18750_v15  ;;  %v4491_v4 = vmax.f32 %v4427_v26, 0.0 }
 0x7ac   : > { %v4426_v24 = vadd.f32 %v4362_v20, %v2996_v10  ;;  %v13542_v34 = vpop.f32.mrb[56].mxu1  ;;  %v4489_v31 = vmax.f32 %v4425_v18, 0.0  ;;  %v3014_v18 = vadd.f32 %v17342_v51, %v17260_v57  ;;  %v3012_v57 = vadd.f32 %v17342_v51, %v17255_v38  ;;  %v14715_v38 = vld [vmem:[#allocation10 + $0x114] ss:$8 sps:$4 sm:$0xff]  }
 0x7ad   : > { %v4492_v61 = vmax.f32 %v4428_v60, 0.0  ;;  %v4303_v63 = vadd.f32 %v13542_v34, %v17338_v7  ;;  %v4143_v25 = vpop.f32.mrb[57].mxu1  ;;  %v18796_v34 = vld [vmem:[#allocation87_spill] sm:$0xff] }
 0x7ae   : > { %v4490_v52 = vmax.f32 %v4426_v24, 0.0  ;;  %v4301_v41 = vadd.f32 %v17338_v7, %v4143_v25  ;;  %v13543_v16 = vpop.f32.mrb[58].mxu1 }
 0x7af   : > { %v4367_v17 = vmax.f32 %v4303_v63, 0.0  ;;  %v4304_v48 = vadd.f32 %v13543_v16, %v17338_v7  ;;  %v4146_v28 = vpop.f32.mrb[59].mxu1  ;;  %v17554_v29 = vpack.c.bf16 %v4492_v61, %v4491_v4  ;;  %v3010_v4 = vadd.f32 %v17342_v51, %v18796_v34 }
 0x7b0   : > { %v4365_v5 = vmax.f32 %v4301_v41, 0.0  ;;  %v4302_v11 = vadd.f32 %v17338_v7, %v4146_v28  ;;  %v17559_v54 = vpack.c.bf16 %v4490_v52, %v4489_v31  ;;  %v3016_v31 = vadd.f32 %v17342_v51, %v17264_v43  ;;  %v14710_v43 = vld [vmem:[#allocation10 + $0x100] ss:$8 sps:$4 sm:$0xff]   ;;  %v14713_v51 = vld [vmem:[#allocation10 + $0x110] ss:$8 sps:$4 sm:$0xff]  }
 0x7b1   : > { %v4431_v59 = vadd.f32 %v4367_v17, %v3006_v23  ;;  %v4368_v62 = vmax.f32 %v4304_v48, 0.0 }
 0x7b2   : > { %v4429_v8 = vadd.f32 %v4365_v5, %v3002_v22  ;;  %v4366_v30 = vmax.f32 %v4302_v11, 0.0  ;;  %4809 = vmatmul.mubr.bf16.gmra.mrb[116].mxu1 %v4526_v45  ;;  %v14718_v11 = vld [vmem:[#allocation10 + $0x124] ss:$8 sps:$4 sm:$0xff]  }
 0x7b3   : > { %v4432_v19 = vadd.f32 %v4368_v62, %v3008_v40  ;;  %4818 = vmatprep.mubr.bf16.mxu1 %v18750_v15  ;;  %v4495_v2 = vmax.f32 %v4431_v59, 0.0  ;;  %v14721_v40 = vld [vmem:[#allocation10 + $0x134] ss:$8 sps:$4 sm:$0xff]   ;;  %v14719_v59 = vld [vmem:[#allocation10 + $0x130] ss:$8 sps:$4 sm:$0xff]  }
 0x7b4   : > { %v4430_v6 = vadd.f32 %v4366_v30, %v3004_v44  ;;  %v13546_v36 = vpop.f32.mrb[60].mxu1  ;;  %v4493_v26 = vmax.f32 %v4429_v8, 0.0  ;;  %v14724_v62 = vld [vmem:[#allocation10 + $0x144] ss:$8 sps:$4 sm:$0xff]   ;;  %v14727_v44 = vld [vmem:[#allocation10 + $0x154] ss:$8 sps:$4 sm:$0xff]  }
 0x7b5   : > { %v4496_v32 = vmax.f32 %v4432_v19, 0.0  ;;  %v4307_v39 = vadd.f32 %v13546_v36, %v17338_v7  ;;  %v4159_v46 = vpop.f32.mrb[61].mxu1  ;;  %v14725_v8 = vld [vmem:[#allocation10 + $0x150] ss:$8 sps:$4 sm:$0xff]   ;;  %v14730_v30 = vld [vmem:[#allocation10 + $0x164] ss:$8 sps:$4 sm:$0xff]  }
 0x7b6   : > { %v4494_v47 = vmax.f32 %v4430_v6, 0.0  ;;  %v4305_v50 = vadd.f32 %v17338_v7, %v4159_v46  ;;  %v13547_v10 = vpop.f32.mrb[62].mxu1  ;;  %v14728_v19 = vld [vmem:[#allocation10 + $0x160] ss:$8 sps:$4 sm:$0xff]   ;;  %v14733_v6 = vld [vmem:[#allocation10 + $0x174] ss:$8 sps:$4 sm:$0xff]  }
 0x7b7   : > { %v4371_v20 = vmax.f32 %v4307_v39, 0.0  ;;  %v4308_v45 = vadd.f32 %v13547_v10, %v17338_v7  ;;  %v4162_v60 = vpop.f32.mrb[63].mxu1  ;;  %v4530_v24 = vpack.c.bf16 %v4496_v32, %v4495_v2  ;;  %v14734_v36 = vld [vmem:[#allocation13 + $0x40] sm:$0xff]   ;;  %v14731_v2 = vld [vmem:[#allocation10 + $0x170] ss:$8 sps:$4 sm:$0xff]  }
 0x7b8   : > { %v4369_v61 = vmax.f32 %v4305_v50, 0.0  ;;  %v4306_v63 = vadd.f32 %v17338_v7, %v4162_v60  ;;  %v4529_v25 = vpack.c.bf16 %v4494_v47, %v4493_v26  ;;  %13548 = vmatprep.subr.bf16.mxu0 %v14734_v36  ;;  %v14735_v32 = vld [vmem:[#allocation13 + $0x48] sm:$0xff]   ;;  %v14736_v39 = vld [vmem:[#allocation13 + $0x50] sm:$0xff]   ;;  %v14737_v46 = vld [vmem:[#allocation13 + $0x58] sm:$0xff]  }
 0x7b9   : > { %v4435_v52 = vadd.f32 %v4371_v20, %v3014_v18  ;;  %v4372_v41 = vmax.f32 %v4308_v45, 0.0  ;;  %13549 = vmatpush3.bf16.msra.mxu0 %v14734_v36  ;;  %v14738_v26 = vld [vmem:[#allocation13 + $0x60] sm:$0xff]   ;;  %v14739_v47 = vld [vmem:[#allocation13 + $0x68] sm:$0xff]  }
 0x7ba   : > { %v4433_v16 = vadd.f32 %v4369_v61, %v3010_v4  ;;  %v4370_v37 = vmax.f32 %v4306_v63, 0.0  ;;  %4819 = vmatmul.mubr.bf16.gmra.mrb[120].mxu1 %v4529_v25  ;;  %13550 = vmatprep.subr.bf16.mxu0 %v14735_v32  ;;  %v14743_v63 = vld [vmem:[#allocation13 + $0x8] sm:$0xff]  }
 0x7bb   : > { %v4436_v23 = vadd.f32 %v4372_v41, %v3016_v31  ;;  %4828 = vmatprep.mubr.bf16.mxu1 %v18750_v15  ;;  %v4499_v48 = vmax.f32 %v4435_v52, 0.0 }
 0x7bc   : > { %v4434_v17 = vadd.f32 %v4370_v37, %v3012_v57  ;;  %v4497_v55 = vmax.f32 %v4433_v16, 0.0  ;;  %v14744_v37 = vld [vmem:[#allocation13 + $0x10] sm:$0xff]  }
 0x7bd   : > { %v4500_v28 = vmax.f32 %v4436_v23, 0.0  ;;  %13551 = vmatpush3.bf16.msra.mxu0 %v14735_v32 }
 0x7be   : > { %v4498_v7 = vmax.f32 %v4434_v17, 0.0  ;;  %13552 = vmatprep.subr.bf16.mxu0 %v14736_v39 }
 0x7bf   : > { %v17579_v22 = vpack.c.bf16 %v4500_v28, %v4499_v48  ;;  %v14745_v28 = vld [vmem:[#allocation13 + $0x18] sm:$0xff]  }
 0x7c0   : > { %v17581_v5 = vpack.c.bf16 %v4498_v7, %v4497_v55 }
 0x7c1   : > { %13553 = vmatpush3.bf16.msra.mxu0 %v14736_v39  ;;  %v14749_v39 = vld [vmem:[#allocation13 + $0x38] sm:$0xff]  }
 0x7c2   : > { %4829 = vmatmul.mubr.bf16.gmra.mrb[124].mxu1 %v4530_v24  ;;  %13554 = vmatprep.subr.bf16.mxu0 %v14737_v46 }
 0x7c3   : > { %4951 = vmatprep.mubr.bf16.mxu1 %v18750_v15 }
 0x7c5   : > { %13555 = vmatpush3.bf16.msra.mxu0 %v14737_v46 }
 0x7c6   : > { %13556 = vmatprep.subr.bf16.mxu0 %v14738_v26 }
 0x7c9   : > { %13557 = vmatpush3.bf16.msra.mxu0 %v14738_v26 }
 0x7ca   : > { %4952 = vmatmul.mubr.bf16.vlgmr.msra.gmra.mrb[64].mxu1 %v18750_v15  ;;  %13558 = vmatprep.subr.bf16.mxu0 %v14739_v47 }
 0x7cb   : > { %5210 = vmatpush1.bf16.msra.mxu1 %v14710_v43  ;;  %4961 = vmatprep.mubr.bf16.mxu1 %v18750_v15 }
 0x7cc   : > { %5211 = vmatprep.subr.bf16.mxu1 %v14715_v38 }
 0x7cd   : > { %13559 = vmatpush3.bf16.msra.mxu0 %v14739_v47 }
 0x7cf   : > { %5212 = vmatpush1.bf16.msra.mxu1 %v14713_v51  ;;  %v14746_v51 = vld [vmem:[#allocation13 + $0x20] sm:$0xff]  }
 0x7d0   : > { %5213 = vmatprep.subr.bf16.mxu1 %v14718_v11 }
 0x7d2   : > { %4962 = vmatmul.mubr.bf16.gmra.mrb[68].mxu1 %v18750_v15 }
 0x7d3   : > { %4971 = vmatprep.mubr.bf16.mxu1 %v18750_v15  ;;  %5214 = vmatpush1.bf16.msra.mxu1 %v14716_v21 }
 0x7d4   : > { %5215 = vmatprep.subr.bf16.mxu1 %v14721_v40 }
 0x7d7   : > { %5216 = vmatpush1.bf16.msra.mxu1 %v14719_v59  ;;  %v14747_v59 = vld [vmem:[#allocation13 + $0x28] sm:$0xff]  }
 0x7d8   : > { %5217 = vmatprep.subr.bf16.mxu1 %v14724_v62 }
 0x7da   : > { %4972 = vmatmul.mubr.bf16.gmra.mrb[72].mxu1 %v17379_v56 }
 0x7db   : > { %4981 = vmatprep.mubr.bf16.mxu1 %v18750_v15  ;;  %5218 = vmatpush1.bf16.msra.mxu1 %v14722_v58 }
 0x7dc   : > { %5219 = vmatprep.subr.bf16.mxu1 %v14727_v44 }
 0x7df   : > { %5220 = vmatpush1.bf16.msra.mxu1 %v14725_v8 }
 0x7e0   : > { %5221 = vmatprep.subr.bf16.mxu1 %v14730_v30 }
 0x7e2   : > { %4982 = vmatmul.mubr.bf16.gmra.mrb[76].mxu1 %v17374_v35 }
 0x7e3   : > { %4991 = vmatprep.mubr.bf16.mxu1 %v18750_v15  ;;  %5222 = vmatpush1.bf16.msra.mxu1 %v14728_v19 }
 0x7e4   : > { %5223 = vmatprep.subr.bf16.mxu1 %v14733_v6  ;;  %v14748_v6 = vld [vmem:[#allocation13 + $0x30] sm:$0xff]  }
 0x7e7   : > { %5224 = vmatpush1.bf16.msra.mxu1 %v14731_v2 }
 0x7ea   : > { %4992 = vmatmul.mubr.bf16.gmra.mrb[80].mxu1 %v17409_v14 }
 0x7eb   : > { %5001 = vmatprep.mubr.bf16.mxu1 %v18750_v15 }
 0x7f2   : > { %5002 = vmatmul.mubr.bf16.gmra.mrb[84].mxu1 %v17404_v0 }
 0x7f3   : > { %5011 = vmatprep.mubr.bf16.mxu1 %v18750_v15 }
 0x7fa   : > { %5012 = vmatmul.mubr.bf16.gmra.mrb[88].mxu1 %v17439_v42 }
 0x7fb   : > { %5021 = vmatprep.mubr.bf16.mxu1 %v18750_v15 }
 0x802   : > { %5022 = vmatmul.mubr.bf16.gmra.mrb[92].mxu1 %v17434_v9 }
 0x803   : > { %5031 = vmatprep.mubr.bf16.mxu1 %v18750_v15 }
 0x80a   : > { %5032 = vmatmul.mubr.bf16.gmra.mrb[96].mxu1 %v17469_v1 }
 0x80b   : > { %5041 = vmatprep.mubr.bf16.mxu1 %v18750_v15 }
 0x812   : > { %5042 = vmatmul.mubr.bf16.gmra.mrb[100].mxu1 %v17464_v27 }
 0x813   : > { %5051 = vmatprep.mubr.bf16.mxu1 %v18750_v15 }
 0x81a   : > { %5052 = vmatmul.mubr.bf16.gmra.mrb[104].mxu1 %v17499_v53 }
 0x81b   : > { %5061 = vmatprep.mubr.bf16.mxu1 %v18750_v15 }
 0x822   : > { %5062 = vmatmul.mubr.bf16.gmra.mrb[108].mxu1 %v17494_v33 }
 0x823   : > { %5071 = vmatprep.mubr.bf16.mxu1 %v18750_v15 }
 0x82a   : > { %5072 = vmatmul.mubr.bf16.gmra.mrb[112].mxu1 %v17529_v3 }
 0x82b   : > { %5081 = vmatprep.mubr.bf16.mxu1 %v18750_v15 }
 0x832   : > { %5082 = vmatmul.mubr.bf16.gmra.mrb[116].mxu1 %v17524_v49 }
 0x833   : > { %5091 = vmatprep.mubr.bf16.mxu1 %v18750_v15 }
 0x83a   : > { %5092 = vmatmul.mubr.bf16.gmra.mrb[120].mxu1 %v17559_v54 }
 0x83b   : > { %5101 = vmatprep.mubr.bf16.mxu1 %v18750_v15 }
 0x842   : > { %5102 = vmatmul.mubr.bf16.gmra.mrb[124].mxu1 %v17554_v29 }
 0x843   : > { %5241 = vmatprep.mubr.bf16.mxu1 %v18750_v15 }
 0x84a   : > { %5242 = vmatmul.mubr.bf16.vlgmr.msra.gmra.mrb[64].mxu1 %v17379_v56  ;;  %v14741_v56 = vld [vmem:[#allocation13 + $0x78] sm:$0xff]  }
 0x84b   : > { %5251 = vmatprep.mubr.bf16.mxu1 %v18750_v15 }
 0x852   : > { %5252 = vmatmul.mubr.bf16.gmra.mrb[68].mxu1 %v17374_v35  ;;  %v14740_v35 = vld [vmem:[#allocation13 + $0x70] sm:$0xff]  }
 0x853   : > { %5261 = vmatprep.mubr.bf16.mxu1 %v18750_v15  ;;  %13560 = vmatprep.subr.bf16.mxu0 %v14740_v35 }
 0x854   : > { %13561 = vmatpush3.bf16.msra.mxu0 %v14740_v35 }
 0x855   : > { %13562 = vmatprep.subr.bf16.mxu0 %v14741_v56 }
 0x858   : > { %13563 = vmatpush3.bf16.msra.mxu0 %v14741_v56 }
 0x85a   : > { %5262 = vmatmul.mubr.bf16.gmra.mrb[72].mxu1 %v17409_v14  ;;  %v17648_v14 = vld [vmem:[#allocation11] sm:$0x3] }
 0x85b   : > { %5271 = vmatprep.mubr.bf16.mxu1 %v18750_v15 }
 0x862   : > { %5272 = vmatmul.mubr.bf16.gmra.mrb[76].mxu1 %v17404_v0  ;;  %v14742_v0 = vld [vmem:[#allocation13] sm:$0xff]  }
 0x863   : > { %5281 = vmatprep.mubr.bf16.mxu1 %v18750_v15  ;;  %13596 = vmatprep.subr.bf16.mxu0 %v14742_v0 }
 0x86a   : > { %5282 = vmatmul.mubr.bf16.gmra.mrb[80].mxu1 %v17439_v42 }
 0x86b   : > { %5291 = vmatprep.mubr.bf16.mxu1 %v18750_v15 }
 0x872   : > { %5292 = vmatmul.mubr.bf16.gmra.mrb[84].mxu1 %v17434_v9  ;;  %v18797_v9 = vld [vmem:[#allocation41_spill] sm:$0xff] }
 0x873   : > { %5301 = vmatprep.mubr.bf16.mxu1 %v18750_v15  ;;  %v17652_v42 = vrot.slane %v17648_v14, %v18797_v9  ;;  %v14751_v9 = vld [vmem:[#allocation13 + $0x88] sm:$0xff]  }
 0x87a   : > { %5302 = vmatmul.mubr.bf16.gmra.mrb[88].mxu1 %v17469_v1 }
 0x87b   : > { %5311 = vmatprep.mubr.bf16.mxu1 %v18750_v15 }
 0x882   : > { %5312 = vmatmul.mubr.bf16.gmra.mrb[92].mxu1 %v17464_v27 }
 0x883   : > { %5321 = vmatprep.mubr.bf16.mxu1 %v18750_v15 }
 0x88a   : > { %5322 = vmatmul.mubr.bf16.gmra.mrb[96].mxu1 %v17499_v53 }
 0x88b   : > { %5331 = vmatprep.mubr.bf16.mxu1 %v18750_v15 }
 0x892   : > { %5332 = vmatmul.mubr.bf16.gmra.mrb[100].mxu1 %v17494_v33 }
 0x893   : > { %5341 = vmatprep.mubr.bf16.mxu1 %v18750_v15 }
 0x89a   : > { %5342 = vmatmul.mubr.bf16.gmra.mrb[104].mxu1 %v17529_v3 }
 0x89b   : > { %5351 = vmatprep.mubr.bf16.mxu1 %v18750_v15 }
 0x8a2   : > { %5352 = vmatmul.mubr.bf16.gmra.mrb[108].mxu1 %v17524_v49 }
 0x8a3   : > { %5361 = vmatprep.mubr.bf16.mxu1 %v18750_v15 }
 0x8aa   : > { %5362 = vmatmul.mubr.bf16.gmra.mrb[112].mxu1 %v17559_v54 }
 0x8ab   : > { %5371 = vmatprep.mubr.bf16.mxu1 %v18750_v15 }
 0x8b2   : > { %5372 = vmatmul.mubr.bf16.gmra.mrb[116].mxu1 %v17554_v29 }
 0x8b3   : > { %5381 = vmatprep.mubr.bf16.mxu1 %v18750_v15 }
 0x8ba   : > { %5382 = vmatmul.mubr.bf16.gmra.mrb[120].mxu1 %v17581_v5 }
 0x8bb   : > { %5391 = vmatprep.mubr.bf16.mxu1 %v18750_v15 }
 0x8c2   : > { %5392 = vmatmul.mubr.bf16.gmra.mrb[124].mxu1 %v17579_v22 }
 0x8c3   : > { %6707 = vmatprep.mubr.bf16.mxu1 %v18750_v15 }
 0x91d   : > { %v5243_v27 = vpop.f32.mrb[64].mxu1 }
 0x91e   : > { %v5478_v1 = vadd.f32 %v17652_v42, %v5243_v27  ;;  %v17655_v33 = vpop.f32.mrb[65].mxu1  ;;  %v17705_v27 = vld [vmem:[#allocation13 + $0x80] sm:$0xff]  }
 0x91f   : > { %v5247_v53 = vpop.f32.mrb[66].mxu1 }
 0x920   : > { %v5480_v49 = vadd.f32 %v17652_v42, %v5247_v53  ;;  %v17658_v3 = vpop.f32.mrb[67].mxu1  ;;  %v5542_v29 = vmax.f32 %v5478_v1, 0.0 }
 0x922   : > { %v5543_v54 = vmax.f32 %v5480_v49, 0.0 }
 0x924   : > { %v17660_v50 = vpack.c.bf16 %v5543_v54, %v5542_v29 }
 0x925   : > { %v5253_v10 = vpop.f32.mrb[68].mxu1 }
 0x926   : > { %v5482_v18 = vadd.f32 %v17652_v42, %v5253_v10  ;;  %v17663_v20 = vpop.f32.mrb[69].mxu1  ;;  %13564 = vmatprep.mubr.bf16.mxu0 %v17660_v50 }
 0x927   : > { %v5257_v45 = vpop.f32.mrb[70].mxu1 }
 0x928   : > { %v5484_v60 = vadd.f32 %v17652_v42, %v5257_v45  ;;  %v17667_v24 = vpop.f32.mrb[71].mxu1  ;;  %v5544_v34 = vmax.f32 %v5482_v18, 0.0 }
 0x92a   : > { %v5545_v4 = vmax.f32 %v5484_v60, 0.0 }
 0x92c   : > { %v17669_v61 = vpack.c.bf16 %v5545_v4, %v5544_v34 }
 0x92d   : > { %v5263_v25 = vpop.f32.mrb[72].mxu1 }
 0x92e   : > { %v5486_v31 = vadd.f32 %v17652_v42, %v5263_v25  ;;  %v17672_v52 = vpop.f32.mrb[73].mxu1  ;;  %13565 = vmatmul.mubr.bf16.vlgmr.msra.gmra.mrb[128].mxu0 %v17669_v61 }
 0x92f   : > { %v5267_v41 = vpop.f32.mrb[74].mxu1  ;;  %13597 = vmatpush3.bf16.msra.mxu0 %v14742_v0 }
 0x930   : > { %v5488_v57 = vadd.f32 %v17652_v42, %v5267_v41  ;;  %v17676_v16 = vpop.f32.mrb[75].mxu1  ;;  %13598 = vmatprep.subr.bf16.mxu0 %v14743_v63  ;;  %v5546_v23 = vmax.f32 %v5486_v31, 0.0 }
 0x932   : > { %v5547_v17 = vmax.f32 %v5488_v57, 0.0 }
 0x933   : > { %13599 = vmatpush3.bf16.msra.mxu0 %v14743_v63 }
 0x934   : > { %v17678_v48 = vpack.c.bf16 %v5547_v17, %v5546_v23  ;;  %13600 = vmatprep.subr.bf16.mxu0 %v14744_v37 }
 0x935   : > { %v5273_v55 = vpop.f32.mrb[76].mxu1 }
 0x936   : > { %v5490_v7 = vadd.f32 %v17652_v42, %v5273_v55  ;;  %v17681_v22 = vpop.f32.mrb[77].mxu1  ;;  %13568 = vmatprep.mubr.bf16.mxu0 %v17678_v48 }
 0x937   : > { %v5277_v5 = vpop.f32.mrb[78].mxu1  ;;  %13601 = vmatpush3.bf16.msra.mxu0 %v14744_v37 }
 0x938   : > { %v5492_v43 = vadd.f32 %v17652_v42, %v5277_v5  ;;  %v17685_v38 = vpop.f32.mrb[79].mxu1  ;;  %13602 = vmatprep.subr.bf16.mxu0 %v14745_v28  ;;  %v5548_v11 = vmax.f32 %v5490_v7, 0.0 }
 0x93a   : > { %v5549_v21 = vmax.f32 %v5492_v43, 0.0 }
 0x93b   : > { %13603 = vmatpush3.bf16.msra.mxu0 %v14745_v28 }
 0x93c   : > { %v17687_v40 = vpack.c.bf16 %v5549_v21, %v5548_v11  ;;  %13604 = vmatprep.subr.bf16.mxu0 %v14746_v51 }
 0x93d   : > { %v5283_v62 = vpop.f32.mrb[80].mxu1 }
 0x93e   : > { %v5494_v58 = vadd.f32 %v17652_v42, %v5283_v62  ;;  %v17690_v44 = vpop.f32.mrb[81].mxu1  ;;  %13569 = vmatmul.mubr.bf16.gmra.mrb[132].mxu0 %v17687_v40 }
 0x93f   : > { %v5287_v8 = vpop.f32.mrb[82].mxu1  ;;  %13605 = vmatpush3.bf16.msra.mxu0 %v14746_v51 }
 0x940   : > { %v5496_v30 = vadd.f32 %v17652_v42, %v5287_v8  ;;  %v17694_v19 = vpop.f32.mrb[83].mxu1  ;;  %13606 = vmatprep.subr.bf16.mxu0 %v14747_v59  ;;  %v5550_v36 = vmax.f32 %v5494_v58, 0.0 }
 0x942   : > { %v5551_v2 = vmax.f32 %v5496_v30, 0.0 }
 0x943   : > { %13607 = vmatpush3.bf16.msra.mxu0 %v14747_v59 }
 0x944   : > { %v17696_v32 = vpack.c.bf16 %v5551_v2, %v5550_v36  ;;  %13608 = vmatprep.subr.bf16.mxu0 %v14748_v6 }
 0x945   : > { %v5293_v46 = vpop.f32.mrb[84].mxu1 }
 0x946   : > { %v5498_v26 = vadd.f32 %v17652_v42, %v5293_v46  ;;  %v17699_v47 = vpop.f32.mrb[85].mxu1  ;;  %13572 = vmatprep.mubr.bf16.mxu0 %v17696_v32 }
 0x947   : > { %v5297_v35 = vpop.f32.mrb[86].mxu1  ;;  %13609 = vmatpush3.bf16.msra.mxu0 %v14748_v6 }
 0x948   : > { %v5500_v56 = vadd.f32 %v17652_v42, %v5297_v35  ;;  %v17703_v0 = vpop.f32.mrb[87].mxu1  ;;  %13610 = vmatprep.subr.bf16.mxu0 %v14749_v39  ;;  %v5552_v1 = vmax.f32 %v5498_v26, 0.0 }
 0x94a   : > { %v5553_v53 = vmax.f32 %v5500_v56, 0.0 }
 0x94b   : > { %13611 = vmatpush3.bf16.msra.mxu0 %v14749_v39 }
 0x94c   : > { %v17707_v49 = vpack.c.bf16 %v5553_v53, %v5552_v1  ;;  %13644 = vmatprep.subr.bf16.mxu0 %v17705_v27 }
 0x94d   : > { %v5303_v29 = vpop.f32.mrb[88].mxu1 }
 0x94e   : > { %v5502_v54 = vadd.f32 %v17652_v42, %v5303_v29  ;;  %v17711_v10 = vpop.f32.mrb[89].mxu1  ;;  %13573 = vmatmul.mubr.bf16.gmra.mrb[136].mxu0 %v17707_v49 }
 0x94f   : > { %v5307_v18 = vpop.f32.mrb[90].mxu1 }
 0x950   : > { %v5504_v45 = vadd.f32 %v17652_v42, %v5307_v18  ;;  %v17715_v60 = vpop.f32.mrb[91].mxu1  ;;  %v5554_v34 = vmax.f32 %v5502_v54, 0.0 }
 0x952   : > { %v5555_v4 = vmax.f32 %v5504_v45, 0.0 }
 0x954   : > { %v17717_v63 = vpack.c.bf16 %v5555_v4, %v5554_v34 }
 0x955   : > { %v5313_v25 = vpop.f32.mrb[92].mxu1 }
 0x956   : > { %v5506_v31 = vadd.f32 %v17652_v42, %v5313_v25  ;;  %v17720_v41 = vpop.f32.mrb[93].mxu1  ;;  %13576 = vmatprep.mubr.bf16.mxu0 %v17717_v63 }
 0x957   : > { %v5317_v57 = vpop.f32.mrb[94].mxu1 }
 0x958   : > { %v5508_v37 = vadd.f32 %v17652_v42, %v5317_v57  ;;  %v17724_v23 = vpop.f32.mrb[95].mxu1  ;;  %v5556_v17 = vmax.f32 %v5506_v31, 0.0 }
 0x95a   : > { %v5557_v28 = vmax.f32 %v5508_v37, 0.0 }
 0x95c   : > { %v17726_v55 = vpack.c.bf16 %v5557_v28, %v5556_v17 }
 0x95d   : > { %v5323_v7 = vpop.f32.mrb[96].mxu1 }
 0x95e   : > { %v5510_v5 = vadd.f32 %v17652_v42, %v5323_v7  ;;  %v17729_v43 = vpop.f32.mrb[97].mxu1  ;;  %13577 = vmatmul.mubr.bf16.gmra.mrb[140].mxu0 %v17726_v55 }
 0x95f   : > { %v5327_v51 = vpop.f32.mrb[98].mxu1 }
 0x960   : > { %v5512_v11 = vadd.f32 %v17652_v42, %v5327_v51  ;;  %v17733_v21 = vpop.f32.mrb[99].mxu1  ;;  %v5558_v59 = vmax.f32 %v5510_v5, 0.0 }
 0x962   : > { %v5559_v62 = vmax.f32 %v5512_v11, 0.0 }
 0x964   : > { %v17735_v58 = vpack.c.bf16 %v5559_v62, %v5558_v59 }
 0x965   : > { %v5333_v8 = vpop.f32.mrb[100].mxu1 }
 0x966   : > { %v5514_v30 = vadd.f32 %v17652_v42, %v5333_v8  ;;  %v17738_v6 = vpop.f32.mrb[101].mxu1  ;;  %13580 = vmatprep.mubr.bf16.mxu0 %v17735_v58 }
 0x967   : > { %v5337_v36 = vpop.f32.mrb[102].mxu1 }
 0x968   : > { %v5516_v2 = vadd.f32 %v17652_v42, %v5337_v36  ;;  %v17742_v39 = vpop.f32.mrb[103].mxu1  ;;  %v5560_v46 = vmax.f32 %v5514_v30, 0.0 }
 0x96a   : > { %v5561_v26 = vmax.f32 %v5516_v2, 0.0 }
 0x96c   : > { %v17744_v35 = vpack.c.bf16 %v5561_v26, %v5560_v46 }
 0x96d   : > { %v5343_v56 = vpop.f32.mrb[104].mxu1 }
 0x96e   : > { %v5518_v1 = vadd.f32 %v17652_v42, %v5343_v56  ;;  %v17747_v53 = vpop.f32.mrb[105].mxu1  ;;  %13581 = vmatmul.mubr.bf16.gmra.mrb[144].mxu0 %v17744_v35 }
 0x96f   : > { %v5347_v29 = vpop.f32.mrb[106].mxu1 }
 0x970   : > { %v5520_v54 = vadd.f32 %v17652_v42, %v5347_v29  ;;  %v17751_v18 = vpop.f32.mrb[107].mxu1  ;;  %v5562_v45 = vmax.f32 %v5518_v1, 0.0 }
 0x972   : > { %v5563_v34 = vmax.f32 %v5520_v54, 0.0 }
 0x974   : > { %v17753_v4 = vpack.c.bf16 %v5563_v34, %v5562_v45 }
 0x975   : > { %v5353_v25 = vpop.f32.mrb[108].mxu1 }
 0x976   : > { %v5522_v31 = vadd.f32 %v17652_v42, %v5353_v25  ;;  %v17756_v57 = vpop.f32.mrb[109].mxu1  ;;  %13584 = vmatprep.mubr.bf16.mxu0 %v17753_v4 }
 0x977   : > { %v5357_v37 = vpop.f32.mrb[110].mxu1 }
 0x978   : > { %v5524_v17 = vadd.f32 %v17652_v42, %v5357_v37  ;;  %v17760_v28 = vpop.f32.mrb[111].mxu1  ;;  %v5564_v7 = vmax.f32 %v5522_v31, 0.0 }
 0x97a   : > { %v5565_v5 = vmax.f32 %v5524_v17, 0.0 }
 0x97c   : > { %v17762_v51 = vpack.c.bf16 %v5565_v5, %v5564_v7 }
 0x97d   : > { %v5363_v11 = vpop.f32.mrb[112].mxu1 }
 0x97e   : > { %v5526_v59 = vadd.f32 %v17652_v42, %v5363_v11  ;;  %v17765_v62 = vpop.f32.mrb[113].mxu1  ;;  %13585 = vmatmul.mubr.bf16.gmra.mrb[148].mxu0 %v17762_v51 }
 0x97f   : > { %v5367_v8 = vpop.f32.mrb[114].mxu1 }
 0x980   : > { %v5528_v30 = vadd.f32 %v17652_v42, %v5367_v8  ;;  %v17769_v36 = vpop.f32.mrb[115].mxu1  ;;  %v5566_v2 = vmax.f32 %v5526_v59, 0.0 }
 0x982   : > { %v5567_v46 = vmax.f32 %v5528_v30, 0.0 }
 0x984   : > { %v17771_v26 = vpack.c.bf16 %v5567_v46, %v5566_v2 }
 0x985   : > { %v5373_v56 = vpop.f32.mrb[116].mxu1 }
 0x986   : > { %v5530_v1 = vadd.f32 %v17652_v42, %v5373_v56  ;;  %v17774_v29 = vpop.f32.mrb[117].mxu1  ;;  %13588 = vmatprep.mubr.bf16.mxu0 %v17771_v26 }
 0x987   : > { %v5377_v54 = vpop.f32.mrb[118].mxu1 }
 0x988   : > { %v5532_v45 = vadd.f32 %v17652_v42, %v5377_v54  ;;  %v17778_v34 = vpop.f32.mrb[119].mxu1  ;;  %v5568_v25 = vmax.f32 %v5530_v1, 0.0 }
 0x98a   : > { %v5569_v31 = vmax.f32 %v5532_v45, 0.0 }
 0x98c   : > { %v17780_v37 = vpack.c.bf16 %v5569_v31, %v5568_v25 }
 0x98d   : > { %v5383_v17 = vpop.f32.mrb[120].mxu1 }
 0x98e   : > { %v5534_v7 = vadd.f32 %v17652_v42, %v5383_v17  ;;  %v17783_v5 = vpop.f32.mrb[121].mxu1  ;;  %13589 = vmatmul.mubr.bf16.gmra.mrb[152].mxu0 %v17780_v37 }
 0x98f   : > { %v5387_v11 = vpop.f32.mrb[122].mxu1 }
 0x990   : > { %v5536_v59 = vadd.f32 %v17652_v42, %v5387_v11  ;;  %v17787_v8 = vpop.f32.mrb[123].mxu1  ;;  %v5570_v30 = vmax.f32 %v5534_v7, 0.0  ;;  %v14758_v7 = vld [vmem:[#allocation16 + $0x100] ss:$16 sps:$4 sm:$0xff]  }
 0x992   : > { %v5571_v2 = vmax.f32 %v5536_v59, 0.0  ;;  %v14760_v59 = vld [vmem:[#allocation16 + $0x104] ss:$16 sps:$4 sm:$0xff]  }
 0x993   : > { %6675 = vmatprep.subr.bf16.mxu1 %v14760_v59  ;;  %v14775_v59 = vld [vmem:[#allocation16 + $0x1a4] ss:$16 sps:$4 sm:$0xff]  }
 0x994   : > { %v17789_v46 = vpack.c.bf16 %v5571_v2, %v5570_v30  ;;  %v14763_v30 = vld [vmem:[#allocation16 + $0x124] ss:$16 sps:$4 sm:$0xff]   ;;  %6676 = vmatpush1.bf16.msra.mxu1 %v14758_v7  ;;  %v14761_v2 = vld [vmem:[#allocation16 + $0x120] ss:$16 sps:$4 sm:$0xff]  }
 0x995   : > { %v5393_v56 = vpop.f32.mrb[124].mxu1  ;;  %6677 = vmatprep.subr.bf16.mxu1 %v14763_v30  ;;  %v14770_v7 = vld [vmem:[#allocation16 + $0x180] ss:$16 sps:$4 sm:$0xff]   ;;  %v14778_v30 = vld [vmem:[#allocation16 + $0x1c4] ss:$16 sps:$4 sm:$0xff]  }
 0x996   : > { %v5538_v1 = vadd.f32 %v17652_v42, %v5393_v56  ;;  %v17792_v54 = vpop.f32.mrb[125].mxu1  ;;  %13592 = vmatprep.mubr.bf16.mxu0 %v17789_v46  ;;  %v14766_v56 = vld [vmem:[#allocation16 + $0x144] ss:$16 sps:$4 sm:$0xff]  }
 0x997   : > { %v5397_v45 = vpop.f32.mrb[126].mxu1 }
 0x998   : > { %v5540_v25 = vadd.f32 %v17652_v42, %v5397_v45  ;;  %v17796_v31 = vpop.f32.mrb[127].mxu1  ;;  %v5572_v17 = vmax.f32 %v5538_v1, 0.0  ;;  %6678 = vmatpush1.bf16.msra.mxu1 %v14761_v2  ;;  %v14764_v42 = vld [vmem:[#allocation16 + $0x140] ss:$16 sps:$4 sm:$0xff]   ;;  %v14769_v1 = vld [vmem:[#allocation16 + $0x164] ss:$16 sps:$4 sm:$0xff]  }
 0x999   : > { %6679 = vmatprep.subr.bf16.mxu1 %v14766_v56  ;;  %v14752_v45 = vld [vmem:[#allocation13 + $0x90] sm:$0xff]  }
 0x99a   : > { %v5573_v11 = vmax.f32 %v5540_v25, 0.0  ;;  %v14767_v25 = vld [vmem:[#allocation16 + $0x160] ss:$16 sps:$4 sm:$0xff]  }
 0x99b   : > { %v14776_v2 = vld [vmem:[#allocation16 + $0x1c0] ss:$16 sps:$4 sm:$0xff]  }
 0x99c   : > { %v17798_v12 = vpack.c.bf16 %v5573_v11, %v5572_v17  ;;  %6680 = vmatpush1.bf16.msra.mxu1 %v14764_v42  ;;  %v14772_v17 = vld [vmem:[#allocation16 + $0x184] ss:$16 sps:$4 sm:$0xff]   ;;  %v14779_v42 = vld [vmem:[#allocation16 + $0x1e0] ss:$16 sps:$4 sm:$0xff]  }
 0x99d   : > { %6681 = vmatprep.subr.bf16.mxu1 %v14769_v1  ;;  %v14753_v11 = vld [vmem:[#allocation13 + $0x98] sm:$0xff]   ;;  %v14756_v56 = vld [vmem:[#allocation13 + $0xb0] sm:$0xff]  }
 0x99e   : > { %13593 = vmatmul.mubr.bf16.gmra.mrb[156].mxu0 %v17798_v12  ;;  %v14757_v1 = vld [vmem:[#allocation13 + $0xb8] sm:$0xff]  }
 0x99f   : > { %13612 = vmatprep.mubr.bf16.mxu0 %v18750_v15 }
 0x9a0   : > { %6682 = vmatpush1.bf16.msra.mxu1 %v14767_v25 }
 0x9a1   : > { %6683 = vmatprep.subr.bf16.mxu1 %v14772_v17 }
 0x9a4   : > { %6684 = vmatpush1.bf16.msra.mxu1 %v14770_v7 }
 0x9a5   : > { %6685 = vmatprep.subr.bf16.mxu1 %v14775_v59 }
 0x9a6   : > { %13613 = vmatmul.mubr.bf16.vlgmr.msra.gmra.mrb[128].mxu0 %v18750_v15 }
 0x9a7   : > { %13616 = vmatprep.mubr.bf16.mxu0 %v17660_v50  ;;  %13645 = vmatpush3.bf16.msra.mxu0 %v17705_v27  ;;  %v14754_v50 = vld [vmem:[#allocation13 + $0xa0] sm:$0xff]  }
 0x9a8   : > { %13646 = vmatprep.subr.bf16.mxu0 %v14751_v9  ;;  %v14773_v27 = vld [vmem:[#allocation16 + $0x1a0] ss:$16 sps:$4 sm:$0xff]  }
 0x9a9   : > { %6686 = vmatpush1.bf16.msra.mxu1 %v14773_v27 }
 0x9aa   : > { %6687 = vmatprep.subr.bf16.mxu1 %v14778_v30 }
 0x9ab   : > { %13647 = vmatpush3.bf16.msra.mxu0 %v14751_v9  ;;  %v14755_v9 = vld [vmem:[#allocation13 + $0xa8] sm:$0xff]  }
 0x9ac   : > { %13648 = vmatprep.subr.bf16.mxu0 %v14752_v45 }
 0x9ad   : > { %6688 = vmatpush1.bf16.msra.mxu1 %v14776_v2 }
 0x9ae   : > { %13617 = vmatmul.mubr.bf16.gmra.mrb[132].mxu0 %v17669_v61  ;;  %v14781_v61 = vld [vmem:[#allocation16 + $0x1e4] ss:$16 sps:$4 sm:$0xff]  }
 0x9af   : > { %13620 = vmatprep.mubr.bf16.mxu0 %v17678_v48  ;;  %13649 = vmatpush3.bf16.msra.mxu0 %v14752_v45 }
 0x9b0   : > { %13650 = vmatprep.subr.bf16.mxu0 %v14753_v11  ;;  %6689 = vmatprep.subr.bf16.mxu1 %v14781_v61 }
 0x9b1   : > { %6690 = vmatpush1.bf16.msra.mxu1 %v14779_v42 }
 0x9b3   : > { %13651 = vmatpush3.bf16.msra.mxu0 %v14753_v11 }
 0x9b4   : > { %13652 = vmatprep.subr.bf16.mxu0 %v14754_v50 }
 0x9b6   : > { %13621 = vmatmul.mubr.bf16.gmra.mrb[136].mxu0 %v17687_v40 }
 0x9b7   : > { %13624 = vmatprep.mubr.bf16.mxu0 %v17696_v32  ;;  %13653 = vmatpush3.bf16.msra.mxu0 %v14754_v50 }
 0x9b8   : > { %13654 = vmatprep.subr.bf16.mxu0 %v14755_v9 }
 0x9bb   : > { %13655 = vmatpush3.bf16.msra.mxu0 %v14755_v9 }
 0x9bc   : > { %13656 = vmatprep.subr.bf16.mxu0 %v14756_v56 }
 0x9be   : > { %13625 = vmatmul.mubr.bf16.gmra.mrb[140].mxu0 %v17707_v49 }
 0x9bf   : > { %13628 = vmatprep.mubr.bf16.mxu0 %v17717_v63  ;;  %13657 = vmatpush3.bf16.msra.mxu0 %v14756_v56 }
 0x9c0   : > { %13658 = vmatprep.subr.bf16.mxu0 %v14757_v1 }
 0x9c3   : > { %13659 = vmatpush3.bf16.msra.mxu0 %v14757_v1 }
 0x9c6   : > { %13629 = vmatmul.mubr.bf16.gmra.mrb[144].mxu0 %v17726_v55 }
 0x9c7   : > { %13632 = vmatprep.mubr.bf16.mxu0 %v17735_v58 }
 0x9ce   : > { %13633 = vmatmul.mubr.bf16.gmra.mrb[148].mxu0 %v17744_v35 }
 0x9cf   : > { %13636 = vmatprep.mubr.bf16.mxu0 %v17753_v4 }
 0x9d6   : > { %13637 = vmatmul.mubr.bf16.gmra.mrb[152].mxu0 %v17762_v51 }
 0x9d7   : > { %13640 = vmatprep.mubr.bf16.mxu0 %v17771_v26 }
 0x9de   : > { %13641 = vmatmul.mubr.bf16.gmra.mrb[156].mxu0 %v17780_v37 }
 0x9df   : > { %13660 = vmatprep.mubr.bf16.mxu0 %v17678_v48  ;;  %v14784_v48 = vld [vmem:[#allocation16 + $0x10c] ss:$16 sps:$4 sm:$0xff]  }
 0x9e0   : > { %6788 = vmatprep.subr.bf16.mxu1 %v14784_v48 }
 0x9e6   : > { %13661 = vmatmul.mubr.bf16.vlgmr.msra.gmra.mrb[128].mxu0 %v17687_v40  ;;  %v17834_v40 = vld [vmem:[#allocation14] ss:$0 sm:$0xff] }
 0x9e7   : > { %13664 = vmatprep.mubr.bf16.mxu0 %v17696_v32  ;;  %v17838_v32 = vrot.slane %v17648_v14, %v17336_v13 }
 0x9e9   : > { %v5485_v45 = vadd.f32 %v17838_v32, %v17667_v24  ;;  %v5481_v11 = vadd.f32 %v17838_v32, %v17658_v3  ;;  %v5491_v1 = vadd.f32 %v17838_v32, %v17681_v22 }
 0x9ee   : > { %13665 = vmatmul.mubr.bf16.gmra.mrb[132].mxu0 %v17707_v49 }
 0x9ef   : > { %13668 = vmatprep.mubr.bf16.mxu0 %v17717_v63 }
 0x9f6   : > { %13669 = vmatmul.mubr.bf16.gmra.mrb[136].mxu0 %v17726_v55 }
 0x9f7   : > { %13672 = vmatprep.mubr.bf16.mxu0 %v17735_v58 }
 0x9fe   : > { %13673 = vmatmul.mubr.bf16.gmra.mrb[140].mxu0 %v17744_v35 }
 0x9ff   : > { %13676 = vmatprep.mubr.bf16.mxu0 %v17753_v4 }
 0xa06   : > { %13677 = vmatmul.mubr.bf16.gmra.mrb[144].mxu0 %v17762_v51 }
 0xa07   : > { %13680 = vmatprep.mubr.bf16.mxu0 %v17771_v26 }
 0xa0e   : > { %13681 = vmatmul.mubr.bf16.gmra.mrb[148].mxu0 %v17780_v37  ;;  %v5479_v37 = vadd.f32 %v17838_v32, %v17655_v33 }
 0xa0f   : > { %13684 = vmatprep.mubr.bf16.mxu0 %v17789_v46 }
 0xa16   : > { %13685 = vmatmul.mubr.bf16.gmra.mrb[152].mxu0 %v17798_v12  ;;  %v5483_v12 = vadd.f32 %v17838_v32, %v17663_v20 }
 0xa17   : > { %13688 = vmatprep.mubr.bf16.mxu0 %v18750_v15 }
 0xa1e   : > { %13689 = vmatmul.mubr.bf16.gmra.mrb[156].mxu0 %v18750_v15 }
 0xab9   : > { %v13662_v49 = vpop.f32.mrb[128].mxu0 }
 0xaba   : > { %v6308_v63 = vadd.f32 %v13662_v49, %v17834_v40  ;;  %v6140_v55 = vpop.f32.mrb[129].mxu0 }
 0xabb   : > { %v6306_v58 = vadd.f32 %v17834_v40, %v6140_v55  ;;  %v13663_v35 = vpop.f32.mrb[130].mxu0 }
 0xabc   : > { %v6340_v4 = vmax.f32 %v6308_v63, 0.0  ;;  %v6309_v51 = vadd.f32 %v13663_v35, %v17834_v40  ;;  %v6143_v26 = vpop.f32.mrb[131].mxu0  ;;  %v14782_v63 = vld [vmem:[#allocation16 + $0x108] ss:$16 sps:$4 sm:$0xff]  }
 0xabd   : > { %v6338_v46 = vmax.f32 %v6306_v58, 0.0  ;;  %v6307_v14 = vadd.f32 %v17834_v40, %v6143_v26  ;;  %v5487_v58 = vadd.f32 %v17838_v32, %v17672_v52  ;;  %v5493_v26 = vadd.f32 %v17838_v32, %v17685_v38  ;;  %v14785_v52 = vld [vmem:[#allocation16 + $0x128] ss:$16 sps:$4 sm:$0xff]  }
 0xabe   : > { %v6372_v25 = vadd.f32 %v6340_v4, %v5483_v12  ;;  %v6341_v17 = vmax.f32 %v6309_v51, 0.0  ;;  %v14787_v51 = vld [vmem:[#allocation16 + $0x12c] ss:$16 sps:$4 sm:$0xff]  }
 0xabf   : > { %v6370_v7 = vadd.f32 %v6338_v46, %v5479_v37  ;;  %v6339_v20 = vmax.f32 %v6307_v14, 0.0  ;;  %v5489_v46 = vadd.f32 %v17838_v32, %v17676_v16 }
 0xac0   : > { %v6373_v59 = vadd.f32 %v6341_v17, %v5485_v45  ;;  %v6404_v30 = vmax.f32 %v6372_v25, 0.0 }
 0xac1   : > { %v6371_v50 = vadd.f32 %v6339_v20, %v5481_v11  ;;  %v13666_v27 = vpop.f32.mrb[132].mxu0  ;;  %v6402_v61 = vmax.f32 %v6370_v7, 0.0  ;;  %v14790_v7 = vld [vmem:[#allocation16 + $0x14c] ss:$16 sps:$4 sm:$0xff]  }
 0xac2   : > { %v6405_v9 = vmax.f32 %v6373_v59, 0.0  ;;  %v6312_v33 = vadd.f32 %v13666_v27, %v17834_v40  ;;  %v6156_v2 = vpop.f32.mrb[133].mxu0 }
 0xac3   : > { %v6403_v56 = vmax.f32 %v6371_v50, 0.0  ;;  %v6310_v42 = vadd.f32 %v17834_v40, %v6156_v2  ;;  %v13667_v24 = vpop.f32.mrb[134].mxu0 }
 0xac4   : > { %v6344_v48 = vmax.f32 %v6312_v33, 0.0  ;;  %v6313_v3 = vadd.f32 %v13667_v24, %v17834_v40  ;;  %v6159_v49 = vpop.f32.mrb[135].mxu0  ;;  %v17857_v55 = vpack.c.bf16 %v6405_v9, %v6404_v30  ;;  %v5499_v33 = vadd.f32 %v17838_v32, %v17699_v47  ;;  %v14788_v24 = vld [vmem:[#allocation16 + $0x148] ss:$16 sps:$4 sm:$0xff]  }
 0xac5   : > { %v17861_v35 = vpack.c.bf16 %v6403_v56, %v6402_v61  ;;  %v6342_v12 = vmax.f32 %v6310_v42, 0.0  ;;  %v6311_v4 = vadd.f32 %v17834_v40, %v6159_v49  ;;  %v5501_v47 = vadd.f32 %v17838_v32, %v17703_v0 }
 0xac6   : > { %v6376_v22 = vadd.f32 %v6344_v48, %v5491_v1  ;;  %v6345_v37 = vmax.f32 %v6313_v3, 0.0  ;;  %v5495_v1 = vadd.f32 %v17838_v32, %v17690_v44 }
 0xac7   : > { %v6374_v14 = vadd.f32 %v6342_v12, %v5487_v58  ;;  %v6343_v45 = vmax.f32 %v6311_v4, 0.0  ;;  %6708 = vmatmul.mubr.bf16.vlgmr.msra.gmra.mrb[128].mxu1 %v17861_v35  ;;  %v5497_v4 = vadd.f32 %v17838_v32, %v17694_v19 }
 0xac8   : > { %v6377_v25 = vadd.f32 %v6345_v37, %v5493_v26  ;;  %6789 = vmatpush1.bf16.msra.mxu1 %v14782_v63  ;;  %6717 = vmatprep.mubr.bf16.mxu1 %v18750_v15  ;;  %v6408_v20 = vmax.f32 %v6376_v22, 0.0  ;;  %v14793_v63 = vld [vmem:[#allocation16 + $0x16c] ss:$16 sps:$4 sm:$0xff]   ;;  %v14791_v22 = vld [vmem:[#allocation16 + $0x168] ss:$16 sps:$4 sm:$0xff]  }
 0xac9   : > { %v6375_v17 = vadd.f32 %v6343_v45, %v5489_v46  ;;  %v13670_v11 = vpop.f32.mrb[136].mxu0  ;;  %6790 = vmatprep.subr.bf16.mxu1 %v14787_v51  ;;  %v6406_v27 = vmax.f32 %v6374_v14, 0.0  ;;  %v14796_v14 = vld [vmem:[#allocation16 + $0x18c] ss:$16 sps:$4 sm:$0xff]  }
 0xaca   : > { %v6409_v38 = vmax.f32 %v6377_v25, 0.0  ;;  %v6316_v59 = vadd.f32 %v13670_v11, %v17834_v40  ;;  %v6172_v50 = vpop.f32.mrb[137].mxu0 }
 0xacb   : > { %v6407_v16 = vmax.f32 %v6375_v17, 0.0  ;;  %v6314_v30 = vadd.f32 %v17834_v40, %v6172_v50  ;;  %v13671_v9 = vpop.f32.mrb[138].mxu0 }
 0xacc   : > { %v17874_v2 = vpack.c.bf16 %v6409_v38, %v6408_v20  ;;  %v6348_v61 = vmax.f32 %v6316_v59, 0.0  ;;  %v6317_v56 = vadd.f32 %v13671_v9, %v17834_v40  ;;  %v6175_v42 = vpop.f32.mrb[139].mxu0  ;;  %6791 = vmatpush1.bf16.msra.mxu1 %v14785_v52  ;;  %v5507_v20 = vadd.f32 %v17838_v32, %v17720_v41 }
 0xacd   : > { %v17879_v48 = vpack.c.bf16 %v6407_v16, %v6406_v27  ;;  %v6346_v3 = vmax.f32 %v6314_v30, 0.0  ;;  %v6315_v49 = vadd.f32 %v17834_v40, %v6175_v42  ;;  %6792 = vmatprep.subr.bf16.mxu1 %v14790_v7  ;;  %v14794_v16 = vld [vmem:[#allocation16 + $0x188] ss:$16 sps:$4 sm:$0xff]   ;;  %v5503_v30 = vadd.f32 %v17838_v32, %v17711_v10 }
 0xace   : > { %v6380_v58 = vadd.f32 %v6348_v61, %v5499_v33  ;;  %v6349_v12 = vmax.f32 %v6317_v56, 0.0  ;;  %v14799_v56 = vld [vmem:[#allocation16 + $0x1ac] ss:$16 sps:$4 sm:$0xff]   ;;  %v5509_v41 = vadd.f32 %v17838_v32, %v17724_v23 }
 0xacf   : > { %v6378_v51 = vadd.f32 %v6346_v3, %v5495_v1  ;;  %v6347_v26 = vmax.f32 %v6315_v49, 0.0  ;;  %6718 = vmatmul.mubr.bf16.gmra.mrb[132].mxu1 %v17857_v55  ;;  %v5505_v1 = vadd.f32 %v17838_v32, %v17715_v60 }
 0xad0   : > { %v6381_v44 = vadd.f32 %v6349_v12, %v5501_v47  ;;  %6727 = vmatprep.mubr.bf16.mxu1 %v18750_v15  ;;  %6793 = vmatpush1.bf16.msra.mxu1 %v14788_v24  ;;  %v6412_v45 = vmax.f32 %v6380_v58, 0.0  ;;  %v14802_v12 = vld [vmem:[#allocation16 + $0x1cc] ss:$16 sps:$4 sm:$0xff]  }
 0xad1   : > { %v6379_v37 = vadd.f32 %v6347_v26, %v5497_v4  ;;  %v13674_v46 = vpop.f32.mrb[140].mxu0  ;;  %6794 = vmatprep.subr.bf16.mxu1 %v14793_v63  ;;  %v6410_v17 = vmax.f32 %v6378_v51, 0.0  ;;  %v14797_v63 = vld [vmem:[#allocation16 + $0x1a8] ss:$16 sps:$4 sm:$0xff]  }
 0xad2   : > { %v6413_v0 = vmax.f32 %v6381_v44, 0.0  ;;  %v6320_v25 = vadd.f32 %v13674_v46, %v17834_v40  ;;  %v6188_v52 = vpop.f32.mrb[141].mxu0  ;;  %v5515_v46 = vadd.f32 %v17838_v32, %v17738_v6  ;;  %v5517_v6 = vadd.f32 %v17838_v32, %v17742_v39 }
 0xad3   : > { %v6411_v19 = vmax.f32 %v6379_v37, 0.0  ;;  %v6318_v11 = vadd.f32 %v17834_v40, %v6188_v52  ;;  %v13675_v7 = vpop.f32.mrb[142].mxu0  ;;  %v14800_v52 = vld [vmem:[#allocation16 + $0x1c8] ss:$16 sps:$4 sm:$0xff]  }
 0xad4   : > { %v6352_v38 = vmax.f32 %v6320_v25, 0.0  ;;  %v6321_v59 = vadd.f32 %v13675_v7, %v17834_v40  ;;  %v6191_v50 = vpop.f32.mrb[143].mxu0  ;;  %v17893_v27 = vpack.c.bf16 %v6413_v0, %v6412_v45  ;;  %6795 = vmatpush1.bf16.msra.mxu1 %v14791_v22 }
 0xad5   : > { %v6350_v9 = vmax.f32 %v6318_v11, 0.0  ;;  %v6319_v33 = vadd.f32 %v17834_v40, %v6191_v50  ;;  %v17898_v61 = vpack.c.bf16 %v6411_v19, %v6410_v17  ;;  %6796 = vmatprep.subr.bf16.mxu1 %v14796_v14  ;;  %v5511_v17 = vadd.f32 %v17838_v32, %v17729_v43 }
 0xad6   : > { %v6384_v42 = vadd.f32 %v6352_v38, %v5507_v20  ;;  %v6353_v24 = vmax.f32 %v6321_v59, 0.0  ;;  %v14805_v20 = vld [vmem:[#allocation16 + $0x1ec] ss:$16 sps:$4 sm:$0xff]   ;;  %v5513_v50 = vadd.f32 %v17838_v32, %v17733_v21 }
 0xad7   : > { %v6382_v3 = vadd.f32 %v6350_v9, %v5503_v30  ;;  %v6351_v49 = vmax.f32 %v6319_v33, 0.0  ;;  %6728 = vmatmul.mubr.bf16.gmra.mrb[136].mxu1 %v17898_v61  ;;  %v14803_v9 = vld [vmem:[#allocation16 + $0x1e8] ss:$16 sps:$4 sm:$0xff]  }
 0xad8   : > { %v6385_v10 = vadd.f32 %v6353_v24, %v5509_v41  ;;  %6737 = vmatprep.mubr.bf16.mxu1 %v18750_v15  ;;  %6797 = vmatpush1.bf16.msra.mxu1 %v14794_v16  ;;  %v6416_v4 = vmax.f32 %v6384_v42, 0.0  ;;  %v14808_v41 = vld [vmem:[#allocation16 + $0x4] ss:$16 sps:$4 sm:$0xff]  }
 0xad9   : > { %v6383_v47 = vadd.f32 %v6351_v49, %v5505_v1  ;;  %v13678_v58 = vpop.f32.mrb[144].mxu0  ;;  %6798 = vmatprep.subr.bf16.mxu1 %v14799_v56  ;;  %v6414_v44 = vmax.f32 %v6382_v3, 0.0 }
 0xada   : > { %v6417_v23 = vmax.f32 %v6385_v10, 0.0  ;;  %v6324_v51 = vadd.f32 %v13678_v58, %v17834_v40  ;;  %v6204_v26 = vpop.f32.mrb[145].mxu0 }
 0xadb   : > { %v6415_v60 = vmax.f32 %v6383_v47, 0.0  ;;  %v6322_v22 = vadd.f32 %v17834_v40, %v6204_v26  ;;  %v13679_v37 = vpop.f32.mrb[146].mxu0 }
 0xadc   : > { %v17910_v14 = vpack.c.bf16 %v6417_v23, %v6416_v4  ;;  %v6356_v45 = vmax.f32 %v6324_v51, 0.0  ;;  %v6325_v0 = vadd.f32 %v13679_v37, %v17834_v40  ;;  %v6207_v25 = vpop.f32.mrb[147].mxu0  ;;  %6799 = vmatpush1.bf16.msra.mxu1 %v14797_v63  ;;  %v5523_v63 = vadd.f32 %v17838_v32, %v17756_v57 }
 0xadd   : > { %v17915_v19 = vpack.c.bf16 %v6415_v60, %v6414_v44  ;;  %v6354_v11 = vmax.f32 %v6322_v22, 0.0  ;;  %v6323_v7 = vadd.f32 %v17834_v40, %v6207_v25  ;;  %6800 = vmatprep.subr.bf16.mxu1 %v14802_v12  ;;  %v5519_v23 = vadd.f32 %v17838_v32, %v17747_v53 }
 0xade   : > { %v6388_v38 = vadd.f32 %v6356_v45, %v5515_v46  ;;  %v6357_v59 = vmax.f32 %v6325_v0, 0.0  ;;  %v5525_v60 = vadd.f32 %v17838_v32, %v17760_v28  ;;  %v5521_v37 = vadd.f32 %v17838_v32, %v17751_v18 }
 0xadf   : > { %v6386_v16 = vadd.f32 %v6354_v11, %v5511_v17  ;;  %v6355_v30 = vmax.f32 %v6323_v7, 0.0  ;;  %6738 = vmatmul.mubr.bf16.gmra.mrb[140].mxu1 %v17893_v27  ;;  %v5531_v18 = vadd.f32 %v17838_v32, %v17774_v29  ;;  %v5529_v29 = vadd.f32 %v17838_v32, %v17769_v36 }
 0xae0   : > { %v6389_v43 = vadd.f32 %v6357_v59, %v5517_v6  ;;  %6747 = vmatprep.mubr.bf16.mxu1 %v18750_v15  ;;  %6801 = vmatpush1.bf16.msra.mxu1 %v14800_v52  ;;  %v6420_v42 = vmax.f32 %v6388_v38, 0.0  ;;  %v5539_v36 = vadd.f32 %v17838_v32, %v17792_v54  ;;  %v5537_v54 = vadd.f32 %v17838_v32, %v17787_v8  ;;  %v14806_v8 = vld [vmem:[#allocation16] ss:$16 sps:$4 sm:$0xff]  }
 0xae1   : > { %v6387_v33 = vadd.f32 %v6355_v30, %v5513_v50  ;;  %v13682_v56 = vpop.f32.mrb[148].mxu0  ;;  %6802 = vmatprep.subr.bf16.mxu1 %v14805_v20  ;;  %v6418_v3 = vmax.f32 %v6386_v16, 0.0 }
 0xae2   : > { %v6421_v39 = vmax.f32 %v6389_v43, 0.0  ;;  %v6328_v24 = vadd.f32 %v13682_v56, %v17834_v40  ;;  %v6220_v1 = vpop.f32.mrb[149].mxu0  ;;  %v5527_v43 = vadd.f32 %v17838_v32, %v17765_v62 }
 0xae3   : > { %v6419_v21 = vmax.f32 %v6387_v33, 0.0  ;;  %v6326_v49 = vadd.f32 %v17834_v40, %v6220_v1  ;;  %v13683_v10 = vpop.f32.mrb[150].mxu0 }
 0xae4   : > { %v6360_v47 = vmax.f32 %v6328_v24, 0.0  ;;  %v6329_v58 = vadd.f32 %v13683_v10, %v17834_v40  ;;  %v6223_v12 = vpop.f32.mrb[151].mxu0  ;;  %v17929_v4 = vpack.c.bf16 %v6421_v39, %v6420_v42  ;;  %6803 = vmatpush1.bf16.msra.mxu1 %v14803_v9 }
 0xae5   : > { %v6358_v51 = vmax.f32 %v6326_v49, 0.0  ;;  %v6327_v26 = vadd.f32 %v17834_v40, %v6223_v12  ;;  %v17934_v44 = vpack.c.bf16 %v6419_v21, %v6418_v3  ;;  %7061 = vmatprep.subr.bf16.mxu1 %v14808_v41  ;;  %v5533_v41 = vadd.f32 %v17838_v32, %v17778_v34 }
 0xae6   : > { %v6392_v57 = vadd.f32 %v6360_v47, %v5523_v63  ;;  %v6361_v22 = vmax.f32 %v6329_v58, 0.0 }
 0xae7   : > { %v6390_v46 = vadd.f32 %v6358_v51, %v5519_v23  ;;  %v6359_v45 = vmax.f32 %v6327_v26, 0.0  ;;  %6748 = vmatmul.mubr.bf16.gmra.mrb[144].mxu1 %v17934_v44 }
 0xae8   : > { %v6393_v0 = vadd.f32 %v6361_v22, %v5525_v60  ;;  %6757 = vmatprep.mubr.bf16.mxu1 %v18750_v15  ;;  %v6424_v52 = vmax.f32 %v6392_v57, 0.0  ;;  %v5535_v22 = vadd.f32 %v17838_v32, %v17783_v5 }
 0xae9   : > { %v6391_v53 = vadd.f32 %v6359_v45, %v5521_v37  ;;  %v13686_v25 = vpop.f32.mrb[152].mxu0  ;;  %v6422_v28 = vmax.f32 %v6390_v46, 0.0 }
 0xaea   : > { %v6425_v17 = vmax.f32 %v6393_v0, 0.0  ;;  %v6332_v11 = vadd.f32 %v13686_v25, %v17834_v40  ;;  %v6236_v7 = vpop.f32.mrb[153].mxu0  ;;  %v5541_v0 = vadd.f32 %v17838_v32, %v17796_v31  ;;  %v14811_v31 = vld [vmem:[#allocation16 + $0x24] ss:$16 sps:$4 sm:$0xff]   ;;  %v14809_v32 = vld [vmem:[#allocation16 + $0x20] ss:$16 sps:$4 sm:$0xff]  }
 0xaeb   : > { %v6423_v20 = vmax.f32 %v6391_v53, 0.0  ;;  %v6330_v6 = vadd.f32 %v17834_v40, %v6236_v7  ;;  %v13687_v38 = vpop.f32.mrb[154].mxu0 }
 0xaec   : > { %v17946_v59 = vpack.c.bf16 %v6425_v17, %v6424_v52  ;;  %v6364_v50 = vmax.f32 %v6332_v11, 0.0  ;;  %v6333_v16 = vadd.f32 %v13687_v38, %v17834_v40  ;;  %v6239_v30 = vpop.f32.mrb[155].mxu0 }
 0xaed   : > { %v17951_v9 = vpack.c.bf16 %v6423_v20, %v6422_v28  ;;  %v6362_v33 = vmax.f32 %v6330_v6, 0.0  ;;  %v6331_v56 = vadd.f32 %v17834_v40, %v6239_v30  ;;  %v14815_v30 = vld [vmem:[#allocation16 + $0x60] ss:$16 sps:$4 sm:$0xff]  }
 0xaee   : > { %v6396_v42 = vadd.f32 %v6364_v50, %v5531_v18  ;;  %v6365_v39 = vmax.f32 %v6333_v16, 0.0  ;;  %v14814_v18 = vld [vmem:[#allocation16 + $0x44] ss:$16 sps:$4 sm:$0xff]   ;;  %v14812_v50 = vld [vmem:[#allocation16 + $0x40] ss:$16 sps:$4 sm:$0xff]  }
 0xaef   : > { %v6394_v24 = vadd.f32 %v6362_v33, %v5527_v43  ;;  %v6363_v1 = vmax.f32 %v6331_v56, 0.0  ;;  %6758 = vmatmul.mubr.bf16.gmra.mrb[148].mxu1 %v17929_v4  ;;  %v14817_v16 = vld [vmem:[#allocation16 + $0x64] ss:$16 sps:$4 sm:$0xff]   ;;  %v14821_v56 = vld [vmem:[#allocation16 + $0xa0] ss:$16 sps:$4 sm:$0xff]  }
 0xaf0   : > { %v6397_v3 = vadd.f32 %v6365_v39, %v5533_v41  ;;  %6767 = vmatprep.mubr.bf16.mxu1 %v18750_v15  ;;  %v6428_v49 = vmax.f32 %v6396_v42, 0.0  ;;  %v14820_v43 = vld [vmem:[#allocation16 + $0x84] ss:$16 sps:$4 sm:$0xff]   ;;  %v14827_v39 = vld [vmem:[#allocation16 + $0xe0] ss:$16 sps:$4 sm:$0xff]  }
 0xaf1   : > { %v6395_v62 = vadd.f32 %v6363_v1, %v5529_v29  ;;  %v13690_v21 = vpop.f32.mrb[156].mxu0  ;;  %v6426_v34 = vmax.f32 %v6394_v24, 0.0  ;;  %v14823_v33 = vld [vmem:[#allocation16 + $0xa4] ss:$16 sps:$4 sm:$0xff]   ;;  %v14832_v29 = vld [vmem:[#allocation16 + $0xc] ss:$16 sps:$4 sm:$0xff]  }
 0xaf2   : > { %v6429_v10 = vmax.f32 %v6397_v3, 0.0  ;;  %v6336_v63 = vadd.f32 %v13690_v21, %v17834_v40  ;;  %v6252_v47 = vpop.f32.mrb[157].mxu0  ;;  %v14826_v41 = vld [vmem:[#allocation16 + $0xc4] ss:$16 sps:$4 sm:$0xff]   ;;  %v14838_v24 = vld [vmem:[#allocation16 + $0x4c] ss:$16 sps:$4 sm:$0xff]  }
 0xaf3   : > { %v6427_v58 = vmax.f32 %v6395_v62, 0.0  ;;  %v6334_v12 = vadd.f32 %v17834_v40, %v6252_v47  ;;  %v13691_v23 = vpop.f32.mrb[158].mxu0  ;;  %v14829_v42 = vld [vmem:[#allocation16 + $0xe4] ss:$16 sps:$4 sm:$0xff]   ;;  %v14841_v1 = vld [vmem:[#allocation16 + $0x6c] ss:$16 sps:$4 sm:$0xff]  }
 0xaf4   : > { %v6368_v51 = vmax.f32 %v6336_v63, 0.0  ;;  %v6337_v26 = vadd.f32 %v13691_v23, %v17834_v40  ;;  %v6255_v60 = vpop.f32.mrb[159].mxu0  ;;  %v17965_v57 = vpack.c.bf16 %v6429_v10, %v6428_v49  ;;  %v14839_v3 = vld [vmem:[#allocation16 + $0x68] ss:$16 sps:$4 sm:$0xff]   ;;  %v14844_v62 = vld [vmem:[#allocation16 + $0x8c] ss:$16 sps:$4 sm:$0xff]  }
 0xaf5   : > { %v6366_v37 = vmax.f32 %v6334_v12, 0.0  ;;  %v6335_v46 = vadd.f32 %v17834_v40, %v6255_v60  ;;  %v6446_v45 = vpack.c.bf16 %v6427_v58, %v6426_v34  ;;  %v14842_v21 = vld [vmem:[#allocation16 + $0x88] ss:$16 sps:$4 sm:$0xff]   ;;  %v14847_v49 = vld [vmem:[#allocation16 + $0xac] ss:$16 sps:$4 sm:$0xff]  }
 0xaf6   : > { %v6400_v53 = vadd.f32 %v6368_v51, %v5539_v36  ;;  %v6369_v25 = vmax.f32 %v6337_v26, 0.0  ;;  %v14845_v10 = vld [vmem:[#allocation16 + $0xa8] ss:$16 sps:$4 sm:$0xff]   ;;  %v14850_v63 = vld [vmem:[#allocation16 + $0xcc] ss:$16 sps:$4 sm:$0xff]  }
 0xaf7   : > { %v6398_v52 = vadd.f32 %v6366_v37, %v5535_v22  ;;  %v6367_v17 = vmax.f32 %v6335_v46, 0.0  ;;  %6768 = vmatmul.mubr.bf16.gmra.mrb[152].mxu1 %v6446_v45  ;;  %v14848_v47 = vld [vmem:[#allocation16 + $0xc8] ss:$16 sps:$4 sm:$0xff]   ;;  %v14853_v34 = vld [vmem:[#allocation16 + $0xec] ss:$16 sps:$4 sm:$0xff]  }
 0xaf8   : > { %v6401_v11 = vadd.f32 %v6369_v25, %v5541_v0  ;;  %6777 = vmatprep.mubr.bf16.mxu1 %v18750_v15  ;;  %v6432_v5 = vmax.f32 %v6400_v53, 0.0  ;;  %v14851_v58 = vld [vmem:[#allocation16 + $0xe8] ss:$16 sps:$4 sm:$0xff]   ;;  %v14856_v12 = vld [vmem:[#allocation16 + $0x204] ss:$16 sps:$4 sm:$0xff]  }
 0xaf9   : > { %v6399_v7 = vadd.f32 %v6367_v17, %v5537_v54  ;;  %v6430_v20 = vmax.f32 %v6398_v52, 0.0  ;;  %v14854_v23 = vld [vmem:[#allocation16 + $0x200] ss:$16 sps:$4 sm:$0xff]   ;;  %v14859_v36 = vld [vmem:[#allocation16 + $0x224] ss:$16 sps:$4 sm:$0xff]  }
 0xafa   : > { %v6433_v28 = vmax.f32 %v6401_v11, 0.0  ;;  %v14857_v51 = vld [vmem:[#allocation16 + $0x220] ss:$16 sps:$4 sm:$0xff]   ;;  %v14862_v26 = vld [vmem:[#allocation16 + $0x244] ss:$16 sps:$4 sm:$0xff]  }
 0xafb   : > { %v6431_v40 = vmax.f32 %v6399_v7, 0.0  ;;  %v14860_v60 = vld [vmem:[#allocation16 + $0x240] ss:$16 sps:$4 sm:$0xff]   ;;  %v14868_v37 = vld [vmem:[#allocation16 + $0x284] ss:$16 sps:$4 sm:$0xff]  }
 0xafc   : > { %v17975_v6 = vpack.c.bf16 %v6433_v28, %v6432_v5  ;;  %v14863_v22 = vld [vmem:[#allocation16 + $0x260] ss:$16 sps:$4 sm:$0xff]   ;;  %v14874_v53 = vld [vmem:[#allocation16 + $0x2c4] ss:$16 sps:$4 sm:$0xff]   ;;  %v14880_v17 = vld [vmem:[#allocation16 + $0x20c] ss:$16 sps:$4 sm:$0xff]  }
 0xafd   : > { %v17977_v38 = vpack.c.bf16 %v6431_v40, %v6430_v20  ;;  %v14866_v46 = vld [vmem:[#allocation16 + $0x280] ss:$16 sps:$4 sm:$0xff]   ;;  %v14877_v54 = vld [vmem:[#allocation16 + $0x2e4] ss:$16 sps:$4 sm:$0xff]   ;;  %v14878_v40 = vld [vmem:[#allocation16 + $0x208] ss:$16 sps:$4 sm:$0xff]  }
 0xafe   : > { %v14869_v0 = vld [vmem:[#allocation16 + $0x2a0] ss:$16 sps:$4 sm:$0xff]   ;;  %v14902_v11 = vld [vmem:[#allocation19 + $0x100] ss:$8 sps:$4 sm:$0xff]   ;;  %v14905_v28 = vld [vmem:[#allocation19 + $0x110] ss:$8 sps:$4 sm:$0xff]  }
 0xaff   : > { %6778 = vmatmul.mubr.bf16.gmra.mrb[156].mxu1 %v17965_v57  ;;  %v14872_v25 = vld [vmem:[#allocation16 + $0x2c0] ss:$16 sps:$4 sm:$0xff]  }
 0xb00   : > { %6820 = vmatprep.mubr.bf16.mxu1 %v18750_v15  ;;  %v14875_v52 = vld [vmem:[#allocation16 + $0x2e0] ss:$16 sps:$4 sm:$0xff]  }
 0xb01   : > { %v14904_v7 = vld [vmem:[#allocation19 + $0x104] ss:$8 sps:$4 sm:$0xff]   ;;  %v14907_v5 = vld [vmem:[#allocation19 + $0x114] ss:$8 sps:$4 sm:$0xff]  }
 0xb02   : > { %8129 = vmatprep.subr.bf16.mxu0 %v14904_v7  ;;  %v14910_v20 = vld [vmem:[#allocation19 + $0x124] ss:$8 sps:$4 sm:$0xff]  }
 0xb03   : > { %8130 = vmatpush1.bf16.msra.mxu0 %v14902_v11 }
 0xb04   : > { %8131 = vmatprep.subr.bf16.mxu0 %v14907_v5 }
 0xb07   : > { %6821 = vmatmul.mubr.bf16.vlgmr.msra.gmra.mrb[160].mxu1 %v17861_v35  ;;  %v14818_v35 = vld [vmem:[#allocation16 + $0x80] ss:$16 sps:$4 sm:$0xff]   ;;  %8132 = vmatpush1.bf16.msra.mxu0 %v14905_v28 }
 0xb08   : > { %7062 = vmatpush1.bf16.msra.mxu1 %v14806_v8  ;;  %6830 = vmatprep.mubr.bf16.mxu1 %v18750_v15  ;;  %v14883_v8 = vld [vmem:[#allocation16 + $0x22c] ss:$16 sps:$4 sm:$0xff]  }
 0xb09   : > { %7063 = vmatprep.subr.bf16.mxu1 %v14811_v31  ;;  %v14908_v31 = vld [vmem:[#allocation19 + $0x120] ss:$8 sps:$4 sm:$0xff]   ;;  %8133 = vmatprep.subr.bf16.mxu0 %v14910_v20 }
 0xb0b   : > { %8134 = vmatpush1.bf16.msra.mxu0 %v14908_v31 }
 0xb0c   : > { %7064 = vmatpush1.bf16.msra.mxu1 %v14809_v32  ;;  %v14913_v32 = vld [vmem:[#allocation19 + $0x134] ss:$8 sps:$4 sm:$0xff]  }
 0xb0d   : > { %7065 = vmatprep.subr.bf16.mxu1 %v14814_v18  ;;  %v14881_v18 = vld [vmem:[#allocation16 + $0x228] ss:$16 sps:$4 sm:$0xff]   ;;  %8135 = vmatprep.subr.bf16.mxu0 %v14913_v32 }
 0xb0e   : > { %v14955_v32 = vld [vmem:[#allocation19 + $0x14] ss:$8 sps:$4 sm:$0xff]  }
 0xb0f   : > { %6831 = vmatmul.mubr.bf16.gmra.mrb[164].mxu1 %v17857_v55  ;;  %v14824_v55 = vld [vmem:[#allocation16 + $0xc0] ss:$16 sps:$4 sm:$0xff]  }
 0xb10   : > { %6840 = vmatprep.mubr.bf16.mxu1 %v18750_v15  ;;  %7066 = vmatpush1.bf16.msra.mxu1 %v14812_v50  ;;  %v14886_v50 = vld [vmem:[#allocation16 + $0x24c] ss:$16 sps:$4 sm:$0xff]  }
 0xb11   : > { %7067 = vmatprep.subr.bf16.mxu1 %v14817_v16  ;;  %v14911_v16 = vld [vmem:[#allocation19 + $0x130] ss:$8 sps:$4 sm:$0xff]  }
 0xb12   : > { %8136 = vmatpush1.bf16.msra.mxu0 %v14911_v16 }
 0xb14   : > { %7068 = vmatpush1.bf16.msra.mxu1 %v14815_v30  ;;  %v14916_v30 = vld [vmem:[#allocation19 + $0x144] ss:$8 sps:$4 sm:$0xff]  }
 0xb15   : > { %7069 = vmatprep.subr.bf16.mxu1 %v14820_v43  ;;  %v14884_v43 = vld [vmem:[#allocation16 + $0x248] ss:$16 sps:$4 sm:$0xff]   ;;  %8137 = vmatprep.subr.bf16.mxu0 %v14916_v30 }
 0xb17   : > { %6841 = vmatmul.mubr.bf16.gmra.mrb[168].mxu1 %v17898_v61  ;;  %v14835_v61 = vld [vmem:[#allocation16 + $0x2c] ss:$16 sps:$4 sm:$0xff]  }
 0xb18   : > { %6850 = vmatprep.mubr.bf16.mxu1 %v18750_v15  ;;  %7070 = vmatpush1.bf16.msra.mxu1 %v14818_v35  ;;  %v14889_v35 = vld [vmem:[#allocation16 + $0x26c] ss:$16 sps:$4 sm:$0xff]  }
 0xb19   : > { %7071 = vmatprep.subr.bf16.mxu1 %v14823_v33  ;;  %v14914_v33 = vld [vmem:[#allocation19 + $0x140] ss:$8 sps:$4 sm:$0xff]  }
 0xb1a   : > { %8138 = vmatpush1.bf16.msra.mxu0 %v14914_v33 }
 0xb1c   : > { %7072 = vmatpush1.bf16.msra.mxu1 %v14821_v56  ;;  %v14919_v56 = vld [vmem:[#allocation19 + $0x154] ss:$8 sps:$4 sm:$0xff]  }
 0xb1d   : > { %7073 = vmatprep.subr.bf16.mxu1 %v14826_v41  ;;  %v14887_v41 = vld [vmem:[#allocation16 + $0x268] ss:$16 sps:$4 sm:$0xff]   ;;  %8139 = vmatprep.subr.bf16.mxu0 %v14919_v56 }
 0xb1f   : > { %6851 = vmatmul.mubr.bf16.gmra.mrb[172].mxu1 %v17893_v27  ;;  %v14830_v27 = vld [vmem:[#allocation16 + $0x8] ss:$16 sps:$4 sm:$0xff]  }
 0xb20   : > { %6860 = vmatprep.mubr.bf16.mxu1 %v18750_v15  ;;  %7074 = vmatpush1.bf16.msra.mxu1 %v14824_v55  ;;  %v14892_v55 = vld [vmem:[#allocation16 + $0x28c] ss:$16 sps:$4 sm:$0xff]  }
 0xb21   : > { %7075 = vmatprep.subr.bf16.mxu1 %v14829_v42  ;;  %v14917_v42 = vld [vmem:[#allocation19 + $0x150] ss:$8 sps:$4 sm:$0xff]  }
 0xb22   : > { %8140 = vmatpush1.bf16.msra.mxu0 %v14917_v42 }
 0xb24   : > { %7076 = vmatpush1.bf16.msra.mxu1 %v14827_v39  ;;  %v14922_v39 = vld [vmem:[#allocation19 + $0x164] ss:$8 sps:$4 sm:$0xff]  }
 0xb25   : > { %7174 = vmatprep.subr.bf16.mxu1 %v14832_v29  ;;  %v14890_v29 = vld [vmem:[#allocation16 + $0x288] ss:$16 sps:$4 sm:$0xff]   ;;  %8141 = vmatprep.subr.bf16.mxu0 %v14922_v39 }
 0xb27   : > { %6861 = vmatmul.mubr.bf16.gmra.mrb[176].mxu1 %v17934_v44  ;;  %v14833_v44 = vld [vmem:[#allocation16 + $0x28] ss:$16 sps:$4 sm:$0xff]  }
 0xb28   : > { %6870 = vmatprep.mubr.bf16.mxu1 %v18750_v15 }
 0xb2f   : > { %6871 = vmatmul.mubr.bf16.gmra.mrb[180].mxu1 %v17929_v4  ;;  %v14836_v4 = vld [vmem:[#allocation16 + $0x48] ss:$16 sps:$4 sm:$0xff]  }
 0xb30   : > { %6880 = vmatprep.mubr.bf16.mxu1 %v18750_v15 }
 0xb37   : > { %6881 = vmatmul.mubr.bf16.gmra.mrb[184].mxu1 %v6446_v45  ;;  %v14871_v45 = vld [vmem:[#allocation16 + $0x2a4] ss:$16 sps:$4 sm:$0xff]  }
 0xb38   : > { %6890 = vmatprep.mubr.bf16.mxu1 %v18750_v15 }
 0xb3f   : > { %6891 = vmatmul.mubr.bf16.gmra.mrb[188].mxu1 %v17965_v57  ;;  %v14865_v57 = vld [vmem:[#allocation16 + $0x264] ss:$16 sps:$4 sm:$0xff]  }
 0xb40   : > { %7093 = vmatprep.mubr.bf16.mxu1 %v18750_v15 }
 0xb47   : > { %7094 = vmatmul.mubr.bf16.vlgmr.msra.gmra.mrb[128].mxu1 %v18750_v15 }
 0xb48   : > { %7175 = vmatpush1.bf16.msra.mxu1 %v14830_v27  ;;  %7103 = vmatprep.mubr.bf16.mxu1 %v18750_v15  ;;  %v14895_v27 = vld [vmem:[#allocation16 + $0x2ac] ss:$16 sps:$4 sm:$0xff]  }
 0xb49   : > { %7176 = vmatprep.subr.bf16.mxu1 %v14835_v61  ;;  %v14920_v61 = vld [vmem:[#allocation19 + $0x160] ss:$8 sps:$4 sm:$0xff]  }
 0xb4a   : > { %8142 = vmatpush1.bf16.msra.mxu0 %v14920_v61  ;;  %v14956_v61 = vld [vmem:[#allocation19 + $0x20] ss:$8 sps:$4 sm:$0xff]  }
 0xb4c   : > { %7177 = vmatpush1.bf16.msra.mxu1 %v14833_v44  ;;  %v14925_v44 = vld [vmem:[#allocation19 + $0x174] ss:$8 sps:$4 sm:$0xff]  }
 0xb4d   : > { %7178 = vmatprep.subr.bf16.mxu1 %v14838_v24  ;;  %v14893_v24 = vld [vmem:[#allocation16 + $0x2a8] ss:$16 sps:$4 sm:$0xff]   ;;  %8143 = vmatprep.subr.bf16.mxu0 %v14925_v44 }
 0xb4f   : > { %7104 = vmatmul.mubr.bf16.gmra.mrb[132].mxu1 %v18750_v15 }
 0xb50   : > { %7113 = vmatprep.mubr.bf16.mxu1 %v18750_v15  ;;  %7179 = vmatpush1.bf16.msra.mxu1 %v14836_v4  ;;  %v14898_v4 = vld [vmem:[#allocation16 + $0x2cc] ss:$16 sps:$4 sm:$0xff]  }
 0xb51   : > { %7180 = vmatprep.subr.bf16.mxu1 %v14841_v1  ;;  %v14923_v1 = vld [vmem:[#allocation19 + $0x170] ss:$8 sps:$4 sm:$0xff]  }
 0xb52   : > { %8144 = vmatpush1.bf16.msra.mxu0 %v14923_v1 }
 0xb54   : > { %7181 = vmatpush1.bf16.msra.mxu1 %v14839_v3  ;;  %v14928_v3 = vld [vmem:[#allocation19 + $0x184] ss:$8 sps:$4 sm:$0xff]  }
 0xb55   : > { %7182 = vmatprep.subr.bf16.mxu1 %v14844_v62  ;;  %v14896_v62 = vld [vmem:[#allocation16 + $0x2c8] ss:$16 sps:$4 sm:$0xff]   ;;  %8145 = vmatprep.subr.bf16.mxu0 %v14928_v3 }
 0xb57   : > { %7114 = vmatmul.mubr.bf16.gmra.mrb[136].mxu1 %v17879_v48 }
 0xb58   : > { %7123 = vmatprep.mubr.bf16.mxu1 %v18750_v15  ;;  %7183 = vmatpush1.bf16.msra.mxu1 %v14842_v21  ;;  %v14901_v21 = vld [vmem:[#allocation16 + $0x2ec] ss:$16 sps:$4 sm:$0xff]  }
 0xb59   : > { %7184 = vmatprep.subr.bf16.mxu1 %v14847_v49  ;;  %v14926_v49 = vld [vmem:[#allocation19 + $0x180] ss:$8 sps:$4 sm:$0xff]  }
 0xb5a   : > { %8146 = vmatpush1.bf16.msra.mxu0 %v14926_v49 }
 0xb5c   : > { %7185 = vmatpush1.bf16.msra.mxu1 %v14845_v10  ;;  %v14931_v10 = vld [vmem:[#allocation19 + $0x194] ss:$8 sps:$4 sm:$0xff]  }
 0xb5d   : > { %7186 = vmatprep.subr.bf16.mxu1 %v14850_v63  ;;  %v14899_v63 = vld [vmem:[#allocation16 + $0x2e8] ss:$16 sps:$4 sm:$0xff]   ;;  %8147 = vmatprep.subr.bf16.mxu0 %v14931_v10  ;;  %v14959_v10 = vld [vmem:[#allocation19 + $0x30] ss:$8 sps:$4 sm:$0xff]  }
 0xb5f   : > { %7124 = vmatmul.mubr.bf16.gmra.mrb[140].mxu1 %v17874_v2 }
 0xb60   : > { %7133 = vmatprep.mubr.bf16.mxu1 %v18750_v15  ;;  %7187 = vmatpush1.bf16.msra.mxu1 %v14848_v47  ;;  %v14929_v47 = vld [vmem:[#allocation19 + $0x190] ss:$8 sps:$4 sm:$0xff]  }
 0xb61   : > { %7188 = vmatprep.subr.bf16.mxu1 %v14853_v34  ;;  %v14934_v34 = vld [vmem:[#allocation19 + $0x1a4] ss:$8 sps:$4 sm:$0xff]   ;;  %8148 = vmatpush1.bf16.msra.mxu0 %v14929_v47 }
 0xb62   : > { %8149 = vmatprep.subr.bf16.mxu0 %v14934_v34  ;;  %v14964_v34 = vld [vmem:[#allocation19 + $0x44] ss:$8 sps:$4 sm:$0xff]  }
 0xb64   : > { %7189 = vmatpush1.bf16.msra.mxu1 %v14851_v58  ;;  %v14932_v58 = vld [vmem:[#allocation19 + $0x1a0] ss:$8 sps:$4 sm:$0xff]  }
 0xb65   : > { %7480 = vmatprep.subr.bf16.mxu1 %v14856_v12  ;;  %v14937_v12 = vld [vmem:[#allocation19 + $0x1b4] ss:$8 sps:$4 sm:$0xff]   ;;  %8150 = vmatpush1.bf16.msra.mxu0 %v14932_v58 }
 0xb66   : > { %8151 = vmatprep.subr.bf16.mxu0 %v14937_v12 }
 0xb67   : > { %7134 = vmatmul.mubr.bf16.gmra.mrb[144].mxu1 %v17915_v19 }
 0xb68   : > { %7143 = vmatprep.mubr.bf16.mxu1 %v18750_v15 }
 0xb6f   : > { %7144 = vmatmul.mubr.bf16.gmra.mrb[148].mxu1 %v17910_v14 }
 0xb70   : > { %7153 = vmatprep.mubr.bf16.mxu1 %v18750_v15 }
 0xb77   : > { %7154 = vmatmul.mubr.bf16.gmra.mrb[152].mxu1 %v17951_v9 }
 0xb78   : > { %7163 = vmatprep.mubr.bf16.mxu1 %v18750_v15 }
 0xb7f   : > { %7164 = vmatmul.mubr.bf16.gmra.mrb[156].mxu1 %v17946_v59 }
 0xb80   : > { %7206 = vmatprep.mubr.bf16.mxu1 %v18750_v15 }
 0xb87   : > { %7207 = vmatmul.mubr.bf16.vlgmr.msra.gmra.mrb[160].mxu1 %v18750_v15 }
 0xb88   : > { %7481 = vmatpush1.bf16.msra.mxu1 %v14854_v23  ;;  %7216 = vmatprep.mubr.bf16.mxu1 %v18750_v15  ;;  %v14935_v23 = vld [vmem:[#allocation19 + $0x1b0] ss:$8 sps:$4 sm:$0xff]  }
 0xb89   : > { %7482 = vmatprep.subr.bf16.mxu1 %v14859_v36  ;;  %v14940_v36 = vld [vmem:[#allocation19 + $0x1c4] ss:$8 sps:$4 sm:$0xff]   ;;  %8152 = vmatpush1.bf16.msra.mxu0 %v14935_v23 }
 0xb8a   : > { %8153 = vmatprep.subr.bf16.mxu0 %v14940_v36 }
 0xb8c   : > { %7483 = vmatpush1.bf16.msra.mxu1 %v14857_v51  ;;  %v14938_v51 = vld [vmem:[#allocation19 + $0x1c0] ss:$8 sps:$4 sm:$0xff]  }
 0xb8d   : > { %7484 = vmatprep.subr.bf16.mxu1 %v14862_v26  ;;  %v14943_v26 = vld [vmem:[#allocation19 + $0x1d4] ss:$8 sps:$4 sm:$0xff]   ;;  %8154 = vmatpush1.bf16.msra.mxu0 %v14938_v51 }
 0xb8e   : > { %8155 = vmatprep.subr.bf16.mxu0 %v14943_v26  ;;  %v14962_v26 = vld [vmem:[#allocation19 + $0x40] ss:$8 sps:$4 sm:$0xff]  }
 0xb8f   : > { %7217 = vmatmul.mubr.bf16.gmra.mrb[164].mxu1 %v18750_v15 }
 0xb90   : > { %7226 = vmatprep.mubr.bf16.mxu1 %v18750_v15  ;;  %7485 = vmatpush1.bf16.msra.mxu1 %v14860_v60  ;;  %v14941_v60 = vld [vmem:[#allocation19 + $0x1d0] ss:$8 sps:$4 sm:$0xff]  }
 0xb91   : > { %7486 = vmatprep.subr.bf16.mxu1 %v14865_v57  ;;  %8156 = vmatpush1.bf16.msra.mxu0 %v14941_v60  ;;  %v14946_v57 = vld [vmem:[#allocation19 + $0x1e4] ss:$8 sps:$4 sm:$0xff]  }
 0xb92   : > { %8157 = vmatprep.subr.bf16.mxu0 %v14946_v57 }
 0xb94   : > { %7487 = vmatpush1.bf16.msra.mxu1 %v14863_v22  ;;  %v14944_v22 = vld [vmem:[#allocation19 + $0x1e0] ss:$8 sps:$4 sm:$0xff]  }
 0xb95   : > { %7488 = vmatprep.subr.bf16.mxu1 %v14868_v37  ;;  %8158 = vmatpush1.bf16.msra.mxu0 %v14944_v22  ;;  %v14949_v37 = vld [vmem:[#allocation19 + $0x1f4] ss:$8 sps:$4 sm:$0xff]  }
 0xb96   : > { %8159 = vmatprep.subr.bf16.mxu0 %v14949_v37  ;;  %v14967_v22 = vld [vmem:[#allocation19 + $0x54] ss:$8 sps:$4 sm:$0xff]  }
 0xb97   : > { %7227 = vmatmul.mubr.bf16.gmra.mrb[168].mxu1 %v17879_v48 }
 0xb98   : > { %7236 = vmatprep.mubr.bf16.mxu1 %v18750_v15  ;;  %7489 = vmatpush1.bf16.msra.mxu1 %v14866_v46  ;;  %v14952_v46 = vld [vmem:[#allocation19 + $0x4] ss:$8 sps:$4 sm:$0xff]  }
 0xb99   : > { %7490 = vmatprep.subr.bf16.mxu1 %v14871_v45 }
 0xb9c   : > { %7491 = vmatpush1.bf16.msra.mxu1 %v14869_v0 }
 0xb9d   : > { %7492 = vmatprep.subr.bf16.mxu1 %v14874_v53 }
 0xb9f   : > { %7237 = vmatmul.mubr.bf16.gmra.mrb[172].mxu1 %v17874_v2 }
 0xba0   : > { %7246 = vmatprep.mubr.bf16.mxu1 %v18750_v15  ;;  %7493 = vmatpush1.bf16.msra.mxu1 %v14872_v25 }
 0xba1   : > { %7494 = vmatprep.subr.bf16.mxu1 %v14877_v54 }
 0xba4   : > { %7495 = vmatpush1.bf16.msra.mxu1 %v14875_v52 }
 0xba5   : > { %7593 = vmatprep.subr.bf16.mxu1 %v14880_v17 }
 0xba7   : > { %7247 = vmatmul.mubr.bf16.gmra.mrb[176].mxu1 %v17915_v19 }
 0xba8   : > { %7256 = vmatprep.mubr.bf16.mxu1 %v18750_v15 }
 0xbaf   : > { %7257 = vmatmul.mubr.bf16.gmra.mrb[180].mxu1 %v17910_v14 }
 0xbb0   : > { %7266 = vmatprep.mubr.bf16.mxu1 %v18750_v15 }
 0xbb7   : > { %7267 = vmatmul.mubr.bf16.gmra.mrb[184].mxu1 %v17951_v9 }
 0xbb8   : > { %7276 = vmatprep.mubr.bf16.mxu1 %v18750_v15 }
 0xbbf   : > { %7277 = vmatmul.mubr.bf16.gmra.mrb[188].mxu1 %v17946_v59 }
 0xbc0   : > { %7512 = vmatprep.mubr.bf16.mxu1 %v18750_v15 }
 0xbc7   : > { %7513 = vmatmul.mubr.bf16.vlgmr.msra.gmra.mrb[128].mxu1 %v17879_v48 }
 0xbc8   : > { %7522 = vmatprep.mubr.bf16.mxu1 %v18750_v15  ;;  %7594 = vmatpush1.bf16.msra.mxu1 %v14878_v40  ;;  %v14950_v40 = vld [vmem:[#allocation19] ss:$8 sps:$4 sm:$0xff]  }
 0xbc9   : > { %7595 = vmatprep.subr.bf16.mxu1 %v14883_v8 }
 0xbcc   : > { %7596 = vmatpush1.bf16.msra.mxu1 %v14881_v18 }
 0xbcd   : > { %7597 = vmatprep.subr.bf16.mxu1 %v14886_v50 }
 0xbcf   : > { %7523 = vmatmul.mubr.bf16.gmra.mrb[132].mxu1 %v17874_v2 }
 0xbd0   : > { %7532 = vmatprep.mubr.bf16.mxu1 %v18750_v15  ;;  %7598 = vmatpush1.bf16.msra.mxu1 %v14884_v43 }
 0xbd1   : > { %7599 = vmatprep.subr.bf16.mxu1 %v14889_v35  ;;  %v14953_v35 = vld [vmem:[#allocation19 + $0x10] ss:$8 sps:$4 sm:$0xff]  }
 0xbd4   : > { %7600 = vmatpush1.bf16.msra.mxu1 %v14887_v41  ;;  %v14958_v41 = vld [vmem:[#allocation19 + $0x24] ss:$8 sps:$4 sm:$0xff]  }
 0xbd5   : > { %7601 = vmatprep.subr.bf16.mxu1 %v14892_v55 }
 0xbd7   : > { %7533 = vmatmul.mubr.bf16.gmra.mrb[136].mxu1 %v17915_v19 }
 0xbd8   : > { %7542 = vmatprep.mubr.bf16.mxu1 %v18750_v15  ;;  %7602 = vmatpush1.bf16.msra.mxu1 %v14890_v29 }
 0xbd9   : > { %7603 = vmatprep.subr.bf16.mxu1 %v14895_v27 }
 0xbdc   : > { %7604 = vmatpush1.bf16.msra.mxu1 %v14893_v24 }
 0xbdd   : > { %7605 = vmatprep.subr.bf16.mxu1 %v14898_v4  ;;  %v14961_v4 = vld [vmem:[#allocation19 + $0x34] ss:$8 sps:$4 sm:$0xff]  }
 0xbdf   : > { %7543 = vmatmul.mubr.bf16.gmra.mrb[140].mxu1 %v17910_v14 }
 0xbe0   : > { %7552 = vmatprep.mubr.bf16.mxu1 %v18750_v15  ;;  %7606 = vmatpush1.bf16.msra.mxu1 %v14896_v62 }
 0xbe1   : > { %7607 = vmatprep.subr.bf16.mxu1 %v14901_v21 }
 0xbe4   : > { %7608 = vmatpush1.bf16.msra.mxu1 %v14899_v63 }
 0xbe7   : > { %7553 = vmatmul.mubr.bf16.gmra.mrb[144].mxu1 %v17951_v9 }
 0xbe8   : > { %7562 = vmatprep.mubr.bf16.mxu1 %v18750_v15 }
 0xbef   : > { %7563 = vmatmul.mubr.bf16.gmra.mrb[148].mxu1 %v17946_v59 }
 0xbf0   : > { %7572 = vmatprep.mubr.bf16.mxu1 %v18750_v15 }
 0xbf7   : > { %7573 = vmatmul.mubr.bf16.gmra.mrb[152].mxu1 %v17977_v38 }
 0xbf8   : > { %7582 = vmatprep.mubr.bf16.mxu1 %v18750_v15 }
 0xbff   : > { %7583 = vmatmul.mubr.bf16.gmra.mrb[156].mxu1 %v17975_v6 }
 0xc00   : > { %7625 = vmatprep.mubr.bf16.mxu1 %v18750_v15 }
 0xc07   : > { %7626 = vmatmul.mubr.bf16.vlgmr.msra.gmra.mrb[160].mxu1 %v17879_v48  ;;  %v14947_v48 = vld [vmem:[#allocation19 + $0x1f0] ss:$8 sps:$4 sm:$0xff]  }
 0xc08   : > { %7635 = vmatprep.mubr.bf16.mxu1 %v18750_v15  ;;  %8160 = vmatpush1.bf16.msra.mxu0 %v14947_v48 }
 0xc09   : > { %8402 = vmatprep.subr.bf16.mxu0 %v14952_v46 }
 0xc0f   : > { %7636 = vmatmul.mubr.bf16.gmra.mrb[164].mxu1 %v17874_v2  ;;  %v18059_v2 = vld [vmem:[#allocation17] sm:$0xf] }
 0xc10   : > { %7645 = vmatprep.mubr.bf16.mxu1 %v18750_v15 }
 0xc17   : > { %7646 = vmatmul.mubr.bf16.gmra.mrb[168].mxu1 %v17915_v19 }
 0xc18   : > { %7655 = vmatprep.mubr.bf16.mxu1 %v18750_v15 }
 0xc1f   : > { %7656 = vmatmul.mubr.bf16.gmra.mrb[172].mxu1 %v17910_v14  ;;  %v18798_v14 = vld [vmem:[#allocation41_spill] sm:$0xff] }
 0xc20   : > { %7665 = vmatprep.mubr.bf16.mxu1 %v18750_v15  ;;  %v18063_v19 = vrot.slane %v18059_v2, %v18798_v14 }
 0xc27   : > { %7666 = vmatmul.mubr.bf16.gmra.mrb[176].mxu1 %v17951_v9  ;;  %v18067_v9 = vrot.slane %v18059_v2, %v17336_v13 }
 0xc28   : > { %7675 = vmatprep.mubr.bf16.mxu1 %v18750_v15 }
 0xc2f   : > { %7676 = vmatmul.mubr.bf16.gmra.mrb[180].mxu1 %v17946_v59 }
 0xc30   : > { %7685 = vmatprep.mubr.bf16.mxu1 %v18750_v15 }
 0xc37   : > { %7686 = vmatmul.mubr.bf16.gmra.mrb[184].mxu1 %v17977_v38 }
 0xc38   : > { %7695 = vmatprep.mubr.bf16.mxu1 %v18750_v15 }
 0xc3f   : > { %7696 = vmatmul.mubr.bf16.gmra.mrb[188].mxu1 %v17975_v6 }
 0xc9a   : > { %v7514_v45 = vpop.f32.mrb[128].mxu1 }
 0xc9b   : > { %v7792_v59 = vadd.f32 %v18063_v19, %v7514_v45  ;;  %v7516_v0 = vpop.f32.mrb[129].mxu1 }
 0xc9c   : > { %v7793_v38 = vadd.f32 %v18067_v9, %v7516_v0  ;;  %v7518_v53 = vpop.f32.mrb[130].mxu1  ;;  %v14965_v0 = vld [vmem:[#allocation19 + $0x50] ss:$8 sps:$4 sm:$0xff]  }
 0xc9d   : > { %v7796_v25 = vadd.f32 %v18063_v19, %v7518_v53  ;;  %v7520_v6 = vpop.f32.mrb[131].mxu1  ;;  %v7856_v52 = vmax.f32 %v7792_v59, 0.0 }
 0xc9e   : > { %v7797_v54 = vadd.f32 %v18067_v9, %v7520_v6  ;;  %v7857_v11 = vmax.f32 %v7793_v38, 0.0 }
 0xc9f   : > { %v7858_v17 = vmax.f32 %v7796_v25, 0.0  ;;  %v14970_v25 = vld [vmem:[#allocation19 + $0x64] ss:$8 sps:$4 sm:$0xff]  }
 0xca0   : > { %v7859_v7 = vmax.f32 %v7797_v54, 0.0 }
 0xca1   : > { %v18073_v5 = vpack.c.bf16 %v7858_v17, %v7856_v52 }
 0xca2   : > { %v18075_v28 = vpack.c.bf16 %v7859_v7, %v7857_v11  ;;  %v7524_v20 = vpop.f32.mrb[132].mxu1  ;;  %v14968_v7 = vld [vmem:[#allocation19 + $0x60] ss:$8 sps:$4 sm:$0xff]  }
 0xca3   : > { %v7800_v8 = vadd.f32 %v18063_v19, %v7524_v20  ;;  %v7526_v31 = vpop.f32.mrb[133].mxu1 }
 0xca4   : > { %v7801_v18 = vadd.f32 %v18067_v9, %v7526_v31  ;;  %v7528_v50 = vpop.f32.mrb[134].mxu1  ;;  %8161 = vmatprep.mubr.bf16.mxu0 %v18075_v28 }
 0xca5   : > { %v7804_v16 = vadd.f32 %v18063_v19, %v7528_v50  ;;  %v7530_v30 = vpop.f32.mrb[135].mxu1  ;;  %8162 = vmatmul.mubr.bf16.vlgmr.msra.gmra.mrb[160].mxu0 %v18073_v5  ;;  %v7860_v33 = vmax.f32 %v7800_v8, 0.0  ;;  %v14973_v8 = vld [vmem:[#allocation19 + $0x74] ss:$8 sps:$4 sm:$0xff]  }
 0xca6   : > { %v7805_v43 = vadd.f32 %v18067_v9, %v7530_v30  ;;  %8403 = vmatpush1.bf16.msra.mxu0 %v14950_v40  ;;  %v7861_v55 = vmax.f32 %v7801_v18, 0.0  ;;  %v14971_v30 = vld [vmem:[#allocation19 + $0x70] ss:$8 sps:$4 sm:$0xff]  }
 0xca7   : > { %v7862_v56 = vmax.f32 %v7804_v16, 0.0  ;;  %8404 = vmatprep.subr.bf16.mxu0 %v14955_v32 }
 0xca8   : > { %v7863_v42 = vmax.f32 %v7805_v43, 0.0 }
 0xca9   : > { %v18083_v39 = vpack.c.bf16 %v7862_v56, %v7860_v33  ;;  %v14976_v33 = vld [vmem:[#allocation19 + $0x84] ss:$8 sps:$4 sm:$0xff]  }
 0xcaa   : > { %v18085_v29 = vpack.c.bf16 %v7863_v42, %v7861_v55  ;;  %v7534_v27 = vpop.f32.mrb[136].mxu1  ;;  %8405 = vmatpush1.bf16.msra.mxu0 %v14953_v35 }
 0xcab   : > { %v7808_v44 = vadd.f32 %v18063_v19, %v7534_v27  ;;  %v7536_v24 = vpop.f32.mrb[137].mxu1  ;;  %8406 = vmatprep.subr.bf16.mxu0 %v14958_v41 }
 0xcac   : > { %v7809_v1 = vadd.f32 %v18067_v9, %v7536_v24  ;;  %v7538_v3 = vpop.f32.mrb[138].mxu1  ;;  %8171 = vmatprep.mubr.bf16.mxu0 %v18085_v29 }
 0xcad   : > { %v7812_v62 = vadd.f32 %v18063_v19, %v7538_v3  ;;  %v7540_v21 = vpop.f32.mrb[139].mxu1  ;;  %8172 = vmatmul.mubr.bf16.gmra.mrb[164].mxu0 %v18083_v39  ;;  %v7864_v63 = vmax.f32 %v7808_v44, 0.0 }
 0xcae   : > { %v7813_v49 = vadd.f32 %v18067_v9, %v7540_v21  ;;  %8407 = vmatpush1.bf16.msra.mxu0 %v14956_v61  ;;  %v7865_v58 = vmax.f32 %v7809_v1, 0.0  ;;  %v14974_v61 = vld [vmem:[#allocation19 + $0x80] ss:$8 sps:$4 sm:$0xff]  }
 0xcaf   : > { %v7866_v47 = vmax.f32 %v7812_v62, 0.0  ;;  %8408 = vmatprep.subr.bf16.mxu0 %v14961_v4  ;;  %v14979_v4 = vld [vmem:[#allocation19 + $0x94] ss:$8 sps:$4 sm:$0xff]  }
 0xcb0   : > { %v7867_v12 = vmax.f32 %v7813_v49, 0.0 }
 0xcb1   : > { %v18093_v23 = vpack.c.bf16 %v7866_v47, %v7864_v63 }
 0xcb2   : > { %v18095_v36 = vpack.c.bf16 %v7867_v12, %v7865_v58  ;;  %v7544_v51 = vpop.f32.mrb[140].mxu1  ;;  %8409 = vmatpush1.bf16.msra.mxu0 %v14959_v10  ;;  %v14977_v10 = vld [vmem:[#allocation19 + $0x90] ss:$8 sps:$4 sm:$0xff]  }
 0xcb3   : > { %v7816_v60 = vadd.f32 %v18063_v19, %v7544_v51  ;;  %v7546_v57 = vpop.f32.mrb[141].mxu1  ;;  %8410 = vmatprep.subr.bf16.mxu0 %v14964_v34  ;;  %v14982_v34 = vld [vmem:[#allocation19 + $0xa4] ss:$8 sps:$4 sm:$0xff]  }
 0xcb4   : > { %v7817_v37 = vadd.f32 %v18067_v9, %v7546_v57  ;;  %v7548_v48 = vpop.f32.mrb[142].mxu1  ;;  %8181 = vmatprep.mubr.bf16.mxu0 %v18095_v36  ;;  %v14980_v57 = vld [vmem:[#allocation19 + $0xa0] ss:$8 sps:$4 sm:$0xff]  }
 0xcb5   : > { %v7820_v46 = vadd.f32 %v18063_v19, %v7548_v48  ;;  %v7550_v45 = vpop.f32.mrb[143].mxu1  ;;  %8182 = vmatmul.mubr.bf16.gmra.mrb[168].mxu0 %v18093_v23  ;;  %v7868_v38 = vmax.f32 %v7816_v60, 0.0  ;;  %v14985_v48 = vld [vmem:[#allocation19 + $0xb4] ss:$8 sps:$4 sm:$0xff]  }
 0xcb6   : > { %v7821_v59 = vadd.f32 %v18067_v9, %v7550_v45  ;;  %8411 = vmatpush1.bf16.msra.mxu0 %v14962_v26  ;;  %v7869_v6 = vmax.f32 %v7817_v37, 0.0 }
 0xcb7   : > { %v7870_v53 = vmax.f32 %v7820_v46, 0.0  ;;  %8412 = vmatprep.subr.bf16.mxu0 %v14967_v22 }
 0xcb8   : > { %v7871_v54 = vmax.f32 %v7821_v59, 0.0 }
 0xcb9   : > { %v18103_v52 = vpack.c.bf16 %v7870_v53, %v7868_v38  ;;  %v14983_v53 = vld [vmem:[#allocation19 + $0xb0] ss:$8 sps:$4 sm:$0xff]  }
 0xcba   : > { %v18105_v17 = vpack.c.bf16 %v7871_v54, %v7869_v6  ;;  %v7554_v11 = vpop.f32.mrb[144].mxu1  ;;  %8413 = vmatpush1.bf16.msra.mxu0 %v14965_v0  ;;  %v14988_v54 = vld [vmem:[#allocation19 + $0xc4] ss:$8 sps:$4 sm:$0xff]  }
 0xcbb   : > { %v7824_v20 = vadd.f32 %v18063_v19, %v7554_v11  ;;  %v7556_v40 = vpop.f32.mrb[145].mxu1  ;;  %8414 = vmatprep.subr.bf16.mxu0 %v14970_v25 }
 0xcbc   : > { %v7825_v31 = vadd.f32 %v18067_v9, %v7556_v40  ;;  %v7558_v32 = vpop.f32.mrb[146].mxu1  ;;  %8191 = vmatprep.mubr.bf16.mxu0 %v18105_v17 }
 0xcbd   : > { %v7828_v18 = vadd.f32 %v18063_v19, %v7558_v32  ;;  %v7560_v50 = vpop.f32.mrb[147].mxu1  ;;  %8192 = vmatmul.mubr.bf16.gmra.mrb[172].mxu0 %v18103_v52  ;;  %v7872_v43 = vmax.f32 %v7824_v20, 0.0 }
 0xcbe   : > { %v7829_v16 = vadd.f32 %v18067_v9, %v7560_v50  ;;  %8415 = vmatpush1.bf16.msra.mxu0 %v14968_v7  ;;  %v7873_v56 = vmax.f32 %v7825_v31, 0.0  ;;  %v14986_v31 = vld [vmem:[#allocation19 + $0xc0] ss:$8 sps:$4 sm:$0xff]   ;;  %v14991_v50 = vld [vmem:[#allocation19 + $0xd4] ss:$8 sps:$4 sm:$0xff]  }
 0xcbf   : > { %v7874_v35 = vmax.f32 %v7828_v18, 0.0  ;;  %8416 = vmatprep.subr.bf16.mxu0 %v14973_v8 }
 0xcc0   : > { %v7875_v41 = vmax.f32 %v7829_v16, 0.0 }
 0xcc1   : > { %v18113_v55 = vpack.c.bf16 %v7874_v35, %v7872_v43 }
 0xcc2   : > { %v18115_v42 = vpack.c.bf16 %v7875_v41, %v7873_v56  ;;  %v7564_v27 = vpop.f32.mrb[148].mxu1  ;;  %8417 = vmatpush1.bf16.msra.mxu0 %v14971_v30  ;;  %v14989_v56 = vld [vmem:[#allocation19 + $0xd0] ss:$8 sps:$4 sm:$0xff]  }
 0xcc3   : > { %v7832_v44 = vadd.f32 %v18063_v19, %v7564_v27  ;;  %v7566_v24 = vpop.f32.mrb[149].mxu1  ;;  %8418 = vmatprep.subr.bf16.mxu0 %v14976_v33 }
 0xcc4   : > { %v7833_v1 = vadd.f32 %v18067_v9, %v7566_v24  ;;  %v7568_v3 = vpop.f32.mrb[150].mxu1  ;;  %8201 = vmatprep.mubr.bf16.mxu0 %v18115_v42 }
 0xcc5   : > { %v7836_v62 = vadd.f32 %v18063_v19, %v7568_v3  ;;  %v7570_v21 = vpop.f32.mrb[151].mxu1  ;;  %8202 = vmatmul.mubr.bf16.gmra.mrb[176].mxu0 %v18113_v55  ;;  %v7876_v63 = vmax.f32 %v7832_v44, 0.0 }
 0xcc6   : > { %v7837_v49 = vadd.f32 %v18067_v9, %v7570_v21  ;;  %8419 = vmatpush1.bf16.msra.mxu0 %v14974_v61  ;;  %v7877_v58 = vmax.f32 %v7833_v1, 0.0  ;;  %v14994_v61 = vld [vmem:[#allocation19 + $0xe4] ss:$8 sps:$4 sm:$0xff]  }
 0xcc7   : > { %v7878_v47 = vmax.f32 %v7836_v62, 0.0  ;;  %8420 = vmatprep.subr.bf16.mxu0 %v14979_v4 }
 0xcc8   : > { %v7879_v12 = vmax.f32 %v7837_v49, 0.0 }
 0xcc9   : > { %v18123_v51 = vpack.c.bf16 %v7878_v47, %v7876_v63  ;;  %v14995_v63 = vld [vmem:[#allocation19 + $0xf0] ss:$8 sps:$4 sm:$0xff]   ;;  %v15049_v47 = vld [vmem:[#allocation22 + $0x80] sm:$0xff]  }
 0xcca   : > { %v18125_v26 = vpack.c.bf16 %v7879_v12, %v7877_v58  ;;  %v7574_v60 = vpop.f32.mrb[152].mxu1  ;;  %8421 = vmatpush1.bf16.msra.mxu0 %v14977_v10  ;;  %v15048_v10 = vld [vmem:[#allocation22 + $0xc0] sm:$0xff]   ;;  %v15052_v58 = vld [vmem:[#allocation22 + $0xc8] sm:$0xff]  }
 0xccb   : > { %v7840_v22 = vadd.f32 %v18063_v19, %v7574_v60  ;;  %v7576_v37 = vpop.f32.mrb[153].mxu1  ;;  %8422 = vmatprep.subr.bf16.mxu0 %v14982_v34  ;;  %v15000_v34 = vld [vmem:[#allocation19 + $0x204] ss:$8 sps:$4 sm:$0xff]   ;;  %12978 = vmatprep.subr.bf16.mxu1 %v15048_v10  ;;  %v15056_v60 = vld [vmem:[#allocation22 + $0xd0] sm:$0xff]  }
 0xccc   : > { %v7841_v46 = vadd.f32 %v18067_v9, %v7576_v37  ;;  %v7578_v45 = vpop.f32.mrb[154].mxu1  ;;  %8211 = vmatprep.mubr.bf16.mxu0 %v18125_v26  ;;  %12979 = vmatpush3.bf16.msra.mxu1 %v15049_v47  ;;  %v15053_v12 = vld [vmem:[#allocation22 + $0x88] sm:$0xff]  }
 0xccd   : > { %v7844_v59 = vadd.f32 %v18063_v19, %v7578_v45  ;;  %v7580_v0 = vpop.f32.mrb[155].mxu1  ;;  %8212 = vmatmul.mubr.bf16.gmra.mrb[180].mxu0 %v18123_v51  ;;  %v7880_v25 = vmax.f32 %v7840_v22, 0.0  ;;  %12980 = vmatprep.subr.bf16.mxu1 %v15052_v58  ;;  %v14998_v22 = vld [vmem:[#allocation19 + $0x200] ss:$8 sps:$4 sm:$0xff]   ;;  %v15057_v45 = vld [vmem:[#allocation22 + $0x90] sm:$0xff]  }
 0xcce   : > { %v7845_v38 = vadd.f32 %v18067_v9, %v7580_v0  ;;  %8423 = vmatpush1.bf16.msra.mxu0 %v14980_v57  ;;  %v7881_v11 = vmax.f32 %v7841_v46, 0.0  ;;  %v15060_v0 = vld [vmem:[#allocation22 + $0xd8] sm:$0xff]  }
 0xccf   : > { %v7882_v6 = vmax.f32 %v7844_v59, 0.0  ;;  %8424 = vmatprep.subr.bf16.mxu0 %v14985_v48  ;;  %v15003_v48 = vld [vmem:[#allocation19 + $0x214] ss:$8 sps:$4 sm:$0xff]  }
 0xcd0   : > { %v7883_v7 = vmax.f32 %v7845_v38, 0.0  ;;  %12981 = vmatpush3.bf16.msra.mxu1 %v15053_v12  ;;  %v15001_v38 = vld [vmem:[#allocation19 + $0x210] ss:$8 sps:$4 sm:$0xff]   ;;  %v15022_v12 = vld [vmem:[#allocation19 + $0x280] ss:$8 sps:$4 sm:$0xff]  }
 0xcd1   : > { %v18133_v20 = vpack.c.bf16 %v7882_v6, %v7880_v25  ;;  %12982 = vmatprep.subr.bf16.mxu1 %v15056_v60  ;;  %v15061_v25 = vld [vmem:[#allocation22 + $0x98] sm:$0xff]   ;;  %v15064_v6 = vld [vmem:[#allocation22 + $0xe0] sm:$0xff]  }
 0xcd2   : > { %v18135_v40 = vpack.c.bf16 %v7883_v7, %v7881_v11  ;;  %v7584_v8 = vpop.f32.mrb[156].mxu1  ;;  %8425 = vmatpush1.bf16.msra.mxu0 %v14983_v53  ;;  %v15006_v53 = vld [vmem:[#allocation19 + $0x224] ss:$8 sps:$4 sm:$0xff]   ;;  %v15004_v11 = vld [vmem:[#allocation19 + $0x220] ss:$8 sps:$4 sm:$0xff]  }
 0xcd3   : > { %v7848_v32 = vadd.f32 %v18063_v19, %v7584_v8  ;;  %v7586_v18 = vpop.f32.mrb[157].mxu1  ;;  %8426 = vmatprep.subr.bf16.mxu0 %v14988_v54  ;;  %v15009_v8 = vld [vmem:[#allocation19 + $0x234] ss:$8 sps:$4 sm:$0xff]  }
 0xcd4   : > { %v7849_v16 = vadd.f32 %v18067_v9, %v7586_v18  ;;  %v7588_v30 = vpop.f32.mrb[158].mxu1  ;;  %8221 = vmatprep.mubr.bf16.mxu0 %v18135_v40  ;;  %12983 = vmatpush3.bf16.msra.mxu1 %v15057_v45 }
 0xcd5   : > { %v7852_v43 = vadd.f32 %v18063_v19, %v7588_v30  ;;  %v7590_v35 = vpop.f32.mrb[159].mxu1  ;;  %8222 = vmatmul.mubr.bf16.gmra.mrb[184].mxu0 %v18133_v20  ;;  %v7884_v41 = vmax.f32 %v7848_v32, 0.0  ;;  %v14992_v19 = vld [vmem:[#allocation19 + $0xe0] ss:$8 sps:$4 sm:$0xff]   ;;  %12984 = vmatprep.subr.bf16.mxu1 %v15060_v0  ;;  %v15012_v30 = vld [vmem:[#allocation19 + $0x244] ss:$8 sps:$4 sm:$0xff]  }
 0xcd6   : > { %v7853_v33 = vadd.f32 %v18067_v9, %v7590_v35  ;;  %8427 = vmatpush1.bf16.msra.mxu0 %v14986_v31  ;;  %v7885_v44 = vmax.f32 %v7849_v16, 0.0  ;;  %v14997_v9 = vld [vmem:[#allocation19 + $0xf4] ss:$8 sps:$4 sm:$0xff]   ;;  %v15065_v32 = vld [vmem:[#allocation22 + $0xa0] sm:$0xff]   ;;  %v15007_v16 = vld [vmem:[#allocation19 + $0x230] ss:$8 sps:$4 sm:$0xff]  }
 0xcd7   : > { %v7886_v27 = vmax.f32 %v7852_v43, 0.0  ;;  %8428 = vmatprep.subr.bf16.mxu0 %v14991_v50  ;;  %v15068_v50 = vld [vmem:[#allocation22 + $0xe8] sm:$0xff]   ;;  %v15072_v35 = vld [vmem:[#allocation22 + $0xf0] sm:$0xff]  }
 0xcd8   : > { %v7887_v24 = vmax.f32 %v7853_v33, 0.0  ;;  %12985 = vmatpush3.bf16.msra.mxu1 %v15061_v25  ;;  %v15069_v43 = vld [vmem:[#allocation22 + $0xa8] sm:$0xff]  }
 0xcd9   : > { %v18143_v4 = vpack.c.bf16 %v7886_v27, %v7884_v41  ;;  %12986 = vmatprep.subr.bf16.mxu1 %v15064_v6  ;;  %v15015_v27 = vld [vmem:[#allocation19 + $0x254] ss:$8 sps:$4 sm:$0xff]   ;;  %v15030_v0 = vld [vmem:[#allocation19 + $0x2a4] ss:$8 sps:$4 sm:$0xff]  }
 0xcda   : > { %v18145_v1 = vpack.c.bf16 %v7887_v24, %v7885_v44  ;;  %v18147_v3 = vpop.f32.mrb[160].mxu1  ;;  %8429 = vmatpush1.bf16.msra.mxu0 %v14989_v56  ;;  %v15010_v56 = vld [vmem:[#allocation19 + $0x240] ss:$8 sps:$4 sm:$0xff]   ;;  %v15013_v44 = vld [vmem:[#allocation19 + $0x250] ss:$8 sps:$4 sm:$0xff]  }
 0xcdb   : > { %v18149_v62 = vpop.f32.mrb[161].mxu1  ;;  %8430 = vmatprep.subr.bf16.mxu0 %v14994_v61  ;;  %v15018_v24 = vld [vmem:[#allocation19 + $0x264] ss:$8 sps:$4 sm:$0xff]   ;;  %v15033_v6 = vld [vmem:[#allocation19 + $0x2b4] ss:$8 sps:$4 sm:$0xff]  }
 0xcdc   : > { %v18151_v21 = vpop.f32.mrb[162].mxu1  ;;  %8231 = vmatprep.mubr.bf16.mxu0 %v18145_v1  ;;  %12987 = vmatpush3.bf16.msra.mxu1 %v15065_v32  ;;  %v15031_v32 = vld [vmem:[#allocation19 + $0x2b0] ss:$8 sps:$4 sm:$0xff]  }
 0xcdd   : > { %v18154_v49 = vpop.f32.mrb[163].mxu1  ;;  %8232 = vmatmul.mubr.bf16.gmra.mrb[188].mxu0 %v18143_v4  ;;  %12988 = vmatprep.subr.bf16.mxu1 %v15068_v50  ;;  %v15036_v50 = vld [vmem:[#allocation19 + $0x2c4] ss:$8 sps:$4 sm:$0xff]  }
 0xcde   : > { %8431 = vmatpush1.bf16.msra.mxu0 %v14992_v19  ;;  %8434 = vmatprep.mubr.bf16.mxu0 %v18750_v15 }
 0xcdf   : > { %8432 = vmatprep.subr.bf16.mxu0 %v14997_v9  ;;  %v15016_v9 = vld [vmem:[#allocation19 + $0x260] ss:$8 sps:$4 sm:$0xff]  }
 0xce0   : > { %12989 = vmatpush3.bf16.msra.mxu1 %v15069_v43 }
 0xce1   : > { %12990 = vmatprep.subr.bf16.mxu1 %v15072_v35  ;;  %v15039_v35 = vld [vmem:[#allocation19 + $0x2d4] ss:$8 sps:$4 sm:$0xff]  }
 0xce2   : > { %v18158_v57 = vpop.f32.mrb[164].mxu1  ;;  %8433 = vmatpush1.bf16.msra.mxu0 %v14995_v63  ;;  %v15021_v63 = vld [vmem:[#allocation19 + $0x274] ss:$8 sps:$4 sm:$0xff]  }
 0xce3   : > { %v18160_v37 = vpop.f32.mrb[165].mxu1  ;;  %8708 = vmatprep.subr.bf16.mxu0 %v15000_v34 }
 0xce4   : > { %v18162_v46 = vpop.f32.mrb[166].mxu1 }
 0xce5   : > { %v18164_v59 = vpop.f32.mrb[167].mxu1  ;;  %8435 = vmatmul.mubr.bf16.vlgmr.msra.gmra.mrb[160].mxu0 %v18750_v15 }
 0xce6   : > { %8709 = vmatpush1.bf16.msra.mxu0 %v14998_v22  ;;  %8444 = vmatprep.mubr.bf16.mxu0 %v18750_v15  ;;  %v15027_v22 = vld [vmem:[#allocation19 + $0x294] ss:$8 sps:$4 sm:$0xff]  }
 0xce7   : > { %8710 = vmatprep.subr.bf16.mxu0 %v15003_v48 }
 0xcea   : > { %v18168_v54 = vpop.f32.mrb[168].mxu1  ;;  %8711 = vmatpush1.bf16.msra.mxu0 %v15001_v38 }
 0xceb   : > { %v18170_v7 = vpop.f32.mrb[169].mxu1  ;;  %8712 = vmatprep.subr.bf16.mxu0 %v15006_v53  ;;  %v15028_v53 = vld [vmem:[#allocation19 + $0x2a0] ss:$8 sps:$4 sm:$0xff]  }
 0xcec   : > { %v18172_v31 = vpop.f32.mrb[170].mxu1 }
 0xced   : > { %v18174_v18 = vpop.f32.mrb[171].mxu1  ;;  %8445 = vmatmul.mubr.bf16.gmra.mrb[164].mxu0 %v18750_v15 }
 0xcee   : > { %8454 = vmatprep.mubr.bf16.mxu0 %v18075_v28  ;;  %8713 = vmatpush1.bf16.msra.mxu0 %v15004_v11 }
 0xcef   : > { %8714 = vmatprep.subr.bf16.mxu0 %v15009_v8 }
 0xcf2   : > { %v18178_v33 = vpop.f32.mrb[172].mxu1  ;;  %8715 = vmatpush1.bf16.msra.mxu0 %v15007_v16 }
 0xcf3   : > { %v18180_v41 = vpop.f32.mrb[173].mxu1  ;;  %8716 = vmatprep.subr.bf16.mxu0 %v15012_v30  ;;  %v15034_v30 = vld [vmem:[#allocation19 + $0x2c0] ss:$8 sps:$4 sm:$0xff]  }
 0xcf4   : > { %v18182_v61 = vpop.f32.mrb[174].mxu1 }
 0xcf5   : > { %v18184_v28 = vpop.f32.mrb[175].mxu1  ;;  %8455 = vmatmul.mubr.bf16.gmra.mrb[168].mxu0 %v18073_v5  ;;  %v15019_v5 = vld [vmem:[#allocation19 + $0x270] ss:$8 sps:$4 sm:$0xff]  }
 0xcf6   : > { %8464 = vmatprep.mubr.bf16.mxu0 %v18085_v29  ;;  %8717 = vmatpush1.bf16.msra.mxu0 %v15010_v56  ;;  %v15024_v29 = vld [vmem:[#allocation19 + $0x284] ss:$8 sps:$4 sm:$0xff]  }
 0xcf7   : > { %8718 = vmatprep.subr.bf16.mxu0 %v15015_v27 }
 0xcfa   : > { %v18188_v19 = vpop.f32.mrb[176].mxu1  ;;  %8719 = vmatpush1.bf16.msra.mxu0 %v15013_v44  ;;  %v15037_v44 = vld [vmem:[#allocation19 + $0x2d0] ss:$8 sps:$4 sm:$0xff]  }
 0xcfb   : > { %v18190_v10 = vpop.f32.mrb[177].mxu1  ;;  %8720 = vmatprep.subr.bf16.mxu0 %v15018_v24  ;;  %v15042_v24 = vld [vmem:[#allocation19 + $0x2e4] ss:$8 sps:$4 sm:$0xff]  }
 0xcfc   : > { %v18192_v47 = vpop.f32.mrb[178].mxu1 }
 0xcfd   : > { %v18194_v34 = vpop.f32.mrb[179].mxu1  ;;  %8465 = vmatmul.mubr.bf16.gmra.mrb[172].mxu0 %v18083_v39  ;;  %v15025_v39 = vld [vmem:[#allocation19 + $0x290] ss:$8 sps:$4 sm:$0xff]  }
 0xcfe   : > { %8474 = vmatprep.mubr.bf16.mxu0 %v18095_v36  ;;  %8721 = vmatpush1.bf16.msra.mxu0 %v15016_v9  ;;  %v15040_v9 = vld [vmem:[#allocation19 + $0x2e0] ss:$8 sps:$4 sm:$0xff]  }
 0xcff   : > { %8722 = vmatprep.subr.bf16.mxu0 %v15021_v63  ;;  %v15045_v63 = vld [vmem:[#allocation19 + $0x2f4] ss:$8 sps:$4 sm:$0xff]  }
 0xd02   : > { %v18198_v58 = vpop.f32.mrb[180].mxu1  ;;  %8723 = vmatpush1.bf16.msra.mxu0 %v15019_v5  ;;  %v15043_v5 = vld [vmem:[#allocation19 + $0x2f0] ss:$8 sps:$4 sm:$0xff]  }
 0xd03   : > { %v18200_v60 = vpop.f32.mrb[181].mxu1  ;;  %8724 = vmatprep.subr.bf16.mxu0 %v15024_v29  ;;  %v15046_v29 = vld [vmem:[#allocation22 + $0x40] sm:$0xff]  }
 0xd04   : > { %v18202_v48 = vpop.f32.mrb[182].mxu1 }
 0xd05   : > { %v18204_v45 = vpop.f32.mrb[183].mxu1  ;;  %8475 = vmatmul.mubr.bf16.gmra.mrb[176].mxu0 %v18093_v23 }
 0xd06   : > { %8484 = vmatprep.mubr.bf16.mxu0 %v18105_v17  ;;  %8725 = vmatpush1.bf16.msra.mxu0 %v15022_v12  ;;  %v15047_v12 = vld [vmem:[#allocation22] sm:$0xff]  }
 0xd07   : > { %8726 = vmatprep.subr.bf16.mxu0 %v15027_v22  ;;  %v15050_v22 = vld [vmem:[#allocation22 + $0x48] sm:$0xff]  }
 0xd0a   : > { %v18208_v38 = vpop.f32.mrb[184].mxu1  ;;  %8727 = vmatpush1.bf16.msra.mxu0 %v15025_v39  ;;  %v15051_v39 = vld [vmem:[#allocation22 + $0x8] sm:$0xff]  }
 0xd0b   : > { %v18210_v25 = vpop.f32.mrb[185].mxu1  ;;  %8728 = vmatprep.subr.bf16.mxu0 %v15030_v0  ;;  %v15054_v0 = vld [vmem:[#allocation22 + $0x50] sm:$0xff]  }
 0xd0c   : > { %v18212_v11 = vpop.f32.mrb[186].mxu1 }
 0xd0d   : > { %v18214_v8 = vpop.f32.mrb[187].mxu1  ;;  %8485 = vmatmul.mubr.bf16.gmra.mrb[180].mxu0 %v18103_v52 }
 0xd0e   : > { %8494 = vmatprep.mubr.bf16.mxu0 %v18115_v42  ;;  %8729 = vmatpush1.bf16.msra.mxu0 %v15028_v53  ;;  %v15055_v53 = vld [vmem:[#allocation22 + $0x10] sm:$0xff]  }
 0xd0f   : > { %8730 = vmatprep.subr.bf16.mxu0 %v15033_v6  ;;  %v15058_v6 = vld [vmem:[#allocation22 + $0x58] sm:$0xff]  }
 0xd12   : > { %v18218_v16 = vpop.f32.mrb[188].mxu1  ;;  %8731 = vmatpush1.bf16.msra.mxu0 %v15031_v32  ;;  %v15062_v32 = vld [vmem:[#allocation22 + $0x60] sm:$0xff]  }
 0xd13   : > { %v18220_v43 = vpop.f32.mrb[189].mxu1  ;;  %8732 = vmatprep.subr.bf16.mxu0 %v15036_v50  ;;  %v15067_v50 = vld [vmem:[#allocation22 + $0x28] sm:$0xff]  }
 0xd14   : > { %v18222_v56 = vpop.f32.mrb[190].mxu1 }
 0xd15   : > { %v18224_v27 = vpop.f32.mrb[191].mxu1  ;;  %8495 = vmatmul.mubr.bf16.gmra.mrb[184].mxu0 %v18113_v55 }
 0xd16   : > { %8504 = vmatprep.mubr.bf16.mxu0 %v18125_v26  ;;  %8733 = vmatpush1.bf16.msra.mxu0 %v15034_v30  ;;  %v15070_v30 = vld [vmem:[#allocation22 + $0x70] sm:$0xff]  }
 0xd17   : > { %8734 = vmatprep.subr.bf16.mxu0 %v15039_v35  ;;  %v18799_v35 = vld [vmem:[#allocation40_spill] sm:$0xff] }
 0xd1a   : > { %8735 = vmatpush1.bf16.msra.mxu0 %v15037_v44  ;;  %v7782_v44 = vsub.s32 2, %v18799_v35 }
 0xd1b   : > { %8736 = vmatprep.subr.bf16.mxu0 %v15042_v24 }
 0xd1d   : > { %8505 = vmatmul.mubr.bf16.gmra.mrb[188].mxu0 %v18123_v51 }
 0xd1e   : > { %8737 = vmatpush1.bf16.msra.mxu0 %v15040_v9  ;;  %8740 = vmatprep.mubr.bf16.mxu0 %v18095_v36  ;;  %v15059_v36 = vld [vmem:[#allocation22 + $0x18] sm:$0xff]  }
 0xd1f   : > { %8738 = vmatprep.subr.bf16.mxu0 %v15045_v63  ;;  %v18254_v63 = vrot.slane %v18059_v2, %v7782_v44  ;;  %v15079_v44 = vld [vmem:[#allocation22 + $0x100] sm:$0xff]  }
 0xd22   : > { %8739 = vmatpush1.bf16.msra.mxu0 %v15043_v5 }
 0xd23   : > { %12956 = vmatprep.subr.bf16.mxu0 %v15046_v29 }
 0xd25   : > { %8741 = vmatmul.mubr.bf16.vlgmr.msra.gmra.mrb[160].mxu0 %v18093_v23  ;;  %v15063_v23 = vld [vmem:[#allocation22 + $0x20] sm:$0xff]  }
 0xd26   : > { %8750 = vmatprep.mubr.bf16.mxu0 %v18105_v17  ;;  %12957 = vmatpush3.bf16.msra.mxu0 %v15047_v12  ;;  %v15066_v17 = vld [vmem:[#allocation22 + $0x68] sm:$0xff]  }
 0xd27   : > { %12958 = vmatprep.subr.bf16.mxu0 %v15050_v22 }
 0xd2a   : > { %12959 = vmatpush3.bf16.msra.mxu0 %v15051_v39 }
 0xd2b   : > { %12960 = vmatprep.subr.bf16.mxu0 %v15054_v0 }
 0xd2d   : > { %8751 = vmatmul.mubr.bf16.gmra.mrb[164].mxu0 %v18103_v52  ;;  %v15071_v52 = vld [vmem:[#allocation22 + $0x30] sm:$0xff]  }
 0xd2e   : > { %8760 = vmatprep.mubr.bf16.mxu0 %v18115_v42  ;;  %12961 = vmatpush3.bf16.msra.mxu0 %v15055_v53  ;;  %v15074_v42 = vld [vmem:[#allocation22 + $0x78] sm:$0xff]  }
 0xd2f   : > { %12962 = vmatprep.subr.bf16.mxu0 %v15058_v6 }
 0xd32   : > { %12963 = vmatpush3.bf16.msra.mxu0 %v15059_v36 }
 0xd33   : > { %12964 = vmatprep.subr.bf16.mxu0 %v15062_v32 }
 0xd35   : > { %8761 = vmatmul.mubr.bf16.gmra.mrb[168].mxu0 %v18113_v55  ;;  %v15073_v55 = vld [vmem:[#allocation22 + $0xb0] sm:$0xff]  }
 0xd36   : > { %8770 = vmatprep.mubr.bf16.mxu0 %v18125_v26  ;;  %12965 = vmatpush3.bf16.msra.mxu0 %v15063_v23  ;;  %v15076_v26 = vld [vmem:[#allocation22 + $0xf8] sm:$0xff]   ;;  %v7798_v23 = vadd.f32 %v18254_v63, %v18151_v21 }
 0xd37   : > { %12966 = vmatprep.subr.bf16.mxu0 %v15066_v17  ;;  %12991 = vmatpush3.bf16.msra.mxu1 %v15073_v55 }
 0xd38   : > { %12992 = vmatprep.subr.bf16.mxu1 %v15076_v26 }
 0xd3a   : > { %12967 = vmatpush3.bf16.msra.mxu0 %v15067_v50 }
 0xd3b   : > { %12968 = vmatprep.subr.bf16.mxu0 %v15070_v30 }
 0xd3d   : > { %8771 = vmatmul.mubr.bf16.gmra.mrb[172].mxu0 %v18123_v51  ;;  %v15075_v51 = vld [vmem:[#allocation22 + $0x38] sm:$0xff]  }
 0xd3e   : > { %8780 = vmatprep.mubr.bf16.mxu0 %v18135_v40  ;;  %12969 = vmatpush3.bf16.msra.mxu0 %v15071_v52  ;;  %v15078_v40 = vld [vmem:[#allocation22 + $0x140] sm:$0xff]  }
 0xd3f   : > { %12970 = vmatprep.subr.bf16.mxu0 %v15074_v42 }
 0xd42   : > { %12971 = vmatpush3.bf16.msra.mxu0 %v15075_v51 }
 0xd43   : > { %13000 = vmatprep.subr.bf16.mxu0 %v15078_v40 }
 0xd45   : > { %8781 = vmatmul.mubr.bf16.gmra.mrb[176].mxu0 %v18133_v20  ;;  %v15077_v20 = vld [vmem:[#allocation22 + $0xb8] sm:$0xff]  }
 0xd46   : > { %8790 = vmatprep.mubr.bf16.mxu0 %v18145_v1  ;;  %12993 = vmatpush3.bf16.msra.mxu1 %v15077_v20  ;;  %v8853_v1 = vld [vmem:[#allocation20] sm:$0x3] }
 0xd47   : > { %v18248_v24 = vrot.slane %v8853_v1, %v18798_v14  ;;  %v18251_v9 = vrot.slane %v8853_v1, %v17336_v13  ;;  %v7794_v14 = vadd.f32 %v18254_v63, %v18147_v3 }
 0xd4d   : > { %8791 = vmatmul.mubr.bf16.gmra.mrb[180].mxu0 %v18143_v4  ;;  %v15080_v4 = vld [vmem:[#allocation22 + $0x1c0] sm:$0xff]  }
 0xd4e   : > { %8800 = vmatprep.mubr.bf16.mxu0 %v18750_v15  ;;  %13022 = vmatprep.subr.bf16.mxu1 %v15080_v4 }
 0xd55   : > { %8801 = vmatmul.mubr.bf16.gmra.mrb[184].mxu0 %v18750_v15 }
 0xd56   : > { %8810 = vmatprep.mubr.bf16.mxu0 %v18750_v15 }
 0xd5d   : > { %8811 = vmatmul.mubr.bf16.gmra.mrb[188].mxu0 %v18750_v15  ;;  %v7786_v15 = vsub.s32 3, %v18799_v35 }
 0xd5f   : > { %v18257_v5 = vrot.slane %v18059_v2, %v7786_v15  ;;  %v7802_v15 = vadd.f32 %v18254_v63, %v18158_v57  ;;  %v7806_v57 = vadd.f32 %v18254_v63, %v18162_v46  ;;  %v15086_v46 = vld [vmem:[#allocation22 + $0x150] sm:$0xff]  }
 0xd61   : > { %v7795_v2 = vadd.f32 %v18257_v5, %v18149_v62  ;;  %v7799_v3 = vadd.f32 %v18257_v5, %v18154_v49 }
 0xdf8   : > { %v8742_v29 = vpop.f32.mrb[160].mxu0 }
 0xdf9   : > { %v8865_v12 = vadd.f32 %v18248_v24, %v8742_v29  ;;  %v8744_v22 = vpop.f32.mrb[161].mxu0 }
 0xdfa   : > { %v8866_v39 = vadd.f32 %v18251_v9, %v8744_v22  ;;  %v8746_v0 = vpop.f32.mrb[162].mxu0 }
 0xdfb   : > { %v8897_v13 = vmax.f32 %v8865_v12, 0.0  ;;  %v8867_v53 = vadd.f32 %v18248_v24, %v8746_v0  ;;  %v8748_v6 = vpop.f32.mrb[163].mxu0  ;;  %v15082_v0 = vld [vmem:[#allocation22 + $0x148] sm:$0xff]  }
 0xdfc   : > { %v8898_v36 = vmax.f32 %v8866_v39, 0.0  ;;  %v8868_v32 = vadd.f32 %v18251_v9, %v8748_v6 }
 0xdfd   : > { %v8929_v17 = vadd.f32 %v8897_v13, %v7794_v14  ;;  %v8899_v50 = vmax.f32 %v8867_v53, 0.0  ;;  %v7803_v14 = vadd.f32 %v18257_v5, %v18160_v37 }
 0xdfe   : > { %v8930_v30 = vadd.f32 %v8898_v36, %v7795_v2  ;;  %v8900_v52 = vmax.f32 %v8868_v32, 0.0  ;;  %v15081_v2 = vld [vmem:[#allocation22 + $0x180] sm:$0xff]  }
 0xdff   : > { %v8961_v55 = vmax.f32 %v8929_v17, 0.0  ;;  %v8931_v42 = vadd.f32 %v8899_v50, %v7798_v23  ;;  %v15084_v17 = vld [vmem:[#allocation22 + $0x1c8] sm:$0xff]   ;;  %v7807_v50 = vadd.f32 %v18257_v5, %v18164_v59 }
 0xe00   : > { %v8962_v51 = vmax.f32 %v8930_v30, 0.0  ;;  %v8932_v26 = vadd.f32 %v8900_v52, %v7799_v3  ;;  %v8752_v20 = vpop.f32.mrb[164].mxu0  ;;  %v15083_v30 = vld [vmem:[#allocation22 + $0x108] sm:$0xff]  }
 0xe01   : > { %8993 = vst [vmem:[%s18273_s6] sm:$0xff] %v8961_v55  ;;  %v8963_v62 = vmax.f32 %v8931_v42, 0.0  ;;  %v8869_v21 = vadd.f32 %v18248_v24, %v8752_v20  ;;  %v8754_v40 = vpop.f32.mrb[165].mxu0  ;;  %v9025_v29 = vpack.c.bf16 %v8961_v55, %v8961_v55  ;;  %v15085_v20 = vld [vmem:[#allocation22 + $0x188] sm:$0xff]  }
 0xe02   : > { %8994 = vst [vmem:[%s18273_s6 + $0x8] sm:$0xff] %v8962_v51  ;;  %v8964_v49 = vmax.f32 %v8932_v26, 0.0  ;;  %v8870_v4 = vadd.f32 %v18251_v9, %v8754_v40  ;;  %v8756_v1 = vpop.f32.mrb[166].mxu0  ;;  %v9026_v35 = vpack.c.bf16 %v8962_v51, %v8962_v51  ;;  %v15088_v40 = vld [vmem:[#allocation22 + $0x1d0] sm:$0xff]  }
 0xe03   : > { %8995 = vst [vmem:[%s18273_s6 + $0x10] sm:$0xff] %v8963_v62  ;;  %v8901_v12 = vmax.f32 %v8869_v21, 0.0  ;;  %v8871_v22 = vadd.f32 %v18248_v24, %v8756_v1  ;;  %v8758_v39 = vpop.f32.mrb[167].mxu0  ;;  %v9027_v36 = vpack.c.bf16 %v8963_v62, %v8963_v62 }
 0xe04   : > { %8996 = vst [vmem:[%s18273_s6 + $0x18] sm:$0xff] %v8964_v49  ;;  %v8902_v13 = vmax.f32 %v8870_v4, 0.0  ;;  %v8872_v53 = vadd.f32 %v18251_v9, %v8758_v39  ;;  %11144 = vmatprep.mubr.bf16.mxu0 %v9026_v35  ;;  %v9028_v6 = vpack.c.bf16 %v8964_v49, %v8964_v49  ;;  %v15090_v39 = vld [vmem:[#allocation22 + $0x158] sm:$0xff]  }
 0xe05   : > { %v8933_v32 = vadd.f32 %v8901_v12, %v7802_v15  ;;  %v8903_v23 = vmax.f32 %v8871_v22, 0.0  ;;  %11145 = vmatmul.mubr.bf16.vlgmr.msra.gmra.mrb[192].mxu0 %v9025_v29  ;;  %v7810_v15 = vadd.f32 %v18254_v63, %v18168_v54  ;;  %v7814_v54 = vadd.f32 %v18254_v63, %v18172_v31 }
 0xe06   : > { %v8934_v37 = vadd.f32 %v8902_v13, %v7803_v14  ;;  %v8904_v3 = vmax.f32 %v8872_v53, 0.0  ;;  %13001 = vmatpush3.bf16.msra.mxu0 %v15079_v44  ;;  %11184 = vmatprep.mubr.bf16.mxu1 %v9028_v6  ;;  %v15087_v44 = vld [vmem:[#allocation22 + $0x110] sm:$0xff]  }
 0xe07   : > { %v18291_v52 = vmax.f32 %v8933_v32, 0.0  ;;  %v8935_v55 = vadd.f32 %v8903_v23, %v7806_v57  ;;  %11185 = vmatmul.mubr.bf16.vlgmr.msra.gmra.mrb[192].mxu1 %v9027_v36  ;;  %13002 = vmatprep.subr.bf16.mxu0 %v15082_v0  ;;  %v7811_v0 = vadd.f32 %v18257_v5, %v18170_v7  ;;  %v15089_v6 = vld [vmem:[#allocation22 + $0x190] sm:$0xff]   ;;  %v15092_v36 = vld [vmem:[#allocation22 + $0x1d8] sm:$0xff]   ;;  %v7815_v32 = vadd.f32 %v18257_v5, %v18174_v18 }
 0xe08   : > { %v8966_v42 = vmax.f32 %v8934_v37, 0.0  ;;  %v8936_v51 = vadd.f32 %v8904_v3, %v7807_v50  ;;  %13023 = vmatpush3.bf16.msra.mxu1 %v15081_v2  ;;  %v8762_v26 = vpop.f32.mrb[168].mxu0  ;;  %v15094_v3 = vld [vmem:[#allocation22 + $0x160] sm:$0xff]  }
 0xe09   : > { %8997 = vst [vmem:[%s18273_s6 + $0x20] sm:$0xff] %v18291_v52  ;;  %v18295_v59 = vmax.f32 %v8935_v55, 0.0  ;;  %v8873_v62 = vadd.f32 %v18248_v24, %v8762_v26  ;;  %v8764_v21 = vpop.f32.mrb[169].mxu0  ;;  %13024 = vmatprep.subr.bf16.mxu1 %v15084_v17  ;;  %v15091_v17 = vld [vmem:[#allocation22 + $0x118] sm:$0xff]   ;;  %v15096_v26 = vld [vmem:[#allocation22 + $0x1e0] sm:$0xff]  }
 0xe0a   : > { %8998 = vst [vmem:[%s18273_s6 + $0x28] sm:$0xff] %v8966_v42  ;;  %v8968_v49 = vmax.f32 %v8936_v51, 0.0  ;;  %v8874_v4 = vadd.f32 %v18251_v9, %v8764_v21  ;;  %13003 = vmatpush3.bf16.msra.mxu0 %v15083_v30  ;;  %v8766_v1 = vpop.f32.mrb[170].mxu0  ;;  %v9030_v35 = vpack.c.bf16 %v8966_v42, %v8966_v42 }
 0xe0b   : > { %8999 = vst [vmem:[%s18273_s6 + $0x30] sm:$0xff] %v18295_v59  ;;  %v8905_v29 = vmax.f32 %v8873_v62, 0.0  ;;  %v8875_v12 = vadd.f32 %v18248_v24, %v8766_v1  ;;  %v8768_v22 = vpop.f32.mrb[171].mxu0  ;;  %13004 = vmatprep.subr.bf16.mxu0 %v15086_v46  ;;  %v15093_v46 = vld [vmem:[#allocation22 + $0x198] sm:$0xff]  }
 0xe0c   : > { %9000 = vst [vmem:[%s18273_s6 + $0x38] sm:$0xff] %v8968_v49  ;;  %v8906_v14 = vmax.f32 %v8874_v4, 0.0  ;;  %v8876_v13 = vadd.f32 %v18251_v9, %v8768_v22  ;;  %13025 = vmatpush3.bf16.msra.mxu1 %v15085_v20  ;;  %11224 = vmatprep.mubr.bf16.mxu0 %v9030_v35  ;;  %v9032_v53 = vpack.c.bf16 %v8968_v49, %v8968_v49  ;;  %v15097_v22 = vld [vmem:[#allocation22 + $0x1a0] sm:$0xff]  }
 0xe0d   : > { %v8937_v2 = vadd.f32 %v8905_v29, %v7810_v15  ;;  %v8907_v57 = vmax.f32 %v8875_v12, 0.0  ;;  %13026 = vmatprep.subr.bf16.mxu1 %v15088_v40  ;;  %v15095_v40 = vld [vmem:[#allocation22 + $0x120] sm:$0xff]   ;;  %v7818_v49 = vadd.f32 %v18254_v63, %v18178_v33  ;;  %v7819_v15 = vadd.f32 %v18257_v5, %v18180_v41 }
 0xe0e   : > { %v8938_v7 = vadd.f32 %v8906_v14, %v7811_v0  ;;  %v8908_v23 = vmax.f32 %v8876_v13, 0.0  ;;  %13005 = vmatpush3.bf16.msra.mxu0 %v15087_v44  ;;  %11264 = vmatprep.mubr.bf16.mxu1 %v9032_v53  ;;  %v15098_v44 = vld [vmem:[#allocation22 + $0x168] sm:$0xff]   ;;  %v7822_v33 = vadd.f32 %v18254_v63, %v18182_v61  ;;  %v7823_v13 = vadd.f32 %v18257_v5, %v18184_v28 }
 0xe0f   : > { %v18313_v50 = vmax.f32 %v8937_v2, 0.0  ;;  %v8939_v37 = vadd.f32 %v8907_v57, %v7814_v54  ;;  %13006 = vmatprep.subr.bf16.mxu0 %v15090_v39  ;;  %v15100_v14 = vld [vmem:[#allocation22 + $0x1e8] sm:$0xff]   ;;  %v15102_v57 = vld [vmem:[#allocation22 + $0x170] sm:$0xff]  }
 0xe10   : > { %v18315_v31 = vmax.f32 %v8938_v7, 0.0  ;;  %v8940_v30 = vadd.f32 %v8908_v23, %v7815_v32  ;;  %13027 = vmatpush3.bf16.msra.mxu1 %v15089_v6  ;;  %v8772_v55 = vpop.f32.mrb[172].mxu0  ;;  %v15099_v6 = vld [vmem:[#allocation22 + $0x128] sm:$0xff]  }
 0xe11   : > { %9001 = vst [vmem:[%s18273_s6 + $0x40] sm:$0xff] %v18313_v50  ;;  %v18319_v18 = vmax.f32 %v8939_v37, 0.0  ;;  %v8877_v42 = vadd.f32 %v18248_v24, %v8772_v55  ;;  %v8774_v51 = vpop.f32.mrb[173].mxu0  ;;  %13028 = vmatprep.subr.bf16.mxu1 %v15092_v36  ;;  %v15101_v7 = vld [vmem:[#allocation22 + $0x1a8] sm:$0xff]   ;;  %v15104_v37 = vld [vmem:[#allocation22 + $0x1f0] sm:$0xff]  }
 0xe12   : > { %9002 = vst [vmem:[%s18273_s6 + $0x48] sm:$0xff] %v18315_v31  ;;  %v18324_v20 = vmax.f32 %v8940_v30, 0.0  ;;  %v8878_v62 = vadd.f32 %v18251_v9, %v8774_v51  ;;  %13007 = vmatpush3.bf16.msra.mxu0 %v15091_v17  ;;  %v8776_v21 = vpop.f32.mrb[174].mxu0 }
 0xe13   : > { %9003 = vst [vmem:[%s18273_s6 + $0x50] sm:$0xff] %v18319_v18  ;;  %v8909_v4 = vmax.f32 %v8877_v42, 0.0  ;;  %v8879_v1 = vadd.f32 %v18248_v24, %v8776_v21  ;;  %v8778_v35 = vpop.f32.mrb[175].mxu0  ;;  %13008 = vmatprep.subr.bf16.mxu0 %v15094_v3  ;;  %v7826_v42 = vadd.f32 %v18254_v63, %v18188_v19  ;;  %v15106_v21 = vld [vmem:[#allocation22 + $0x178] sm:$0xff]   ;;  %v7830_v19 = vadd.f32 %v18254_v63, %v18192_v47 }
 0xe14   : > { %9004 = vst [vmem:[%s18273_s6 + $0x58] sm:$0xff] %v18324_v20  ;;  %v8910_v29 = vmax.f32 %v8878_v62, 0.0  ;;  %v8880_v12 = vadd.f32 %v18251_v9, %v8778_v35  ;;  %13029 = vmatpush3.bf16.msra.mxu1 %v15093_v46  ;;  %v15103_v46 = vld [vmem:[#allocation22 + $0x130] sm:$0xff]  }
 0xe15   : > { %v8941_v39 = vadd.f32 %v8909_v4, %v7818_v49  ;;  %v8911_v0 = vmax.f32 %v8879_v1, 0.0  ;;  %13030 = vmatprep.subr.bf16.mxu1 %v15096_v26  ;;  %v15105_v1 = vld [vmem:[#allocation22 + $0x1b0] sm:$0xff]  }
 0xe16   : > { %v8942_v53 = vadd.f32 %v8910_v29, %v7819_v15  ;;  %v8912_v41 = vmax.f32 %v8880_v12, 0.0  ;;  %13009 = vmatpush3.bf16.msra.mxu0 %v15095_v40  ;;  %v7827_v40 = vadd.f32 %v18257_v5, %v18190_v10  ;;  %v15108_v15 = vld [vmem:[#allocation22 + $0x1f8] sm:$0xff]   ;;  %v7831_v29 = vadd.f32 %v18257_v5, %v18194_v34 }
 0xe17   : > { %v18341_v54 = vmax.f32 %v8941_v39, 0.0  ;;  %v8943_v2 = vadd.f32 %v8911_v0, %v7822_v33  ;;  %13010 = vmatprep.subr.bf16.mxu0 %v15098_v44  ;;  %v15110_v0 = vld [vmem:[#allocation22 + $0x240] sm:$0xff]  }
 0xe18   : > { %v18343_v36 = vmax.f32 %v8942_v53, 0.0  ;;  %v8944_v61 = vadd.f32 %v8912_v41, %v7823_v13  ;;  %13031 = vmatpush3.bf16.msra.mxu1 %v15097_v22  ;;  %v8782_v32 = vpop.f32.mrb[176].mxu0  ;;  %v15107_v22 = vld [vmem:[#allocation22 + $0x138] sm:$0xff]  }
 0xe19   : > { %9005 = vst [vmem:[%s18273_s6 + $0x60] sm:$0xff] %v18341_v54  ;;  %v18347_v28 = vmax.f32 %v8943_v2, 0.0  ;;  %v8881_v23 = vadd.f32 %v18248_v24, %v8782_v32  ;;  %v8784_v17 = vpop.f32.mrb[177].mxu0  ;;  %13032 = vmatprep.subr.bf16.mxu1 %v15100_v14  ;;  %v15109_v53 = vld [vmem:[#allocation22 + $0x1b8] sm:$0xff]   ;;  %v15112_v2 = vld [vmem:[#allocation22 + $0x2c0] sm:$0xff]  }
 0xe1a   : > { %9006 = vst [vmem:[%s18273_s6 + $0x68] sm:$0xff] %v18343_v36  ;;  %v18352_v3 = vmax.f32 %v8944_v61, 0.0  ;;  %v8882_v30 = vadd.f32 %v18251_v9, %v8784_v17  ;;  %13011 = vmatpush3.bf16.msra.mxu0 %v15099_v6  ;;  %v8786_v55 = vpop.f32.mrb[178].mxu0  ;;  %v9029_v17 = vpack.c.bf16 %v18291_v52, %v18291_v52  ;;  %v15113_v52 = vld [vmem:[#allocation22 + $0x280] sm:$0xff]  }
 0xe1b   : > { %9007 = vst [vmem:[%s18273_s6 + $0x70] sm:$0xff] %v18347_v28  ;;  %v8913_v51 = vmax.f32 %v8881_v23, 0.0  ;;  %v8883_v26 = vadd.f32 %v18248_v24, %v8786_v55  ;;  %v8788_v62 = vpop.f32.mrb[179].mxu0  ;;  %13012 = vmatprep.subr.bf16.mxu0 %v15102_v57  ;;  %v7834_v23 = vadd.f32 %v18254_v63, %v18198_v58  ;;  %v9034_v58 = vpack.c.bf16 %v18315_v31, %v18315_v31 }
 0xe1c   : > { %9008 = vst [vmem:[%s18273_s6 + $0x78] sm:$0xff] %v18352_v3  ;;  %v8914_v49 = vmax.f32 %v8882_v30, 0.0  ;;  %v8884_v4 = vadd.f32 %v18251_v9, %v8788_v62  ;;  %13033 = vmatpush3.bf16.msra.mxu1 %v15101_v7  ;;  %v15111_v7 = vld [vmem:[#allocation22 + $0x200] sm:$0xff]   ;;  %v7838_v62 = vadd.f32 %v18254_v63, %v18202_v48  ;;  %v9036_v31 = vpack.c.bf16 %v18324_v20, %v18324_v20  ;;  %v15115_v48 = vld [vmem:[#allocation22 + $0x208] sm:$0xff]  }
 0xe1d   : > { %v8945_v35 = vadd.f32 %v8913_v51, %v7826_v42  ;;  %v8915_v44 = vmax.f32 %v8883_v26, 0.0  ;;  %13034 = vmatprep.subr.bf16.mxu1 %v15104_v37  ;;  %v7835_v42 = vadd.f32 %v18257_v5, %v18200_v60  ;;  %v15116_v60 = vld [vmem:[#allocation22 + $0x2c8] sm:$0xff]  }
 0xe1e   : > { %v8946_v12 = vadd.f32 %v8914_v49, %v7827_v40  ;;  %v8916_v10 = vmax.f32 %v8884_v4, 0.0  ;;  %13013 = vmatpush3.bf16.msra.mxu0 %v15103_v46  ;;  %v15114_v46 = vld [vmem:[#allocation22 + $0x248] sm:$0xff]   ;;  %v7839_v4 = vadd.f32 %v18257_v5, %v18204_v45 }
 0xe1f   : > { %v18369_v33 = vmax.f32 %v8945_v35, 0.0  ;;  %v8947_v39 = vadd.f32 %v8915_v44, %v7830_v19  ;;  %13014 = vmatprep.subr.bf16.mxu0 %v15106_v21  ;;  %v9031_v21 = vpack.c.bf16 %v18295_v59, %v18295_v59  ;;  %v15118_v44 = vld [vmem:[#allocation22 + $0x250] sm:$0xff]  }
 0xe20   : > { %v18371_v14 = vmax.f32 %v8946_v12, 0.0  ;;  %v8948_v47 = vadd.f32 %v8916_v10, %v7831_v29  ;;  %13035 = vmatpush3.bf16.msra.mxu1 %v15105_v1  ;;  %v8792_v13 = vpop.f32.mrb[180].mxu0  ;;  %v15117_v12 = vld [vmem:[#allocation22 + $0x288] sm:$0xff]  }
 0xe21   : > { %9009 = vst [vmem:[%s18273_s6 + $0x80] sm:$0xff] %v18369_v33  ;;  %v18375_v34 = vmax.f32 %v8947_v39, 0.0  ;;  %v8885_v41 = vadd.f32 %v18248_v24, %v8792_v13  ;;  %v8794_v6 = vpop.f32.mrb[181].mxu0  ;;  %13036 = vmatprep.subr.bf16.mxu1 %v15108_v15  ;;  %v15120_v39 = vld [vmem:[#allocation22 + $0x2d0] sm:$0xff]  }
 0xe22   : > { %9010 = vst [vmem:[%s18273_s6 + $0x88] sm:$0xff] %v18371_v14  ;;  %v18380_v57 = vmax.f32 %v8948_v47, 0.0  ;;  %v8886_v61 = vadd.f32 %v18251_v9, %v8794_v6  ;;  %13015 = vmatpush3.bf16.msra.mxu0 %v15107_v22  ;;  %v8796_v32 = vpop.f32.mrb[182].mxu0 }
 0xe23   : > { %9011 = vst [vmem:[%s18273_s6 + $0x90] sm:$0xff] %v18375_v34  ;;  %v8917_v37 = vmax.f32 %v8885_v41, 0.0  ;;  %v8887_v30 = vadd.f32 %v18248_v24, %v8796_v32  ;;  %v8798_v55 = vpop.f32.mrb[183].mxu0  ;;  %13044 = vmatprep.subr.bf16.mxu0 %v15110_v0  ;;  %v7842_v41 = vadd.f32 %v18254_v63, %v18208_v38  ;;  %v15122_v32 = vld [vmem:[#allocation22 + $0x258] sm:$0xff]   ;;  %v7846_v38 = vadd.f32 %v18254_v63, %v18212_v11 }
 0xe24   : > { %9012 = vst [vmem:[%s18273_s6 + $0x98] sm:$0xff] %v18380_v57  ;;  %v8918_v51 = vmax.f32 %v8886_v61, 0.0  ;;  %v8888_v26 = vadd.f32 %v18251_v9, %v8798_v55  ;;  %13037 = vmatpush3.bf16.msra.mxu1 %v15109_v53  ;;  %v15119_v53 = vld [vmem:[#allocation22 + $0x210] sm:$0xff]  }
 0xe25   : > { %v8949_v40 = vadd.f32 %v8917_v37, %v7834_v23  ;;  %v8919_v49 = vmax.f32 %v8887_v30, 0.0  ;;  %11225 = vmatmul.mubr.bf16.vlgmr.msra.gmra.mrb[196].mxu0 %v9029_v17  ;;  %13066 = vmatprep.subr.bf16.mxu1 %v15112_v2  ;;  %v15121_v37 = vld [vmem:[#allocation22 + $0x290] sm:$0xff]  }
 0xe26   : > { %v8950_v1 = vadd.f32 %v8918_v51, %v7835_v42  ;;  %v8920_v19 = vmax.f32 %v8888_v26, 0.0  ;;  %13045 = vmatpush3.bf16.msra.mxu0 %v15111_v7  ;;  %11304 = vmatprep.mubr.bf16.mxu0 %v9034_v58  ;;  %v7843_v7 = vadd.f32 %v18257_v5, %v18210_v25  ;;  %v7847_v42 = vadd.f32 %v18257_v5, %v18214_v8  ;;  %v15123_v26 = vld [vmem:[#allocation22 + $0x218] sm:$0xff]  }
 0xe27   : > { %v18405_v35 = vmax.f32 %v8949_v40, 0.0  ;;  %v8951_v59 = vadd.f32 %v8919_v49, %v7838_v62  ;;  %11265 = vmatmul.mubr.bf16.vlgmr.msra.gmra.mrb[196].mxu1 %v9031_v21  ;;  %13046 = vmatprep.subr.bf16.mxu0 %v15114_v46  ;;  %v15124_v46 = vld [vmem:[#allocation22 + $0x2d8] sm:$0xff]   ;;  %v15126_v62 = vld [vmem:[#allocation22 + $0x260] sm:$0xff]  }
 0xe28   : > { %v18407_v15 = vmax.f32 %v8950_v1, 0.0  ;;  %v8952_v29 = vadd.f32 %v8920_v19, %v7839_v4  ;;  %13067 = vmatpush3.bf16.msra.mxu1 %v15113_v52  ;;  %11344 = vmatprep.mubr.bf16.mxu1 %v9036_v31  ;;  %v8802_v45 = vpop.f32.mrb[184].mxu0  ;;  %v15125_v49 = vld [vmem:[#allocation22 + $0x298] sm:$0xff]   ;;  %v15128_v1 = vld [vmem:[#allocation22 + $0x2e0] sm:$0xff]  }
 0xe29   : > { %9013 = vst [vmem:[%s18273_s6 + $0xa0] sm:$0xff] %v18405_v35  ;;  %v18411_v10 = vmax.f32 %v8951_v59, 0.0  ;;  %v8889_v20 = vadd.f32 %v18248_v24, %v8802_v45  ;;  %v8804_v22 = vpop.f32.mrb[185].mxu0  ;;  %13068 = vmatprep.subr.bf16.mxu1 %v15116_v60  ;;  %v15127_v59 = vld [vmem:[#allocation22 + $0x220] sm:$0xff]  }
 0xe2a   : > { %9014 = vst [vmem:[%s18273_s6 + $0xa8] sm:$0xff] %v18407_v15  ;;  %v18416_v0 = vmax.f32 %v8952_v29, 0.0  ;;  %v8890_v47 = vadd.f32 %v18251_v9, %v8804_v22  ;;  %13047 = vmatpush3.bf16.msra.mxu0 %v15115_v48  ;;  %v8806_v13 = vpop.f32.mrb[186].mxu0  ;;  %v7851_v22 = vadd.f32 %v18257_v5, %v18220_v43 }
 0xe2b   : > { %9015 = vst [vmem:[%s18273_s6 + $0xb0] sm:$0xff] %v18411_v10  ;;  %v8921_v6 = vmax.f32 %v8889_v20, 0.0  ;;  %v8891_v2 = vadd.f32 %v18248_v24, %v8806_v13  ;;  %v8808_v61 = vpop.f32.mrb[187].mxu0  ;;  %13048 = vmatprep.subr.bf16.mxu0 %v15118_v44  ;;  %v7850_v44 = vadd.f32 %v18254_v63, %v18218_v16  ;;  %v15130_v20 = vld [vmem:[#allocation22 + $0x268] sm:$0xff]   ;;  %v15129_v13 = vld [vmem:[#allocation22 + $0x2a0] sm:$0xff]   ;;  %v7854_v16 = vadd.f32 %v18254_v63, %v18222_v56 }
 0xe2c   : > { %9016 = vst [vmem:[%s18273_s6 + $0xb8] sm:$0xff] %v18416_v0  ;;  %v8922_v23 = vmax.f32 %v8890_v47, 0.0  ;;  %v8892_v17 = vadd.f32 %v18251_v9, %v8808_v61  ;;  %13069 = vmatpush3.bf16.msra.mxu1 %v15117_v12  ;;  %v15131_v61 = vld [vmem:[#allocation22 + $0x228] sm:$0xff]  }
 0xe2d   : > { %v8953_v30 = vadd.f32 %v8921_v6, %v7842_v41  ;;  %v8923_v55 = vmax.f32 %v8891_v2, 0.0  ;;  %13070 = vmatprep.subr.bf16.mxu1 %v15120_v39  ;;  %v7855_v6 = vadd.f32 %v18257_v5, %v18224_v27  ;;  %v15136_v5 = vld [vmem:[#allocation22 + $0x2f0] sm:$0xff]  }
 0xe2e   : > { %v8954_v51 = vadd.f32 %v8922_v23, %v7843_v7  ;;  %v8924_v25 = vmax.f32 %v8892_v17, 0.0  ;;  %13049 = vmatpush3.bf16.msra.mxu0 %v15119_v53  ;;  %v15134_v7 = vld [vmem:[#allocation22 + $0x270] sm:$0xff]   ;;  %v15133_v23 = vld [vmem:[#allocation22 + $0x2a8] sm:$0xff]  }
 0xe2f   : > { %v18433_v58 = vmax.f32 %v8953_v30, 0.0  ;;  %v8955_v52 = vadd.f32 %v8923_v55, %v7846_v38  ;;  %13050 = vmatprep.subr.bf16.mxu0 %v15122_v32  ;;  %v15138_v38 = vld [vmem:[#allocation22 + $0x278] sm:$0xff]   ;;  %v15137_v30 = vld [vmem:[#allocation22 + $0x2b0] sm:$0xff]  }
 0xe30   : > { %v18435_v21 = vmax.f32 %v8954_v51, 0.0  ;;  %v8956_v11 = vadd.f32 %v8924_v25, %v7847_v42  ;;  %13071 = vmatpush3.bf16.msra.mxu1 %v15121_v37  ;;  %v8812_v40 = vpop.f32.mrb[188].mxu0  ;;  %v15135_v37 = vld [vmem:[#allocation22 + $0x230] sm:$0xff]   ;;  %v15140_v55 = vld [vmem:[#allocation22 + $0x2f8] sm:$0xff]   ;;  %v15142_v42 = vld [vmem:[#allocation22 + $0x340] sm:$0xff]  }
 0xe31   : > { %9017 = vst [vmem:[%s18273_s6 + $0xc0] sm:$0xff] %v18433_v58  ;;  %v18439_v8 = vmax.f32 %v8955_v52, 0.0  ;;  %v8893_v60 = vadd.f32 %v18248_v24, %v8812_v40  ;;  %v8814_v4 = vpop.f32.mrb[189].mxu0  ;;  %13072 = vmatprep.subr.bf16.mxu1 %v15124_v46  ;;  %v15139_v46 = vld [vmem:[#allocation22 + $0x238] sm:$0xff]   ;;  %v15144_v25 = vld [vmem:[#allocation22 + $0x3c0] sm:$0xff]   ;;  %v9033_v52 = vpack.c.bf16 %v18313_v50, %v18313_v50  ;;  %v15150_v50 = vld [vmem:[#allocation22 + $0x350] sm:$0xff]  }
 0xe32   : > { %9018 = vst [vmem:[%s18273_s6 + $0xc8] sm:$0xff] %v18435_v21  ;;  %v18444_v19 = vmax.f32 %v8956_v11, 0.0  ;;  %v8894_v31 = vadd.f32 %v18251_v9, %v8814_v4  ;;  %13051 = vmatpush3.bf16.msra.mxu0 %v15123_v26  ;;  %v8816_v48 = vpop.f32.mrb[190].mxu0  ;;  %v15141_v51 = vld [vmem:[#allocation22 + $0x2b8] sm:$0xff]   ;;  %v15143_v26 = vld [vmem:[#allocation22 + $0x300] sm:$0xff]   ;;  %v9038_v11 = vpack.c.bf16 %v18343_v36, %v18343_v36  ;;  %v9040_v4 = vpack.c.bf16 %v18352_v3, %v18352_v3  ;;  %v15152_v36 = vld [vmem:[#allocation22 + $0x3d0] sm:$0xff]  }
 0xe33   : > { %9019 = vst [vmem:[%s18273_s6 + $0xd0] sm:$0xff] %v18439_v8  ;;  %v8925_v29 = vmax.f32 %v8893_v60, 0.0  ;;  %v8895_v45 = vadd.f32 %v18248_v24, %v8816_v48  ;;  %v8818_v12 = vpop.f32.mrb[191].mxu0  ;;  %13052 = vmatprep.subr.bf16.mxu0 %v15126_v62  ;;  %v15132_v24 = vld [vmem:[#allocation22 + $0x2e8] sm:$0xff]   ;;  %v15145_v40 = vld [vmem:[#allocation22 + $0x380] sm:$0xff]   ;;  %v15151_v48 = vld [vmem:[#allocation22 + $0x310] sm:$0xff]  }
 0xe34   : > { %9020 = vst [vmem:[%s18273_s6 + $0xd8] sm:$0xff] %v18444_v19  ;;  %v8926_v39 = vmax.f32 %v8894_v31, 0.0  ;;  %v8896_v47 = vadd.f32 %v18251_v9, %v8818_v12  ;;  %13073 = vmatpush3.bf16.msra.mxu1 %v15125_v49  ;;  %v15146_v62 = vld [vmem:[#allocation22 + $0x348] sm:$0xff]   ;;  %v9035_v49 = vpack.c.bf16 %v18319_v18, %v18319_v18  ;;  %v15154_v18 = vld [vmem:[#allocation22 + $0x358] sm:$0xff]   ;;  %v15158_v3 = vld [vmem:[#allocation22 + $0x360] sm:$0xff]  }
 0xe35   : > { %v8957_v53 = vadd.f32 %v8925_v29, %v7850_v44  ;;  %v8927_v41 = vmax.f32 %v8895_v45, 0.0  ;;  %13074 = vmatprep.subr.bf16.mxu1 %v15128_v1  ;;  %v15148_v60 = vld [vmem:[#allocation22 + $0x3c8] sm:$0xff]   ;;  %v15156_v44 = vld [vmem:[#allocation22 + $0x3d8] sm:$0xff]   ;;  %v15160_v12 = vld [vmem:[#allocation22 + $0x3e0] sm:$0xff]  }
 0xe36   : > { %v8958_v2 = vadd.f32 %v8926_v39, %v7851_v22  ;;  %v8928_v43 = vmax.f32 %v8896_v47, 0.0  ;;  %13053 = vmatpush3.bf16.msra.mxu0 %v15127_v59  ;;  %v15147_v1 = vld [vmem:[#allocation22 + $0x308] sm:$0xff]   ;;  %v15153_v59 = vld [vmem:[#allocation22 + $0x390] sm:$0xff]   ;;  %v15155_v29 = vld [vmem:[#allocation22 + $0x318] sm:$0xff]  }
 0xe37   : > { %v18461_v32 = vmax.f32 %v8957_v53, 0.0  ;;  %v8959_v9 = vadd.f32 %v8927_v41, %v7854_v16  ;;  %13054 = vmatprep.subr.bf16.mxu0 %v15130_v20  ;;  %v15149_v31 = vld [vmem:[#allocation22 + $0x388] sm:$0xff]   ;;  %v15157_v45 = vld [vmem:[#allocation22 + $0x398] sm:$0xff]   ;;  %v15159_v20 = vld [vmem:[#allocation22 + $0x320] sm:$0xff]  }
 0xe38   : > { %v18463_v56 = vmax.f32 %v8958_v2, 0.0  ;;  %v8960_v63 = vadd.f32 %v8928_v43, %v7855_v6  ;;  %13075 = vmatpush3.bf16.msra.mxu1 %v15129_v13  ;;  %v15162_v22 = vld [vmem:[#allocation22 + $0x368] sm:$0xff]   ;;  %v15161_v39 = vld [vmem:[#allocation22 + $0x3a0] sm:$0xff]   ;;  %v15166_v16 = vld [vmem:[#allocation22 + $0x370] sm:$0xff]  }
 0xe39   : > { %9021 = vst [vmem:[%s18273_s6 + $0xe0] sm:$0xff] %v18461_v32  ;;  %v18467_v27 = vmax.f32 %v8959_v9, 0.0  ;;  %13076 = vmatprep.subr.bf16.mxu1 %v15132_v24  ;;  %v15164_v47 = vld [vmem:[#allocation22 + $0x3e8] sm:$0xff]   ;;  %v15168_v41 = vld [vmem:[#allocation22 + $0x3f0] sm:$0xff]   ;;  %v15170_v6 = vld [vmem:[#allocation22 + $0x378] sm:$0xff]  }
 0xe3a   : > { %9022 = vst [vmem:[%s18273_s6 + $0xe8] sm:$0xff] %v18463_v56  ;;  %v18471_v17 = vmax.f32 %v8960_v63, 0.0  ;;  %13055 = vmatpush3.bf16.msra.mxu0 %v15131_v61  ;;  %v15163_v13 = vld [vmem:[#allocation22 + $0x328] sm:$0xff]   ;;  %v15167_v24 = vld [vmem:[#allocation22 + $0x330] sm:$0xff]   ;;  %v15172_v43 = vld [vmem:[#allocation22 + $0x3f8] sm:$0xff]  }
 0xe3b   : > { %9023 = vst [vmem:[%s18273_s6 + $0xf0] sm:$0xff] %v18467_v27  ;;  %13056 = vmatprep.subr.bf16.mxu0 %v15134_v7  ;;  %v15165_v53 = vld [vmem:[#allocation22 + $0x3a8] sm:$0xff]   ;;  %v15169_v2 = vld [vmem:[#allocation22 + $0x3b0] sm:$0xff]   ;;  %v15171_v61 = vld [vmem:[#allocation22 + $0x338] sm:$0xff]  }
 0xe3c   : > { %9024 = vst [vmem:[%s18273_s6 + $0xf8] sm:$0xff] %v18471_v17  ;;  %13077 = vmatpush3.bf16.msra.mxu1 %v15133_v23  ;;  %v15174_v9 = vld [vmem:[#allocation22 + $0x440] sm:$0xff]   ;;  %v15173_v7 = vld [vmem:[#allocation22 + $0x3b8] sm:$0xff]  }
 0xe3d   : > { %13078 = vmatprep.subr.bf16.mxu1 %v15136_v5  ;;  %v15176_v63 = vld [vmem:[#allocation22 + $0x4c0] sm:$0xff]   ;;  %v9037_v5 = vpack.c.bf16 %v18341_v54, %v18341_v54  ;;  %v15182_v54 = vld [vmem:[#allocation22 + $0x450] sm:$0xff]  }
 0xe3e   : > { %13057 = vmatpush3.bf16.msra.mxu0 %v15135_v37  ;;  %v15175_v23 = vld [vmem:[#allocation22 + $0x400] sm:$0xff]   ;;  %v15178_v37 = vld [vmem:[#allocation22 + $0x448] sm:$0xff]  }
 0xe3f   : > { %13058 = vmatprep.subr.bf16.mxu0 %v15138_v38  ;;  %v9042_v38 = vpack.c.bf16 %v18371_v14, %v18371_v14  ;;  %v15184_v14 = vld [vmem:[#allocation22 + $0x4d0] sm:$0xff]  }
 0xe40   : > { %13079 = vmatpush3.bf16.msra.mxu1 %v15137_v30  ;;  %v15177_v30 = vld [vmem:[#allocation22 + $0x480] sm:$0xff]  }
 0xe41   : > { %13080 = vmatprep.subr.bf16.mxu1 %v15140_v55  ;;  %v9039_v55 = vpack.c.bf16 %v18347_v28, %v18347_v28  ;;  %v15186_v28 = vld [vmem:[#allocation22 + $0x458] sm:$0xff]  }
 0xe42   : > { %13059 = vmatpush3.bf16.msra.mxu0 %v15139_v46  ;;  %v15180_v46 = vld [vmem:[#allocation22 + $0x4c8] sm:$0xff]  }
 0xe43   : > { %13088 = vmatprep.subr.bf16.mxu0 %v15142_v42  ;;  %v9044_v42 = vpack.c.bf16 %v18380_v57, %v18380_v57  ;;  %v15190_v57 = vld [vmem:[#allocation22 + $0x460] sm:$0xff]  }
 0xe44   : > { %13081 = vmatpush3.bf16.msra.mxu1 %v15141_v51  ;;  %v15179_v51 = vld [vmem:[#allocation22 + $0x408] sm:$0xff]  }
 0xe45   : > { %11305 = vmatmul.mubr.bf16.vlgmr.msra.gmra.mrb[200].mxu0 %v9033_v52  ;;  %13110 = vmatprep.subr.bf16.mxu1 %v15144_v25  ;;  %v15181_v25 = vld [vmem:[#allocation22 + $0x488] sm:$0xff]   ;;  %v15185_v52 = vld [vmem:[#allocation22 + $0x490] sm:$0xff]  }
 0xe46   : > { %13089 = vmatpush3.bf16.msra.mxu0 %v15143_v26  ;;  %11384 = vmatprep.mubr.bf16.mxu0 %v9038_v11  ;;  %v15183_v26 = vld [vmem:[#allocation22 + $0x410] sm:$0xff]   ;;  %v15187_v11 = vld [vmem:[#allocation22 + $0x418] sm:$0xff]  }
 0xe47   : > { %11345 = vmatmul.mubr.bf16.vlgmr.msra.gmra.mrb[200].mxu1 %v9035_v49  ;;  %13090 = vmatprep.subr.bf16.mxu0 %v15146_v62  ;;  %v15188_v62 = vld [vmem:[#allocation22 + $0x4d8] sm:$0xff]   ;;  %v15192_v49 = vld [vmem:[#allocation22 + $0x4e0] sm:$0xff]  }
 0xe48   : > { %13111 = vmatpush3.bf16.msra.mxu1 %v15145_v40  ;;  %11424 = vmatprep.mubr.bf16.mxu1 %v9040_v4  ;;  %v15189_v40 = vld [vmem:[#allocation22 + $0x498] sm:$0xff]   ;;  %v15194_v4 = vld [vmem:[#allocation22 + $0x468] sm:$0xff]  }
 0xe49   : > { %13112 = vmatprep.subr.bf16.mxu1 %v15148_v60  ;;  %v15191_v60 = vld [vmem:[#allocation22 + $0x420] sm:$0xff]  }
 0xe4a   : > { %13091 = vmatpush3.bf16.msra.mxu0 %v15147_v1  ;;  %v15193_v1 = vld [vmem:[#allocation22 + $0x4a0] sm:$0xff]  }
 0xe4b   : > { %13092 = vmatprep.subr.bf16.mxu0 %v15150_v50  ;;  %v15196_v50 = vld [vmem:[#allocation22 + $0x4e8] sm:$0xff]  }
 0xe4c   : > { %13113 = vmatpush3.bf16.msra.mxu1 %v15149_v31  ;;  %v15195_v31 = vld [vmem:[#allocation22 + $0x428] sm:$0xff]  }
 0xe4d   : > { %13114 = vmatprep.subr.bf16.mxu1 %v15152_v36  ;;  %v15198_v36 = vld [vmem:[#allocation22 + $0x470] sm:$0xff]  }
 0xe4e   : > { %13093 = vmatpush3.bf16.msra.mxu0 %v15151_v48  ;;  %v15197_v48 = vld [vmem:[#allocation22 + $0x4a8] sm:$0xff]  }
 0xe4f   : > { %13094 = vmatprep.subr.bf16.mxu0 %v15154_v18  ;;  %v15200_v18 = vld [vmem:[#allocation22 + $0x4f0] sm:$0xff]  }
 0xe50   : > { %13115 = vmatpush3.bf16.msra.mxu1 %v15153_v59  ;;  %v15199_v59 = vld [vmem:[#allocation22 + $0x430] sm:$0xff]  }
 0xe51   : > { %13116 = vmatprep.subr.bf16.mxu1 %v15156_v44  ;;  %v15202_v44 = vld [vmem:[#allocation22 + $0x478] sm:$0xff]  }
 0xe52   : > { %13095 = vmatpush3.bf16.msra.mxu0 %v15155_v29  ;;  %v15201_v29 = vld [vmem:[#allocation22 + $0x4b0] sm:$0xff]  }
 0xe53   : > { %13096 = vmatprep.subr.bf16.mxu0 %v15158_v3  ;;  %v15204_v3 = vld [vmem:[#allocation22 + $0x4f8] sm:$0xff]  }
 0xe54   : > { %13117 = vmatpush3.bf16.msra.mxu1 %v15157_v45  ;;  %v15203_v45 = vld [vmem:[#allocation22 + $0x438] sm:$0xff]  }
 0xe55   : > { %13118 = vmatprep.subr.bf16.mxu1 %v15160_v12  ;;  %v15206_v12 = vld [vmem:[#allocation22 + $0x540] sm:$0xff]  }
 0xe56   : > { %13097 = vmatpush3.bf16.msra.mxu0 %v15159_v20  ;;  %v15205_v20 = vld [vmem:[#allocation22 + $0x4b8] sm:$0xff]  }
 0xe57   : > { %13098 = vmatprep.subr.bf16.mxu0 %v15162_v22  ;;  %v15208_v22 = vld [vmem:[#allocation22 + $0x5c0] sm:$0xff]  }
 0xe58   : > { %13119 = vmatpush3.bf16.msra.mxu1 %v15161_v39  ;;  %v15207_v39 = vld [vmem:[#allocation22 + $0x500] sm:$0xff]  }
 0xe59   : > { %13120 = vmatprep.subr.bf16.mxu1 %v15164_v47  ;;  %v9041_v47 = vpack.c.bf16 %v18369_v33, %v18369_v33  ;;  %v15214_v33 = vld [vmem:[#allocation22 + $0x550] sm:$0xff]  }
 0xe5a   : > { %13099 = vmatpush3.bf16.msra.mxu0 %v15163_v13  ;;  %v15210_v13 = vld [vmem:[#allocation22 + $0x548] sm:$0xff]  }
 0xe5b   : > { %13100 = vmatprep.subr.bf16.mxu0 %v15166_v16  ;;  %v9046_v16 = vpack.c.bf16 %v18407_v15, %v18407_v15  ;;  %v15216_v15 = vld [vmem:[#allocation22 + $0x5d0] sm:$0xff]  }
 0xe5c   : > { %13121 = vmatpush3.bf16.msra.mxu1 %v15165_v53  ;;  %v15209_v53 = vld [vmem:[#allocation22 + $0x580] sm:$0xff]  }
 0xe5d   : > { %13122 = vmatprep.subr.bf16.mxu1 %v15168_v41  ;;  %v9043_v41 = vpack.c.bf16 %v18375_v34, %v18375_v34  ;;  %v15218_v34 = vld [vmem:[#allocation22 + $0x558] sm:$0xff]  }
 0xe5e   : > { %13101 = vmatpush3.bf16.msra.mxu0 %v15167_v24  ;;  %v15212_v24 = vld [vmem:[#allocation22 + $0x5c8] sm:$0xff]  }
 0xe5f   : > { %13102 = vmatprep.subr.bf16.mxu0 %v15170_v6  ;;  %v9048_v6 = vpack.c.bf16 %v18416_v0, %v18416_v0  ;;  %v15222_v0 = vld [vmem:[#allocation22 + $0x560] sm:$0xff]  }
 0xe60   : > { %13123 = vmatpush3.bf16.msra.mxu1 %v15169_v2  ;;  %v15211_v2 = vld [vmem:[#allocation22 + $0x508] sm:$0xff]  }
 0xe61   : > { %13124 = vmatprep.subr.bf16.mxu1 %v15172_v43  ;;  %v15213_v43 = vld [vmem:[#allocation22 + $0x588] sm:$0xff]  }
 0xe62   : > { %13103 = vmatpush3.bf16.msra.mxu0 %v15171_v61  ;;  %v15215_v61 = vld [vmem:[#allocation22 + $0x510] sm:$0xff]  }
 0xe63   : > { %13132 = vmatprep.subr.bf16.mxu0 %v15174_v9  ;;  %v15217_v9 = vld [vmem:[#allocation22 + $0x590] sm:$0xff]  }
 0xe64   : > { %13125 = vmatpush3.bf16.msra.mxu1 %v15173_v7  ;;  %v15220_v7 = vld [vmem:[#allocation22 + $0x5d8] sm:$0xff]  }
 0xe65   : > { %11385 = vmatmul.mubr.bf16.vlgmr.msra.gmra.mrb[204].mxu0 %v9037_v5  ;;  %13154 = vmatprep.subr.bf16.mxu1 %v15176_v63  ;;  %v15219_v63 = vld [vmem:[#allocation22 + $0x518] sm:$0xff]   ;;  %v15224_v5 = vld [vmem:[#allocation22 + $0x5e0] sm:$0xff]  }
 0xe66   : > { %13133 = vmatpush3.bf16.msra.mxu0 %v15175_v23  ;;  %11464 = vmatprep.mubr.bf16.mxu0 %v9042_v38  ;;  %v15221_v23 = vld [vmem:[#allocation22 + $0x598] sm:$0xff]   ;;  %v15226_v38 = vld [vmem:[#allocation22 + $0x568] sm:$0xff]  }
 0xe67   : > { %11425 = vmatmul.mubr.bf16.vlgmr.msra.gmra.mrb[204].mxu1 %v9039_v55  ;;  %13134 = vmatprep.subr.bf16.mxu0 %v15178_v37  ;;  %v15223_v37 = vld [vmem:[#allocation22 + $0x520] sm:$0xff]   ;;  %v15228_v55 = vld [vmem:[#allocation22 + $0x5e8] sm:$0xff]  }
 0xe68   : > { %13155 = vmatpush3.bf16.msra.mxu1 %v15177_v30  ;;  %11504 = vmatprep.mubr.bf16.mxu1 %v9044_v42  ;;  %v15225_v30 = vld [vmem:[#allocation22 + $0x5a0] sm:$0xff]   ;;  %v15230_v42 = vld [vmem:[#allocation22 + $0x570] sm:$0xff]  }
 0xe69   : > { %13156 = vmatprep.subr.bf16.mxu1 %v15180_v46  ;;  %v15227_v46 = vld [vmem:[#allocation22 + $0x528] sm:$0xff]  }
 0xe6a   : > { %13135 = vmatpush3.bf16.msra.mxu0 %v15179_v51  ;;  %v15229_v51 = vld [vmem:[#allocation22 + $0x5a8] sm:$0xff]  }
 0xe6b   : > { %13136 = vmatprep.subr.bf16.mxu0 %v15182_v54  ;;  %v15232_v54 = vld [vmem:[#allocation22 + $0x5f0] sm:$0xff]  }
 0xe6c   : > { %13157 = vmatpush3.bf16.msra.mxu1 %v15181_v25  ;;  %v15231_v25 = vld [vmem:[#allocation22 + $0x530] sm:$0xff]  }
 0xe6d   : > { %13158 = vmatprep.subr.bf16.mxu1 %v15184_v14  ;;  %v15234_v14 = vld [vmem:[#allocation22 + $0x578] sm:$0xff]  }
 0xe6e   : > { %13137 = vmatpush3.bf16.msra.mxu0 %v15183_v26  ;;  %v15233_v26 = vld [vmem:[#allocation22 + $0x5b0] sm:$0xff]  }
 0xe6f   : > { %13138 = vmatprep.subr.bf16.mxu0 %v15186_v28  ;;  %v15236_v28 = vld [vmem:[#allocation22 + $0x5f8] sm:$0xff]  }
 0xe70   : > { %13159 = vmatpush3.bf16.msra.mxu1 %v15185_v52  ;;  %v15235_v52 = vld [vmem:[#allocation22 + $0x538] sm:$0xff]  }
 0xe71   : > { %13160 = vmatprep.subr.bf16.mxu1 %v15188_v62  ;;  %v15238_v62 = vld [vmem:[#allocation22 + $0x640] sm:$0xff]  }
 0xe72   : > { %13139 = vmatpush3.bf16.msra.mxu0 %v15187_v11  ;;  %v15237_v11 = vld [vmem:[#allocation22 + $0x5b8] sm:$0xff]  }
 0xe73   : > { %13140 = vmatprep.subr.bf16.mxu0 %v15190_v57  ;;  %v15240_v57 = vld [vmem:[#allocation22 + $0x6c0] sm:$0xff]  }
 0xe74   : > { %13161 = vmatpush3.bf16.msra.mxu1 %v15189_v40  ;;  %v15239_v40 = vld [vmem:[#allocation22 + $0x600] sm:$0xff]  }
 0xe75   : > { %13162 = vmatprep.subr.bf16.mxu1 %v15192_v49  ;;  %v9045_v49 = vpack.c.bf16 %v18405_v35, %v18405_v35  ;;  %v15246_v35 = vld [vmem:[#allocation22 + $0x650] sm:$0xff]  }
 0xe76   : > { %13141 = vmatpush3.bf16.msra.mxu0 %v15191_v60  ;;  %v15242_v60 = vld [vmem:[#allocation22 + $0x648] sm:$0xff]  }
 0xe77   : > { %13142 = vmatprep.subr.bf16.mxu0 %v15194_v4  ;;  %v9050_v4 = vpack.c.bf16 %v18435_v21, %v18435_v21  ;;  %v15248_v21 = vld [vmem:[#allocation22 + $0x6d0] sm:$0xff]  }
 0xe78   : > { %13163 = vmatpush3.bf16.msra.mxu1 %v15193_v1  ;;  %v15241_v1 = vld [vmem:[#allocation22 + $0x680] sm:$0xff]  }
 0xe79   : > { %13164 = vmatprep.subr.bf16.mxu1 %v15196_v50  ;;  %v9047_v50 = vpack.c.bf16 %v18411_v10, %v18411_v10  ;;  %v15250_v10 = vld [vmem:[#allocation22 + $0x658] sm:$0xff]  }
 0xe7a   : > { %13143 = vmatpush3.bf16.msra.mxu0 %v15195_v31  ;;  %v15244_v31 = vld [vmem:[#allocation22 + $0x6c8] sm:$0xff]  }
 0xe7b   : > { %13144 = vmatprep.subr.bf16.mxu0 %v15198_v36  ;;  %v9052_v36 = vpack.c.bf16 %v18444_v19, %v18444_v19  ;;  %v15254_v19 = vld [vmem:[#allocation22 + $0x660] sm:$0xff]  }
 0xe7c   : > { %13165 = vmatpush3.bf16.msra.mxu1 %v15197_v48  ;;  %v15243_v48 = vld [vmem:[#allocation22 + $0x608] sm:$0xff]  }
 0xe7d   : > { %13166 = vmatprep.subr.bf16.mxu1 %v15200_v18  ;;  %v15245_v18 = vld [vmem:[#allocation22 + $0x688] sm:$0xff]  }
 0xe7e   : > { %13145 = vmatpush3.bf16.msra.mxu0 %v15199_v59  ;;  %v15247_v59 = vld [vmem:[#allocation22 + $0x610] sm:$0xff]  }
 0xe7f   : > { %13146 = vmatprep.subr.bf16.mxu0 %v15202_v44  ;;  %v15249_v44 = vld [vmem:[#allocation22 + $0x690] sm:$0xff]  }
 0xe80   : > { %13167 = vmatpush3.bf16.msra.mxu1 %v15201_v29  ;;  %v15252_v29 = vld [vmem:[#allocation22 + $0x6d8] sm:$0xff]  }
 0xe81   : > { %13168 = vmatprep.subr.bf16.mxu1 %v15204_v3  ;;  %v15251_v3 = vld [vmem:[#allocation22 + $0x618] sm:$0xff]  }
 0xe82   : > { %13147 = vmatpush3.bf16.msra.mxu0 %v15203_v45  ;;  %v15253_v45 = vld [vmem:[#allocation22 + $0x698] sm:$0xff]  }
 0xe83   : > { %13176 = vmatprep.subr.bf16.mxu0 %v15206_v12  ;;  %v15256_v12 = vld [vmem:[#allocation22 + $0x6e0] sm:$0xff]  }
 0xe84   : > { %13169 = vmatpush3.bf16.msra.mxu1 %v15205_v20  ;;  %v15255_v20 = vld [vmem:[#allocation22 + $0x620] sm:$0xff]  }
 0xe85   : > { %11465 = vmatmul.mubr.bf16.vlgmr.msra.gmra.mrb[208].mxu0 %v9041_v47  ;;  %13198 = vmatprep.subr.bf16.mxu1 %v15208_v22  ;;  %v15258_v22 = vld [vmem:[#allocation22 + $0x668] sm:$0xff]  }
 0xe86   : > { %13177 = vmatpush3.bf16.msra.mxu0 %v15207_v39  ;;  %11544 = vmatprep.mubr.bf16.mxu0 %v9046_v16  ;;  %v15257_v39 = vld [vmem:[#allocation22 + $0x6a0] sm:$0xff]   ;;  %v15260_v47 = vld [vmem:[#allocation22 + $0x6e8] sm:$0xff]   ;;  %v15262_v16 = vld [vmem:[#allocation22 + $0x670] sm:$0xff]  }
 0xe87   : > { %11505 = vmatmul.mubr.bf16.vlgmr.msra.gmra.mrb[208].mxu1 %v9043_v41  ;;  %13178 = vmatprep.subr.bf16.mxu0 %v15210_v13  ;;  %v15259_v13 = vld [vmem:[#allocation22 + $0x628] sm:$0xff]   ;;  %v15264_v41 = vld [vmem:[#allocation22 + $0x6f0] sm:$0xff]  }
 0xe88   : > { %13199 = vmatpush3.bf16.msra.mxu1 %v15209_v53  ;;  %11584 = vmatprep.mubr.bf16.mxu1 %v9048_v6  ;;  %v15261_v53 = vld [vmem:[#allocation22 + $0x6a8] sm:$0xff]   ;;  %v15266_v6 = vld [vmem:[#allocation22 + $0x678] sm:$0xff]  }
 0xe89   : > { %13200 = vmatprep.subr.bf16.mxu1 %v15212_v24  ;;  %v15263_v24 = vld [vmem:[#allocation22 + $0x630] sm:$0xff]  }
 0xe8a   : > { %13179 = vmatpush3.bf16.msra.mxu0 %v15211_v2  ;;  %v15265_v2 = vld [vmem:[#allocation22 + $0x6b0] sm:$0xff]  }
 0xe8b   : > { %13180 = vmatprep.subr.bf16.mxu0 %v15214_v33  ;;  %v15268_v33 = vld [vmem:[#allocation22 + $0x6f8] sm:$0xff]  }
 0xe8c   : > { %13201 = vmatpush3.bf16.msra.mxu1 %v15213_v43  ;;  %v15267_v43 = vld [vmem:[#allocation22 + $0x638] sm:$0xff]  }
 0xe8d   : > { %13202 = vmatprep.subr.bf16.mxu1 %v15216_v15  ;;  %v15270_v15 = vld [vmem:[#allocation22 + $0x740] sm:$0xff]  }
 0xe8e   : > { %13181 = vmatpush3.bf16.msra.mxu0 %v15215_v61  ;;  %v15269_v61 = vld [vmem:[#allocation22 + $0x6b8] sm:$0xff]  }
 0xe8f   : > { %13182 = vmatprep.subr.bf16.mxu0 %v15218_v34  ;;  %v15272_v34 = vld [vmem:[#allocation22 + $0x7c0] sm:$0xff]  }
 0xe90   : > { %13203 = vmatpush3.bf16.msra.mxu1 %v15217_v9  ;;  %v15271_v9 = vld [vmem:[#allocation22 + $0x700] sm:$0xff]  }
 0xe91   : > { %13204 = vmatprep.subr.bf16.mxu1 %v15220_v7  ;;  %v9049_v7 = vpack.c.bf16 %v18433_v58, %v18433_v58  ;;  %v15278_v58 = vld [vmem:[#allocation22 + $0x750] sm:$0xff]  }
 0xe92   : > { %13183 = vmatpush3.bf16.msra.mxu0 %v15219_v63  ;;  %v15274_v63 = vld [vmem:[#allocation22 + $0x748] sm:$0xff]  }
 0xe93   : > { %13184 = vmatprep.subr.bf16.mxu0 %v15222_v0  ;;  %v9054_v0 = vpack.c.bf16 %v18463_v56, %v18463_v56  ;;  %v15280_v56 = vld [vmem:[#allocation22 + $0x7d0] sm:$0xff]  }
 0xe94   : > { %13205 = vmatpush3.bf16.msra.mxu1 %v15221_v23  ;;  %v15273_v23 = vld [vmem:[#allocation22 + $0x780] sm:$0xff]  }
 0xe95   : > { %13206 = vmatprep.subr.bf16.mxu1 %v15224_v5  ;;  %v9051_v5 = vpack.c.bf16 %v18439_v8, %v18439_v8  ;;  %v15282_v8 = vld [vmem:[#allocation22 + $0x758] sm:$0xff]  }
 0xe96   : > { %13185 = vmatpush3.bf16.msra.mxu0 %v15223_v37  ;;  %v15276_v37 = vld [vmem:[#allocation22 + $0x7c8] sm:$0xff]  }
 0xe97   : > { %13186 = vmatprep.subr.bf16.mxu0 %v15226_v38  ;;  %v9056_v38 = vpack.c.bf16 %v18471_v17, %v18471_v17  ;;  %v15286_v17 = vld [vmem:[#allocation22 + $0x760] sm:$0xff]  }
 0xe98   : > { %13207 = vmatpush3.bf16.msra.mxu1 %v15225_v30  ;;  %v15275_v30 = vld [vmem:[#allocation22 + $0x708] sm:$0xff]  }
 0xe99   : > { %13208 = vmatprep.subr.bf16.mxu1 %v15228_v55  ;;  %v15277_v55 = vld [vmem:[#allocation22 + $0x788] sm:$0xff]  }
 0xe9a   : > { %13187 = vmatpush3.bf16.msra.mxu0 %v15227_v46  ;;  %v15279_v46 = vld [vmem:[#allocation22 + $0x710] sm:$0xff]  }
 0xe9b   : > { %13188 = vmatprep.subr.bf16.mxu0 %v15230_v42  ;;  %v15281_v42 = vld [vmem:[#allocation22 + $0x790] sm:$0xff]  }
 0xe9c   : > { %13209 = vmatpush3.bf16.msra.mxu1 %v15229_v51  ;;  %v15284_v51 = vld [vmem:[#allocation22 + $0x7d8] sm:$0xff]  }
 0xe9d   : > { %13210 = vmatprep.subr.bf16.mxu1 %v15232_v54  ;;  %v15283_v54 = vld [vmem:[#allocation22 + $0x718] sm:$0xff]  }
 0xe9e   : > { %13189 = vmatpush3.bf16.msra.mxu0 %v15231_v25  ;;  %v15285_v25 = vld [vmem:[#allocation22 + $0x798] sm:$0xff]  }
 0xe9f   : > { %13190 = vmatprep.subr.bf16.mxu0 %v15234_v14  ;;  %v15288_v14 = vld [vmem:[#allocation22 + $0x7e0] sm:$0xff]  }
 0xea0   : > { %13211 = vmatpush3.bf16.msra.mxu1 %v15233_v26  ;;  %v15287_v26 = vld [vmem:[#allocation22 + $0x720] sm:$0xff]  }
 0xea1   : > { %13212 = vmatprep.subr.bf16.mxu1 %v15236_v28  ;;  %v15290_v28 = vld [vmem:[#allocation22 + $0x768] sm:$0xff]  }
 0xea2   : > { %13191 = vmatpush3.bf16.msra.mxu0 %v15235_v52  ;;  %v15289_v52 = vld [vmem:[#allocation22 + $0x7a0] sm:$0xff]  }
 0xea3   : > { %13220 = vmatprep.subr.bf16.mxu0 %v15238_v62  ;;  %v15292_v62 = vld [vmem:[#allocation22 + $0x7e8] sm:$0xff]  }
 0xea4   : > { %13213 = vmatpush3.bf16.msra.mxu1 %v15237_v11  ;;  %v15291_v11 = vld [vmem:[#allocation22 + $0x728] sm:$0xff]  }
 0xea5   : > { %11545 = vmatmul.mubr.bf16.vlgmr.msra.gmra.mrb[212].mxu0 %v9045_v49  ;;  %13242 = vmatprep.subr.bf16.mxu1 %v15240_v57  ;;  %v15294_v57 = vld [vmem:[#allocation22 + $0x770] sm:$0xff]   ;;  %v15293_v49 = vld [vmem:[#allocation22 + $0x7a8] sm:$0xff]  }
 0xea6   : > { %13221 = vmatpush3.bf16.msra.mxu0 %v15239_v40  ;;  %11624 = vmatprep.mubr.bf16.mxu0 %v9050_v4 }
 0xea7   : > { %11585 = vmatmul.mubr.bf16.vlgmr.msra.gmra.mrb[212].mxu1 %v9047_v50  ;;  %13222 = vmatprep.subr.bf16.mxu0 %v15242_v60  ;;  %v12498_v60 = vld [vmem:[#allocation23] ss:$0 sm:$0xff] }
 0xea8   : > { %13243 = vmatpush3.bf16.msra.mxu1 %v15241_v1  ;;  %11664 = vmatprep.mubr.bf16.mxu1 %v9052_v36  ;;  %v15296_v1 = vld [vmem:[#allocation22 + $0x7f0] sm:$0xff]  }
 0xea9   : > { %13244 = vmatprep.subr.bf16.mxu1 %v15244_v31 }
 0xeaa   : > { %13223 = vmatpush3.bf16.msra.mxu0 %v15243_v48  ;;  %v15295_v48 = vld [vmem:[#allocation22 + $0x730] sm:$0xff]  }
 0xeab   : > { %13224 = vmatprep.subr.bf16.mxu0 %v15246_v35 }
 0xeac   : > { %13245 = vmatpush3.bf16.msra.mxu1 %v15245_v18 }
 0xead   : > { %13246 = vmatprep.subr.bf16.mxu1 %v15248_v21  ;;  %v15298_v21 = vld [vmem:[#allocation22 + $0x778] sm:$0xff]  }
 0xeae   : > { %13225 = vmatpush3.bf16.msra.mxu0 %v15247_v59 }
 0xeaf   : > { %13226 = vmatprep.subr.bf16.mxu0 %v15250_v10 }
 0xeb0   : > { %13247 = vmatpush3.bf16.msra.mxu1 %v15249_v44 }
 0xeb1   : > { %13248 = vmatprep.subr.bf16.mxu1 %v15252_v29  ;;  %v15297_v29 = vld [vmem:[#allocation22 + $0x7b0] sm:$0xff]  }
 0xeb2   : > { %13227 = vmatpush3.bf16.msra.mxu0 %v15251_v3 }
 0xeb3   : > { %13228 = vmatprep.subr.bf16.mxu0 %v15254_v19  ;;  %v15300_v19 = vld [vmem:[#allocation22 + $0x7f8] sm:$0xff]  }
 0xeb4   : > { %13249 = vmatpush3.bf16.msra.mxu1 %v15253_v45 }
 0xeb5   : > { %13250 = vmatprep.subr.bf16.mxu1 %v15256_v12  ;;  %v15299_v12 = vld [vmem:[#allocation22 + $0x738] sm:$0xff]  }
 0xeb6   : > { %13229 = vmatpush3.bf16.msra.mxu0 %v15255_v20  ;;  %v15301_v20 = vld [vmem:[#allocation22 + $0x7b8] sm:$0xff]  }
 0xeb7   : > { %13230 = vmatprep.subr.bf16.mxu0 %v15258_v22  ;;  %v9053_v22 = vpack.c.bf16 %v18461_v32, %v18461_v32 }
 0xeb8   : > { %13251 = vmatpush3.bf16.msra.mxu1 %v15257_v39  ;;  %v9055_v39 = vpack.c.bf16 %v18467_v27, %v18467_v27 }
 0xeb9   : > { %13252 = vmatprep.subr.bf16.mxu1 %v15260_v47 }
 0xeba   : > { %13231 = vmatpush3.bf16.msra.mxu0 %v15259_v13 }
 0xebb   : > { %13232 = vmatprep.subr.bf16.mxu0 %v15262_v16 }
 0xebc   : > { %13253 = vmatpush3.bf16.msra.mxu1 %v15261_v53 }
 0xebd   : > { %13254 = vmatprep.subr.bf16.mxu1 %v15264_v41 }
 0xebe   : > { %13233 = vmatpush3.bf16.msra.mxu0 %v15263_v24 }
 0xebf   : > { %13234 = vmatprep.subr.bf16.mxu0 %v15266_v6 }
 0xec0   : > { %13255 = vmatpush3.bf16.msra.mxu1 %v15265_v2 }
 0xec1   : > { %13256 = vmatprep.subr.bf16.mxu1 %v15268_v33 }
 0xec2   : > { %13235 = vmatpush3.bf16.msra.mxu0 %v15267_v43 }
 0xec3   : > { %13264 = vmatprep.subr.bf16.mxu0 %v15270_v15 }
 0xec4   : > { %13257 = vmatpush3.bf16.msra.mxu1 %v15269_v61 }
 0xec5   : > { %11625 = vmatmul.mubr.bf16.vlgmr.msra.gmra.mrb[216].mxu0 %v9049_v7  ;;  %13286 = vmatprep.subr.bf16.mxu1 %v15272_v34 }
 0xec6   : > { %13265 = vmatpush3.bf16.msra.mxu0 %v15271_v9  ;;  %11704 = vmatprep.mubr.bf16.mxu0 %v9054_v0 }
 0xec7   : > { %11665 = vmatmul.mubr.bf16.vlgmr.msra.gmra.mrb[216].mxu1 %v9051_v5  ;;  %13266 = vmatprep.subr.bf16.mxu0 %v15274_v63 }
 0xec8   : > { %13287 = vmatpush3.bf16.msra.mxu1 %v15273_v23  ;;  %11744 = vmatprep.mubr.bf16.mxu1 %v9056_v38 }
 0xec9   : > { %13288 = vmatprep.subr.bf16.mxu1 %v15276_v37 }
 0xeca   : > { %13267 = vmatpush3.bf16.msra.mxu0 %v15275_v30 }
 0xecb   : > { %13268 = vmatprep.subr.bf16.mxu0 %v15278_v58 }
 0xecc   : > { %13289 = vmatpush3.bf16.msra.mxu1 %v15277_v55 }
 0xecd   : > { %13290 = vmatprep.subr.bf16.mxu1 %v15280_v56 }
 0xece   : > { %13269 = vmatpush3.bf16.msra.mxu0 %v15279_v46 }
 0xecf   : > { %13270 = vmatprep.subr.bf16.mxu0 %v15282_v8 }
 0xed0   : > { %13291 = vmatpush3.bf16.msra.mxu1 %v15281_v42 }
 0xed1   : > { %13292 = vmatprep.subr.bf16.mxu1 %v15284_v51 }
 0xed2   : > { %13271 = vmatpush3.bf16.msra.mxu0 %v15283_v54 }
 0xed3   : > { %13272 = vmatprep.subr.bf16.mxu0 %v15286_v17 }
 0xed4   : > { %13293 = vmatpush3.bf16.msra.mxu1 %v15285_v25 }
 0xed5   : > { %13294 = vmatprep.subr.bf16.mxu1 %v15288_v14 }
 0xed6   : > { %13273 = vmatpush3.bf16.msra.mxu0 %v15287_v26 }
 0xed7   : > { %13274 = vmatprep.subr.bf16.mxu0 %v15290_v28 }
 0xed8   : > { %13295 = vmatpush3.bf16.msra.mxu1 %v15289_v52  ;;  %v12972_v40 = vpop.f32.mrb[192].mxu0 }
 0xed9   : > { %v12973_v4 = vpop.f32.mrb[193].mxu0  ;;  %13296 = vmatprep.subr.bf16.mxu1 %v15292_v62 }
 0xeda   : > { %v12974_v50 = vadd.f32 %v12973_v4, %v12972_v40  ;;  %13275 = vmatpush3.bf16.msra.mxu0 %v15291_v11  ;;  %v12975_v31 = vpop.f32.mrb[194].mxu0  ;;  %v12994_v36 = vpop.f32.mrb[192].mxu1 }
 0xedb   : > { %v12976_v35 = vpop.f32.mrb[195].mxu0  ;;  %v12995_v18 = vpop.f32.mrb[193].mxu1  ;;  %13276 = vmatprep.subr.bf16.mxu0 %v15294_v57 }
 0xedc   : > { %v11147_v59 = vadd.f32 %v12974_v50, %v12498_v60  ;;  %v12996_v10 = vadd.f32 %v12995_v18, %v12994_v36  ;;  %13297 = vmatpush3.bf16.msra.mxu1 %v15293_v49  ;;  %v12997_v44 = vpop.f32.mrb[194].mxu1 }
 0xedd   : > { %v12998_v3 = vpop.f32.mrb[195].mxu1  ;;  %13298 = vmatprep.subr.bf16.mxu1 %v15296_v1 }
 0xede   : > { %v11187_v45 = vadd.f32 %v12996_v10, %v11147_v59  ;;  %13277 = vmatpush3.bf16.msra.mxu0 %v15295_v48 }
 0xedf   : > { %13278 = vmatprep.subr.bf16.mxu0 %v15298_v21 }
 0xee0   : > { %13299 = vmatpush3.bf16.msra.mxu1 %v15297_v29 }
 0xee1   : > { %13300 = vmatprep.subr.bf16.mxu1 %v15300_v19 }
 0xee2   : > { %13279 = vmatpush3.bf16.msra.mxu0 %v15299_v12 }
 0xee4   : > { %13301 = vmatpush3.bf16.msra.mxu1 %v15301_v20 }
 0xee5   : > { %11705 = vmatmul.mubr.bf16.vlgmr.msra.gmra.mrb[220].mxu0 %v9053_v22 }
 0xee7   : > { %11745 = vmatmul.mubr.bf16.vlgmr.msra.gmra.mrb[220].mxu1 %v9055_v39 }
 0xef8   : > { %v13016_v47 = vpop.f32.mrb[196].mxu0 }
 0xef9   : > { %v13017_v13 = vpop.f32.mrb[197].mxu0 }
 0xefa   : > { %v13018_v16 = vadd.f32 %v13017_v13, %v13016_v47  ;;  %v13019_v53 = vpop.f32.mrb[198].mxu0  ;;  %v13038_v41 = vpop.f32.mrb[196].mxu1 }
 0xefb   : > { %v13020_v24 = vpop.f32.mrb[199].mxu0  ;;  %v13039_v6 = vpop.f32.mrb[197].mxu1 }
 0xefc   : > { %v11227_v2 = vadd.f32 %v13018_v16, %v11187_v45  ;;  %v13040_v33 = vadd.f32 %v13039_v6, %v13038_v41  ;;  %v13041_v43 = vpop.f32.mrb[198].mxu1 }
 0xefd   : > { %v13042_v15 = vpop.f32.mrb[199].mxu1 }
 0xefe   : > { %v11267_v61 = vadd.f32 %v13040_v33, %v11227_v2 }
 0xf18   : > { %v13060_v34 = vpop.f32.mrb[200].mxu0 }
 0xf19   : > { %v13061_v32 = vpop.f32.mrb[201].mxu0 }
 0xf1a   : > { %v13062_v9 = vadd.f32 %v13061_v32, %v13060_v34  ;;  %v13063_v7 = vpop.f32.mrb[202].mxu0  ;;  %v13082_v63 = vpop.f32.mrb[200].mxu1 }
 0xf1b   : > { %v13064_v27 = vpop.f32.mrb[203].mxu0  ;;  %v13083_v0 = vpop.f32.mrb[201].mxu1 }
 0xf1c   : > { %v11307_v23 = vadd.f32 %v13062_v9, %v11267_v61  ;;  %v13084_v5 = vadd.f32 %v13083_v0, %v13082_v63  ;;  %v13085_v37 = vpop.f32.mrb[202].mxu1 }
 0xf1d   : > { %v13086_v38 = vpop.f32.mrb[203].mxu1  ;;  %v11785_v37 = vld [vmem:[%s18273_s6 + $0x8] sm:$0xff] (%p18802_p8) }
 0xf1e   : > { %v11347_v30 = vadd.f32 %v13084_v5, %v11307_v23  ;;  %v11783_v5 = vld [vmem:[%s18273_s6] sm:$0xff] (%p18802_p8)  ;;  %v11787_v38 = vld [vmem:[%s18273_s6 + $0x10] sm:$0xff] (%p18802_p8)  ;;  %11786 = vst [vmem:[%s18535_s24 + $0x8] sm:$0xff] (%p18802_p8), %v11785_v37 }
 0xf1f   : > { %11784 = vst [vmem:[%s18535_s24] sm:$0xff] (%p18802_p8), %v11783_v5  ;;  %11788 = vst [vmem:[%s18535_s24 + $0x10] sm:$0xff] (%p18802_p8), %v11787_v38 }
 0xf38   : > { %v13104_v58 = vpop.f32.mrb[204].mxu0 }
 0xf39   : > { %v13105_v55 = vpop.f32.mrb[205].mxu0 }
 0xf3a   : > { %v13106_v56 = vadd.f32 %v13105_v55, %v13104_v58  ;;  %v13107_v46 = vpop.f32.mrb[206].mxu0  ;;  %v13126_v8 = vpop.f32.mrb[204].mxu1  ;;  %v11791_v58 = vld [vmem:[%s18273_s6 + $0x20] sm:$0xff] (%p18802_p8)  ;;  %v11793_v55 = vld [vmem:[%s18273_s6 + $0x28] sm:$0xff] (%p18802_p8) }
 0xf3b   : > { %v13108_v42 = vpop.f32.mrb[207].mxu0  ;;  %v13127_v51 = vpop.f32.mrb[205].mxu1  ;;  %11792 = vst [vmem:[%s18535_s24 + $0x20] sm:$0xff] (%p18802_p8), %v11791_v58  ;;  %11794 = vst [vmem:[%s18535_s24 + $0x28] sm:$0xff] (%p18802_p8), %v11793_v55  ;;  %v11797_v46 = vld [vmem:[%s18273_s6 + $0x38] sm:$0xff] (%p18802_p8) }
 0xf3c   : > { %v11387_v54 = vadd.f32 %v13106_v56, %v11347_v30  ;;  %v13128_v17 = vadd.f32 %v13127_v51, %v13126_v8  ;;  %v13129_v25 = vpop.f32.mrb[206].mxu1  ;;  %v11789_v30 = vld [vmem:[%s18273_s6 + $0x18] sm:$0xff] (%p18802_p8)  ;;  %v11795_v56 = vld [vmem:[%s18273_s6 + $0x30] sm:$0xff] (%p18802_p8)  ;;  %v11799_v8 = vld [vmem:[%s18273_s6 + $0x40] sm:$0xff] (%p18802_p8)  ;;  %11798 = vst [vmem:[%s18535_s24 + $0x38] sm:$0xff] (%p18802_p8), %v11797_v46 }
 0xf3d   : > { %v13130_v14 = vpop.f32.mrb[207].mxu1  ;;  %11790 = vst [vmem:[%s18535_s24 + $0x18] sm:$0xff] (%p18802_p8), %v11789_v30  ;;  %11796 = vst [vmem:[%s18535_s24 + $0x30] sm:$0xff] (%p18802_p8), %v11795_v56  ;;  %v11801_v42 = vld [vmem:[%s18273_s6 + $0x48] sm:$0xff] (%p18802_p8)  ;;  %v11803_v51 = vld [vmem:[%s18273_s6 + $0x50] sm:$0xff] (%p18802_p8) }
 0xf3e   : > { %v11427_v26 = vadd.f32 %v13128_v17, %v11387_v54  ;;  %11800 = vst [vmem:[%s18535_s24 + $0x80] sm:$0xff] (%p18802_p8), %v11799_v8  ;;  %v11805_v54 = vld [vmem:[%s18273_s6 + $0x58] sm:$0xff] (%p18802_p8)  ;;  %11802 = vst [vmem:[%s18535_s24 + $0x88] sm:$0xff] (%p18802_p8), %v11801_v42  ;;  %v11807_v17 = vld [vmem:[%s18273_s6 + $0x60] sm:$0xff] (%p18802_p8) }
 0xf3f   : > { %11804 = vst [vmem:[%s18535_s24 + $0x90] sm:$0xff] (%p18802_p8), %v11803_v51  ;;  %11806 = vst [vmem:[%s18535_s24 + $0x98] sm:$0xff] (%p18802_p8), %v11805_v54  ;;  %v11809_v25 = vld [vmem:[%s18273_s6 + $0x68] sm:$0xff] (%p18802_p8)  ;;  %v11811_v14 = vld [vmem:[%s18273_s6 + $0x70] sm:$0xff] (%p18802_p8) }
 0xf40   : > { %11808 = vst [vmem:[%s18535_s24 + $0xa0] sm:$0xff] (%p18802_p8), %v11807_v17  ;;  %11810 = vst [vmem:[%s18535_s24 + $0xa8] sm:$0xff] (%p18802_p8), %v11809_v25 }
 0xf41   : > { %11812 = vst [vmem:[%s18535_s24 + $0xb0] sm:$0xff] (%p18802_p8), %v11811_v14 }
 0xf58   : > { %v13148_v28 = vpop.f32.mrb[208].mxu0 }
 0xf59   : > { %v13149_v52 = vpop.f32.mrb[209].mxu0 }
 0xf5a   : > { %v13150_v62 = vadd.f32 %v13149_v52, %v13148_v28  ;;  %v13151_v11 = vpop.f32.mrb[210].mxu0  ;;  %v13170_v57 = vpop.f32.mrb[208].mxu1  ;;  %v11815_v28 = vld [vmem:[%s18273_s6 + $0x80] sm:$0xff] (%p18802_p8)  ;;  %v11817_v52 = vld [vmem:[%s18273_s6 + $0x88] sm:$0xff] (%p18802_p8) }
 0xf5b   : > { %v13152_v40 = vpop.f32.mrb[211].mxu0  ;;  %v13171_v49 = vpop.f32.mrb[209].mxu1  ;;  %11816 = vst [vmem:[%s18535_s24 + $0x100] sm:$0xff] (%p18802_p8), %v11815_v28  ;;  %11818 = vst [vmem:[%s18535_s24 + $0x108] sm:$0xff] (%p18802_p8), %v11817_v52  ;;  %v11821_v11 = vld [vmem:[%s18273_s6 + $0x98] sm:$0xff] (%p18802_p8) }
 0xf5c   : > { %v11467_v60 = vadd.f32 %v13150_v62, %v11427_v26  ;;  %v13172_v4 = vadd.f32 %v13171_v49, %v13170_v57  ;;  %v13173_v1 = vpop.f32.mrb[210].mxu1  ;;  %v11813_v26 = vld [vmem:[%s18273_s6 + $0x78] sm:$0xff] (%p18802_p8)  ;;  %v11819_v62 = vld [vmem:[%s18273_s6 + $0x90] sm:$0xff] (%p18802_p8)  ;;  %v11823_v57 = vld [vmem:[%s18273_s6 + $0xa0] sm:$0xff] (%p18802_p8)  ;;  %11822 = vst [vmem:[%s18535_s24 + $0x118] sm:$0xff] (%p18802_p8), %v11821_v11 }
 0xf5d   : > { %v13174_v50 = vpop.f32.mrb[211].mxu1  ;;  %11814 = vst [vmem:[%s18535_s24 + $0xb8] sm:$0xff] (%p18802_p8), %v11813_v26  ;;  %11820 = vst [vmem:[%s18535_s24 + $0x110] sm:$0xff] (%p18802_p8), %v11819_v62  ;;  %v11825_v40 = vld [vmem:[%s18273_s6 + $0xa8] sm:$0xff] (%p18802_p8)  ;;  %v11827_v49 = vld [vmem:[%s18273_s6 + $0xb0] sm:$0xff] (%p18802_p8) }
 0xf5e   : > { %v11507_v31 = vadd.f32 %v13172_v4, %v11467_v60  ;;  %11824 = vst [vmem:[%s18535_s24 + $0x120] sm:$0xff] (%p18802_p8), %v11823_v57  ;;  %v11829_v60 = vld [vmem:[%s18273_s6 + $0xb8] sm:$0xff] (%p18802_p8)  ;;  %11826 = vst [vmem:[%s18535_s24 + $0x128] sm:$0xff] (%p18802_p8), %v11825_v40  ;;  %v11831_v4 = vld [vmem:[%s18273_s6 + $0xc0] sm:$0xff] (%p18802_p8) }
 0xf5f   : > { %11828 = vst [vmem:[%s18535_s24 + $0x130] sm:$0xff] (%p18802_p8), %v11827_v49  ;;  %11830 = vst [vmem:[%s18535_s24 + $0x138] sm:$0xff] (%p18802_p8), %v11829_v60  ;;  %v11833_v1 = vld [vmem:[%s18273_s6 + $0xc8] sm:$0xff] (%p18802_p8)  ;;  %v11835_v50 = vld [vmem:[%s18273_s6 + $0xd0] sm:$0xff] (%p18802_p8) }
 0xf60   : > { %11832 = vst [vmem:[%s18535_s24 + $0x180] sm:$0xff] (%p18802_p8), %v11831_v4  ;;  %11834 = vst [vmem:[%s18535_s24 + $0x188] sm:$0xff] (%p18802_p8), %v11833_v1 }
 0xf61   : > { %11836 = vst [vmem:[%s18535_s24 + $0x190] sm:$0xff] (%p18802_p8), %v11835_v50 }
 0xf78   : > { %v13192_v36 = vpop.f32.mrb[212].mxu0 }
 0xf79   : > { %v13193_v48 = vpop.f32.mrb[213].mxu0 }
 0xf7a   : > { %v13194_v35 = vadd.f32 %v13193_v48, %v13192_v36  ;;  %v13195_v18 = vpop.f32.mrb[214].mxu0  ;;  %v13214_v21 = vpop.f32.mrb[212].mxu1  ;;  %v11839_v36 = vld [vmem:[%s18273_s6 + $0xe0] sm:$0xff] (%p18802_p8)  ;;  %v11841_v48 = vld [vmem:[%s18273_s6 + $0xe8] sm:$0xff] (%p18802_p8) }
 0xf7b   : > { %v13196_v59 = vpop.f32.mrb[215].mxu0  ;;  %v13215_v10 = vpop.f32.mrb[213].mxu1  ;;  %11840 = vst [vmem:[%s18535_s24 + $0x1a0] sm:$0xff] (%p18802_p8), %v11839_v36  ;;  %11842 = vst [vmem:[%s18535_s24 + $0x1a8] sm:$0xff] (%p18802_p8), %v11841_v48  ;;  %v11845_v18 = vld [vmem:[%s18273_s6 + $0xf8] sm:$0xff] (%p18802_p8) }
 0xf7c   : > { %v11547_v44 = vadd.f32 %v13194_v35, %v11507_v31  ;;  %v13216_v29 = vadd.f32 %v13215_v10, %v13214_v21  ;;  %v13217_v3 = vpop.f32.mrb[214].mxu1  ;;  %v11837_v31 = vld [vmem:[%s18273_s6 + $0xd8] sm:$0xff] (%p18802_p8)  ;;  %v11843_v35 = vld [vmem:[%s18273_s6 + $0xf0] sm:$0xff] (%p18802_p8)  ;;  %11846 = vst [vmem:[%s18535_s24 + $0x1b8] sm:$0xff] (%p18802_p8), %v11845_v18 }
 0xf7d   : > { %v13218_v19 = vpop.f32.mrb[215].mxu1  ;;  %11838 = vst [vmem:[%s18535_s24 + $0x198] sm:$0xff] (%p18802_p8), %v11837_v31  ;;  %11844 = vst [vmem:[%s18535_s24 + $0x1b0] sm:$0xff] (%p18802_p8), %v11843_v35 }
 0xf7e   : > { %v11587_v45 = vadd.f32 %v13216_v29, %v11547_v44 }
 0xf98   : > { %v13236_v12 = vpop.f32.mrb[216].mxu0 }
 0xf99   : > { %v13237_v20 = vpop.f32.mrb[217].mxu0 }
 0xf9a   : > { %v13238_v22 = vadd.f32 %v13237_v20, %v13236_v12  ;;  %v13239_v39 = vpop.f32.mrb[218].mxu0  ;;  %v13258_v47 = vpop.f32.mrb[216].mxu1 }
 0xf9b   : > { %v13240_v13 = vpop.f32.mrb[219].mxu0  ;;  %v13259_v16 = vpop.f32.mrb[217].mxu1 }
 0xf9c   : > { %v11627_v53 = vadd.f32 %v13238_v22, %v11587_v45  ;;  %v13260_v41 = vadd.f32 %v13259_v16, %v13258_v47  ;;  %v13261_v24 = vpop.f32.mrb[218].mxu1 }
 0xf9d   : > { %v13262_v6 = vpop.f32.mrb[219].mxu1 }
 0xf9e   : > { %v11667_v2 = vadd.f32 %v13260_v41, %v11627_v53 }
 0xfb8   : > { %v13280_v33 = vpop.f32.mrb[220].mxu0 }
 0xfb9   : > { %v13281_v43 = vpop.f32.mrb[221].mxu0 }
 0xfba   : > { %v13282_v15 = vadd.f32 %v13281_v43, %v13280_v33  ;;  %v13283_v61 = vpop.f32.mrb[222].mxu0  ;;  %v13302_v34 = vpop.f32.mrb[220].mxu1  ;;  %11766 = sbr.rel (!%p18802_p8) target bundleno = 4033 (0xfc1), region = 182 }
 0xfbb   : > { %v13284_v32 = vpop.f32.mrb[223].mxu0  ;;  %v13303_v9 = vpop.f32.mrb[221].mxu1 }
 0xfbc   : > { %v11707_v7 = vadd.f32 %v13282_v15, %v11667_v2  ;;  %v13304_v63 = vadd.f32 %v13303_v9, %v13302_v34  ;;  %v13305_v27 = vpop.f32.mrb[222].mxu1 }
 0xfbd   : > { %v13306_v0 = vpop.f32.mrb[223].mxu1 }
 0xfbe   : > { %v11747_v23 = vadd.f32 %v13304_v63, %v11707_v7 }
 0xfc0   : > { %11752 = vst [vmem:[%s1260_s27] sm:$0xff] %v11747_v23 }
 0xfc1 PF: > { %s18805_s23 = sld [smem:[#allocation36_spill]]  ;;  %s18806_s30 = sld [smem:[#allocation37_spill]] }
 0xfc2   : > { %s18807_s21 = smov %s15744_s22 }
 0xfc7   : > { %p32_p9 = scmp.ge.s32.totalorder %s18805_s23, 4   ;;  %s18808_s22 = smov %s18806_s30 }
 0xfc9   :  { %34 = sbr.rel (!%p32_p9) target bundleno = 20 (0x14), region = 257 }
 0xfd0   :  { %11869 = vsyncpa [#allocation4], 1 }
 0xfd1   :  { %11871 = vsyncpa [#allocation4 + $0x1], 1 }
 0xfd2   :  { %11872 = vsyncpa [#allocation6], 1 }
 0xfd3   :  { %11873 = vsyncpa [#allocation9], 1 }
 0xfd4   :  { %11874 = vsyncpa [#allocation12], 1 }
 0xfd5   :  { %11875 = vsyncpa [#allocation15], 1 }
 0xfd6   :  { %11876 = vsyncpa [#allocation18], 1 }
 0xfd7   :  { %11877 = vsyncpa [#allocation21], 1 }
 0xfd8   :  { %11878 = vsyncpa [#allocation24], 1 }

</bundles_post_ra>
